<compile_context>
chip_gen: v5e
topology: v5e:2x2
jax: 0.10.0
libtpu: 0.0.40
codegen_flags: <defaults>
</compile_context>

<pallas_src>
import functools

import numpy as np
import jax
import jax.numpy as jnp
from jax.experimental import pallas as pl
from jax.experimental.pallas import tpu as pltpu


CONV_OUT = 8      # stand-in encoder conv width
IMG_FEAT = 32     # img_feature_size of the stand-in encoder
KH = KW = 3
STRIDE = 2
PAD = 1
OUT_PAD = 128     # lane-dense output width (kpts cols 0..31, ef col 32)


# ----------------------------------------------------------------------------
# Pallas kernel: whole CNN25D_GCN forward, fused
# ----------------------------------------------------------------------------
def _elu(h):
    # F.elu (alpha=1). exp argument clamped so the discarded branch cannot
    # overflow.  TODO(synk): jnp.expm1 would be nicer near 0 but exp-1 is the
    # guaranteed-lowering form on Mosaic.
    return jnp.where(h > 0.0, h, jnp.exp(jnp.minimum(h, 0.0)) - 1.0)


def _fused_forward_kernel(xin_ref, convw_ref, m1_ref, w1_ref, w2_ref,
                          bias_ref, out_ref):
    f32 = jnp.float32
    bf16 = jnp.bfloat16

    nh = m1_ref.shape[1] - 1          # num_nodes * gcn_channels[-1]
    nk = w2_ref.shape[1]              # num_nodes * kpt_channels

    bias = bias_ref[...]              # (4, 2*S) f32 packed bias slab
    cb = bias[0:1, :]                 # expanded conv biases (both encoders)
    b1 = bias[1:2, :nh + 1]           # fused head bias  (dec+spiral0 | reg)
    b2 = bias[2:3, :w1_ref.shape[1]]  # spiral1 bias
    b3 = bias[3:4, :nk]               # spiral2 bias

    # Both encoders' conv3x3/s2 as ONE block-diagonal unrolled-conv matmul.
    x = xin_ref[...].astype(bf16)                                   # (B, 2*C*H*W)
    conv = jnp.dot(x, convw_ref[...], preferred_element_type=f32) + cb
    act = jnp.maximum(conv, 0.0).astype(bf16)                       # ReLU

    # pool + fc + {decoder Linear, regression head} + SpiralConv0, all folded.
    t = jnp.dot(act, m1_ref[...], preferred_element_type=f32) + b1  # (B, nh+1)
    ef = t[:, nh:nh + 1]                                            # (B, 1)
    h = _elu(t[:, :nh])                                             # (B, nh)

    # remaining SpiralConv chain (static spiral gather folded into dense W).
    h = jnp.dot(h.astype(bf16), w1_ref[...], preferred_element_type=f32) + b2
    h = _elu(h)
    kpts = jnp.dot(h.astype(bf16), w2_ref[...], preferred_element_type=f32) + b3

    # single lane-dense output slab: cols [0:nk) = kpts, col nk = ef.
    out_ref[...] = jnp.zeros(out_ref.shape, jnp.float32)
    out_ref[:, :nk] = kpts.astype(out_ref.dtype)
    out_ref[:, nk:nk + 1] = ef.astype(out_ref.dtype)


def _full_spec(a):
    zeros = (0,) * a.ndim
    return pl.BlockSpec(a.shape, lambda i, _z=zeros: _z)


def _fused_forward_call(xin, ops):
    B = xin.shape[0]
    operands = [xin, ops["conv_w"], ops["m1"], ops["w1"], ops["w2"], ops["bias"]]

    # advisory cost estimate for the XLA scheduler
    flops = 2 * B * sum(int(w.shape[0]) * int(w.shape[1]) for w in operands[1:5])
    transcendentals = B * (int(ops["m1"].shape[1]) - 1 + int(ops["w1"].shape[1]))
    bytes_accessed = (int(xin.size) * 4
                      + sum(int(np.prod(w.shape)) * 2 for w in operands[1:5])
                      + int(ops["bias"].size) * 4 + B * OUT_PAD * 4)

    out = pl.pallas_call(
        _fused_forward_kernel,
        grid=(1,),
        in_specs=[_full_spec(o) for o in operands],
        out_specs=pl.BlockSpec((B, OUT_PAD), lambda i: (0, 0)),
        out_shape=jax.ShapeDtypeStruct((B, OUT_PAD), jnp.float32),
        compiler_params=pltpu.CompilerParams(
            dimension_semantics=("arbitrary",)),
        cost_estimate=pl.CostEstimate(
            flops=flops, transcendentals=transcendentals,
            bytes_accessed=bytes_accessed),
    )(*operands)
    return out


# ----------------------------------------------------------------------------
# init-time folding helpers (pure numpy; no runtime cost)
# ----------------------------------------------------------------------------
def build_spiral_indices(num_kpts, num_tpts):
    """Mirrors spatiotemporal_kpts_decoder.__init__ index construction."""
    n = num_kpts
    adjacency = []
    for ii in range(n):
        row = list(range(n))
        row.insert(0, row.pop(ii))
        adjacency.append(row)
    adjacency = np.array(adjacency, dtype=np.int64)
    indices = adjacency
    for tpts in range(1, num_tpts):
        indices = np.concatenate([indices, adjacency + n * tpts], axis=0)
    time_edges = np.roll(indices[:, 0], n)
    indices = np.concatenate([indices, time_edges[:, None]], axis=1)
    if num_tpts > 3:
        time_edges = np.roll(indices[:, 0], -n)
        indices = np.concatenate([indices, time_edges[:, None]], axis=1)
    return indices.astype(np.int32)                # (num_kpts*num_tpts, seq)


def expand_spiral_weight(w, b, indices, num_nodes):
    """Fold 'static gather + Linear(seq*cin, cout)' into one dense matmul."""
    seq = indices.shape[1]
    cin_seq, cout = w.shape
    cin = cin_seq // seq
    w3 = np.asarray(w, np.float32).reshape(seq, cin, cout)
    onehot = np.zeros((num_nodes, seq, num_nodes), np.float32)
    onehot[np.arange(num_nodes)[:, None], np.arange(seq)[None, :], indices] = 1.0
    m = np.einsum('nsm,sco->mcno', onehot, w3).reshape(num_nodes * cin,
                                                       num_nodes * cout)
    b_exp = np.tile(np.asarray(b, np.float32), num_nodes)
    return m, b_exp


def conv_to_dense(w, b, H, W):
    """Unroll conv3x3 / stride 2 / pad 1 (implicit zero pad) into one matmul.

    w: (C, kh, kw, O).  Returns K (C*H*W, Ho*Wo*O), expanded bias, Ho, Wo with
    output flat layout (ho, wo, o) and input flat layout (c, h, w).
    """
    C, kh, kw, O = w.shape
    Ho = (H + 2 * PAD - kh) // STRIDE + 1
    Wo = (W + 2 * PAD - kw) // STRIDE + 1
    K = np.zeros((C * H * W, Ho * Wo * O), np.float32)
    for ho in range(Ho):
        for wo in range(Wo):
            col = (ho * Wo + wo) * O
            for ki in range(kh):
                h = STRIDE * ho + ki - PAD
                if h < 0 or h >= H:
                    continue
                for kj in range(kw):
                    ww = STRIDE * wo + kj - PAD
                    if ww < 0 or ww >= W:
                        continue
                    for c in range(C):
                        K[c * H * W + h * W + ww, col:col + O] = w[c, ki, kj, :]
    b_exp = np.tile(np.asarray(b, np.float32), Ho * Wo)
    return K, b_exp, Ho, Wo


def init_params(seed, in_ch, H, W, kpt_channels, gcn_channels,
                num_kpts, num_tpts):
    rng = np.random.default_rng(seed)

    def dense(k_in, k_out):
        s = 1.0 / np.sqrt(k_in)
        return (rng.uniform(-s, s, (k_in, k_out)).astype(np.float32),
                rng.uniform(-s, s, (k_out,)).astype(np.float32))

    indices = build_spiral_indices(num_kpts, num_tpts)
    seq = indices.shape[1]
    num_nodes = num_kpts * num_tpts
    c_last = gcn_channels[-1]

    # --- two independent stand-in image encoders (see TODO at top) ---------
    Ks, cbs, PFs, fbs = [], [], [], []
    for _ in range(2):
        cw, cb = dense(in_ch * KH * KW, CONV_OUT)
        cw = cw.reshape(in_ch, KH, KW, CONV_OUT)
        fw, fb = dense(CONV_OUT, IMG_FEAT)
        K, cb_exp, Ho, Wo = conv_to_dense(cw, cb, H, W)
        # mean-pool + fc folded: (Ho*Wo*O, IMG_FEAT)
        P = np.tile(np.eye(CONV_OUT, dtype=np.float32), (Ho * Wo, 1)) / float(Ho * Wo)
        Ks.append(K); cbs.append(cb_exp); PFs.append(P @ fw); fbs.append(fb)

    S = Ho * Wo * CONV_OUT
    in_flat = in_ch * H * W
    conv_w = np.zeros((2 * in_flat, 2 * S), np.float32)
    conv_w[:in_flat, :S] = Ks[0]
    conv_w[in_flat:, S:] = Ks[1]
    cb_cat = np.concatenate(cbs)                               # (2S,)
    PF = np.zeros((2 * S, 2 * IMG_FEAT), np.float32)
    PF[:S, :IMG_FEAT] = PFs[0]
    PF[S:, IMG_FEAT:] = PFs[1]
    fb_cat = np.concatenate(fbs)                               # (2F,)

    # --- regression head + decoder first Linear on feat = [f1 | f2] --------
    reg_w, reg_b = dense(2 * IMG_FEAT, 1)
    dec_w, dec_b = dense(2 * IMG_FEAT, num_nodes * c_last)
    head_w = np.concatenate([dec_w, reg_w], axis=1)            # (2F, nh+1)
    head_b = np.concatenate([dec_b, reg_b])
    G = PF @ head_w                                            # (2S, nh+1)
    gb = fb_cat @ head_w + head_b                              # (nh+1,)

    # --- SpiralConv layers, folded to dense matmuls -------------------------
    spiral_dims = []
    for idx in range(len(gcn_channels)):
        if idx == 0:
            spiral_dims.append((gcn_channels[-1], gcn_channels[-1]))
        else:
            spiral_dims.append((gcn_channels[-idx], gcn_channels[-idx - 1]))
    spiral_dims.append((gcn_channels[0], kpt_channels))
    sws, sbs = [], []
    for cin, cout in spiral_dims:
        w, b = dense(cin * seq, cout)
        m, be = expand_spiral_weight(w, b, indices, num_nodes)
        sws.append(m); sbs.append(be)

    nh = num_nodes * c_last
    # fold decoder Linear + regression + SpiralConv0 into ONE matrix
    m1 = np.zeros((2 * S, nh + 1), np.float32)
    m1[:, :nh] = G[:, :nh] @ sws[0]
    m1[:, nh] = G[:, nh]
    b1 = np.zeros((nh + 1,), np.float32)
    b1[:nh] = gb[:nh] @ sws[0] + sbs[0]
    b1[nh] = gb[nh]

    w1, b2 = sws[1], sbs[1]
    w2, b3 = sws[2], sbs[2]

    # pack every bias into one f32 slab (one DMA)
    bias = np.zeros((4, 2 * S), np.float32)
    bias[0, :cb_cat.shape[0]] = cb_cat
    bias[1, :b1.shape[0]] = b1
    bias[2, :b2.shape[0]] = b2
    bias[3, :b3.shape[0]] = b3

    ops = {
        "conv_w": jnp.asarray(conv_w, jnp.bfloat16),
        "m1": jnp.asarray(m1, jnp.bfloat16),
        "w1": jnp.asarray(w1, jnp.bfloat16),
        "w2": jnp.asarray(w2, jnp.bfloat16),
        "bias": jnp.asarray(bias, jnp.float32),
    }
    return ops, num_nodes


# ----------------------------------------------------------------------------
# Forward pass (jitted; one pallas_call + one tiny slice/reshape/concat fusion)
# ----------------------------------------------------------------------------
@functools.partial(jax.jit, static_argnames=("num_nodes", "kpt_channels"))
def cnn25d_gcn_forward(x, ops, *, num_nodes, kpt_channels):
    # x: (B, C, H, W, T).  x[..., t] == x.permute(0,1,4,2,3)[:, :, t]  (no copy)
    B = x.shape[0]
    f1 = x[..., 0].reshape(B, -1).astype(jnp.float32)
    f2 = x[..., 1].reshape(B, -1).astype(jnp.float32)
    xin = jnp.concatenate([f1, f2], axis=1)

    out = _fused_forward_call(xin, ops)                   # (B, 128)
    nk = num_nodes * kpt_channels
    kpts = out[:, :nk].reshape(B, num_nodes, kpt_channels)
    ef = out[:, nk:nk + 1]
    return kpts, ef


# ----------------------------------------------------------------------------
if __name__ == "__main__":
    # model config (CNN25D_GCN defaults: num_kpts=8, num_tpts=2)
    kpt_channels = 2
    gcn_channels = [16, 32]
    num_kpts, num_tpts = 8, 2
    B, C, H, W, T = 2, 3, 16, 16, 2

    ops, num_nodes = init_params(42, C, H, W, kpt_channels, gcn_channels,
                                 num_kpts, num_tpts)

    x = jax.random.normal(jax.random.PRNGKey(0), (B, C, H, W, T),
                          dtype=jnp.float32)

    kpts, ef = cnn25d_gcn_forward(x, ops, num_nodes=num_nodes,
                                  kpt_channels=kpt_channels)
    kpts = jax.block_until_ready(kpts)
    ef = jax.block_until_ready(ef)

    assert kpts.shape == (B, num_kpts * num_tpts, kpt_channels), kpts.shape
    assert ef.shape == (B, 1), ef.shape
    assert bool(jnp.all(jnp.isfinite(kpts))) and bool(jnp.all(jnp.isfinite(ef)))
    print("KERNEL_OK")
</pallas_src>

<mosaic_0001>
module attributes {stable_mosaic.version = 11 : i64} {
  func.func @_fused_forward_kernel(%arg0: i32, %arg1: memref<2x1536xf32, #tpu.memory_space<vmem>>, %arg2: memref<1536x1024xbf16, #tpu.memory_space<vmem>>, %arg3: memref<1024x513xbf16, #tpu.memory_space<vmem>>, %arg4: memref<512x256xbf16, #tpu.memory_space<vmem>>, %arg5: memref<256x32xbf16, #tpu.memory_space<vmem>>, %arg6: memref<4x1024xf32, #tpu.memory_space<vmem>>, %arg7: memref<2x128xf32, #tpu.memory_space<vmem>>) attributes {dimension_semantics = [#tpu.dimension_semantics<arbitrary>], iteration_bounds = array<i64: 1>, scalar_prefetch = 0 : i64, scratch_operands = 0 : i64, tpu.core_type = #tpu.core_type<tc>, window_params = [{pipeline_mode = #tpu.pipeline_mode<synchronous>, transform_indices = @transform_0, window_bounds = array<i64: 2, 1536>}, {pipeline_mode = #tpu.pipeline_mode<synchronous>, transform_indices = @transform_1, window_bounds = array<i64: 1536, 1024>}, {pipeline_mode = #tpu.pipeline_mode<synchronous>, transform_indices = @transform_2, window_bounds = array<i64: 1024, 513>}, {pipeline_mode = #tpu.pipeline_mode<synchronous>, transform_indices = @transform_3, window_bounds = array<i64: 512, 256>}, {pipeline_mode = #tpu.pipeline_mode<synchronous>, transform_indices = @transform_4, window_bounds = array<i64: 256, 32>}, {pipeline_mode = #tpu.pipeline_mode<synchronous>, transform_indices = @transform_5, window_bounds = array<i64: 4, 1024>}, {pipeline_mode = #tpu.pipeline_mode<synchronous>, transform_indices = @transform_6, window_bounds = array<i64: 2, 128>}]} {
    %c0 = arith.constant 0 : index
    %c0_0 = arith.constant 0 : index
    %0 = vector.load %arg6[%c0, %c0_0] : memref<4x1024xf32, #tpu.memory_space<vmem>>, vector<4x1024xf32>
    %1 = vector.extract_strided_slice %0 {offsets = [0, 0], sizes = [1, 1024], strides = [1, 1]} : vector<4x1024xf32> to vector<1x1024xf32>
    %2 = vector.extract_strided_slice %0 {offsets = [1, 0], sizes = [1, 513], strides = [1, 1]} : vector<4x1024xf32> to vector<1x513xf32>
    %3 = vector.extract_strided_slice %0 {offsets = [2, 0], sizes = [1, 256], strides = [1, 1]} : vector<4x1024xf32> to vector<1x256xf32>
    %4 = vector.extract_strided_slice %0 {offsets = [3, 0], sizes = [1, 32], strides = [1, 1]} : vector<4x1024xf32> to vector<1x32xf32>
    %c0_1 = arith.constant 0 : index
    %c0_2 = arith.constant 0 : index
    %5 = vector.load %arg1[%c0_1, %c0_2] : memref<2x1536xf32, #tpu.memory_space<vmem>>, vector<2x1536xf32>
    %6 = arith.truncf %5 : vector<2x1536xf32> to vector<2x1536xbf16>
    %c0_3 = arith.constant 0 : index
    %c0_4 = arith.constant 0 : index
    %7 = vector.load %arg2[%c0_3, %c0_4] : memref<1536x1024xbf16, #tpu.memory_space<vmem>>, vector<1536x1024xbf16>
    %cst = arith.constant dense<0.000000e+00> : vector<2x1024xf32>
    %8 = tpu.matmul %6, %7, %cst {dimension_numbers = #tpu.dot_dimension_numbers<[1], [0], [0], [1], [0, 0, 1, 1], [], []>} : vector<2x1536xbf16>, vector<1536x1024xbf16>, vector<2x1024xf32> -> vector<2x1024xf32>
    %9 = vector.broadcast %1 : vector<1x1024xf32> to vector<2x1024xf32>
    %10 = arith.addf %8, %9 : vector<2x1024xf32>
    %cst_5 = arith.constant 0.000000e+00 : f32
    %11 = vector.broadcast %cst_5 : f32 to vector<2x1024xf32>
    %12 = arith.maximumf %10, %11 : vector<2x1024xf32>
    %13 = arith.truncf %12 : vector<2x1024xf32> to vector<2x1024xbf16>
    %c0_6 = arith.constant 0 : index
    %c0_7 = arith.constant 0 : index
    %14 = vector.load %arg3[%c0_6, %c0_7] : memref<1024x513xbf16, #tpu.memory_space<vmem>>, vector<1024x513xbf16>
    %cst_8 = arith.constant dense<0.000000e+00> : vector<2x513xf32>
    %15 = tpu.matmul %13, %14, %cst_8 {dimension_numbers = #tpu.dot_dimension_numbers<[1], [0], [0], [1], [0, 0, 1, 1], [], []>} : vector<2x1024xbf16>, vector<1024x513xbf16>, vector<2x513xf32> -> vector<2x513xf32>
    %16 = vector.broadcast %2 : vector<1x513xf32> to vector<2x513xf32>
    %17 = arith.addf %15, %16 : vector<2x513xf32>
    %18 = vector.extract_strided_slice %17 {offsets = [0, 512], sizes = [2, 1], strides = [1, 1]} : vector<2x513xf32> to vector<2x1xf32>
    %19 = vector.extract_strided_slice %17 {offsets = [0, 0], sizes = [2, 512], strides = [1, 1]} : vector<2x513xf32> to vector<2x512xf32>
    %cst_9 = arith.constant 0.000000e+00 : f32
    %20 = vector.broadcast %cst_9 : f32 to vector<2x512xf32>
    %21 = arith.cmpf ogt, %19, %20 : vector<2x512xf32>
    %cst_10 = arith.constant 0.000000e+00 : f32
    %22 = vector.broadcast %cst_10 : f32 to vector<2x512xf32>
    %23 = arith.minimumf %19, %22 : vector<2x512xf32>
    %24 = math.exp %23 : vector<2x512xf32>
    %cst_11 = arith.constant 1.000000e+00 : f32
    %25 = vector.broadcast %cst_11 : f32 to vector<2x512xf32>
    %26 = arith.subf %24, %25 : vector<2x512xf32>
    %27 = arith.select %21, %19, %26 : vector<2x512xi1>, vector<2x512xf32>
    %28 = arith.truncf %27 : vector<2x512xf32> to vector<2x512xbf16>
    %c0_12 = arith.constant 0 : index
    %c0_13 = arith.constant 0 : index
    %29 = vector.load %arg4[%c0_12, %c0_13] : memref<512x256xbf16, #tpu.memory_space<vmem>>, vector<512x256xbf16>
    %cst_14 = arith.constant dense<0.000000e+00> : vector<2x256xf32>
    %30 = tpu.matmul %28, %29, %cst_14 {dimension_numbers = #tpu.dot_dimension_numbers<[1], [0], [0], [1], [0, 0, 1, 1], [], []>} : vector<2x512xbf16>, vector<512x256xbf16>, vector<2x256xf32> -> vector<2x256xf32>
    %31 = vector.broadcast %3 : vector<1x256xf32> to vector<2x256xf32>
    %32 = arith.addf %30, %31 : vector<2x256xf32>
    %cst_15 = arith.constant 0.000000e+00 : f32
    %33 = vector.broadcast %cst_15 : f32 to vector<2x256xf32>
    %34 = arith.cmpf ogt, %32, %33 : vector<2x256xf32>
    %cst_16 = arith.constant 0.000000e+00 : f32
    %35 = vector.broadcast %cst_16 : f32 to vector<2x256xf32>
    %36 = arith.minimumf %32, %35 : vector<2x256xf32>
    %37 = math.exp %36 : vector<2x256xf32>
    %cst_17 = arith.constant 1.000000e+00 : f32
    %38 = vector.broadcast %cst_17 : f32 to vector<2x256xf32>
    %39 = arith.subf %37, %38 : vector<2x256xf32>
    %40 = arith.select %34, %32, %39 : vector<2x256xi1>, vector<2x256xf32>
    %41 = arith.truncf %40 : vector<2x256xf32> to vector<2x256xbf16>
    %c0_18 = arith.constant 0 : index
    %c0_19 = arith.constant 0 : index
    %42 = vector.load %arg5[%c0_18, %c0_19] : memref<256x32xbf16, #tpu.memory_space<vmem>>, vector<256x32xbf16>
    %cst_20 = arith.constant dense<0.000000e+00> : vector<2x32xf32>
    %43 = tpu.matmul %41, %42, %cst_20 {dimension_numbers = #tpu.dot_dimension_numbers<[1], [0], [0], [1], [0, 0, 1, 1], [], []>} : vector<2x256xbf16>, vector<256x32xbf16>, vector<2x32xf32> -> vector<2x32xf32>
    %44 = vector.broadcast %4 : vector<1x32xf32> to vector<2x32xf32>
    %45 = arith.addf %43, %44 : vector<2x32xf32>
    %cst_21 = arith.constant 0.000000e+00 : f32
    %46 = vector.broadcast %cst_21 : f32 to vector<2x128xf32>
    %c0_22 = arith.constant 0 : index
    %c0_23 = arith.constant 0 : index
    %47 = vector.load %arg7[%c0_22, %c0_23] : memref<2x128xf32, #tpu.memory_space<vmem>>, vector<2x128xf32>
    tpu.vector_store %arg7[%c0_22, %c0_23], %46 {strides = array<i32>} : memref<2x128xf32, #tpu.memory_space<vmem>>, vector<2x128xf32>,
    %c0_24 = arith.constant 0 : index
    %c0_25 = arith.constant 0 : index
    %48 = vector.load %arg7[%c0_24, %c0_25] : memref<2x128xf32, #tpu.memory_space<vmem>>, vector<2x32xf32>
    tpu.vector_store %arg7[%c0_24, %c0_25], %45 {strides = array<i32>} : memref<2x128xf32, #tpu.memory_space<vmem>>, vector<2x32xf32>,
    %c0_26 = arith.constant 0 : index
    %c32 = arith.constant 32 : index
    %49 = vector.load %arg7[%c0_26, %c32] : memref<2x128xf32, #tpu.memory_space<vmem>>, vector<2x1xf32>
    tpu.vector_store %arg7[%c0_26, %c32], %18 {strides = array<i32>} : memref<2x128xf32, #tpu.memory_space<vmem>>, vector<2x1xf32>,
    return
  }
  func.func @transform_0(%arg0: i32) -> (i32, i32) {
    %c0_i32 = arith.constant 0 : i32
    %c0_i32_0 = arith.constant 0 : i32
    %c0_i32_1 = arith.constant 0 : i32
    return %c0_i32, %c0_i32_0 : i32, i32
  }
  func.func @transform_1(%arg0: i32) -> (i32, i32) {
    %c0_i32 = arith.constant 0 : i32
    %c0_i32_0 = arith.constant 0 : i32
    %c0_i32_1 = arith.constant 0 : i32
    return %c0_i32, %c0_i32_0 : i32, i32
  }
  func.func @transform_2(%arg0: i32) -> (i32, i32) {
    %c0_i32 = arith.constant 0 : i32
    %c0_i32_0 = arith.constant 0 : i32
    %c0_i32_1 = arith.constant 0 : i32
    return %c0_i32, %c0_i32_0 : i32, i32
  }
  func.func @transform_3(%arg0: i32) -> (i32, i32) {
    %c0_i32 = arith.constant 0 : i32
    %c0_i32_0 = arith.constant 0 : i32
    %c0_i32_1 = arith.constant 0 : i32
    return %c0_i32, %c0_i32_0 : i32, i32
  }
  func.func @transform_4(%arg0: i32) -> (i32, i32) {
    %c0_i32 = arith.constant 0 : i32
    %c0_i32_0 = arith.constant 0 : i32
    %c0_i32_1 = arith.constant 0 : i32
    return %c0_i32, %c0_i32_0 : i32, i32
  }
  func.func @transform_5(%arg0: i32) -> (i32, i32) {
    %c0_i32 = arith.constant 0 : i32
    %c0_i32_0 = arith.constant 0 : i32
    %c0_i32_1 = arith.constant 0 : i32
    return %c0_i32, %c0_i32_0 : i32, i32
  }
  func.func @transform_6(%arg0: i32) -> (i32, i32) {
    %c0_i32 = arith.constant 0 : i32
    %c0_i32_0 = arith.constant 0 : i32
    %c0_i32_1 = arith.constant 0 : i32
    return %c0_i32, %c0_i32_0 : i32, i32
  }
}

</mosaic_0001>

<bundles_post_ra>
// kernel: squeeze.2
= control target key start
LH: loop header
LB: loop body
LE: loop exit
PB: predicated region body
PF: predicated region fallthrough
CT: control target
= control target key end

     0   :  { %vm22_vm0 = vcmask 1043458   ;;  %vm27_vm1 = vcmask 1045508   ;;  %vm32_vm2 = vcmask 1047558   ;;  %s60_s6 = smov 3  ;;  %s63_s7 = smov 12  ;;  %vm4_vm3 = vcmask 1047556   ;;  %s632_s0 = inlined_call_operand.vmem [shape: f32[2,3,16,16], index: 0, kind: input, shape index: {}]   ;;  %s633_s1 = inlined_call_operand.vmem [shape: f32[2,768], index: 1, kind: output, shape index: {}]  }
   0x1   :  { %v360_v0 = vld [vmem:[%s632_s0 + $0x6] ss:$48 sm:%s60_s6]   ;;  %v361_v1 = vld [vmem:[%s632_s0 - $0x52] ss:$48 sm:%s63_s7]   ;;  %s68_s12 = smov 48  ;;  %s73_s13 = smov 192 }
   0x2   :  { %v66_v2 = vsel %vm22_vm0, %v361_v1, %v360_v0  ;;  %v362_v3 = vld [vmem:[%s632_s0 - $0xaa] ss:$48 sm:%s68_s12]   ;;  %v363_v4 = vld [vmem:[%s632_s0 - $0x102] ss:$48 sm:%s73_s13]   ;;  %s17_s18 = smov 3  ;;  %s20_s21 = smov 12 }
   0x3   :  { %v71_v5 = vsel %vm27_vm1, %v362_v3, %v66_v2  ;;  %v354_v6 = vld [vmem:[%s632_s0 + $0x7] ss:$48 sm:%s17_s18]   ;;  %s25_s22 = smov 48  ;;  %v355_v8 = vld [vmem:[%s632_s0 - $0x51] ss:$48 sm:%s20_s21]   ;;  %s30_s27 = smov 192 }
   0x4   :  { %v76_v7 = vsel %vm32_vm2, %v363_v4, %v71_v5  ;;  %v356_v9 = vld [vmem:[%s632_s0 - $0xa9] ss:$48 sm:%s25_s22]   ;;  %s408_s28 = smov 96   ;;  %v23_v10 = vsel %vm22_vm0, %v355_v8, %v354_v6  ;;  %v357_v11 = vld [vmem:[%s632_s0 - $0x101] ss:$48 sm:%s30_s27]   ;;  %s88_s2 = smov 3 }
   0x5   :  { %77 = vrot.lane.b32.xlu1 %v76_v7, %s408_s28  ;;  %s91_s3 = smov 12  ;;  %v28_v12 = vsel %vm27_vm1, %v356_v9, %v23_v10  ;;  %v364_v14 = vld [vmem:[%s632_s0 + $0x26] ss:$48 sm:%s88_s2]   ;;  %s45_s8 = smov 3  ;;  %vm6_vm4 = vcmask 130048   ;;  %vm36_vm5 = vcmask 1048448  }
   0x6   :  { %v33_v13 = vsel %vm32_vm2, %v357_v11, %v28_v12  ;;  %v365_v15 = vld [vmem:[%s632_s0 - $0x32] ss:$48 sm:%s91_s3]   ;;  %s48_s9 = smov 12  ;;  %s409_s10 = smov 112   ;;  %v358_v17 = vld [vmem:[%s632_s0 + $0x27] ss:$48 sm:%s45_s8]  }
   0x7   :  { %34 = vrot.lane.b32.xlu0 %v33_v13, %s409_s10  ;;  %s146_s11 = smov 3  ;;  %s149_s12 = smov 12  ;;  %v94_v16 = vsel %vm22_vm0, %v365_v15, %v364_v14  ;;  %v359_v18 = vld [vmem:[%s632_s0 - $0x31] ss:$48 sm:%s48_s9]   ;;  %vm79_vm6 = vcmask 917248   ;;  %vm122_vm7 = vcmask 786048  }
   0x8   :  { %s174_s17 = smov 3  ;;  %s177_s18 = smov 12  ;;  %v372_v19 = vld [vmem:[%s632_s0 + $0x4] ss:$48 sm:%s146_s11]   ;;  %v373_v20 = vld [vmem:[%s632_s0 - $0x54] ss:$48 sm:%s149_s12]   ;;  %v51_v21 = vsel %vm22_vm0, %v359_v18, %v358_v17 }
   0x9   :  { %s154_s19 = smov 48  ;;  %s232_s24 = smov 3  ;;  %v376_v22 = vld [vmem:[%s632_s0 + $0x24] ss:$48 sm:%s174_s17]   ;;  %v377_v23 = vld [vmem:[%s632_s0 - $0x34] ss:$48 sm:%s177_s18]   ;;  %v152_v25 = vsel %vm22_vm0, %v373_v20, %v372_v19 }
   0xa   :  { %s235_s25 = smov 12  ;;  %v374_v24 = vld [vmem:[%s632_s0 - $0xac] ss:$48 sm:%s154_s19]   ;;  %s159_s3 = smov 192  ;;  %v384_v26 = vld [vmem:[%s632_s0 + $0x2] ss:$48 sm:%s232_s24]   ;;  %v180_v33 = vsel %vm22_vm0, %v377_v23, %v376_v22 }
   0xb   :  { %s103_s4 = smov 3  ;;  %v385_v27 = vld [vmem:[%s632_s0 - $0x56] ss:$48 sm:%s235_s25]   ;;  %s106_s12 = smov 12  ;;  %v157_v34 = vsel %vm27_vm1, %v374_v24, %v152_v25  ;;  %v375_v35 = vld [vmem:[%s632_s0 - $0x104] ss:$48 sm:%s159_s3]  }
   0xc   :  { %v366_v28 = vld [vmem:[%s632_s0 + $0x5] ss:$48 sm:%s103_s4]   ;;  %s111_s13 = smov 48  ;;  %v367_v29 = vld [vmem:[%s632_s0 - $0x53] ss:$48 sm:%s106_s12]   ;;  %s116_s15 = smov 192  ;;  %v238_v38 = vsel %vm22_vm0, %v385_v27, %v384_v26  ;;  %v162_v40 = vsel %vm32_vm2, %v375_v35, %v157_v34 }
   0xd   :  { %95 = vrot.lane.b32.xlu1 %v94_v16, %s408_s28  ;;  %s240_s16 = smov 48  ;;  %v109_v30 = vsel %vm22_vm0, %v367_v29, %v366_v28  ;;  %v368_v31 = vld [vmem:[%s632_s0 - $0xab] ss:$48 sm:%s111_s13]   ;;  %s245_s23 = smov 192  ;;  %vm165_vm8 = vcmask 654848   ;;  %vm208_vm9 = vcmask 523648  }
   0xe   :  { %v369_v32 = vld [vmem:[%s632_s0 - $0x103] ss:$48 sm:%s116_s15]   ;;  %v114_v36 = vsel %vm27_vm1, %v368_v31, %v109_v30  ;;  %v386_v39 = vld [vmem:[%s632_s0 - $0xae] ss:$48 sm:%s240_s16]   ;;  %s410_s26 = smov 80   ;;  %s131_s27 = smov 3 }
   0xf   :  { %52 = vrot.lane.b32.xlu0 %v51_v21, %s409_s10  ;;  %v119_v37 = vsel %vm32_vm2, %v369_v32, %v114_v36  ;;  %s411_s28 = smov 64   ;;  %s134_s29 = smov 12  ;;  %v387_v41 = vld [vmem:[%s632_s0 - $0x106] ss:$48 sm:%s245_s23]   ;;  %v243_v43 = vsel %vm27_vm1, %v386_v39, %v238_v38  ;;  %vm251_vm10 = vcmask 392448   ;;  %vm294_vm11 = vcmask 261248  }
  0x10   :  { %120 = vrot.lane.b32.xlu2 %v119_v37, %s410_s26  ;;  %s189_s30 = smov 3  ;;  %v370_v42 = vld [vmem:[%s632_s0 + $0x25] ss:$48 sm:%s131_s27]   ;;  %s192_s6 = smov 12  ;;  %v248_v48 = vsel %vm32_vm2, %v387_v41, %v243_v43 }
  0x11   :  { %s217_s7 = smov 3  ;;  %s220_s8 = smov 12  ;;  %v371_v44 = vld [vmem:[%s632_s0 - $0x33] ss:$48 sm:%s134_s29]   ;;  %v378_v45 = vld [vmem:[%s632_s0 + $0x3] ss:$48 sm:%s189_s30]  }
  0x12   :  { %s275_s10 = smov 3  ;;  %v379_v46 = vld [vmem:[%s632_s0 - $0x55] ss:$48 sm:%s192_s6]   ;;  %s197_s16 = smov 48  ;;  %v137_v47 = vsel %vm22_vm0, %v371_v44, %v370_v42  ;;  %v382_v49 = vld [vmem:[%s632_s0 + $0x23] ss:$48 sm:%s217_s7]  }
  0x13   :  { %s278_s17 = smov 12  ;;  %v383_v50 = vld [vmem:[%s632_s0 - $0x35] ss:$48 sm:%s220_s8]   ;;  %s303_s22 = smov 3  ;;  %v390_v51 = vld [vmem:[%s632_s0 + $0x1] ss:$48 sm:%s275_s10]   ;;  %v195_v52 = vsel %vm22_vm0, %v379_v46, %v378_v45 }
  0x14   :  { %v380_v53 = vld [vmem:[%s632_s0 - $0xad] ss:$48 sm:%s197_s16]   ;;  %s306_s29 = smov 12  ;;  %v391_v54 = vld [vmem:[%s632_s0 - $0x57] ss:$48 sm:%s278_s17]   ;;  %s283_s3 = smov 48  ;;  %v223_v55 = vsel %vm22_vm0, %v383_v50, %v382_v49 }
  0x15   :  { %181 = vrot.lane.b32.xlu1 %v180_v33, %s411_s28  ;;  %v394_v56 = vld [vmem:[%s632_s0 + $0x21] ss:$48 sm:%s303_s22]   ;;  %v200_v57 = vsel %vm27_vm1, %v380_v53, %v195_v52  ;;  %v281_v60 = vsel %vm22_vm0, %v391_v54, %v390_v51  ;;  %s288_s13 = smov 192  ;;  %s413_s10 = smov 48  }
  0x16   :  { %v395_v59 = vld [vmem:[%s632_s0 - $0x37] ss:$48 sm:%s306_s29]   ;;  %v392_v61 = vld [vmem:[%s632_s0 - $0xaf] ss:$48 sm:%s283_s3]   ;;  %s260_s16 = smov 3  ;;  %s263_s17 = smov 12 }
  0x17   :  { %163 = vrot.lane.b32.xlu0 %v162_v40, %s411_s28  ;;  %s202_s28 = smov 192  ;;  %v309_v63 = vsel %vm22_vm0, %v395_v59, %v394_v56  ;;  %v286_v0 = vsel %vm27_vm1, %v392_v61, %v281_v60  ;;  %v393_v1 = vld [vmem:[%s632_s0 - $0x107] ss:$48 sm:%s288_s13]   ;;  %s414_s18 = smov 16  }
  0x18   :  { %138 = vrot.lane.b32.xlu2 %v137_v47, %s410_s26  ;;  %s412_s26 = smov 32   ;;  %v381_v58 = vld [vmem:[%s632_s0 - $0x105] ss:$48 sm:%s202_s28]   ;;  %v291_v2 = vsel %vm32_vm2, %v393_v1, %v286_v0  ;;  %v2_v6 = vld [vmem:[%s632_s0] ss:$8 sm:$0xf]  }
  0x19   :  { %v205_v62 = vsel %vm32_vm2, %v381_v58, %v200_v57  ;;  %v388_v3 = vld [vmem:[%s632_s0 + $0x22] ss:$48 sm:%s260_s16]   ;;  %v389_v4 = vld [vmem:[%s632_s0 - $0x36] ss:$48 sm:%s263_s17]  }
  0x1a   :  { %v266_v5 = vsel %vm22_vm0, %v389_v4, %v388_v3  ;;  %v3_v7 = vld [vmem:[%s632_s0] ss:$8 sm:$0xf0]  }
  0x1b   :  { %v353_v8 = vld [vmem:[%s632_s0 + $0x40] ss:$8 sm:$0xf]   ;;  %v5_v9 = vsel %vm4_vm3, %v3_v7, %v2_v6 }
  0x1c   :  { %15 = vst.msk [vmem:[#allocation0 + $0x11] ss:$8 sm:$0xf] %vm6_vm4, %v353_v8  }
  0x1d   :  { %249 = vrot.lane.b32.xlu1 %v248_v48, %s412_s26  ;;  %7 = vst.msk [vmem:[#allocation0] ss:$8 sm:$0xf] %vm6_vm4, %v5_v9  }
  0x1e   :  { %10 = vst.msk [vmem:[#allocation0 - $0x2f] ss:$8 sm:$0xc0] %vm6_vm4, %v5_v9  }
  0x1f   :  { %224 = vrot.lane.b32.xlu0 %v223_v55, %s413_s10  ;;  %8 = vst.msk [vmem:[#allocation0] ss:$8 sm:$0x30] %vm6_vm4, %v5_v9  }
  0x20   :  { %206 = vrot.lane.b32.xlu2 %v205_v62, %s413_s10 }
  0x25   :  { %310 = vrot.lane.b32.xlu1 %v309_v63, %s414_s18 }
  0x27   :  { %292 = vrot.lane.b32.xlu0 %v291_v2, %s414_s18 }
  0x28   :  { %267 = vrot.lane.b32.xlu2 %v266_v5, %s412_s26 }
  0x6a   :  { %v121_v10 = vpop.permute.xlu2 %120  }
  0x72   :  { %v139_v11 = vpop.permute.xlu2 %138  }
  0x77   :  { %v78_v12 = vpop.permute.xlu1 %77  }
  0x79   :  { %v35_v13 = vpop.permute.xlu0 %34  }
  0x7a   :  { %37 = vst.msk [vmem:[#allocation0] sm:$0x3] %vm36_vm5, %v35_v13   ;;  %v207_v14 = vpop.permute.xlu2 %206  }
  0x7b   :  { %39 = vst.msk [vmem:[#allocation0 + $0x6] sm:$0xc] %vm36_vm5, %v35_v13  }
  0x7c   :  { %41 = vst.msk [vmem:[#allocation0 + $0xc] sm:$0x30] %vm36_vm5, %v35_v13  }
  0x7d   :  { %43 = vst.msk [vmem:[#allocation0 + $0x12] sm:$0xc0] %vm36_vm5, %v35_v13  }
  0x7e   :  { %80 = vst.msk [vmem:[#allocation0] sm:$0x3] %vm79_vm6, %v78_v12  }
  0x7f   :  { %v96_v15 = vpop.permute.xlu1 %95   ;;  %82 = vst.msk [vmem:[#allocation0 + $0x6] sm:$0xc] %vm79_vm6, %v78_v12  }
  0x80   :  { %84 = vst.msk [vmem:[#allocation0 + $0xc] sm:$0x30] %vm79_vm6, %v78_v12  }
  0x81   :  { %86 = vst.msk [vmem:[#allocation0 + $0x12] sm:$0xc0] %vm79_vm6, %v78_v12   ;;  %v53_v16 = vpop.permute.xlu0 %52  }
  0x82   :  { %123 = vst.msk [vmem:[#allocation0] sm:$0x3] %vm122_vm7, %v121_v10   ;;  %v268_v17 = vpop.permute.xlu2 %267  }
  0x83   :  { %125 = vst.msk [vmem:[#allocation0 + $0x6] sm:$0xc] %vm122_vm7, %v121_v10  }
  0x84   :  { %127 = vst.msk [vmem:[#allocation0 + $0xc] sm:$0x30] %vm122_vm7, %v121_v10  }
  0x85   :  { %129 = vst.msk [vmem:[#allocation0 + $0x12] sm:$0xc0] %vm122_vm7, %v121_v10  }
  0x86   :  { %56 = vst.msk [vmem:[#allocation0 + $0x20] sm:$0x3] %vm36_vm5, %v53_v16  }
  0x87   :  { %v182_v18 = vpop.permute.xlu1 %181   ;;  %58 = vst.msk [vmem:[#allocation0 + $0x26] sm:$0xc] %vm36_vm5, %v53_v16  }
  0x88   :  { %99 = vst.msk [vmem:[#allocation0 + $0x20] sm:$0x3] %vm79_vm6, %v96_v15  }
  0x89   :  { %101 = vst.msk [vmem:[#allocation0 + $0x26] sm:$0xc] %vm79_vm6, %v96_v15   ;;  %v164_v19 = vpop.permute.xlu0 %163  }
  0x8a   :  { %142 = vst.msk [vmem:[#allocation0 + $0x20] sm:$0x3] %vm122_vm7, %v139_v11  }
  0x8b   :  { %144 = vst.msk [vmem:[#allocation0 + $0x26] sm:$0xc] %vm122_vm7, %v139_v11  }
  0x8c   :  { %185 = vst.msk [vmem:[#allocation0 + $0x20] sm:$0x3] %vm165_vm8, %v182_v18  }
  0x8d   :  { %187 = vst.msk [vmem:[#allocation0 + $0x26] sm:$0xc] %vm165_vm8, %v182_v18  }
  0x8e   :  { %166 = vst.msk [vmem:[#allocation0] sm:$0x3] %vm165_vm8, %v164_v19  }
  0x8f   :  { %v250_v20 = vpop.permute.xlu1 %249   ;;  %168 = vst.msk [vmem:[#allocation0 + $0x6] sm:$0xc] %vm165_vm8, %v164_v19  }
  0x90   :  { %170 = vst.msk [vmem:[#allocation0 + $0xc] sm:$0x30] %vm165_vm8, %v164_v19  }
  0x91   :  { %172 = vst.msk [vmem:[#allocation0 + $0x12] sm:$0xc0] %vm165_vm8, %v164_v19   ;;  %v225_v21 = vpop.permute.xlu0 %224  }
  0x92   :  { %209 = vst.msk [vmem:[#allocation0] sm:$0x3] %vm208_vm9, %v207_v14  }
  0x93   :  { %211 = vst.msk [vmem:[#allocation0 + $0x6] sm:$0xc] %vm208_vm9, %v207_v14  }
  0x94   :  { %213 = vst.msk [vmem:[#allocation0 + $0xc] sm:$0x30] %vm208_vm9, %v207_v14  }
  0x95   :  { %215 = vst.msk [vmem:[#allocation0 + $0x12] sm:$0xc0] %vm208_vm9, %v207_v14  }
  0x96   :  { %252 = vst.msk [vmem:[#allocation0] sm:$0x3] %vm251_vm10, %v250_v20  }
  0x97   :  { %v311_v22 = vpop.permute.xlu1 %310   ;;  %254 = vst.msk [vmem:[#allocation0 + $0x6] sm:$0xc] %vm251_vm10, %v250_v20  }
  0x98   :  { %256 = vst.msk [vmem:[#allocation0 + $0xc] sm:$0x30] %vm251_vm10, %v250_v20  }
  0x99   :  { %258 = vst.msk [vmem:[#allocation0 + $0x12] sm:$0xc0] %vm251_vm10, %v250_v20   ;;  %v293_v23 = vpop.permute.xlu0 %292  }
  0x9a   :  { %228 = vst.msk [vmem:[#allocation0 + $0x20] sm:$0x3] %vm208_vm9, %v225_v21  }
  0x9b   :  { %230 = vst.msk [vmem:[#allocation0 + $0x26] sm:$0xc] %vm208_vm9, %v225_v21  }
  0x9c   :  { %271 = vst.msk [vmem:[#allocation0 + $0x20] sm:$0x3] %vm251_vm10, %v268_v17  }
  0x9d   :  { %273 = vst.msk [vmem:[#allocation0 + $0x26] sm:$0xc] %vm251_vm10, %v268_v17  }
  0x9e   :  { %314 = vst.msk [vmem:[#allocation0 + $0x20] sm:$0x3] %vm294_vm11, %v311_v22  }
  0x9f   :  { %316 = vst.msk [vmem:[#allocation0 + $0x26] sm:$0xc] %vm294_vm11, %v311_v22  }
  0xa0   :  { %295 = vst.msk [vmem:[#allocation0] sm:$0x3] %vm294_vm11, %v293_v23  }
  0xa1   :  { %297 = vst.msk [vmem:[#allocation0 + $0x6] sm:$0xc] %vm294_vm11, %v293_v23  }
  0xa2   :  { %299 = vst.msk [vmem:[#allocation0 + $0xc] sm:$0x30] %vm294_vm11, %v293_v23  }
  0xa3   :  { %301 = vst.msk [vmem:[#allocation0 + $0x12] sm:$0xc0] %vm294_vm11, %v293_v23  }
  0xa5   :  { %v342_v24 = vld [vmem:[#allocation0 + $0x20] sm:$0x3] }
  0xa6   :  { %399 = vst [vmem:[%s633_s1 + $0x8] sm:$0x3] %v342_v24  ;;  %v348_v25 = vld [vmem:[#allocation0 + $0x28] sm:$0x3] }
  0xa7   :  { %400 = vst [vmem:[%s633_s1 + $0xa] sm:$0x3] %v348_v25  ;;  %v319_v26 = vld [vmem:[#allocation0] sm:$0x3] }
  0xa8   :  { %322 = vst [vmem:[%s633_s1] sm:$0x3] %v319_v26  ;;  %v324_v27 = vld [vmem:[#allocation0 + $0x8] sm:$0x3] }
  0xa9   :  { %396 = vst [vmem:[%s633_s1 + $0x2] sm:$0x3] %v324_v27  ;;  %v330_v28 = vld [vmem:[#allocation0 + $0x10] sm:$0x3] }
  0xaa   :  { %397 = vst [vmem:[%s633_s1 + $0x4] sm:$0x3] %v330_v28  ;;  %v336_v29 = vld [vmem:[#allocation0 + $0x18] sm:$0x3] }
  0xab   :  { %398 = vst [vmem:[%s633_s1 + $0x6] sm:$0x3] %v336_v29 }

// kernel: cnn25d_gcn_forward.1
= control target key start
LH: loop header
LB: loop body
LE: loop exit
PB: predicated region body
PF: predicated region fallthrough
CT: control target
= control target key end

     0   :  { %11 = vsyncpa [#allocation3], 0  ;;  %s15169_s24 = smov [#allocation2]   ;;  %s15170_s26 = smov 512   ;;  %s17980_s0 = inlined_call_operand.vmem [shape: f32[2,1536], index: 0, kind: input, shape index: {}]   ;;  %s17981_s1 = inlined_call_operand.hbm [shape: bf16[1536,1024], index: 1, kind: input, shape index: {}]   ;;  %s17982_s2 = inlined_call_operand.vmem [shape: bf16[1024,513], index: 2, kind: input, shape index: {}]   ;;  %s17983_s3 = inlined_call_operand.vmem [shape: bf16[512,256], index: 3, kind: input, shape index: {}]   ;;  %s17984_s4 = inlined_call_operand.vmem [shape: bf16[256,32], index: 4, kind: input, shape index: {}]   ;;  %s17985_s5 = inlined_call_operand.vmem [shape: f32[4,1024], index: 5, kind: input, shape index: {}]   ;;  %s17986_s6 = inlined_call_operand.vmem [shape: f32[2,128], index: 6, kind: output, shape index: {}]  }
   0x1   :  { %s18_s23 = sshll.u32 %s17981_s1, 4  ;;  %s20_s25 = sshll.u32 %s15169_s24, 4  ;;  %s19_s23 = int_to_ptr.hbm [resolvable:$true] %s18_s23  ;;  %s21_s25 = int_to_ptr.vmem [resolvable:$true] %s20_s25 }
   0x2   :  { %s15171_s27 = smov 32  }
   0x3   :  { %26 = dma.hbm_to_vmem [thread:$0]  %s19_s23, 98304, %s21_s25, [#allocation3], %s15170_s26, %s15170_s26, %s15171_s27  }
   0x4   :  { %15167 = dma.done.wait [#allocation3], 98304  }
   0x5   :  { %15168 = vsyncadd [#allocation3], 4294868992  ;;  %v9503_v0 = vld [vmem:[#allocation2 + $0x1c0] sm:$0xf]  ;;  %vm9264_vm6 = vcmask 254976   ;;  %vm9270_vm7 = vcmask 263424  }
   0x6   :  { %v14015_v1 = vld [vmem:[#allocation2 + $0x1dc] sm:$0xf0] }
   0x7   :  { %v9759_v2 = vld [vmem:[#allocation2 + $0x3c0] sm:$0xf]  ;;  %v9504_v3 = vor.u32 %v14015_v1, %v9503_v0 }
   0x8   :  { %v14079_v4 = vld [vmem:[#allocation2 + $0x3dc] sm:$0xf0] }
   0x9   :  { %v10015_v5 = vld [vmem:[#allocation2 + $0x5c0] sm:$0xf]  ;;  %v9760_v7 = vor.u32 %v14079_v4, %v9759_v2  ;;  %4725 = vmatpush.bf16.msra.mxu0 %v9504_v3 }
   0xa   :  { %v14143_v6 = vld [vmem:[#allocation2 + $0x5dc] sm:$0xf0] }
   0xb   :  { %v10016_v8 = vor.u32 %v14143_v6, %v10015_v5  ;;  %v10271_v9 = vld [vmem:[#allocation2 + $0x7c0] sm:$0xf]  ;;  %4738 = vmatpush.bf16.msra.mxu1 %v9760_v7 }
   0xc   :  { %v14207_v10 = vld [vmem:[#allocation2 + $0x7dc] sm:$0xf0] }
   0xd   :  { %v9471_v11 = vld [vmem:[#allocation2 + $0x180] sm:$0xf]  ;;  %v10272_v12 = vor.u32 %v14207_v10, %v10271_v9  ;;  %4751 = vmatpush.bf16.msra.mxu2 %v10016_v8 }
   0xe   :  { %v14007_v13 = vld [vmem:[#allocation2 + $0x19c] sm:$0xf0] }
   0xf   :  { %v9727_v14 = vld [vmem:[#allocation2 + $0x380] sm:$0xf]  ;;  %v9472_v16 = vor.u32 %v14007_v13, %v9471_v11  ;;  %4764 = vmatpush.bf16.msra.mxu3 %v10272_v12 }
  0x10   :  { %v14071_v15 = vld [vmem:[#allocation2 + $0x39c] sm:$0xf0] }
  0x11   :  { %v9728_v17 = vor.u32 %v14071_v15, %v9727_v14  ;;  %v9983_v18 = vld [vmem:[#allocation2 + $0x580] sm:$0xf]  ;;  %4726 = vmatpush.bf16.msra.mxu0 %v9472_v16 }
  0x12   :  { %v14135_v19 = vld [vmem:[#allocation2 + $0x59c] sm:$0xf0] }
  0x13   :  { %v10239_v20 = vld [vmem:[#allocation2 + $0x780] sm:$0xf]  ;;  %v9984_v21 = vor.u32 %v14135_v19, %v9983_v18  ;;  %4739 = vmatpush.bf16.msra.mxu1 %v9728_v17 }
  0x14   :  { %v14199_v22 = vld [vmem:[#allocation2 + $0x79c] sm:$0xf0] }
  0x15   :  { %v9439_v23 = vld [vmem:[#allocation2 + $0x140] sm:$0xf]  ;;  %v10240_v25 = vor.u32 %v14199_v22, %v10239_v20  ;;  %4752 = vmatpush.bf16.msra.mxu2 %v9984_v21 }
  0x16   :  { %v13999_v24 = vld [vmem:[#allocation2 + $0x15c] sm:$0xf0] }
  0x17   :  { %v9695_v26 = vld [vmem:[#allocation2 + $0x340] sm:$0xf]  ;;  %v9440_v29 = vor.u32 %v13999_v24, %v9439_v23  ;;  %4765 = vmatpush.bf16.msra.mxu3 %v10240_v25 }
  0x18   :  { %v14063_v27 = vld [vmem:[#allocation2 + $0x35c] sm:$0xf0] }
  0x19   :  { %v9951_v28 = vld [vmem:[#allocation2 + $0x540] sm:$0xf]  ;;  %v9696_v33 = vor.u32 %v14063_v27, %v9695_v26  ;;  %4727 = vmatpush.bf16.msra.mxu0 %v9440_v29 }
  0x1a   :  { %v14127_v30 = vld [vmem:[#allocation2 + $0x55c] sm:$0xf0] }
  0x1b   :  { %v10207_v31 = vld [vmem:[#allocation2 + $0x740] sm:$0xf]  ;;  %v9952_v34 = vor.u32 %v14127_v30, %v9951_v28  ;;  %4740 = vmatpush.bf16.msra.mxu1 %v9696_v33 }
  0x1c   :  { %v14191_v32 = vld [vmem:[#allocation2 + $0x75c] sm:$0xf0] }
  0x1d   :  { %v9407_v35 = vld [vmem:[#allocation2 + $0x100] sm:$0xf]  ;;  %v10208_v38 = vor.u32 %v14191_v32, %v10207_v31  ;;  %4753 = vmatpush.bf16.msra.mxu2 %v9952_v34 }
  0x1e   :  { %v13991_v36 = vld [vmem:[#allocation2 + $0x11c] sm:$0xf0] }
  0x1f   :  { %v9663_v37 = vld [vmem:[#allocation2 + $0x300] sm:$0xf]  ;;  %v9408_v44 = vor.u32 %v13991_v36, %v9407_v35  ;;  %4766 = vmatpush.bf16.msra.mxu3 %v10208_v38 }
  0x20   :  { %v14055_v39 = vld [vmem:[#allocation2 + $0x31c] sm:$0xf0] }
  0x21   :  { %v9919_v40 = vld [vmem:[#allocation2 + $0x500] sm:$0xf]  ;;  %v9664_v45 = vor.u32 %v14055_v39, %v9663_v37  ;;  %4728 = vmatpush.bf16.msra.mxu0 %v9408_v44 }
  0x22   :  { %v14119_v41 = vld [vmem:[#allocation2 + $0x51c] sm:$0xf0] }
  0x23   :  { %v10175_v42 = vld [vmem:[#allocation2 + $0x700] sm:$0xf]  ;;  %v9920_v46 = vor.u32 %v14119_v41, %v9919_v40  ;;  %4741 = vmatpush.bf16.msra.mxu1 %v9664_v45 }
  0x24   :  { %v14183_v43 = vld [vmem:[#allocation2 + $0x71c] sm:$0xf0] }
  0x25   :  { %v9375_v47 = vld [vmem:[#allocation2 + $0xc0] sm:$0xf]  ;;  %v10176_v50 = vor.u32 %v14183_v43, %v10175_v42  ;;  %4754 = vmatpush.bf16.msra.mxu2 %v9920_v46 }
  0x26   :  { %v13983_v48 = vld [vmem:[#allocation2 + $0xdc] sm:$0xf0] }
  0x27   :  { %v9631_v49 = vld [vmem:[#allocation2 + $0x2c0] sm:$0xf]  ;;  %v9376_v56 = vor.u32 %v13983_v48, %v9375_v47  ;;  %4767 = vmatpush.bf16.msra.mxu3 %v10176_v50 }
  0x28   :  { %v14047_v51 = vld [vmem:[#allocation2 + $0x2dc] sm:$0xf0] }
  0x29   :  { %v9887_v52 = vld [vmem:[#allocation2 + $0x4c0] sm:$0xf]  ;;  %v9632_v57 = vor.u32 %v14047_v51, %v9631_v49  ;;  %4729 = vmatpush.bf16.msra.mxu0 %v9376_v56 }
  0x2a   :  { %v14111_v53 = vld [vmem:[#allocation2 + $0x4dc] sm:$0xf0] }
  0x2b   :  { %v10143_v54 = vld [vmem:[#allocation2 + $0x6c0] sm:$0xf]  ;;  %v9888_v58 = vor.u32 %v14111_v53, %v9887_v52  ;;  %4742 = vmatpush.bf16.msra.mxu1 %v9632_v57 }
  0x2c   :  { %v14175_v55 = vld [vmem:[#allocation2 + $0x6dc] sm:$0xf0] }
  0x2d   :  { %v9343_v59 = vld [vmem:[#allocation2 + $0x80] sm:$0xf]  ;;  %v10144_v62 = vor.u32 %v14175_v55, %v10143_v54  ;;  %4755 = vmatpush.bf16.msra.mxu2 %v9888_v58 }
  0x2e   :  { %v13975_v60 = vld [vmem:[#allocation2 + $0x9c] sm:$0xf0] }
  0x2f   :  { %v9599_v61 = vld [vmem:[#allocation2 + $0x280] sm:$0xf]  ;;  %v9344_v4 = vor.u32 %v13975_v60, %v9343_v59  ;;  %4768 = vmatpush.bf16.msra.mxu3 %v10144_v62 }
  0x30   :  { %v14039_v63 = vld [vmem:[#allocation2 + $0x29c] sm:$0xf0] }
  0x31   :  { %v9855_v0 = vld [vmem:[#allocation2 + $0x480] sm:$0xf]  ;;  %v9600_v5 = vor.u32 %v14039_v63, %v9599_v61  ;;  %4730 = vmatpush.bf16.msra.mxu0 %v9344_v4 }
  0x32   :  { %v14103_v1 = vld [vmem:[#allocation2 + $0x49c] sm:$0xf0] }
  0x33   :  { %v10111_v2 = vld [vmem:[#allocation2 + $0x680] sm:$0xf]  ;;  %v9856_v6 = vor.u32 %v14103_v1, %v9855_v0  ;;  %4743 = vmatpush.bf16.msra.mxu1 %v9600_v5 }
  0x34   :  { %v14167_v3 = vld [vmem:[#allocation2 + $0x69c] sm:$0xf0] }
  0x35   :  { %v9311_v7 = vld [vmem:[#allocation2 + $0x40] sm:$0xf]  ;;  %v10112_v10 = vor.u32 %v14167_v3, %v10111_v2  ;;  %4756 = vmatpush.bf16.msra.mxu2 %v9856_v6  ;;  %v43_v2 = vld [vmem:[%s17980_s0] sm:$0xff] }
  0x36   :  { %v13967_v8 = vld [vmem:[#allocation2 + $0x5c] sm:$0xf0]  ;;  %49 = vst [vmem:[#allocation1] ss:$4 sm:$0xff] %v43_v2 }
  0x37   :  { %v9567_v9 = vld [vmem:[#allocation2 + $0x240] sm:$0xf]  ;;  %v9312_v16 = vor.u32 %v13967_v8, %v9311_v7  ;;  %4769 = vmatpush.bf16.msra.mxu3 %v10112_v10 }
  0x38   :  { %v14031_v11 = vld [vmem:[#allocation2 + $0x25c] sm:$0xf0] }
  0x39   :  { %v9823_v12 = vld [vmem:[#allocation2 + $0x440] sm:$0xf]  ;;  %v9568_v19 = vor.u32 %v14031_v11, %v9567_v9  ;;  %4731 = vmatpush.bf16.msra.mxu0 %v9312_v16 }
  0x3a   :  { %v14095_v13 = vld [vmem:[#allocation2 + $0x45c] sm:$0xf0] }
  0x3b   :  { %v10079_v14 = vld [vmem:[#allocation2 + $0x640] sm:$0xf]  ;;  %v9824_v20 = vor.u32 %v14095_v13, %v9823_v12  ;;  %4744 = vmatpush.bf16.msra.mxu1 %v9568_v19 }
  0x3c   :  { %v14159_v15 = vld [vmem:[#allocation2 + $0x65c] sm:$0xf0] }
  0x3d   :  { %v9279_v17 = vld [vmem:[#allocation2] sm:$0xf]  ;;  %v10080_v24 = vor.u32 %v14159_v15, %v10079_v14  ;;  %4757 = vmatpush.bf16.msra.mxu2 %v9824_v20 }
  0x3e   :  { %v13959_v18 = vld [vmem:[#allocation2 + $0x1c] sm:$0xf0] }
  0x3f   :  { %v9535_v21 = vld [vmem:[#allocation2 + $0x200] sm:$0xf]  ;;  %v9280_v31 = vor.u32 %v13959_v18, %v9279_v17  ;;  %4770 = vmatpush.bf16.msra.mxu3 %v10080_v24 }
  0x40   :  { %v14023_v22 = vld [vmem:[#allocation2 + $0x21c] sm:$0xf0] }
  0x41   :  { %v9791_v23 = vld [vmem:[#allocation2 + $0x400] sm:$0xf]  ;;  %v9536_v35 = vor.u32 %v14023_v22, %v9535_v21  ;;  %4732 = vmatpush.bf16.msra.mxu0 %v9280_v31 }
  0x42   :  { %v14087_v25 = vld [vmem:[#allocation2 + $0x41c] sm:$0xf0] }
  0x43   :  { %v10047_v26 = vld [vmem:[#allocation2 + $0x600] sm:$0xf]  ;;  %v9792_v36 = vor.u32 %v14087_v25, %v9791_v23  ;;  %4745 = vmatpush.bf16.msra.mxu1 %v9536_v35 }
  0x44   :  { %v14151_v27 = vld [vmem:[#allocation2 + $0x61c] sm:$0xf0] }
  0x45   :  { %v10527_v28 = vld [vmem:[#allocation2 + $0x9c0] sm:$0xf]  ;;  %v10048_v39 = vor.u32 %v14151_v27, %v10047_v26  ;;  %4758 = vmatpush.bf16.msra.mxu2 %v9792_v36  ;;  %v45_v27 = vld [vmem:[%s17980_s0 + $0x10] sm:$0xff] }
  0x46   :  { %v14271_v29 = vld [vmem:[#allocation2 + $0x9dc] sm:$0xf0] }
  0x47   :  { %v10783_v30 = vld [vmem:[#allocation2 + $0xbc0] sm:$0xf]  ;;  %v10528_v40 = vor.u32 %v14271_v29, %v10527_v28  ;;  %4771 = vmatpush.bf16.msra.mxu3 %v10048_v39 }
  0x48   :  { %v14335_v32 = vld [vmem:[#allocation2 + $0xbdc] sm:$0xf0] }
  0x49   :  { %v11039_v33 = vld [vmem:[#allocation2 + $0xdc0] sm:$0xf]  ;;  %v10784_v41 = vor.u32 %v14335_v32, %v10783_v30  ;;  %4777 = vmatpush.bf16.msrb.mxu0 %v10528_v40  ;;  %v54_v32 = vld.sshfl [vmem:[#allocation1 + $0x10] sm:$0xff pattern:$0x73625140] }
  0x4a   :  { %v14399_v34 = vld [vmem:[#allocation2 + $0xddc] sm:$0xf0]  ;;  %v15218_v35 = vpack.c.bf16 %v54_v32, %v54_v32 }
  0x4b   :  { %v11295_v37 = vld [vmem:[#allocation2 + $0xfc0] sm:$0xf]  ;;  %v11040_v42 = vor.u32 %v14399_v34, %v11039_v33  ;;  %4790 = vmatpush.bf16.msrb.mxu1 %v10784_v41  ;;  %v52_v33 = vld.sshfl [vmem:[#allocation1] sm:$0xff pattern:$0x73625140] }
  0x4c   :  { %v14463_v38 = vld [vmem:[#allocation2 + $0xfdc] sm:$0xf0]  ;;  %v15220_v36 = vpack.c.bf16 %v52_v33, %v52_v33  ;;  %4759 = vmatmul.bf16.vlgmr.msra.gmra.mxu2 %v15218_v35 }
  0x4d   :  { %v10495_v43 = vld [vmem:[#allocation2 + $0x980] sm:$0xf]  ;;  %v11296_v46 = vor.u32 %v14463_v38, %v11295_v37  ;;  %4803 = vmatpush.bf16.msrb.mxu2 %v11040_v42  ;;  %v55_v37 = vld.sshfl [vmem:[#allocation1 + $0x18] sm:$0xff pattern:$0x73625140] }
  0x4e   :  { %v14263_v44 = vld [vmem:[#allocation2 + $0x99c] sm:$0xf0]  ;;  %v15222_v42 = vpack.c.bf16 %v55_v37, %v55_v37  ;;  %4733 = vmatmul.bf16.vlgmr.msra.gmra.mxu0 %v15220_v36 }
  0x4f   :  { %v10751_v45 = vld [vmem:[#allocation2 + $0xb80] sm:$0xf]  ;;  %v10496_v52 = vor.u32 %v14263_v44, %v10495_v43  ;;  %4816 = vmatpush.bf16.msrb.mxu3 %v11296_v46 }
  0x50   :  { %v14327_v47 = vld [vmem:[#allocation2 + $0xb9c] sm:$0xf0]  ;;  %4772 = vmatmul.bf16.vlgmr.msra.gmra.mxu3 %v15222_v42 }
  0x51   :  { %v11007_v48 = vld [vmem:[#allocation2 + $0xd80] sm:$0xf]  ;;  %v10752_v53 = vor.u32 %v14327_v47, %v10751_v45  ;;  %4778 = vmatpush.bf16.msrb.mxu0 %v10496_v52 }
  0x52   :  { %v14391_v49 = vld [vmem:[#allocation2 + $0xd9c] sm:$0xf0] }
  0x53   :  { %v11263_v50 = vld [vmem:[#allocation2 + $0xf80] sm:$0xf]  ;;  %v11008_v54 = vor.u32 %v14391_v49, %v11007_v48  ;;  %4791 = vmatpush.bf16.msrb.mxu1 %v10752_v53 }
  0x54   :  { %v14455_v51 = vld [vmem:[#allocation2 + $0xf9c] sm:$0xf0] }
  0x55   :  { %v10463_v55 = vld [vmem:[#allocation2 + $0x940] sm:$0xf]  ;;  %v11264_v58 = vor.u32 %v14455_v51, %v11263_v50  ;;  %4804 = vmatpush.bf16.msrb.mxu2 %v11008_v54 }
  0x56   :  { %v14255_v56 = vld [vmem:[#allocation2 + $0x95c] sm:$0xf0] }
  0x57   :  { %v10719_v57 = vld [vmem:[#allocation2 + $0xb40] sm:$0xf]  ;;  %v10464_v0 = vor.u32 %v14255_v56, %v10463_v55  ;;  %4817 = vmatpush.bf16.msrb.mxu3 %v11264_v58 }
  0x58   :  { %v14319_v59 = vld [vmem:[#allocation2 + $0xb5c] sm:$0xf0] }
  0x59   :  { %v10975_v60 = vld [vmem:[#allocation2 + $0xd40] sm:$0xf]  ;;  %v10720_v3 = vor.u32 %v14319_v59, %v10719_v57  ;;  %4779 = vmatpush.bf16.msrb.mxu0 %v10464_v0 }
  0x5a   :  { %v14383_v61 = vld [vmem:[#allocation2 + $0xd5c] sm:$0xf0] }
  0x5b   :  { %v11231_v62 = vld [vmem:[#allocation2 + $0xf40] sm:$0xf]  ;;  %v10976_v4 = vor.u32 %v14383_v61, %v10975_v60  ;;  %4792 = vmatpush.bf16.msrb.mxu1 %v10720_v3 }
  0x5c   :  { %v14447_v63 = vld [vmem:[#allocation2 + $0xf5c] sm:$0xf0] }
  0x5d   :  { %v10431_v1 = vld [vmem:[#allocation2 + $0x900] sm:$0xf]  ;;  %v11232_v7 = vor.u32 %v14447_v63, %v11231_v62  ;;  %4805 = vmatpush.bf16.msrb.mxu2 %v10976_v4 }
  0x5e   :  { %v14247_v5 = vld [vmem:[#allocation2 + $0x91c] sm:$0xf0] }
  0x5f   :  { %v10687_v6 = vld [vmem:[#allocation2 + $0xb00] sm:$0xf]  ;;  %v10432_v13 = vor.u32 %v14247_v5, %v10431_v1  ;;  %4818 = vmatpush.bf16.msrb.mxu3 %v11232_v7 }
  0x60   :  { %v14311_v8 = vld [vmem:[#allocation2 + $0xb1c] sm:$0xf0] }
  0x61   :  { %v10943_v9 = vld [vmem:[#allocation2 + $0xd00] sm:$0xf]  ;;  %v10688_v16 = vor.u32 %v14311_v8, %v10687_v6  ;;  %4780 = vmatpush.bf16.msrb.mxu0 %v10432_v13 }
  0x62   :  { %v14375_v10 = vld [vmem:[#allocation2 + $0xd1c] sm:$0xf0] }
  0x63   :  { %v11199_v11 = vld [vmem:[#allocation2 + $0xf00] sm:$0xf]  ;;  %v10944_v17 = vor.u32 %v14375_v10, %v10943_v9  ;;  %4793 = vmatpush.bf16.msrb.mxu1 %v10688_v16 }
  0x64   :  { %v14439_v12 = vld [vmem:[#allocation2 + $0xf1c] sm:$0xf0] }
  0x65   :  { %v10399_v14 = vld [vmem:[#allocation2 + $0x8c0] sm:$0xf]  ;;  %v11200_v21 = vor.u32 %v14439_v12, %v11199_v11  ;;  %4806 = vmatpush.bf16.msrb.mxu2 %v10944_v17 }
  0x66   :  { %v14239_v15 = vld [vmem:[#allocation2 + $0x8dc] sm:$0xf0] }
  0x67   :  { %v10655_v18 = vld [vmem:[#allocation2 + $0xac0] sm:$0xf]  ;;  %v10400_v28 = vor.u32 %v14239_v15, %v10399_v14  ;;  %4819 = vmatpush.bf16.msrb.mxu3 %v11200_v21 }
  0x68   :  { %v14303_v19 = vld [vmem:[#allocation2 + $0xadc] sm:$0xf0] }
  0x69   :  { %v10911_v20 = vld [vmem:[#allocation2 + $0xcc0] sm:$0xf]  ;;  %v10656_v29 = vor.u32 %v14303_v19, %v10655_v18  ;;  %4781 = vmatpush.bf16.msrb.mxu0 %v10400_v28 }
  0x6a   :  { %v14367_v22 = vld [vmem:[#allocation2 + $0xcdc] sm:$0xf0] }
  0x6b   :  { %v11167_v23 = vld [vmem:[#allocation2 + $0xec0] sm:$0xf]  ;;  %v10912_v34 = vor.u32 %v14367_v22, %v10911_v20  ;;  %4794 = vmatpush.bf16.msrb.mxu1 %v10656_v29 }
  0x6c   :  { %v14431_v24 = vld [vmem:[#allocation2 + $0xedc] sm:$0xf0] }
  0x6d   :  { %v10367_v25 = vld [vmem:[#allocation2 + $0x880] sm:$0xf]  ;;  %v11168_v39 = vor.u32 %v14431_v24, %v11167_v23  ;;  %4807 = vmatpush.bf16.msrb.mxu2 %v10912_v34 }
  0x6e   :  { %v14231_v26 = vld [vmem:[#allocation2 + $0x89c] sm:$0xf0] }
  0x6f   :  { %v10623_v30 = vld [vmem:[#allocation2 + $0xa80] sm:$0xf]  ;;  %v10368_v46 = vor.u32 %v14231_v26, %v10367_v25  ;;  %4820 = vmatpush.bf16.msrb.mxu3 %v11168_v39 }
  0x70   :  { %v14295_v31 = vld [vmem:[#allocation2 + $0xa9c] sm:$0xf0] }
  0x71   :  { %v53_v38 = vld.sshfl [vmem:[#allocation1 + $0x8] sm:$0xff pattern:$0x73625140]  ;;  %v10624_v48 = vor.u32 %v14295_v31, %v10623_v30  ;;  %4782 = vmatpush.bf16.msrb.mxu0 %v10368_v46 }
  0x72   :  { %v10879_v40 = vld [vmem:[#allocation2 + $0xc80] sm:$0xf]  ;;  %60 = vst [vmem:[#allocation1] ss:$4 sm:$0xff] %v45_v27  ;;  %v15224_v43 = vpack.c.bf16 %v53_v38, %v53_v38 }
  0x73   :  { %v14359_v41 = vld [vmem:[#allocation2 + $0xc9c] sm:$0xf0]  ;;  %4795 = vmatpush.bf16.msrb.mxu1 %v10624_v48 }
  0x74   :  { %v11135_v44 = vld [vmem:[#allocation2 + $0xe80] sm:$0xf]  ;;  %v10880_v49 = vor.u32 %v14359_v41, %v10879_v40  ;;  %4746 = vmatmul.bf16.vlgmr.msra.gmra.mxu1 %v15224_v43 }
  0x75   :  { %v14423_v45 = vld [vmem:[#allocation2 + $0xe9c] sm:$0xf0] }
  0x76   :  { %v10335_v47 = vld [vmem:[#allocation2 + $0x840] sm:$0xf]  ;;  %v11136_v53 = vor.u32 %v14423_v45, %v11135_v44  ;;  %4808 = vmatpush.bf16.msrb.mxu2 %v10880_v49 }
  0x77   :  { %v14223_v50 = vld [vmem:[#allocation2 + $0x85c] sm:$0xf0] }
  0x78   :  { %v10591_v51 = vld [vmem:[#allocation2 + $0xa40] sm:$0xf]  ;;  %v10336_v59 = vor.u32 %v14223_v50, %v10335_v47  ;;  %4821 = vmatpush.bf16.msrb.mxu3 %v11136_v53 }
  0x79   :  { %v14287_v52 = vld [vmem:[#allocation2 + $0xa5c] sm:$0xf0] }
  0x7a   :  { %v10847_v54 = vld [vmem:[#allocation2 + $0xc40] sm:$0xf]  ;;  %v10592_v63 = vor.u32 %v14287_v52, %v10591_v51  ;;  %4783 = vmatpush.bf16.msrb.mxu0 %v10336_v59 }
  0x7b   :  { %v14351_v55 = vld [vmem:[#allocation2 + $0xc5c] sm:$0xf0] }
  0x7c   :  { %v44_v56 = vld [vmem:[%s17980_s0 + $0x8] sm:$0xff]  ;;  %v10848_v0 = vor.u32 %v14351_v55, %v10847_v54  ;;  %4796 = vmatpush.bf16.msrb.mxu1 %v10592_v63 }
  0x7d   :  { %v11103_v57 = vld [vmem:[#allocation2 + $0xe40] sm:$0xf]  ;;  %51 = vst [vmem:[#allocation1 + $0x20] ss:$4 sm:$0xff] %v44_v56 }
  0x7e   :  { %v14415_v58 = vld [vmem:[#allocation2 + $0xe5c] sm:$0xf0]  ;;  %4809 = vmatpush.bf16.msrb.mxu2 %v10848_v0 }
  0x7f   :  { %v10303_v60 = vld [vmem:[#allocation2 + $0x800] sm:$0xf]  ;;  %v11104_v4 = vor.u32 %v14415_v58, %v11103_v57 }
  0x80   :  { %v14215_v61 = vld [vmem:[#allocation2 + $0x81c] sm:$0xf0] }
  0x81   :  { %v10559_v62 = vld [vmem:[#allocation2 + $0xa00] sm:$0xf]  ;;  %v10304_v11 = vor.u32 %v14215_v61, %v10303_v60  ;;  %4822 = vmatpush.bf16.msrb.mxu3 %v11104_v4 }
  0x82   :  { %v14279_v1 = vld [vmem:[#allocation2 + $0xa1c] sm:$0xf0] }
  0x83   :  { %v10815_v2 = vld [vmem:[#allocation2 + $0xc00] sm:$0xf]  ;;  %v10560_v15 = vor.u32 %v14279_v1, %v10559_v62  ;;  %4784 = vmatpush.bf16.msrb.mxu0 %v10304_v11 }
  0x84   :  { %v14343_v3 = vld [vmem:[#allocation2 + $0xc1c] sm:$0xf0]  ;;  %v58_v23 = vld.sshfl [vmem:[#allocation1 + $0x30] sm:$0xff pattern:$0x73625140] }
  0x85   :  { %v11071_v5 = vld [vmem:[#allocation2 + $0xe00] sm:$0xf]  ;;  %v10816_v16 = vor.u32 %v14343_v3, %v10815_v2  ;;  %v56_v24 = vld.sshfl [vmem:[#allocation1 + $0x20] sm:$0xff pattern:$0x73625140]  ;;  %v15233_v33 = vpack.c.bf16 %v58_v23, %v58_v23  ;;  %4797 = vmatpush.bf16.msrb.mxu1 %v10560_v15 }
  0x86   :  { %v14407_v6 = vld [vmem:[#allocation2 + $0xe1c] sm:$0xf0]  ;;  %v59_v27 = vld.sshfl [vmem:[#allocation1 + $0x38] sm:$0xff pattern:$0x73625140]  ;;  %v15235_v38 = vpack.c.bf16 %v56_v24, %v56_v24 }
  0x87   :  { %v11551_v7 = vld [vmem:[#allocation2 + $0x11c0] sm:$0xf]  ;;  %v11072_v20 = vor.u32 %v14407_v6, %v11071_v5  ;;  %4810 = vmatpush.bf16.msrb.mxu2 %v10816_v16  ;;  %v15237_v39 = vpack.c.bf16 %v59_v27, %v59_v27 }
  0x88   :  { %v14527_v8 = vld [vmem:[#allocation2 + $0x11dc] sm:$0xf0]  ;;  %4785 = vmatmul.bf16.vlgmr.msrb.gmra.mxu0 %v15235_v38 }
  0x89   :  { %v11807_v9 = vld [vmem:[#allocation2 + $0x13c0] sm:$0xf]  ;;  %v11552_v21 = vor.u32 %v14527_v8, %v11551_v7  ;;  %4823 = vmatpush.bf16.msrb.mxu3 %v11072_v20 }
  0x8a   :  { %v14591_v10 = vld [vmem:[#allocation2 + $0x13dc] sm:$0xf0]  ;;  %4811 = vmatmul.bf16.vlgmr.msrb.gmra.mxu2 %v15233_v33 }
  0x8b   :  { %v12063_v12 = vld [vmem:[#allocation2 + $0x15c0] sm:$0xf]  ;;  %v11808_v25 = vor.u32 %v14591_v10, %v11807_v9  ;;  %4829 = vmatpush.bf16.msra.mxu0 %v11552_v21 }
  0x8c   :  { %v14655_v13 = vld [vmem:[#allocation2 + $0x15dc] sm:$0xf0]  ;;  %4824 = vmatmul.bf16.vlgmr.msrb.gmra.mxu3 %v15237_v39 }
  0x8d   :  { %v12319_v14 = vld [vmem:[#allocation2 + $0x17c0] sm:$0xf]  ;;  %v12064_v26 = vor.u32 %v14655_v13, %v12063_v12  ;;  %4842 = vmatpush.bf16.msra.mxu1 %v11808_v25 }
  0x8e   :  { %v14719_v17 = vld [vmem:[#allocation2 + $0x17dc] sm:$0xf0] }
  0x8f   :  { %v11519_v18 = vld [vmem:[#allocation2 + $0x1180] sm:$0xf]  ;;  %v12320_v29 = vor.u32 %v14719_v17, %v12319_v14  ;;  %4855 = vmatpush.bf16.msra.mxu2 %v12064_v26 }
  0x90   :  { %v14519_v19 = vld [vmem:[#allocation2 + $0x119c] sm:$0xf0] }
  0x91   :  { %v11775_v22 = vld [vmem:[#allocation2 + $0x1380] sm:$0xf]  ;;  %v11520_v40 = vor.u32 %v14519_v19, %v11519_v18  ;;  %4868 = vmatpush.bf16.msra.mxu3 %v12320_v29 }
  0x92   :  { %v57_v28 = vld.sshfl [vmem:[#allocation1 + $0x28] sm:$0xff pattern:$0x73625140] }
  0x93   :  { %v14583_v30 = vld [vmem:[#allocation2 + $0x139c] sm:$0xf0]  ;;  %v15239_v41 = vpack.c.bf16 %v57_v28, %v57_v28  ;;  %4830 = vmatpush.bf16.msra.mxu0 %v11520_v40 }
  0x94   :  { %v12031_v31 = vld [vmem:[#allocation2 + $0x1580] sm:$0xf]  ;;  %v11776_v44 = vor.u32 %v14583_v30, %v11775_v22 }
  0x95   :  { %v14647_v32 = vld [vmem:[#allocation2 + $0x159c] sm:$0xf0]  ;;  %4798 = vmatmul.bf16.vlgmr.msrb.gmra.mxu1 %v15239_v41 }
  0x96   :  { %v12287_v34 = vld [vmem:[#allocation2 + $0x1780] sm:$0xf]  ;;  %v12032_v45 = vor.u32 %v14647_v32, %v12031_v31  ;;  %4843 = vmatpush.bf16.msra.mxu1 %v11776_v44 }
  0x97   :  { %v14711_v37 = vld [vmem:[#allocation2 + $0x179c] sm:$0xf0] }
  0x98   :  { %v11487_v46 = vld [vmem:[#allocation2 + $0x1140] sm:$0xf]  ;;  %v12288_v49 = vor.u32 %v14711_v37, %v12287_v34  ;;  %4856 = vmatpush.bf16.msra.mxu2 %v12032_v45 }
  0x99   :  { %v14511_v47 = vld [vmem:[#allocation2 + $0x115c] sm:$0xf0] }
  0x9a   :  { %v11743_v48 = vld [vmem:[#allocation2 + $0x1340] sm:$0xf]  ;;  %v11488_v55 = vor.u32 %v14511_v47, %v11487_v46  ;;  %4869 = vmatpush.bf16.msra.mxu3 %v12288_v49 }
  0x9b   :  { %v14575_v50 = vld [vmem:[#allocation2 + $0x135c] sm:$0xf0] }
  0x9c   :  { %v11999_v51 = vld [vmem:[#allocation2 + $0x1540] sm:$0xf]  ;;  %v11744_v56 = vor.u32 %v14575_v50, %v11743_v48  ;;  %4831 = vmatpush.bf16.msra.mxu0 %v11488_v55 }
  0x9d   :  { %v14639_v52 = vld [vmem:[#allocation2 + $0x155c] sm:$0xf0] }
  0x9e   :  { %v12255_v53 = vld [vmem:[#allocation2 + $0x1740] sm:$0xf]  ;;  %v12000_v57 = vor.u32 %v14639_v52, %v11999_v51  ;;  %4844 = vmatpush.bf16.msra.mxu1 %v11744_v56 }
  0x9f   :  { %v14703_v54 = vld [vmem:[#allocation2 + $0x175c] sm:$0xf0] }
  0xa0   :  { %v11455_v58 = vld [vmem:[#allocation2 + $0x1100] sm:$0xf]  ;;  %v12256_v61 = vor.u32 %v14703_v54, %v12255_v53  ;;  %4857 = vmatpush.bf16.msra.mxu2 %v12000_v57 }
  0xa1   :  { %v14503_v59 = vld [vmem:[#allocation2 + $0x111c] sm:$0xf0] }
  0xa2   :  { %v11711_v60 = vld [vmem:[#allocation2 + $0x1300] sm:$0xf]  ;;  %v11456_v3 = vor.u32 %v14503_v59, %v11455_v58  ;;  %4870 = vmatpush.bf16.msra.mxu3 %v12256_v61  ;;  %v14011_v59 = vld [vmem:[#allocation2 + $0x1c4] sm:$0xf] }
  0xa3   :  { %v14567_v62 = vld [vmem:[#allocation2 + $0x131c] sm:$0xf0]  ;;  %v14075_v61 = vld [vmem:[#allocation2 + $0x3c4] sm:$0xf] }
  0xa4   :  { %v11967_v63 = vld [vmem:[#allocation2 + $0x1500] sm:$0xf]  ;;  %v11712_v4 = vor.u32 %v14567_v62, %v11711_v60  ;;  %4832 = vmatpush.bf16.msra.mxu0 %v11456_v3  ;;  %v9505_v60 = vld [vmem:[#allocation2 + $0x1e0] sm:$0xf0] }
  0xa5   :  { %v14631_v0 = vld [vmem:[#allocation2 + $0x151c] sm:$0xf0]  ;;  %v9761_v62 = vld [vmem:[#allocation2 + $0x3e0] sm:$0xf0] }
  0xa6   :  { %v12223_v1 = vld [vmem:[#allocation2 + $0x1700] sm:$0xf]  ;;  %v11968_v5 = vor.u32 %v14631_v0, %v11967_v63  ;;  %4845 = vmatpush.bf16.msra.mxu1 %v11712_v4  ;;  %v14139_v63 = vld [vmem:[#allocation2 + $0x5c4] sm:$0xf] }
  0xa7   :  { %v14695_v2 = vld [vmem:[#allocation2 + $0x171c] sm:$0xf0]  ;;  %v10273_v3 = vld [vmem:[#allocation2 + $0x7e0] sm:$0xf0] }
  0xa8   :  { %v11423_v6 = vld [vmem:[#allocation2 + $0x10c0] sm:$0xf]  ;;  %v12224_v9 = vor.u32 %v14695_v2, %v12223_v1  ;;  %4858 = vmatpush.bf16.msra.mxu2 %v11968_v5  ;;  %v10017_v1 = vld [vmem:[#allocation2 + $0x5e0] sm:$0xf0] }
  0xa9   :  { %v14495_v7 = vld [vmem:[#allocation2 + $0x10dc] sm:$0xf0]  ;;  %v14203_v2 = vld [vmem:[#allocation2 + $0x7c4] sm:$0xf] }
  0xaa   :  { %v11679_v8 = vld [vmem:[#allocation2 + $0x12c0] sm:$0xf]  ;;  %v11424_v15 = vor.u32 %v14495_v7, %v11423_v6  ;;  %4871 = vmatpush.bf16.msra.mxu3 %v12224_v9  ;;  %v61_v6 = vld.sshfl [vmem:[#allocation1] sm:$0xff pattern:$0x73625140]  ;;  %v9508_v9 = vor.u32 %v14011_v59, %v9505_v60 }
  0xab   :  { %v14559_v10 = vld [vmem:[#allocation2 + $0x12dc] sm:$0xf0]  ;;  %v63_v7 = vld.sshfl [vmem:[#allocation1 + $0x10] sm:$0xff pattern:$0x73625140] }
  0xac   :  { %v11935_v11 = vld [vmem:[#allocation2 + $0x14c0] sm:$0xf]  ;;  %v11680_v16 = vor.u32 %v14559_v10, %v11679_v8  ;;  %4833 = vmatpush.bf16.msra.mxu0 %v11424_v15  ;;  %v9473_v15 = vld [vmem:[#allocation2 + $0x1a0] sm:$0xf0] }
  0xad   :  { %v14623_v12 = vld [vmem:[#allocation2 + $0x14dc] sm:$0xf0] }
  0xae   :  { %v12191_v13 = vld [vmem:[#allocation2 + $0x16c0] sm:$0xf]  ;;  %v11936_v17 = vor.u32 %v14623_v12, %v11935_v11  ;;  %4846 = vmatpush.bf16.msra.mxu1 %v11680_v16  ;;  %v64_v11 = vld.sshfl [vmem:[#allocation1 + $0x18] sm:$0xff pattern:$0x73625140]  ;;  %v9764_v12 = vor.u32 %v14075_v61, %v9761_v62 }
  0xaf   :  { %v14687_v14 = vld [vmem:[#allocation2 + $0x16dc] sm:$0xf0]  ;;  %v14067_v16 = vld [vmem:[#allocation2 + $0x384] sm:$0xf] }
  0xb0   :  { %v11391_v18 = vld [vmem:[#allocation2 + $0x1080] sm:$0xf]  ;;  %v12192_v21 = vor.u32 %v14687_v14, %v12191_v13  ;;  %4859 = vmatpush.bf16.msra.mxu2 %v11936_v17  ;;  %v10020_v13 = vor.u32 %v14139_v63, %v10017_v1  ;;  %v14003_v14 = vld [vmem:[#allocation2 + $0x184] sm:$0xf]  ;;  %v10276_v17 = vor.u32 %v14203_v2, %v10273_v3 }
  0xb1   :  { %v14487_v19 = vld [vmem:[#allocation2 + $0x109c] sm:$0xf0]  ;;  %v13979_v62 = vld [vmem:[#allocation2 + $0xc4] sm:$0xf] }
  0xb2   :  { %v11647_v20 = vld [vmem:[#allocation2 + $0x1280] sm:$0xf]  ;;  %v11392_v27 = vor.u32 %v14487_v19, %v11391_v18  ;;  %4872 = vmatpush.bf16.msra.mxu3 %v12192_v21  ;;  %v15245_v18 = vpack.c.bf16 %v61_v6, %v61_v6  ;;  %v9729_v19 = vld [vmem:[#allocation2 + $0x3a0] sm:$0xf0] }
  0xb3   :  { %v14551_v22 = vld [vmem:[#allocation2 + $0x129c] sm:$0xf0]  ;;  %v9985_v21 = vld [vmem:[#allocation2 + $0x5a0] sm:$0xf0] }
  0xb4   :  { %v11903_v23 = vld [vmem:[#allocation2 + $0x1480] sm:$0xf]  ;;  %v11648_v28 = vor.u32 %v14551_v22, %v11647_v20  ;;  %4834 = vmatpush.bf16.msra.mxu0 %v11392_v27  ;;  %v14131_v20 = vld [vmem:[#allocation2 + $0x584] sm:$0xf]  ;;  %v15247_v22 = vpack.c.bf16 %v63_v7, %v63_v7  ;;  %v9476_v27 = vor.u32 %v14003_v14, %v9473_v15 }
  0xb5   :  { %v14615_v24 = vld [vmem:[#allocation2 + $0x149c] sm:$0xf0]  ;;  %v9377_v63 = vld [vmem:[#allocation2 + $0xe0] sm:$0xf0] }
  0xb6   :  { %v12159_v25 = vld [vmem:[#allocation2 + $0x1680] sm:$0xf]  ;;  %v11904_v29 = vor.u32 %v14615_v24, %v11903_v23  ;;  %4847 = vmatpush.bf16.msra.mxu1 %v11648_v28  ;;  %v14195_v24 = vld [vmem:[#allocation2 + $0x784] sm:$0xf]  ;;  %v9732_v28 = vor.u32 %v14067_v16, %v9729_v19  ;;  %v9380_v7 = vor.u32 %v13979_v62, %v9377_v63 }
  0xb7   :  { %v14679_v26 = vld [vmem:[#allocation2 + $0x169c] sm:$0xf0]  ;;  %v9633_v2 = vld [vmem:[#allocation2 + $0x2e0] sm:$0xf0] }
  0xb8   :  { %v11359_v30 = vld [vmem:[#allocation2 + $0x1040] sm:$0xf]  ;;  %v12160_v34 = vor.u32 %v14679_v26, %v12159_v25  ;;  %4860 = vmatpush.bf16.msra.mxu2 %v11904_v29  ;;  %v10241_v25 = vld [vmem:[#allocation2 + $0x7a0] sm:$0xf0]  ;;  %v15251_v26 = vpack.c.bf16 %v64_v11, %v64_v11  ;;  %v9988_v29 = vor.u32 %v14131_v20, %v9985_v21 }
  0xb9   :  { %v14479_v31 = vld [vmem:[#allocation2 + $0x105c] sm:$0xf0]  ;;  %v14107_v3 = vld [vmem:[#allocation2 + $0x4c4] sm:$0xf] }
  0xba   :  { %v11615_v32 = vld [vmem:[#allocation2 + $0x1240] sm:$0xf]  ;;  %v11360_v48 = vor.u32 %v14479_v31, %v11359_v30  ;;  %4873 = vmatpush.bf16.msra.mxu3 %v12160_v34  ;;  %v13995_v30 = vld [vmem:[#allocation2 + $0x144] sm:$0xf]  ;;  %v10244_v34 = vor.u32 %v14195_v24, %v10241_v25 }
  0xbb   :  { %v14543_v37 = vld [vmem:[#allocation2 + $0x125c] sm:$0xf0]  ;;  %v9441_v31 = vld [vmem:[#allocation2 + $0x160] sm:$0xf0] }
  0xbc   :  { %v11871_v40 = vld [vmem:[#allocation2 + $0x1440] sm:$0xf]  ;;  %v11616_v52 = vor.u32 %v14543_v37, %v11615_v32  ;;  %4835 = vmatpush.bf16.msra.mxu0 %v11360_v48  ;;  %v14059_v32 = vld [vmem:[#allocation2 + $0x344] sm:$0xf] }
  0xbd   :  { %v14607_v44 = vld [vmem:[#allocation2 + $0x145c] sm:$0xf0]  ;;  %v9697_v37 = vld [vmem:[#allocation2 + $0x360] sm:$0xf0] }
  0xbe   :  { %v12127_v45 = vld [vmem:[#allocation2 + $0x1640] sm:$0xf]  ;;  %v11872_v53 = vor.u32 %v14607_v44, %v11871_v40  ;;  %4848 = vmatpush.bf16.msra.mxu1 %v11616_v52  ;;  %v14123_v40 = vld [vmem:[#allocation2 + $0x544] sm:$0xf]  ;;  %v9700_v48 = vor.u32 %v14059_v32, %v9697_v37 }
  0xbf   :  { %v14671_v46 = vld [vmem:[#allocation2 + $0x165c] sm:$0xf0]  ;;  %v9953_v44 = vld [vmem:[#allocation2 + $0x560] sm:$0xf0] }
  0xc0   :  { %v11327_v47 = vld [vmem:[#allocation2 + $0x1000] sm:$0xf]  ;;  %v12128_v57 = vor.u32 %v14671_v46, %v12127_v45  ;;  %4861 = vmatpush.bf16.msra.mxu2 %v11872_v53  ;;  %v14187_v45 = vld [vmem:[#allocation2 + $0x744] sm:$0xf] }
  0xc1   :  { %v14471_v49 = vld [vmem:[#allocation2 + $0x101c] sm:$0xf0]  ;;  %v10209_v46 = vld [vmem:[#allocation2 + $0x760] sm:$0xf0] }
  0xc2   :  { %v11583_v50 = vld [vmem:[#allocation2 + $0x1200] sm:$0xf]  ;;  %v11328_v0 = vor.u32 %v14471_v49, %v11327_v47  ;;  %4874 = vmatpush.bf16.msra.mxu3 %v12128_v57  ;;  %v9444_v47 = vor.u32 %v13995_v30, %v9441_v31  ;;  %v9956_v49 = vor.u32 %v14123_v40, %v9953_v44  ;;  %v14051_v52 = vld [vmem:[#allocation2 + $0x304] sm:$0xf]  ;;  %v10212_v53 = vor.u32 %v14187_v45, %v10209_v46 }
  0xc3   :  { %v14535_v51 = vld [vmem:[#allocation2 + $0x121c] sm:$0xf0]  ;;  %v14179_v57 = vld [vmem:[#allocation2 + $0x704] sm:$0xf] }
  0xc4   :  { %v11839_v54 = vld [vmem:[#allocation2 + $0x1400] sm:$0xf]  ;;  %v11584_v4 = vor.u32 %v14535_v51, %v11583_v50  ;;  %4836 = vmatpush.bf16.msra.mxu0 %v11328_v0  ;;  %v13987_v50 = vld [vmem:[#allocation2 + $0x104] sm:$0xf] }
  0xc5   :  { %v14599_v55 = vld [vmem:[#allocation2 + $0x141c] sm:$0xf0]  ;;  %v9409_v51 = vld [vmem:[#allocation2 + $0x120] sm:$0xf0] }
  0xc6   :  { %v12095_v56 = vld [vmem:[#allocation2 + $0x1600] sm:$0xf]  ;;  %v11840_v5 = vor.u32 %v14599_v55, %v11839_v54  ;;  %4849 = vmatpush.bf16.msra.mxu1 %v11584_v4  ;;  %v9665_v54 = vld [vmem:[#allocation2 + $0x320] sm:$0xf0]  ;;  %v9412_v59 = vor.u32 %v13987_v50, %v9409_v51 }
  0xc7   :  { %v14663_v58 = vld [vmem:[#allocation2 + $0x161c] sm:$0xf0]  ;;  %4837 = vmatmul.bf16.vlgmr.msra.gmra.mxu0 %v15245_v18  ;;  %v14115_v55 = vld [vmem:[#allocation2 + $0x504] sm:$0xf]  ;;  %v9668_v60 = vor.u32 %v14051_v52, %v9665_v54 }
  0xc8   :  { %v12096_v8 = vor.u32 %v14663_v58, %v12095_v56  ;;  %v62_v10 = vld.sshfl [vmem:[#allocation1 + $0x8] sm:$0xff pattern:$0x73625140]  ;;  %4862 = vmatpush.bf16.msra.mxu2 %v11840_v5  ;;  %4881 = vmatpush.bf16.msrb.mxu0 %v9508_v9 }
  0xc9   :  { %v15249_v23 = vpack.c.bf16 %v62_v10, %v62_v10  ;;  %v9921_v56 = vld [vmem:[#allocation2 + $0x520] sm:$0xf0] }
  0xca   :  { %4875 = vmatpush.bf16.msra.mxu3 %v12096_v8  ;;  %4894 = vmatpush.bf16.msrb.mxu1 %v9764_v12  ;;  %v10177_v58 = vld [vmem:[#allocation2 + $0x720] sm:$0xf0]  ;;  %v9924_v61 = vor.u32 %v14115_v55, %v9921_v56 }
  0xcb   :  { %4863 = vmatmul.bf16.vlgmr.msra.gmra.mxu2 %v15247_v22  ;;  %4850 = vmatmul.bf16.vlgmr.msra.gmra.mxu1 %v15249_v23  ;;  %v14043_v0 = vld [vmem:[#allocation2 + $0x2c4] sm:$0xf]  ;;  %v10180_v1 = vor.u32 %v14179_v57, %v10177_v58 }
  0xcc   :  { %4907 = vmatpush.bf16.msrb.mxu2 %v10020_v13  ;;  %4882 = vmatpush.bf16.msrb.mxu0 %v9476_v27  ;;  %v9889_v4 = vld [vmem:[#allocation2 + $0x4e0] sm:$0xf0]  ;;  %v9636_v8 = vor.u32 %v14043_v0, %v9633_v2 }
  0xcd   :  { %4876 = vmatmul.bf16.vlgmr.msra.gmra.mxu3 %v15251_v26  ;;  %v14171_v5 = vld [vmem:[#allocation2 + $0x6c4] sm:$0xf]  ;;  %v9892_v9 = vor.u32 %v14107_v3, %v9889_v4 }
  0xce   :  { %4920 = vmatpush.bf16.msrb.mxu3 %v10276_v17  ;;  %4895 = vmatpush.bf16.msrb.mxu1 %v9732_v28  ;;  %v10145_v6 = vld [vmem:[#allocation2 + $0x6e0] sm:$0xf0] }
  0xcf   :  { %v13971_v10 = vld [vmem:[#allocation2 + $0x84] sm:$0xf]  ;;  %v10148_v13 = vor.u32 %v14171_v5, %v10145_v6 }
  0xd0   :  { %4908 = vmatpush.bf16.msrb.mxu2 %v9988_v29  ;;  %4883 = vmatpush.bf16.msrb.mxu0 %v9444_v47  ;;  %v9345_v11 = vld [vmem:[#allocation2 + $0xa0] sm:$0xf0] }
  0xd1   :  { %v14035_v12 = vld [vmem:[#allocation2 + $0x284] sm:$0xf]  ;;  %v9348_v20 = vor.u32 %v13971_v10, %v9345_v11 }
  0xd2   :  { %4921 = vmatpush.bf16.msrb.mxu3 %v10244_v34  ;;  %4896 = vmatpush.bf16.msrb.mxu1 %v9700_v48  ;;  %v9601_v14 = vld [vmem:[#allocation2 + $0x2a0] sm:$0xf0] }
  0xd3   :  { %v14099_v15 = vld [vmem:[#allocation2 + $0x484] sm:$0xf]  ;;  %v9604_v21 = vor.u32 %v14035_v12, %v9601_v14 }
  0xd4   :  { %4909 = vmatpush.bf16.msrb.mxu2 %v9956_v49  ;;  %4884 = vmatpush.bf16.msrb.mxu0 %v9412_v59  ;;  %v9857_v16 = vld [vmem:[#allocation2 + $0x4a0] sm:$0xf0] }
  0xd5   :  { %v14163_v17 = vld [vmem:[#allocation2 + $0x684] sm:$0xf]  ;;  %v9860_v24 = vor.u32 %v14099_v15, %v9857_v16 }
  0xd6   :  { %4922 = vmatpush.bf16.msrb.mxu3 %v10212_v53  ;;  %4897 = vmatpush.bf16.msrb.mxu1 %v9668_v60  ;;  %v10113_v19 = vld [vmem:[#allocation2 + $0x6a0] sm:$0xf0] }
  0xd7   :  { %v13963_v25 = vld [vmem:[#allocation2 + $0x44] sm:$0xf]  ;;  %v10116_v29 = vor.u32 %v14163_v17, %v10113_v19 }
  0xd8   :  { %4910 = vmatpush.bf16.msrb.mxu2 %v9924_v61  ;;  %4885 = vmatpush.bf16.msrb.mxu0 %v9380_v7  ;;  %v9313_v27 = vld [vmem:[#allocation2 + $0x60] sm:$0xf0] }
  0xd9   :  { %v14027_v28 = vld [vmem:[#allocation2 + $0x244] sm:$0xf]  ;;  %v9316_v40 = vor.u32 %v13963_v25, %v9313_v27 }
  0xda   :  { %4923 = vmatpush.bf16.msrb.mxu3 %v10180_v1  ;;  %4898 = vmatpush.bf16.msrb.mxu1 %v9636_v8  ;;  %v9569_v30 = vld [vmem:[#allocation2 + $0x260] sm:$0xf0] }
  0xdb   :  { %v14091_v31 = vld [vmem:[#allocation2 + $0x444] sm:$0xf]  ;;  %v9572_v46 = vor.u32 %v14027_v28, %v9569_v30 }
  0xdc   :  { %4911 = vmatpush.bf16.msrb.mxu2 %v9892_v9  ;;  %v9825_v32 = vld [vmem:[#allocation2 + $0x460] sm:$0xf0]  ;;  %4886 = vmatpush.bf16.msrb.mxu0 %v9348_v20 }
  0xdd   :  { %v14155_v34 = vld [vmem:[#allocation2 + $0x644] sm:$0xf]  ;;  %v9828_v47 = vor.u32 %v14091_v31, %v9825_v32 }
  0xde   :  { %4924 = vmatpush.bf16.msrb.mxu3 %v10148_v13  ;;  %v10081_v37 = vld [vmem:[#allocation2 + $0x660] sm:$0xf0]  ;;  %4899 = vmatpush.bf16.msrb.mxu1 %v9604_v21 }
  0xdf   :  { %v13955_v44 = vld [vmem:[#allocation2 + $0x4] sm:$0xf]  ;;  %v10084_v51 = vor.u32 %v14155_v34, %v10081_v37 }
  0xe0   :  { %v9281_v45 = vld [vmem:[#allocation2 + $0x20] sm:$0xf0]  ;;  %4912 = vmatpush.bf16.msrb.mxu2 %v9860_v24  ;;  %4887 = vmatpush.bf16.msrb.mxu0 %v9316_v40 }
  0xe1   :  { %v14019_v48 = vld [vmem:[#allocation2 + $0x204] sm:$0xf]  ;;  %v9284_v58 = vor.u32 %v13955_v44, %v9281_v45 }
  0xe2   :  { %v9537_v49 = vld [vmem:[#allocation2 + $0x220] sm:$0xf0]  ;;  %4925 = vmatpush.bf16.msrb.mxu3 %v10116_v29  ;;  %4900 = vmatpush.bf16.msrb.mxu1 %v9572_v46 }
  0xe3   :  { %v14083_v50 = vld [vmem:[#allocation2 + $0x404] sm:$0xf]  ;;  %v9540_v62 = vor.u32 %v14019_v48, %v9537_v49 }
  0xe4   :  { %v9793_v52 = vld [vmem:[#allocation2 + $0x420] sm:$0xf0]  ;;  %4913 = vmatpush.bf16.msrb.mxu2 %v9828_v47  ;;  %4888 = vmatpush.bf16.msrb.mxu0 %v9284_v58 }
  0xe5   :  { %v14147_v53 = vld [vmem:[#allocation2 + $0x604] sm:$0xf]  ;;  %v9796_v63 = vor.u32 %v14083_v50, %v9793_v52 }
  0xe6   :  { %v10049_v54 = vld [vmem:[#allocation2 + $0x620] sm:$0xf0]  ;;  %4926 = vmatpush.bf16.msrb.mxu3 %v10084_v51  ;;  %4901 = vmatpush.bf16.msrb.mxu1 %v9540_v62 }
  0xe7   :  { %v14267_v55 = vld [vmem:[#allocation2 + $0x9c4] sm:$0xf]  ;;  %v10052_v2 = vor.u32 %v14147_v53, %v10049_v54  ;;  %4889 = vmatmul.bf16.vlgmr.msrb.gmra.mxu0 %v15220_v36 }
  0xe8   :  { %v10529_v56 = vld [vmem:[#allocation2 + $0x9e0] sm:$0xf0]  ;;  %4914 = vmatpush.bf16.msrb.mxu2 %v9796_v63 }
  0xe9   :  { %v14331_v57 = vld [vmem:[#allocation2 + $0xbc4] sm:$0xf]  ;;  %v10532_v3 = vor.u32 %v14267_v55, %v10529_v56  ;;  %4902 = vmatmul.bf16.vlgmr.msrb.gmra.mxu1 %v15224_v43 }
  0xea   :  { %v10785_v59 = vld [vmem:[#allocation2 + $0xbe0] sm:$0xf0]  ;;  %4927 = vmatpush.bf16.msrb.mxu3 %v10052_v2 }
  0xeb   :  { %v14395_v60 = vld [vmem:[#allocation2 + $0xdc4] sm:$0xf]  ;;  %v10788_v4 = vor.u32 %v14331_v57, %v10785_v59  ;;  %4933 = vmatpush.bf16.msra.mxu0 %v10532_v3  ;;  %4915 = vmatmul.bf16.vlgmr.msrb.gmra.mxu2 %v15218_v35 }
  0xec   :  { %v11041_v61 = vld [vmem:[#allocation2 + $0xde0] sm:$0xf0] }
  0xed   :  { %v14459_v0 = vld [vmem:[#allocation2 + $0xfc4] sm:$0xf]  ;;  %v11044_v5 = vor.u32 %v14395_v60, %v11041_v61  ;;  %4946 = vmatpush.bf16.msra.mxu1 %v10788_v4  ;;  %4928 = vmatmul.bf16.vlgmr.msrb.gmra.mxu3 %v15222_v42 }
  0xee   :  { %v11297_v1 = vld [vmem:[#allocation2 + $0xfe0] sm:$0xf0] }
  0xef   :  { %v14259_v6 = vld [vmem:[#allocation2 + $0x984] sm:$0xf]  ;;  %v11300_v9 = vor.u32 %v14459_v0, %v11297_v1  ;;  %4959 = vmatpush.bf16.msra.mxu2 %v11044_v5 }
  0xf0   :  { %v10497_v7 = vld [vmem:[#allocation2 + $0x9a0] sm:$0xf0] }
  0xf1   :  { %v14323_v8 = vld [vmem:[#allocation2 + $0xb84] sm:$0xf]  ;;  %v10500_v15 = vor.u32 %v14259_v6, %v10497_v7  ;;  %4972 = vmatpush.bf16.msra.mxu3 %v11300_v9 }
  0xf2   :  { %v10753_v10 = vld [vmem:[#allocation2 + $0xba0] sm:$0xf0] }
  0xf3   :  { %v14387_v11 = vld [vmem:[#allocation2 + $0xd84] sm:$0xf]  ;;  %v10756_v16 = vor.u32 %v14323_v8, %v10753_v10  ;;  %4934 = vmatpush.bf16.msra.mxu0 %v10500_v15 }
  0xf4   :  { %v11009_v12 = vld [vmem:[#allocation2 + $0xda0] sm:$0xf0] }
  0xf5   :  { %v14451_v13 = vld [vmem:[#allocation2 + $0xf84] sm:$0xf]  ;;  %v11012_v17 = vor.u32 %v14387_v11, %v11009_v12  ;;  %4947 = vmatpush.bf16.msra.mxu1 %v10756_v16 }
  0xf6   :  { %v11265_v14 = vld [vmem:[#allocation2 + $0xfa0] sm:$0xf0] }
  0xf7   :  { %v14251_v19 = vld [vmem:[#allocation2 + $0x944] sm:$0xf]  ;;  %v11268_v24 = vor.u32 %v14451_v13, %v11265_v14  ;;  %4960 = vmatpush.bf16.msra.mxu2 %v11012_v17 }
  0xf8   :  { %v10465_v20 = vld [vmem:[#allocation2 + $0x960] sm:$0xf0] }
  0xf9   :  { %v14315_v21 = vld [vmem:[#allocation2 + $0xb44] sm:$0xf]  ;;  %v10468_v31 = vor.u32 %v14251_v19, %v10465_v20  ;;  %4973 = vmatpush.bf16.msra.mxu3 %v11268_v24 }
  0xfa   :  { %v10721_v25 = vld [vmem:[#allocation2 + $0xb60] sm:$0xf0] }
  0xfb   :  { %v14379_v27 = vld [vmem:[#allocation2 + $0xd44] sm:$0xf]  ;;  %v10724_v32 = vor.u32 %v14315_v21, %v10721_v25  ;;  %4935 = vmatpush.bf16.msra.mxu0 %v10468_v31 }
  0xfc   :  { %v10977_v28 = vld [vmem:[#allocation2 + $0xd60] sm:$0xf0] }
  0xfd   :  { %v14443_v29 = vld [vmem:[#allocation2 + $0xf44] sm:$0xf]  ;;  %v10980_v34 = vor.u32 %v14379_v27, %v10977_v28  ;;  %4948 = vmatpush.bf16.msra.mxu1 %v10724_v32 }
  0xfe   :  { %v11233_v30 = vld [vmem:[#allocation2 + $0xf60] sm:$0xf0] }
  0xff   :  { %v14243_v37 = vld [vmem:[#allocation2 + $0x904] sm:$0xf]  ;;  %v11236_v45 = vor.u32 %v14443_v29, %v11233_v30  ;;  %4961 = vmatpush.bf16.msra.mxu2 %v10980_v34 }
 0x100   :  { %v10433_v40 = vld [vmem:[#allocation2 + $0x920] sm:$0xf0] }
 0x101   :  { %v14307_v44 = vld [vmem:[#allocation2 + $0xb04] sm:$0xf]  ;;  %v10436_v51 = vor.u32 %v14243_v37, %v10433_v40  ;;  %4974 = vmatpush.bf16.msra.mxu3 %v11236_v45 }
 0x102   :  { %v10689_v46 = vld [vmem:[#allocation2 + $0xb20] sm:$0xf0] }
 0x103   :  { %v14371_v47 = vld [vmem:[#allocation2 + $0xd04] sm:$0xf]  ;;  %v10692_v52 = vor.u32 %v14307_v44, %v10689_v46  ;;  %4936 = vmatpush.bf16.msra.mxu0 %v10436_v51 }
 0x104   :  { %v10945_v48 = vld [vmem:[#allocation2 + $0xd20] sm:$0xf0] }
 0x105   :  { %v14435_v49 = vld [vmem:[#allocation2 + $0xf04] sm:$0xf]  ;;  %v10948_v53 = vor.u32 %v14371_v47, %v10945_v48  ;;  %4949 = vmatpush.bf16.msra.mxu1 %v10692_v52 }
 0x106   :  { %v11201_v50 = vld [vmem:[#allocation2 + $0xf20] sm:$0xf0] }
 0x107   :  { %v14235_v54 = vld [vmem:[#allocation2 + $0x8c4] sm:$0xf]  ;;  %v11204_v57 = vor.u32 %v14435_v49, %v11201_v50  ;;  %4962 = vmatpush.bf16.msra.mxu2 %v10948_v53 }
 0x108   :  { %v10401_v55 = vld [vmem:[#allocation2 + $0x8e0] sm:$0xf0] }
 0x109   :  { %v14299_v56 = vld [vmem:[#allocation2 + $0xac4] sm:$0xf]  ;;  %v10404_v63 = vor.u32 %v14235_v54, %v10401_v55  ;;  %4975 = vmatpush.bf16.msra.mxu3 %v11204_v57 }
 0x10a   :  { %v10657_v58 = vld [vmem:[#allocation2 + $0xae0] sm:$0xf0] }
 0x10b   :  { %v14363_v59 = vld [vmem:[#allocation2 + $0xcc4] sm:$0xf]  ;;  %v10660_v0 = vor.u32 %v14299_v56, %v10657_v58  ;;  %4937 = vmatpush.bf16.msra.mxu0 %v10404_v63 }
 0x10c   :  { %v10913_v60 = vld [vmem:[#allocation2 + $0xce0] sm:$0xf0] }
 0x10d   :  { %v14427_v61 = vld [vmem:[#allocation2 + $0xec4] sm:$0xf]  ;;  %v10916_v1 = vor.u32 %v14363_v59, %v10913_v60  ;;  %4950 = vmatpush.bf16.msra.mxu1 %v10660_v0 }
 0x10e   :  { %v11169_v62 = vld [vmem:[#allocation2 + $0xee0] sm:$0xf0] }
 0x10f   :  { %v14227_v2 = vld [vmem:[#allocation2 + $0x884] sm:$0xf]  ;;  %v11172_v5 = vor.u32 %v14427_v61, %v11169_v62  ;;  %4963 = vmatpush.bf16.msra.mxu2 %v10916_v1 }
 0x110   :  { %v10369_v3 = vld [vmem:[#allocation2 + $0x8a0] sm:$0xf0] }
 0x111   :  { %v14291_v4 = vld [vmem:[#allocation2 + $0xa84] sm:$0xf]  ;;  %v10372_v11 = vor.u32 %v14227_v2, %v10369_v3  ;;  %4976 = vmatpush.bf16.msra.mxu3 %v11172_v5 }
 0x112   :  { %v10625_v6 = vld [vmem:[#allocation2 + $0xaa0] sm:$0xf0] }
 0x113   :  { %v14355_v7 = vld [vmem:[#allocation2 + $0xc84] sm:$0xf]  ;;  %v10628_v12 = vor.u32 %v14291_v4, %v10625_v6  ;;  %4938 = vmatpush.bf16.msra.mxu0 %v10372_v11 }
 0x114   :  { %v10881_v8 = vld [vmem:[#allocation2 + $0xca0] sm:$0xf0] }
 0x115   :  { %v14419_v9 = vld [vmem:[#allocation2 + $0xe84] sm:$0xf]  ;;  %v10884_v13 = vor.u32 %v14355_v7, %v10881_v8  ;;  %4951 = vmatpush.bf16.msra.mxu1 %v10628_v12 }
 0x116   :  { %v11137_v10 = vld [vmem:[#allocation2 + $0xea0] sm:$0xf0] }
 0x117   :  { %v14219_v14 = vld [vmem:[#allocation2 + $0x844] sm:$0xf]  ;;  %v11140_v17 = vor.u32 %v14419_v9, %v11137_v10  ;;  %4964 = vmatpush.bf16.msra.mxu2 %v10884_v13 }
 0x118   :  { %v10337_v15 = vld [vmem:[#allocation2 + $0x860] sm:$0xf0] }
 0x119   :  { %v14283_v16 = vld [vmem:[#allocation2 + $0xa44] sm:$0xf]  ;;  %v10340_v27 = vor.u32 %v14219_v14, %v10337_v15  ;;  %4977 = vmatpush.bf16.msra.mxu3 %v11140_v17 }
 0x11a   :  { %v10593_v19 = vld [vmem:[#allocation2 + $0xa60] sm:$0xf0] }
 0x11b   :  { %v14347_v20 = vld [vmem:[#allocation2 + $0xc44] sm:$0xf]  ;;  %v10596_v30 = vor.u32 %v14283_v16, %v10593_v19  ;;  %4939 = vmatpush.bf16.msra.mxu0 %v10340_v27 }
 0x11c   :  { %v10849_v21 = vld [vmem:[#allocation2 + $0xc60] sm:$0xf0] }
 0x11d   :  { %v14411_v24 = vld [vmem:[#allocation2 + $0xe44] sm:$0xf]  ;;  %v10852_v31 = vor.u32 %v14347_v20, %v10849_v21  ;;  %4952 = vmatpush.bf16.msra.mxu1 %v10596_v30 }
 0x11e   :  { %v11105_v25 = vld [vmem:[#allocation2 + $0xe60] sm:$0xf0] }
 0x11f   :  { %v14211_v28 = vld [vmem:[#allocation2 + $0x804] sm:$0xf]  ;;  %v11108_v40 = vor.u32 %v14411_v24, %v11105_v25  ;;  %4965 = vmatpush.bf16.msra.mxu2 %v10852_v31 }
 0x120   :  { %v10305_v29 = vld [vmem:[#allocation2 + $0x820] sm:$0xf0] }
 0x121   :  { %v14275_v32 = vld [vmem:[#allocation2 + $0xa04] sm:$0xf]  ;;  %v10308_v50 = vor.u32 %v14211_v28, %v10305_v29  ;;  %4978 = vmatpush.bf16.msra.mxu3 %v11108_v40 }
 0x122   :  { %v10561_v34 = vld [vmem:[#allocation2 + $0xa20] sm:$0xf0] }
 0x123   :  { %v14339_v37 = vld [vmem:[#allocation2 + $0xc04] sm:$0xf]  ;;  %v10564_v54 = vor.u32 %v14275_v32, %v10561_v34  ;;  %4940 = vmatpush.bf16.msra.mxu0 %v10308_v50 }
 0x124   :  { %v10817_v44 = vld [vmem:[#allocation2 + $0xc20] sm:$0xf0] }
 0x125   :  { %v14403_v45 = vld [vmem:[#allocation2 + $0xe04] sm:$0xf]  ;;  %v10820_v55 = vor.u32 %v14339_v37, %v10817_v44  ;;  %4953 = vmatpush.bf16.msra.mxu1 %v10564_v54 }
 0x126   :  { %v11073_v46 = vld [vmem:[#allocation2 + $0xe20] sm:$0xf0]  ;;  %4941 = vmatmul.bf16.vlgmr.msra.gmra.mxu0 %v15235_v38 }
 0x127   :  { %v14523_v47 = vld [vmem:[#allocation2 + $0x11c4] sm:$0xf]  ;;  %v11076_v58 = vor.u32 %v14403_v45, %v11073_v46  ;;  %4966 = vmatpush.bf16.msra.mxu2 %v10820_v55 }
 0x128   :  { %v11553_v48 = vld [vmem:[#allocation2 + $0x11e0] sm:$0xf0]  ;;  %4954 = vmatmul.bf16.vlgmr.msra.gmra.mxu1 %v15239_v41 }
 0x129   :  { %v14587_v49 = vld [vmem:[#allocation2 + $0x13c4] sm:$0xf]  ;;  %v11556_v59 = vor.u32 %v14523_v47, %v11553_v48  ;;  %4979 = vmatpush.bf16.msra.mxu3 %v11076_v58 }
 0x12a   :  { %v11809_v51 = vld [vmem:[#allocation2 + $0x13e0] sm:$0xf0]  ;;  %4967 = vmatmul.bf16.vlgmr.msra.gmra.mxu2 %v15233_v33 }
 0x12b   :  { %v14651_v52 = vld [vmem:[#allocation2 + $0x15c4] sm:$0xf]  ;;  %v11812_v60 = vor.u32 %v14587_v49, %v11809_v51  ;;  %4985 = vmatpush.bf16.msrb.mxu0 %v11556_v59 }
 0x12c   :  { %v12065_v53 = vld [vmem:[#allocation2 + $0x15e0] sm:$0xf0]  ;;  %4980 = vmatmul.bf16.vlgmr.msra.gmra.mxu3 %v15237_v39 }
 0x12d   :  { %v14715_v56 = vld [vmem:[#allocation2 + $0x17c4] sm:$0xf]  ;;  %v12068_v61 = vor.u32 %v14651_v52, %v12065_v53  ;;  %4998 = vmatpush.bf16.msrb.mxu1 %v11812_v60  ;;  %v15268_v53 = vld [vmem:[%s17985_s5] sm:$0xff] }
 0x12e   :  { %v12321_v57 = vld [vmem:[#allocation2 + $0x17e0] sm:$0xf0] }
 0x12f   :  { %v14515_v62 = vld [vmem:[#allocation2 + $0x1184] sm:$0xf]  ;;  %v12324_v1 = vor.u32 %v14715_v56, %v12321_v57  ;;  %5011 = vmatpush.bf16.msrb.mxu2 %v12068_v61 }
 0x130   :  { %v11521_v63 = vld [vmem:[#allocation2 + $0x11a0] sm:$0xf0] }
 0x131   :  { %v14579_v0 = vld [vmem:[#allocation2 + $0x1384] sm:$0xf]  ;;  %v11524_v7 = vor.u32 %v14515_v62, %v11521_v63  ;;  %5024 = vmatpush.bf16.msrb.mxu3 %v12324_v1  ;;  %v861_v62 = vperm.slane %v15268_v53, 0 }
 0x132   :  { %v11777_v2 = vld [vmem:[#allocation2 + $0x13a0] sm:$0xf0] }
 0x133   :  { %v14643_v3 = vld [vmem:[#allocation2 + $0x1584] sm:$0xf]  ;;  %v11780_v8 = vor.u32 %v14579_v0, %v11777_v2  ;;  %4986 = vmatpush.bf16.msrb.mxu0 %v11524_v7 }
 0x134   :  { %v12033_v4 = vld [vmem:[#allocation2 + $0x15a0] sm:$0xf0] }
 0x135   :  { %v14707_v5 = vld [vmem:[#allocation2 + $0x1784] sm:$0xf]  ;;  %v12036_v9 = vor.u32 %v14643_v3, %v12033_v4  ;;  %4999 = vmatpush.bf16.msrb.mxu1 %v11780_v8 }
 0x136   :  { %v12289_v6 = vld [vmem:[#allocation2 + $0x17a0] sm:$0xf0] }
 0x137   :  { %v14507_v10 = vld [vmem:[#allocation2 + $0x1144] sm:$0xf]  ;;  %v12292_v13 = vor.u32 %v14707_v5, %v12289_v6  ;;  %5012 = vmatpush.bf16.msrb.mxu2 %v12036_v9 }
 0x138   :  { %v11489_v11 = vld [vmem:[#allocation2 + $0x1160] sm:$0xf0] }
 0x139   :  { %v14571_v12 = vld [vmem:[#allocation2 + $0x1344] sm:$0xf]  ;;  %v11492_v20 = vor.u32 %v14507_v10, %v11489_v11  ;;  %5025 = vmatpush.bf16.msrb.mxu3 %v12292_v13  ;;  %v877_v11 = vperm.slane %v861_v62, 0 }
 0x13a   :  { %v11745_v14 = vld [vmem:[#allocation2 + $0x1360] sm:$0xf0] }
 0x13b   :  { %v14635_v15 = vld [vmem:[#allocation2 + $0x1544] sm:$0xf]  ;;  %v11748_v21 = vor.u32 %v14571_v12, %v11745_v14  ;;  %4987 = vmatpush.bf16.msrb.mxu0 %v11492_v20 }
 0x13c   :  { %v12001_v16 = vld [vmem:[#allocation2 + $0x1560] sm:$0xf0] }
 0x13d   :  { %v14699_v17 = vld [vmem:[#allocation2 + $0x1744] sm:$0xf]  ;;  %v12004_v24 = vor.u32 %v14635_v15, %v12001_v16  ;;  %5000 = vmatpush.bf16.msrb.mxu1 %v11748_v21 }
 0x13e   :  { %v12257_v19 = vld [vmem:[#allocation2 + $0x1760] sm:$0xf0] }
 0x13f   :  { %v14499_v25 = vld [vmem:[#allocation2 + $0x1104] sm:$0xf]  ;;  %v12260_v29 = vor.u32 %v14699_v17, %v12257_v19  ;;  %5013 = vmatpush.bf16.msrb.mxu2 %v12004_v24  ;;  %v4734_v24 = vpop.f32.mrf.mxu0 }
 0x140   :  { %v11457_v27 = vld [vmem:[#allocation2 + $0x1120] sm:$0xf0] }
 0x141   :  { %v14563_v28 = vld [vmem:[#allocation2 + $0x1304] sm:$0xf]  ;;  %v11460_v40 = vor.u32 %v14499_v25, %v11457_v27  ;;  %5026 = vmatpush.bf16.msrb.mxu3 %v12260_v29 }
 0x142   :  { %v11713_v30 = vld [vmem:[#allocation2 + $0x1320] sm:$0xf0] }
 0x143   :  { %v14627_v31 = vld [vmem:[#allocation2 + $0x1504] sm:$0xf]  ;;  %v11716_v45 = vor.u32 %v14563_v28, %v11713_v30  ;;  %4988 = vmatpush.bf16.msrb.mxu0 %v11460_v40 }
 0x144   :  { %v11969_v32 = vld [vmem:[#allocation2 + $0x1520] sm:$0xf0] }
 0x145   :  { %v14691_v34 = vld [vmem:[#allocation2 + $0x1704] sm:$0xf]  ;;  %v11972_v46 = vor.u32 %v14627_v31, %v11969_v32  ;;  %5001 = vmatpush.bf16.msrb.mxu1 %v11716_v45  ;;  %v4735_v31 = vadd.f32 %v4734_v24, %v877_v11  ;;  %v14016_v45 = vld [vmem:[#allocation2 + $0x1e4] sm:$0xf0] }
 0x146   :  { %v12225_v37 = vld [vmem:[#allocation2 + $0x1720] sm:$0xf0]  ;;  %v9959_v24 = vld [vmem:[#allocation2 + $0x548] sm:$0xf] }
 0x147   :  { %v14491_v44 = vld [vmem:[#allocation2 + $0x10c4] sm:$0xf]  ;;  %v12228_v50 = vor.u32 %v14691_v34, %v12225_v37  ;;  %5014 = vmatpush.bf16.msrb.mxu2 %v11972_v46  ;;  %v9767_v46 = vld [vmem:[#allocation2 + $0x3c8] sm:$0xf] }
 0x148   :  { %v11425_v47 = vld [vmem:[#allocation2 + $0x10e0] sm:$0xf0] }
 0x149   :  { %v14555_v48 = vld [vmem:[#allocation2 + $0x12c4] sm:$0xf]  ;;  %v11428_v56 = vor.u32 %v14491_v44, %v11425_v47  ;;  %5027 = vmatpush.bf16.msrb.mxu3 %v12228_v50  ;;  %v9511_v44 = vld [vmem:[#allocation2 + $0x1c8] sm:$0xf]  ;;  %v4747_v47 = vpop.f32.mrf.mxu1 }
 0x14a   :  { %v11681_v49 = vld [vmem:[#allocation2 + $0x12e0] sm:$0xf0]  ;;  %v10023_v50 = vld [vmem:[#allocation2 + $0x5c8] sm:$0xf] }
 0x14b   :  { %v14619_v51 = vld [vmem:[#allocation2 + $0x14c4] sm:$0xf]  ;;  %v11684_v58 = vor.u32 %v14555_v48, %v11681_v49  ;;  %4989 = vmatpush.bf16.msrb.mxu0 %v11428_v56  ;;  %v14080_v49 = vld [vmem:[#allocation2 + $0x3e4] sm:$0xf0] }
 0x14c   :  { %v11937_v52 = vld [vmem:[#allocation2 + $0x14e0] sm:$0xf0]  ;;  %v10279_v56 = vld [vmem:[#allocation2 + $0x7c8] sm:$0xf] }
 0x14d   :  { %v14683_v54 = vld [vmem:[#allocation2 + $0x16c4] sm:$0xf]  ;;  %v11940_v59 = vor.u32 %v14619_v51, %v11937_v52  ;;  %5002 = vmatpush.bf16.msrb.mxu1 %v11684_v58  ;;  %v14144_v51 = vld [vmem:[#allocation2 + $0x5e4] sm:$0xf0]  ;;  %v4748_v52 = vadd.f32 %v4747_v47, %v4735_v31 }
 0x14e   :  { %v12193_v55 = vld [vmem:[#allocation2 + $0x16e0] sm:$0xf0]  ;;  %v10024_v62 = vor.u32 %v14144_v51, %v10023_v50  ;;  %v9927_v47 = vld [vmem:[#allocation2 + $0x508] sm:$0xf] }
 0x14f   :  { %v14483_v57 = vld [vmem:[#allocation2 + $0x1084] sm:$0xf]  ;;  %v12196_v63 = vor.u32 %v14683_v54, %v12193_v55  ;;  %5015 = vmatpush.bf16.msrb.mxu2 %v11940_v59  ;;  %v9512_v59 = vor.u32 %v14016_v45, %v9511_v44  ;;  %v14184_v50 = vld [vmem:[#allocation2 + $0x724] sm:$0xf0] }
 0x150   :  { %v11393_v60 = vld [vmem:[#allocation2 + $0x10a0] sm:$0xf0] }
 0x151   :  { %v14547_v61 = vld [vmem:[#allocation2 + $0x1284] sm:$0xf]  ;;  %v11396_v5 = vor.u32 %v14483_v57, %v11393_v60  ;;  %5028 = vmatpush.bf16.msrb.mxu3 %v12196_v63  ;;  %v14208_v57 = vld [vmem:[#allocation2 + $0x7e4] sm:$0xf0]  ;;  %v4760_v60 = vpop.f32.mrf.mxu2 }
 0x152   :  { %v11649_v0 = vld [vmem:[#allocation2 + $0x12a0] sm:$0xf0]  ;;  %v9479_v63 = vld [vmem:[#allocation2 + $0x188] sm:$0xf] }
 0x153   :  { %v14611_v1 = vld [vmem:[#allocation2 + $0x1484] sm:$0xf]  ;;  %v11652_v7 = vor.u32 %v14547_v61, %v11649_v0  ;;  %4990 = vmatpush.bf16.msrb.mxu0 %v11396_v5  ;;  %v9768_v61 = vor.u32 %v14080_v49, %v9767_v46  ;;  %v14008_v0 = vld [vmem:[#allocation2 + $0x1a4] sm:$0xf0] }
 0x154   :  { %v11905_v2 = vld [vmem:[#allocation2 + $0x14a0] sm:$0xf0]  ;;  %v14072_v5 = vld [vmem:[#allocation2 + $0x3a4] sm:$0xf0] }
 0x155   :  { %v14675_v3 = vld [vmem:[#allocation2 + $0x1684] sm:$0xf]  ;;  %v11908_v8 = vor.u32 %v14611_v1, %v11905_v2  ;;  %5003 = vmatpush.bf16.msrb.mxu1 %v11652_v7  ;;  %v9735_v1 = vld [vmem:[#allocation2 + $0x388] sm:$0xf]  ;;  %v4761_v2 = vadd.f32 %v4760_v60, %v4748_v52 }
 0x156   :  { %v12161_v4 = vld [vmem:[#allocation2 + $0x16a0] sm:$0xf0]  ;;  %v14136_v7 = vld [vmem:[#allocation2 + $0x5a4] sm:$0xf0] }
 0x157   :  { %v14475_v6 = vld [vmem:[#allocation2 + $0x1044] sm:$0xf]  ;;  %v12164_v12 = vor.u32 %v14675_v3, %v12161_v4  ;;  %5016 = vmatpush.bf16.msrb.mxu2 %v11908_v8  ;;  %v4773_v3 = vpop.f32.mrf.mxu3  ;;  %v10280_v4 = vor.u32 %v14208_v57, %v10279_v56  ;;  %v4736_v8 = vpop.f32.mrf.mxu0  ;;  %v14056_v46 = vld [vmem:[#allocation2 + $0x324] sm:$0xf0] }
 0x158   :  { %v11361_v9 = vld [vmem:[#allocation2 + $0x1060] sm:$0xf0]  ;;  %v4774_v11 = vadd.f32 %v4773_v3, %v4761_v2  ;;  %v10183_v49 = vld [vmem:[#allocation2 + $0x708] sm:$0xf] }
 0x159   :  { %v14539_v10 = vld [vmem:[#allocation2 + $0x1244] sm:$0xf]  ;;  %v11364_v19 = vor.u32 %v14475_v6, %v11361_v9  ;;  %5029 = vmatpush.bf16.msrb.mxu3 %v12164_v12  ;;  %v9991_v6 = vld [vmem:[#allocation2 + $0x588] sm:$0xf]  ;;  %v9480_v12 = vor.u32 %v14008_v0, %v9479_v63 }
 0x15a   :  { %v11617_v13 = vld [vmem:[#allocation2 + $0x1260] sm:$0xf0]  ;;  %v10247_v9 = vld [vmem:[#allocation2 + $0x788] sm:$0xf] }
 0x15b   :  { %v14603_v14 = vld [vmem:[#allocation2 + $0x1444] sm:$0xf]  ;;  %v11620_v25 = vor.u32 %v14539_v10, %v11617_v13  ;;  %4991 = vmatpush.bf16.msrb.mxu0 %v11364_v19  ;;  %v14200_v10 = vld [vmem:[#allocation2 + $0x7a4] sm:$0xf0]  ;;  %v9736_v13 = vor.u32 %v14072_v5, %v9735_v1  ;;  %v4749_v19 = vpop.f32.mrf.mxu1 }
 0x15c   :  { %v11873_v15 = vld [vmem:[#allocation2 + $0x1460] sm:$0xf0]  ;;  %v9383_v56 = vld [vmem:[#allocation2 + $0xc8] sm:$0xf] }
 0x15d   :  { %v14667_v16 = vld [vmem:[#allocation2 + $0x1644] sm:$0xf]  ;;  %v11876_v27 = vor.u32 %v14603_v14, %v11873_v15  ;;  %5004 = vmatpush.bf16.msrb.mxu1 %v11620_v25  ;;  %v9992_v14 = vor.u32 %v14136_v7, %v9991_v6  ;;  %v9447_v15 = vld [vmem:[#allocation2 + $0x148] sm:$0xf] }
 0x15e   :  { %v12129_v17 = vld [vmem:[#allocation2 + $0x1660] sm:$0xf0]  ;;  %v14128_v25 = vld [vmem:[#allocation2 + $0x564] sm:$0xf0] }
 0x15f   :  { %v14467_v20 = vld [vmem:[#allocation2 + $0x1004] sm:$0xf]  ;;  %v12132_v32 = vor.u32 %v14667_v16, %v12129_v17  ;;  %5017 = vmatpush.bf16.msrb.mxu2 %v11876_v27  ;;  %v14000_v16 = vld [vmem:[#allocation2 + $0x164] sm:$0xf0]  ;;  %v4775_v44 = vpop.f32.mrf.mxu3  ;;  %v4786_v52 = vpop.f32.mrf.mxu0 }
 0x160   :  { %v11329_v21 = vld [vmem:[#allocation2 + $0x1020] sm:$0xf0]  ;;  %v9703_v17 = vld [vmem:[#allocation2 + $0x348] sm:$0xf] }
 0x161   :  { %v14531_v28 = vld [vmem:[#allocation2 + $0x1204] sm:$0xf]  ;;  %v11332_v48 = vor.u32 %v14467_v20, %v11329_v21  ;;  %5030 = vmatpush.bf16.msrb.mxu3 %v12132_v32  ;;  %v10248_v20 = vor.u32 %v14200_v10, %v10247_v9  ;;  %v14064_v21 = vld [vmem:[#allocation2 + $0x364] sm:$0xf0]  ;;  %v9960_v32 = vor.u32 %v14128_v25, %v9959_v24 }
 0x162   :  { %v11585_v29 = vld [vmem:[#allocation2 + $0x1220] sm:$0xf0]  ;;  %v10215_v27 = vld [vmem:[#allocation2 + $0x748] sm:$0xf]  ;;  %v9704_v31 = vor.u32 %v14064_v21, %v9703_v17 }
 0x163   :  { %v14595_v30 = vld [vmem:[#allocation2 + $0x1404] sm:$0xf]  ;;  %v11588_v54 = vor.u32 %v14531_v28, %v11585_v29  ;;  %4992 = vmatpush.bf16.msrb.mxu0 %v11332_v48  ;;  %v14192_v28 = vld [vmem:[#allocation2 + $0x764] sm:$0xf0]  ;;  %v9448_v29 = vor.u32 %v14000_v16, %v9447_v15  ;;  %v4799_v60 = vpop.f32.mrf.mxu1 }
 0x164   :  { %v11841_v34 = vld [vmem:[#allocation2 + $0x1420] sm:$0xf0]  ;;  %v10216_v45 = vor.u32 %v14192_v28, %v10215_v27  ;;  %v14120_v48 = vld [vmem:[#allocation2 + $0x524] sm:$0xf0] }
 0x165   :  { %v14659_v37 = vld [vmem:[#allocation2 + $0x1604] sm:$0xf]  ;;  %v11844_v55 = vor.u32 %v14595_v30, %v11841_v34  ;;  %5005 = vmatpush.bf16.msrb.mxu1 %v11588_v54  ;;  %v4762_v30 = vpop.f32.mrf.mxu2  ;;  %v9415_v34 = vld [vmem:[#allocation2 + $0x108] sm:$0xf] }
 0x166   :  { %v12097_v40 = vld [vmem:[#allocation2 + $0x1620] sm:$0xf0]  ;;  %4993 = vmatmul.bf16.vlgmr.msrb.gmra.mxu0 %v15245_v18  ;;  %v13984_v57 = vld [vmem:[#allocation2 + $0xe4] sm:$0xf0] }
 0x167   :  { %v12100_v58 = vor.u32 %v14659_v37, %v12097_v40  ;;  %5018 = vmatpush.bf16.msrb.mxu2 %v11844_v55  ;;  %5037 = vmatpush.bf16.msra.mxu0 %v9512_v59  ;;  %v13992_v37 = vld [vmem:[#allocation2 + $0x124] sm:$0xf0]  ;;  %v9928_v55 = vor.u32 %v14120_v48, %v9927_v47  ;;  %v4787_v59 = vadd.f32 %v4786_v52, %v4774_v11  ;;  %v4825_v16 = vpop.f32.mrf.mxu3  ;;  %v4788_v24 = vpop.f32.mrf.mxu0 }
 0x168   :  { %5006 = vmatmul.bf16.vlgmr.msrb.gmra.mxu1 %v15249_v23  ;;  %v9671_v40 = vld [vmem:[#allocation2 + $0x308] sm:$0xf]  ;;  %v9416_v51 = vor.u32 %v13992_v37, %v9415_v34 }
 0x169   :  { %5031 = vmatpush.bf16.msrb.mxu3 %v12100_v58  ;;  %5050 = vmatpush.bf16.msra.mxu1 %v9768_v61  ;;  %v9672_v54 = vor.u32 %v14056_v46, %v9671_v40  ;;  %v9639_v58 = vld [vmem:[#allocation2 + $0x2c8] sm:$0xf]  ;;  %v10184_v61 = vor.u32 %v14184_v50, %v10183_v49  ;;  %v4800_v3 = vadd.f32 %v4799_v60, %v4787_v59 }
 0x16a   :  { %5019 = vmatmul.bf16.vlgmr.msrb.gmra.mxu2 %v15247_v22  ;;  %v9895_v63 = vld [vmem:[#allocation2 + $0x4c8] sm:$0xf] }
 0x16b   :  { %5063 = vmatpush.bf16.msra.mxu2 %v10024_v62  ;;  %5038 = vmatpush.bf16.msra.mxu0 %v9480_v12  ;;  %v14048_v62 = vld [vmem:[#allocation2 + $0x2e4] sm:$0xf0] }
 0x16c   :  { %5032 = vmatmul.bf16.vlgmr.msrb.gmra.mxu3 %v15251_v26  ;;  %v14112_v0 = vld [vmem:[#allocation2 + $0x4e4] sm:$0xf0]  ;;  %v9640_v5 = vor.u32 %v14048_v62, %v9639_v58 }
 0x16d   :  { %5076 = vmatpush.bf16.msra.mxu3 %v10280_v4  ;;  %5051 = vmatpush.bf16.msra.mxu1 %v9736_v13  ;;  %v10151_v1 = vld [vmem:[#allocation2 + $0x6c8] sm:$0xf]  ;;  %v9384_v4 = vor.u32 %v13984_v57, %v9383_v56  ;;  %v9896_v6 = vor.u32 %v14112_v0, %v9895_v63  ;;  %v4812_v10 = vpop.f32.mrf.mxu2 }
 0x16e   :  { %v14176_v2 = vld [vmem:[#allocation2 + $0x6e4] sm:$0xf0]  ;;  %v4813_v15 = vadd.f32 %v4812_v10, %v4800_v3 }
 0x16f   :  { %5064 = vmatpush.bf16.msra.mxu2 %v9992_v14  ;;  %5039 = vmatpush.bf16.msra.mxu0 %v9448_v29  ;;  %v9351_v7 = vld [vmem:[#allocation2 + $0x88] sm:$0xf]  ;;  %v10152_v11 = vor.u32 %v14176_v2, %v10151_v1  ;;  %v4827_v60 = vpop.f32.mrf.mxu3 }
 0x170   :  { %v13976_v8 = vld [vmem:[#allocation2 + $0xa4] sm:$0xf0]  ;;  %v15275_v21 = vadd.f32 %v4825_v16, %v4813_v15 }
 0x171   :  { %5077 = vmatpush.bf16.msra.mxu3 %v10248_v20  ;;  %5052 = vmatpush.bf16.msra.mxu1 %v9704_v31  ;;  %v9607_v9 = vld [vmem:[#allocation2 + $0x288] sm:$0xf]  ;;  %v9352_v20 = vor.u32 %v13976_v8, %v9351_v7  ;;  %v4801_v31 = vpop.f32.mrf.mxu1 }
 0x172   :  { %v14040_v12 = vld [vmem:[#allocation2 + $0x2a4] sm:$0xf0] }
 0x173   :  { %5065 = vmatpush.bf16.msra.mxu2 %v9960_v32  ;;  %5040 = vmatpush.bf16.msra.mxu0 %v9416_v51  ;;  %v9863_v13 = vld [vmem:[#allocation2 + $0x488] sm:$0xf]  ;;  %v9608_v25 = vor.u32 %v14040_v12, %v9607_v9 }
 0x174   :  { %v14104_v14 = vld [vmem:[#allocation2 + $0x4a4] sm:$0xf0] }
 0x175   :  { %5078 = vmatpush.bf16.msra.mxu3 %v10216_v45  ;;  %5053 = vmatpush.bf16.msra.mxu1 %v9672_v54  ;;  %v10119_v17 = vld [vmem:[#allocation2 + $0x688] sm:$0xf]  ;;  %v9864_v27 = vor.u32 %v14104_v14, %v9863_v13 }
 0x176   :  { %v14168_v19 = vld [vmem:[#allocation2 + $0x6a4] sm:$0xf0] }
 0x177   :  { %5066 = vmatpush.bf16.msra.mxu2 %v9928_v55  ;;  %5041 = vmatpush.bf16.msra.mxu0 %v9384_v4  ;;  %v9319_v28 = vld [vmem:[#allocation2 + $0x48] sm:$0xf]  ;;  %v10120_v32 = vor.u32 %v14168_v19, %v10119_v17  ;;  %v4814_v55 = vpop.f32.mrf.mxu2 }
 0x178   :  { %v13968_v29 = vld [vmem:[#allocation2 + $0x64] sm:$0xf0] }
 0x179   :  { %5079 = vmatpush.bf16.msra.mxu3 %v10184_v61  ;;  %5054 = vmatpush.bf16.msra.mxu1 %v9640_v5  ;;  %v9575_v30 = vld [vmem:[#allocation2 + $0x248] sm:$0xf]  ;;  %v9320_v46 = vor.u32 %v13968_v29, %v9319_v28 }
 0x17a   :  { %v14032_v34 = vld [vmem:[#allocation2 + $0x264] sm:$0xf0] }
 0x17b   :  { %5067 = vmatpush.bf16.msra.mxu2 %v9896_v6  ;;  %v9831_v37 = vld [vmem:[#allocation2 + $0x448] sm:$0xf]  ;;  %5042 = vmatpush.bf16.msra.mxu0 %v9352_v20  ;;  %v9576_v49 = vor.u32 %v14032_v34, %v9575_v30 }
 0x17c   :  { %v14096_v40 = vld [vmem:[#allocation2 + $0x464] sm:$0xf0] }
 0x17d   :  { %5080 = vmatpush.bf16.msra.mxu3 %v10152_v11  ;;  %v10087_v44 = vld [vmem:[#allocation2 + $0x648] sm:$0xf]  ;;  %5055 = vmatpush.bf16.msra.mxu1 %v9608_v25  ;;  %v9832_v50 = vor.u32 %v14096_v40, %v9831_v37 }
 0x17e   :  { %v14160_v45 = vld [vmem:[#allocation2 + $0x664] sm:$0xf0] }
 0x17f   :  { %v9287_v47 = vld [vmem:[#allocation2 + $0x8] sm:$0xf]  ;;  %5068 = vmatpush.bf16.msra.mxu2 %v9864_v27  ;;  %v10088_v56 = vor.u32 %v14160_v45, %v10087_v44  ;;  %5043 = vmatpush.bf16.msra.mxu0 %v9320_v46 }
 0x180   :  { %v13960_v48 = vld [vmem:[#allocation2 + $0x24] sm:$0xf0] }
 0x181   :  { %v9543_v51 = vld [vmem:[#allocation2 + $0x208] sm:$0xf]  ;;  %5081 = vmatpush.bf16.msra.mxu3 %v10120_v32  ;;  %v9288_v0 = vor.u32 %v13960_v48, %v9287_v47  ;;  %5056 = vmatpush.bf16.msra.mxu1 %v9576_v49 }
 0x182   :  { %v14024_v52 = vld [vmem:[#allocation2 + $0x224] sm:$0xf0] }
 0x183   :  { %v9799_v54 = vld [vmem:[#allocation2 + $0x408] sm:$0xf]  ;;  %5069 = vmatpush.bf16.msra.mxu2 %v9832_v50  ;;  %v9544_v4 = vor.u32 %v14024_v52, %v9543_v51  ;;  %5044 = vmatpush.bf16.msra.mxu0 %v9288_v0 }
 0x184   :  { %v14088_v57 = vld [vmem:[#allocation2 + $0x424] sm:$0xf0] }
 0x185   :  { %v10055_v58 = vld [vmem:[#allocation2 + $0x608] sm:$0xf]  ;;  %v9800_v5 = vor.u32 %v14088_v57, %v9799_v54  ;;  %5082 = vmatpush.bf16.msra.mxu3 %v10088_v56  ;;  %5057 = vmatpush.bf16.msra.mxu1 %v9544_v4  ;;  %v4838_v57 = vpop.f32.mrf.mxu0 }
 0x186   :  { %v14152_v59 = vld [vmem:[#allocation2 + $0x624] sm:$0xf0]  ;;  %5045 = vmatmul.bf16.vlgmr.msra.gmra.mxu0 %v15220_v36  ;;  %v4839_v60 = vadd.f32 %v4838_v57, %v15275_v21 }
 0x187   :  { %v10535_v61 = vld [vmem:[#allocation2 + $0x9c8] sm:$0xf]  ;;  %v10056_v8 = vor.u32 %v14152_v59, %v10055_v58  ;;  %5070 = vmatpush.bf16.msra.mxu2 %v9800_v5 }
 0x188   :  { %v14272_v62 = vld [vmem:[#allocation2 + $0x9e4] sm:$0xf0]  ;;  %5058 = vmatmul.bf16.vlgmr.msra.gmra.mxu1 %v15224_v43 }
 0x189   :  { %v10791_v63 = vld [vmem:[#allocation2 + $0xbc8] sm:$0xf]  ;;  %v10536_v9 = vor.u32 %v14272_v62, %v10535_v61  ;;  %5083 = vmatpush.bf16.msra.mxu3 %v10056_v8  ;;  %v4851_v62 = vpop.f32.mrf.mxu1 }
 0x18a   :  { %v14336_v1 = vld [vmem:[#allocation2 + $0xbe4] sm:$0xf0]  ;;  %5071 = vmatmul.bf16.vlgmr.msra.gmra.mxu2 %v15218_v35  ;;  %v4852_v5 = vadd.f32 %v4851_v62, %v4839_v60 }
 0x18b   :  { %v11047_v2 = vld [vmem:[#allocation2 + $0xdc8] sm:$0xf]  ;;  %v10792_v10 = vor.u32 %v14336_v1, %v10791_v63  ;;  %5089 = vmatpush.bf16.msrb.mxu0 %v10536_v9 }
 0x18c   :  { %v14400_v3 = vld [vmem:[#allocation2 + $0xde4] sm:$0xf0]  ;;  %5084 = vmatmul.bf16.vlgmr.msra.gmra.mxu3 %v15222_v42 }
 0x18d   :  { %v11303_v6 = vld [vmem:[#allocation2 + $0xfc8] sm:$0xf]  ;;  %v11048_v11 = vor.u32 %v14400_v3, %v11047_v2  ;;  %5102 = vmatpush.bf16.msrb.mxu1 %v10792_v10 }
 0x18e   :  { %v14464_v7 = vld [vmem:[#allocation2 + $0xfe4] sm:$0xf0] }
 0x18f   :  { %v10503_v12 = vld [vmem:[#allocation2 + $0x988] sm:$0xf]  ;;  %v11304_v15 = vor.u32 %v14464_v7, %v11303_v6  ;;  %5115 = vmatpush.bf16.msrb.mxu2 %v11048_v11 }
 0x190   :  { %v14264_v13 = vld [vmem:[#allocation2 + $0x9a4] sm:$0xf0] }
 0x191   :  { %v10759_v14 = vld [vmem:[#allocation2 + $0xb88] sm:$0xf]  ;;  %v10504_v25 = vor.u32 %v14264_v13, %v10503_v12  ;;  %5128 = vmatpush.bf16.msrb.mxu3 %v11304_v15 }
 0x192   :  { %v14328_v16 = vld [vmem:[#allocation2 + $0xba4] sm:$0xf0] }
 0x193   :  { %v11015_v17 = vld [vmem:[#allocation2 + $0xd88] sm:$0xf]  ;;  %v10760_v27 = vor.u32 %v14328_v16, %v10759_v14  ;;  %5090 = vmatpush.bf16.msrb.mxu0 %v10504_v25 }
 0x194   :  { %v14392_v19 = vld [vmem:[#allocation2 + $0xda4] sm:$0xf0] }
 0x195   :  { %v11271_v20 = vld [vmem:[#allocation2 + $0xf88] sm:$0xf]  ;;  %v11016_v28 = vor.u32 %v14392_v19, %v11015_v17  ;;  %5103 = vmatpush.bf16.msrb.mxu1 %v10760_v27  ;;  %v4864_v17 = vpop.f32.mrf.mxu2  ;;  %v4877_v27 = vpop.f32.mrf.mxu3 }
 0x196   :  { %v14456_v24 = vld [vmem:[#allocation2 + $0xfa4] sm:$0xf0]  ;;  %v4865_v25 = vadd.f32 %v4864_v17, %v4852_v5 }
 0x197   :  { %v10471_v29 = vld [vmem:[#allocation2 + $0x948] sm:$0xf]  ;;  %v11272_v32 = vor.u32 %v14456_v24, %v11271_v20  ;;  %5116 = vmatpush.bf16.msrb.mxu2 %v11016_v28 }
 0x198   :  { %v14256_v30 = vld [vmem:[#allocation2 + $0x964] sm:$0xf0] }
 0x199   :  { %v10727_v31 = vld [vmem:[#allocation2 + $0xb48] sm:$0xf]  ;;  %v10472_v46 = vor.u32 %v14256_v30, %v10471_v29  ;;  %5129 = vmatpush.bf16.msrb.mxu3 %v11272_v32  ;;  %v4840_v30 = vpop.f32.mrf.mxu0  ;;  %v4853_v32 = vpop.f32.mrf.mxu1 }
 0x19a   :  { %v14320_v34 = vld [vmem:[#allocation2 + $0xb64] sm:$0xf0] }
 0x19b   :  { %v10983_v37 = vld [vmem:[#allocation2 + $0xd48] sm:$0xf]  ;;  %v10728_v47 = vor.u32 %v14320_v34, %v10727_v31  ;;  %5091 = vmatpush.bf16.msrb.mxu0 %v10472_v46  ;;  %v15282_v34 = vadd.f32 %v4877_v27, %v4865_v25 }
 0x19c   :  { %v14384_v40 = vld [vmem:[#allocation2 + $0xd64] sm:$0xf0] }
 0x19d   :  { %v11239_v44 = vld [vmem:[#allocation2 + $0xf48] sm:$0xf]  ;;  %v10984_v48 = vor.u32 %v14384_v40, %v10983_v37  ;;  %5104 = vmatpush.bf16.msrb.mxu1 %v10728_v47 }
 0x19e   :  { %v14448_v45 = vld [vmem:[#allocation2 + $0xf64] sm:$0xf0] }
 0x19f   :  { %v10439_v49 = vld [vmem:[#allocation2 + $0x908] sm:$0xf]  ;;  %v11240_v52 = vor.u32 %v14448_v45, %v11239_v44  ;;  %5117 = vmatpush.bf16.msrb.mxu2 %v10984_v48 }
 0x1a0   :  { %v14248_v50 = vld [vmem:[#allocation2 + $0x924] sm:$0xf0] }
 0x1a1   :  { %v10695_v51 = vld [vmem:[#allocation2 + $0xb08] sm:$0xf]  ;;  %v10440_v61 = vor.u32 %v14248_v50, %v10439_v49  ;;  %5130 = vmatpush.bf16.msrb.mxu3 %v11240_v52 }
 0x1a2   :  { %v14312_v54 = vld [vmem:[#allocation2 + $0xb24] sm:$0xf0] }
 0x1a3   :  { %v10951_v55 = vld [vmem:[#allocation2 + $0xd08] sm:$0xf]  ;;  %v10696_v63 = vor.u32 %v14312_v54, %v10695_v51  ;;  %5092 = vmatpush.bf16.msrb.mxu0 %v10440_v61 }
 0x1a4   :  { %v14376_v56 = vld [vmem:[#allocation2 + $0xd24] sm:$0xf0] }
 0x1a5   :  { %v11207_v58 = vld [vmem:[#allocation2 + $0xf08] sm:$0xf]  ;;  %v10952_v0 = vor.u32 %v14376_v56, %v10951_v55  ;;  %5105 = vmatpush.bf16.msrb.mxu1 %v10696_v63 }
 0x1a6   :  { %v14440_v59 = vld [vmem:[#allocation2 + $0xf24] sm:$0xf0] }
 0x1a7   :  { %v10407_v1 = vld [vmem:[#allocation2 + $0x8c8] sm:$0xf]  ;;  %v11208_v4 = vor.u32 %v14440_v59, %v11207_v58  ;;  %5118 = vmatpush.bf16.msrb.mxu2 %v10952_v0 }
 0x1a8   :  { %v14240_v2 = vld [vmem:[#allocation2 + $0x8e4] sm:$0xf0] }
 0x1a9   :  { %v10663_v3 = vld [vmem:[#allocation2 + $0xac8] sm:$0xf]  ;;  %v10408_v11 = vor.u32 %v14240_v2, %v10407_v1  ;;  %5131 = vmatpush.bf16.msrb.mxu3 %v11208_v4  ;;  %v4866_v2 = vpop.f32.mrf.mxu2 }
 0x1aa   :  { %v14304_v6 = vld [vmem:[#allocation2 + $0xae4] sm:$0xf0] }
 0x1ab   :  { %v10919_v7 = vld [vmem:[#allocation2 + $0xcc8] sm:$0xf]  ;;  %v10664_v21 = vor.u32 %v14304_v6, %v10663_v3  ;;  %5093 = vmatpush.bf16.msrb.mxu0 %v10408_v11  ;;  %v4879_v6 = vpop.f32.mrf.mxu3 }
 0x1ac   :  { %v14368_v8 = vld [vmem:[#allocation2 + $0xce4] sm:$0xf0] }
 0x1ad   :  { %v11175_v9 = vld [vmem:[#allocation2 + $0xec8] sm:$0xf]  ;;  %v10920_v12 = vor.u32 %v14368_v8, %v10919_v7  ;;  %5106 = vmatpush.bf16.msrb.mxu1 %v10664_v21 }
 0x1ae   :  { %v14432_v10 = vld [vmem:[#allocation2 + $0xee4] sm:$0xf0] }
 0x1af   :  { %v10375_v13 = vld [vmem:[#allocation2 + $0x888] sm:$0xf]  ;;  %v11176_v16 = vor.u32 %v14432_v10, %v11175_v9  ;;  %5119 = vmatpush.bf16.msrb.mxu2 %v10920_v12 }
 0x1b0   :  { %v14232_v14 = vld [vmem:[#allocation2 + $0x8a4] sm:$0xf0] }
 0x1b1   :  { %v10631_v15 = vld [vmem:[#allocation2 + $0xa88] sm:$0xf]  ;;  %v10376_v31 = vor.u32 %v14232_v14, %v10375_v13  ;;  %5132 = vmatpush.bf16.msrb.mxu3 %v11176_v16 }
 0x1b2   :  { %v14296_v19 = vld [vmem:[#allocation2 + $0xaa4] sm:$0xf0] }
 0x1b3   :  { %v10887_v20 = vld [vmem:[#allocation2 + $0xc88] sm:$0xf]  ;;  %v10632_v37 = vor.u32 %v14296_v19, %v10631_v15  ;;  %5094 = vmatpush.bf16.msrb.mxu0 %v10376_v31 }
 0x1b4   :  { %v14360_v24 = vld [vmem:[#allocation2 + $0xca4] sm:$0xf0] }
 0x1b5   :  { %v11143_v28 = vld [vmem:[#allocation2 + $0xe88] sm:$0xf]  ;;  %v10888_v40 = vor.u32 %v14360_v24, %v10887_v20  ;;  %5107 = vmatpush.bf16.msrb.mxu1 %v10632_v37 }
 0x1b6   :  { %v14424_v29 = vld [vmem:[#allocation2 + $0xea4] sm:$0xf0] }
 0x1b7   :  { %v10343_v44 = vld [vmem:[#allocation2 + $0x848] sm:$0xf]  ;;  %v11144_v47 = vor.u32 %v14424_v29, %v11143_v28  ;;  %5120 = vmatpush.bf16.msrb.mxu2 %v10888_v40 }
 0x1b8   :  { %v14224_v45 = vld [vmem:[#allocation2 + $0x864] sm:$0xf0] }
 0x1b9   :  { %v10599_v46 = vld [vmem:[#allocation2 + $0xa48] sm:$0xf]  ;;  %v10344_v54 = vor.u32 %v14224_v45, %v10343_v44  ;;  %5133 = vmatpush.bf16.msrb.mxu3 %v11144_v47  ;;  %v862_v47 = vperm.slane %v15268_v53, 4 }
 0x1ba   :  { %v14288_v48 = vld [vmem:[#allocation2 + $0xa64] sm:$0xf0] }
 0x1bb   :  { %v10855_v49 = vld [vmem:[#allocation2 + $0xc48] sm:$0xf]  ;;  %v10600_v57 = vor.u32 %v14288_v48, %v10599_v46  ;;  %5095 = vmatpush.bf16.msrb.mxu0 %v10344_v54 }
 0x1bc   :  { %v14352_v50 = vld [vmem:[#allocation2 + $0xc64] sm:$0xf0] }
 0x1bd   :  { %v11111_v51 = vld [vmem:[#allocation2 + $0xe48] sm:$0xf]  ;;  %v10856_v58 = vor.u32 %v14352_v50, %v10855_v49  ;;  %5108 = vmatpush.bf16.msrb.mxu1 %v10600_v57 }
 0x1be   :  { %v14416_v52 = vld [vmem:[#allocation2 + $0xe64] sm:$0xf0] }
 0x1bf   :  { %v10311_v55 = vld [vmem:[#allocation2 + $0x808] sm:$0xf]  ;;  %v11112_v62 = vor.u32 %v14416_v52, %v11111_v51  ;;  %5121 = vmatpush.bf16.msrb.mxu2 %v10856_v58 }
 0x1c0   :  { %v14216_v56 = vld [vmem:[#allocation2 + $0x824] sm:$0xf0] }
 0x1c1   :  { %v10567_v59 = vld [vmem:[#allocation2 + $0xa08] sm:$0xf]  ;;  %v10312_v7 = vor.u32 %v14216_v56, %v10311_v55  ;;  %5134 = vmatpush.bf16.msrb.mxu3 %v11112_v62 }
 0x1c2   :  { %v14280_v60 = vld [vmem:[#allocation2 + $0xa24] sm:$0xf0] }
 0x1c3   :  { %v10823_v61 = vld [vmem:[#allocation2 + $0xc08] sm:$0xf]  ;;  %v10568_v11 = vor.u32 %v14280_v60, %v10567_v59  ;;  %5096 = vmatpush.bf16.msrb.mxu0 %v10312_v7  ;;  %v878_v60 = vperm.slane %v862_v47, 0 }
 0x1c4   :  { %v14344_v63 = vld [vmem:[#allocation2 + $0xc24] sm:$0xf0] }
 0x1c5   :  { %v11079_v0 = vld [vmem:[#allocation2 + $0xe08] sm:$0xf]  ;;  %v10824_v21 = vor.u32 %v14344_v63, %v10823_v61  ;;  %5109 = vmatpush.bf16.msrb.mxu1 %v10568_v11  ;;  %v4903_v11 = vpop.f32.mrf.mxu1 }
 0x1c6   :  { %v14408_v1 = vld [vmem:[#allocation2 + $0xe24] sm:$0xf0]  ;;  %5097 = vmatmul.bf16.vlgmr.msrb.gmra.mxu0 %v15235_v38 }
 0x1c7   :  { %v11559_v3 = vld [vmem:[#allocation2 + $0x11c8] sm:$0xf]  ;;  %v11080_v14 = vor.u32 %v14408_v1, %v11079_v0  ;;  %5122 = vmatpush.bf16.msrb.mxu2 %v10824_v21 }
 0x1c8   :  { %v14528_v4 = vld [vmem:[#allocation2 + $0x11e4] sm:$0xf0]  ;;  %5110 = vmatmul.bf16.vlgmr.msrb.gmra.mxu1 %v15239_v41 }
 0x1c9   :  { %v11815_v5 = vld [vmem:[#allocation2 + $0x13c8] sm:$0xf]  ;;  %v11560_v15 = vor.u32 %v14528_v4, %v11559_v3  ;;  %5135 = vmatpush.bf16.msrb.mxu3 %v11080_v14  ;;  %v4890_v4 = vpop.f32.mrf.mxu0 }
 0x1ca   :  { %v14592_v8 = vld [vmem:[#allocation2 + $0x13e4] sm:$0xf0]  ;;  %5123 = vmatmul.bf16.vlgmr.msrb.gmra.mxu2 %v15233_v33 }
 0x1cb   :  { %v12071_v9 = vld [vmem:[#allocation2 + $0x15c8] sm:$0xf]  ;;  %v11816_v16 = vor.u32 %v14592_v8, %v11815_v5  ;;  %5141 = vmatpush.bf16.msra.mxu0 %v11560_v15 }
 0x1cc   :  { %v14656_v10 = vld [vmem:[#allocation2 + $0x15e4] sm:$0xf0]  ;;  %5136 = vmatmul.bf16.vlgmr.msrb.gmra.mxu3 %v15237_v39 }
 0x1cd   :  { %v12327_v12 = vld [vmem:[#allocation2 + $0x17c8] sm:$0xf]  ;;  %v12072_v17 = vor.u32 %v14656_v10, %v12071_v9  ;;  %5154 = vmatpush.bf16.msra.mxu1 %v11816_v16  ;;  %v4891_v10 = vadd.f32 %v4890_v4, %v878_v60 }
 0x1ce   :  { %v14720_v13 = vld [vmem:[#allocation2 + $0x17e4] sm:$0xf0] }
 0x1cf   :  { %v11527_v19 = vld [vmem:[#allocation2 + $0x1188] sm:$0xf]  ;;  %v12328_v25 = vor.u32 %v14720_v13, %v12327_v12  ;;  %5167 = vmatpush.bf16.msra.mxu2 %v12072_v17  ;;  %v4904_v17 = vadd.f32 %v4903_v11, %v4891_v10 }
 0x1d0   :  { %v14520_v20 = vld [vmem:[#allocation2 + $0x11a4] sm:$0xf0] }
 0x1d1   :  { %v11783_v24 = vld [vmem:[#allocation2 + $0x1388] sm:$0xf]  ;;  %v11528_v32 = vor.u32 %v14520_v20, %v11527_v19  ;;  %5180 = vmatpush.bf16.msra.mxu3 %v12328_v25 }
 0x1d2   :  { %v14584_v27 = vld [vmem:[#allocation2 + $0x13a4] sm:$0xf0] }
 0x1d3   :  { %v12039_v28 = vld [vmem:[#allocation2 + $0x1588] sm:$0xf]  ;;  %v11784_v40 = vor.u32 %v14584_v27, %v11783_v24  ;;  %5142 = vmatpush.bf16.msra.mxu0 %v11528_v32 }
 0x1d4   :  { %v14648_v29 = vld [vmem:[#allocation2 + $0x15a4] sm:$0xf0] }
 0x1d5   :  { %v12295_v30 = vld [vmem:[#allocation2 + $0x1788] sm:$0xf]  ;;  %v12040_v44 = vor.u32 %v14648_v29, %v12039_v28  ;;  %5155 = vmatpush.bf16.msra.mxu1 %v11784_v40  ;;  %v4916_v29 = vpop.f32.mrf.mxu2 }
 0x1d6   :  { %v14712_v31 = vld [vmem:[#allocation2 + $0x17a4] sm:$0xf0]  ;;  %v4917_v40 = vadd.f32 %v4916_v29, %v4904_v17  ;;  %v10025_v17 = vld [vmem:[#allocation2 + $0x5e8] sm:$0xf0] }
 0x1d7   :  { %v11495_v37 = vld [vmem:[#allocation2 + $0x1148] sm:$0xf]  ;;  %v12296_v48 = vor.u32 %v14712_v31, %v12295_v30  ;;  %5168 = vmatpush.bf16.msra.mxu2 %v12040_v44  ;;  %v4929_v44 = vpop.f32.mrf.mxu3 }
 0x1d8   :  { %v14512_v45 = vld [vmem:[#allocation2 + $0x1164] sm:$0xf0] }
 0x1d9   :  { %v11751_v46 = vld [vmem:[#allocation2 + $0x1348] sm:$0xf]  ;;  %v11496_v55 = vor.u32 %v14512_v45, %v11495_v37  ;;  %5181 = vmatpush.bf16.msra.mxu3 %v12296_v48  ;;  %v15289_v48 = vadd.f32 %v4929_v44, %v4917_v40  ;;  %v9737_v44 = vld [vmem:[#allocation2 + $0x3a8] sm:$0xf0] }
 0x1da   :  { %v14576_v49 = vld [vmem:[#allocation2 + $0x1364] sm:$0xf0] }
 0x1db   :  { %v12007_v50 = vld [vmem:[#allocation2 + $0x1548] sm:$0xf]  ;;  %v11752_v53 = vor.u32 %v14576_v49, %v11751_v46  ;;  %5143 = vmatpush.bf16.msra.mxu0 %v11496_v55  ;;  %v4892_v49 = vpop.f32.mrf.mxu0 }
 0x1dc   :  { %v14640_v51 = vld [vmem:[#allocation2 + $0x1564] sm:$0xf0]  ;;  %v10249_v49 = vld [vmem:[#allocation2 + $0x7a8] sm:$0xf0] }
 0x1dd   :  { %v12263_v52 = vld [vmem:[#allocation2 + $0x1748] sm:$0xf]  ;;  %v12008_v57 = vor.u32 %v14640_v51, %v12007_v50  ;;  %5156 = vmatpush.bf16.msra.mxu1 %v11752_v53 }
 0x1de   :  { %v14704_v54 = vld [vmem:[#allocation2 + $0x1764] sm:$0xf0] }
 0x1df   :  { %v11463_v56 = vld [vmem:[#allocation2 + $0x1108] sm:$0xf]  ;;  %v12264_v61 = vor.u32 %v14704_v54, %v12263_v52  ;;  %5169 = vmatpush.bf16.msra.mxu2 %v12008_v57  ;;  %v4931_v11 = vpop.f32.mrf.mxu3 }
 0x1e0   :  { %v14504_v58 = vld [vmem:[#allocation2 + $0x1124] sm:$0xf0] }
 0x1e1   :  { %v11719_v59 = vld [vmem:[#allocation2 + $0x1308] sm:$0xf]  ;;  %v11464_v3 = vor.u32 %v14504_v58, %v11463_v56  ;;  %5182 = vmatpush.bf16.msra.mxu3 %v12264_v61  ;;  %v4905_v56 = vpop.f32.mrf.mxu1 }
 0x1e2   :  { %v14568_v62 = vld [vmem:[#allocation2 + $0x1324] sm:$0xf0]  ;;  %v14060_v56 = vld [vmem:[#allocation2 + $0x34c] sm:$0xf] }
 0x1e3   :  { %v11975_v63 = vld [vmem:[#allocation2 + $0x1508] sm:$0xf]  ;;  %v11720_v5 = vor.u32 %v14568_v62, %v11719_v59  ;;  %5144 = vmatpush.bf16.msra.mxu0 %v11464_v3  ;;  %v4942_v11 = vpop.f32.mrf.mxu0 }
 0x1e4   :  { %v14632_v0 = vld [vmem:[#allocation2 + $0x1524] sm:$0xf0] }
 0x1e5   :  { %v12231_v1 = vld [vmem:[#allocation2 + $0x1708] sm:$0xf]  ;;  %v11976_v6 = vor.u32 %v14632_v0, %v11975_v63  ;;  %5157 = vmatpush.bf16.msra.mxu1 %v11720_v5 }
 0x1e6   :  { %v14696_v2 = vld [vmem:[#allocation2 + $0x1724] sm:$0xf0] }
 0x1e7   :  { %v11431_v7 = vld [vmem:[#allocation2 + $0x10c8] sm:$0xf]  ;;  %v12232_v21 = vor.u32 %v14696_v2, %v12231_v1  ;;  %5170 = vmatpush.bf16.msra.mxu2 %v11976_v6  ;;  %v4918_v6 = vpop.f32.mrf.mxu2 }
 0x1e8   :  { %v14496_v8 = vld [vmem:[#allocation2 + $0x10e4] sm:$0xf0]  ;;  %v14116_v6 = vld [vmem:[#allocation2 + $0x50c] sm:$0xf] }
 0x1e9   :  { %v11687_v9 = vld [vmem:[#allocation2 + $0x12c8] sm:$0xf]  ;;  %v11432_v19 = vor.u32 %v14496_v8, %v11431_v7  ;;  %5183 = vmatpush.bf16.msra.mxu3 %v12232_v21  ;;  %v14012_v21 = vld [vmem:[#allocation2 + $0x1cc] sm:$0xf] }
 0x1ea   :  { %v14560_v12 = vld [vmem:[#allocation2 + $0x12e4] sm:$0xf0] }
 0x1eb   :  { %v11943_v13 = vld [vmem:[#allocation2 + $0x14c8] sm:$0xf]  ;;  %v11688_v20 = vor.u32 %v14560_v12, %v11687_v9  ;;  %5145 = vmatpush.bf16.msra.mxu0 %v11432_v19  ;;  %v9513_v12 = vld [vmem:[#allocation2 + $0x1e8] sm:$0xf0] }
 0x1ec   :  { %v14624_v14 = vld [vmem:[#allocation2 + $0x14e4] sm:$0xf0] }
 0x1ed   :  { %v12199_v15 = vld [vmem:[#allocation2 + $0x16c8] sm:$0xf]  ;;  %v11944_v24 = vor.u32 %v14624_v14, %v11943_v13  ;;  %5158 = vmatpush.bf16.msra.mxu1 %v11688_v20  ;;  %v14076_v13 = vld [vmem:[#allocation2 + $0x3cc] sm:$0xf] }
 0x1ee   :  { %v14688_v16 = vld [vmem:[#allocation2 + $0x16e4] sm:$0xf0] }
 0x1ef   :  { %v11399_v25 = vld [vmem:[#allocation2 + $0x1088] sm:$0xf]  ;;  %v12200_v30 = vor.u32 %v14688_v16, %v12199_v15  ;;  %5171 = vmatpush.bf16.msra.mxu2 %v11944_v24  ;;  %v9769_v15 = vld [vmem:[#allocation2 + $0x3e8] sm:$0xf0] }
 0x1f0   :  { %v14488_v27 = vld [vmem:[#allocation2 + $0x10a4] sm:$0xf0]  ;;  %v14140_v16 = vld [vmem:[#allocation2 + $0x5cc] sm:$0xf]  ;;  %v9772_v29 = vor.u32 %v14076_v13, %v9769_v15 }
 0x1f1   :  { %v11655_v28 = vld [vmem:[#allocation2 + $0x1288] sm:$0xf]  ;;  %v11400_v47 = vor.u32 %v14488_v27, %v11399_v25  ;;  %5184 = vmatpush.bf16.msra.mxu3 %v12200_v30  ;;  %v14204_v24 = vld [vmem:[#allocation2 + $0x7cc] sm:$0xf]  ;;  %v10028_v30 = vor.u32 %v14140_v16, %v10025_v17  ;;  %v4943_v16 = vadd.f32 %v4942_v11, %v15289_v48  ;;  %v4955_v17 = vpop.f32.mrf.mxu1 }
 0x1f2   :  { %v14552_v31 = vld [vmem:[#allocation2 + $0x12a4] sm:$0xf0]  ;;  %v10281_v25 = vld [vmem:[#allocation2 + $0x7e8] sm:$0xf0] }
 0x1f3   :  { %v11911_v32 = vld [vmem:[#allocation2 + $0x1488] sm:$0xf]  ;;  %v11656_v50 = vor.u32 %v14552_v31, %v11655_v28  ;;  %5146 = vmatpush.bf16.msra.mxu0 %v11400_v47  ;;  %v9516_v28 = vor.u32 %v14012_v21, %v9513_v12  ;;  %v14004_v31 = vld [vmem:[#allocation2 + $0x18c] sm:$0xf]  ;;  %v10284_v40 = vor.u32 %v14204_v24, %v10281_v25 }
 0x1f4   :  { %v14616_v37 = vld [vmem:[#allocation2 + $0x14a4] sm:$0xf0]  ;;  %v14196_v47 = vld [vmem:[#allocation2 + $0x78c] sm:$0xf] }
 0x1f5   :  { %v12167_v45 = vld [vmem:[#allocation2 + $0x1688] sm:$0xf]  ;;  %v11912_v51 = vor.u32 %v14616_v37, %v11911_v32  ;;  %5159 = vmatpush.bf16.msra.mxu1 %v11656_v50  ;;  %v9481_v32 = vld [vmem:[#allocation2 + $0x1a8] sm:$0xf0] }
 0x1f6   :  { %v14680_v46 = vld [vmem:[#allocation2 + $0x16a4] sm:$0xf0]  ;;  %v14068_v37 = vld [vmem:[#allocation2 + $0x38c] sm:$0xf]  ;;  %v9484_v50 = vor.u32 %v14004_v31, %v9481_v32 }
 0x1f7   :  { %v11367_v52 = vld [vmem:[#allocation2 + $0x1048] sm:$0xf]  ;;  %v12168_v53 = vor.u32 %v14680_v46, %v12167_v45  ;;  %5172 = vmatpush.bf16.msra.mxu2 %v11912_v51  ;;  %v14132_v45 = vld [vmem:[#allocation2 + $0x58c] sm:$0xf]  ;;  %v9740_v51 = vor.u32 %v14068_v37, %v9737_v44 }
 0x1f8   :  { %v14480_v54 = vld [vmem:[#allocation2 + $0x1064] sm:$0xf0]  ;;  %v9993_v46 = vld [vmem:[#allocation2 + $0x5a8] sm:$0xf0] }
 0x1f9   :  { %v11623_v55 = vld [vmem:[#allocation2 + $0x1248] sm:$0xf]  ;;  %v11368_v62 = vor.u32 %v14480_v54, %v11367_v52  ;;  %5185 = vmatpush.bf16.msra.mxu3 %v12168_v53  ;;  %v9996_v52 = vor.u32 %v14132_v45, %v9993_v46  ;;  %v13996_v54 = vld [vmem:[#allocation2 + $0x14c] sm:$0xf]  ;;  %v10252_v53 = vor.u32 %v14196_v47, %v10249_v49  ;;  %v4968_v45 = vpop.f32.mrf.mxu2 }
 0x1fa   :  { %v14544_v57 = vld [vmem:[#allocation2 + $0x1264] sm:$0xf0]  ;;  %v13980_v13 = vld [vmem:[#allocation2 + $0xcc] sm:$0xf] }
 0x1fb   :  { %v11879_v58 = vld [vmem:[#allocation2 + $0x1448] sm:$0xf]  ;;  %v11624_v1 = vor.u32 %v14544_v57, %v11623_v55  ;;  %5147 = vmatpush.bf16.msra.mxu0 %v11368_v62  ;;  %v9449_v55 = vld [vmem:[#allocation2 + $0x168] sm:$0xf0] }
 0x1fc   :  { %v14608_v59 = vld [vmem:[#allocation2 + $0x1464] sm:$0xf0]  ;;  %v9705_v57 = vld [vmem:[#allocation2 + $0x368] sm:$0xf0]  ;;  %v9452_v62 = vor.u32 %v13996_v54, %v9449_v55 }
 0x1fd   :  { %v12135_v60 = vld [vmem:[#allocation2 + $0x1648] sm:$0xf]  ;;  %v11880_v2 = vor.u32 %v14608_v59, %v11879_v58  ;;  %5160 = vmatpush.bf16.msra.mxu1 %v11624_v1  ;;  %v14124_v58 = vld [vmem:[#allocation2 + $0x54c] sm:$0xf] }
 0x1fe   :  { %v14672_v61 = vld [vmem:[#allocation2 + $0x1664] sm:$0xf0]  ;;  %v9961_v59 = vld [vmem:[#allocation2 + $0x568] sm:$0xf0] }
 0x1ff   :  { %v11335_v63 = vld [vmem:[#allocation2 + $0x1008] sm:$0xf]  ;;  %v12136_v7 = vor.u32 %v14672_v61, %v12135_v60  ;;  %5173 = vmatpush.bf16.msra.mxu2 %v11880_v2  ;;  %v14188_v60 = vld [vmem:[#allocation2 + $0x74c] sm:$0xf] }
 0x200   :  { %v14472_v0 = vld [vmem:[#allocation2 + $0x1024] sm:$0xf0]  ;;  %v10217_v61 = vld [vmem:[#allocation2 + $0x768] sm:$0xf0] }
 0x201   :  { %v11591_v3 = vld [vmem:[#allocation2 + $0x1208] sm:$0xf]  ;;  %v11336_v14 = vor.u32 %v14472_v0, %v11335_v63  ;;  %5186 = vmatpush.bf16.msra.mxu3 %v12136_v7  ;;  %v9708_v63 = vor.u32 %v14060_v56, %v9705_v57  ;;  %v9964_v0 = vor.u32 %v14124_v58, %v9961_v59  ;;  %v13988_v1 = vld [vmem:[#allocation2 + $0x10c] sm:$0xf] }
 0x202   :  { %v14536_v4 = vld [vmem:[#allocation2 + $0x1224] sm:$0xf0]  ;;  %v9417_v2 = vld [vmem:[#allocation2 + $0x128] sm:$0xf0] }
 0x203   :  { %v11847_v5 = vld [vmem:[#allocation2 + $0x1408] sm:$0xf]  ;;  %v11592_v19 = vor.u32 %v14536_v4, %v11591_v3  ;;  %5148 = vmatpush.bf16.msra.mxu0 %v11336_v14  ;;  %v14052_v3 = vld [vmem:[#allocation2 + $0x30c] sm:$0xf]  ;;  %v10220_v4 = vor.u32 %v14188_v60, %v10217_v61 }
 0x204   :  { %v14600_v8 = vld [vmem:[#allocation2 + $0x1424] sm:$0xf0]  ;;  %v9929_v7 = vld [vmem:[#allocation2 + $0x528] sm:$0xf0] }
 0x205   :  { %v12103_v9 = vld [vmem:[#allocation2 + $0x1608] sm:$0xf]  ;;  %v11848_v20 = vor.u32 %v14600_v8, %v11847_v5  ;;  %5161 = vmatpush.bf16.msra.mxu1 %v11592_v19  ;;  %v9673_v5 = vld [vmem:[#allocation2 + $0x328] sm:$0xf0]  ;;  %v9932_v12 = vor.u32 %v14116_v6, %v9929_v7 }
 0x206   :  { %v14664_v10 = vld [vmem:[#allocation2 + $0x1624] sm:$0xf0]  ;;  %5149 = vmatmul.bf16.vlgmr.msra.gmra.mxu0 %v15245_v18  ;;  %v14180_v8 = vld [vmem:[#allocation2 + $0x70c] sm:$0xf]  ;;  %v9676_v21 = vor.u32 %v14052_v3, %v9673_v5 }
 0x207   :  { %v12104_v27 = vor.u32 %v14664_v10, %v12103_v9  ;;  %5174 = vmatpush.bf16.msra.mxu2 %v11848_v20  ;;  %5193 = vmatpush.bf16.msrb.mxu0 %v9516_v28  ;;  %v10185_v9 = vld [vmem:[#allocation2 + $0x728] sm:$0xf0]  ;;  %v9420_v10 = vor.u32 %v13988_v1, %v9417_v2 }
 0x208   :  { %5162 = vmatmul.bf16.vlgmr.msra.gmra.mxu1 %v15249_v23  ;;  %v9385_v14 = vld [vmem:[#allocation2 + $0xe8] sm:$0xf0]  ;;  %v10188_v19 = vor.u32 %v14180_v8, %v10185_v9 }
 0x209   :  { %5187 = vmatpush.bf16.msra.mxu3 %v12104_v27  ;;  %5206 = vmatpush.bf16.msrb.mxu1 %v9772_v29  ;;  %v14044_v15 = vld [vmem:[#allocation2 + $0x2cc] sm:$0xf]  ;;  %v4956_v29 = vadd.f32 %v4955_v17, %v4943_v16 }
 0x20a   :  { %5175 = vmatmul.bf16.vlgmr.msra.gmra.mxu2 %v15247_v22  ;;  %v9641_v20 = vld [vmem:[#allocation2 + $0x2e8] sm:$0xf0] }
 0x20b   :  { %5219 = vmatpush.bf16.msrb.mxu2 %v10028_v30  ;;  %5194 = vmatpush.bf16.msrb.mxu0 %v9484_v50  ;;  %v14108_v24 = vld [vmem:[#allocation2 + $0x4cc] sm:$0xf]  ;;  %v9388_v30 = vor.u32 %v13980_v13, %v9385_v14  ;;  %v9644_v31 = vor.u32 %v14044_v15, %v9641_v20  ;;  %v4969_v50 = vadd.f32 %v4968_v45, %v4956_v29 }
 0x20c   :  { %5188 = vmatmul.bf16.vlgmr.msra.gmra.mxu3 %v15251_v26  ;;  %v9897_v25 = vld [vmem:[#allocation2 + $0x4e8] sm:$0xf0] }
 0x20d   :  { %5232 = vmatpush.bf16.msrb.mxu3 %v10284_v40  ;;  %5207 = vmatpush.bf16.msrb.mxu1 %v9740_v51  ;;  %v14172_v27 = vld [vmem:[#allocation2 + $0x6cc] sm:$0xf]  ;;  %v9900_v32 = vor.u32 %v14108_v24, %v9897_v25  ;;  %v4981_v51 = vpop.f32.mrf.mxu3 }
 0x20e   :  { %v10153_v28 = vld [vmem:[#allocation2 + $0x6e8] sm:$0xf0]  ;;  %v15296_v56 = vadd.f32 %v4981_v51, %v4969_v50 }
 0x20f   :  { %5220 = vmatpush.bf16.msrb.mxu2 %v9996_v52  ;;  %5195 = vmatpush.bf16.msrb.mxu0 %v9452_v62  ;;  %v13972_v37 = vld [vmem:[#allocation2 + $0x8c] sm:$0xf]  ;;  %v10156_v48 = vor.u32 %v14172_v27, %v10153_v28  ;;  %v4957_v62 = vpop.f32.mrf.mxu1 }
 0x210   :  { %v9353_v40 = vld [vmem:[#allocation2 + $0xa8] sm:$0xf0] }
 0x211   :  { %5233 = vmatpush.bf16.msrb.mxu3 %v10252_v53  ;;  %5208 = vmatpush.bf16.msrb.mxu1 %v9708_v63  ;;  %v14036_v44 = vld [vmem:[#allocation2 + $0x28c] sm:$0xf]  ;;  %v9356_v55 = vor.u32 %v13972_v37, %v9353_v40  ;;  %v4944_v53 = vpop.f32.mrf.mxu0 }
 0x212   :  { %v9609_v46 = vld [vmem:[#allocation2 + $0x2a8] sm:$0xf0] }
 0x213   :  { %5221 = vmatpush.bf16.msrb.mxu2 %v9964_v0  ;;  %5196 = vmatpush.bf16.msrb.mxu0 %v9420_v10  ;;  %v14100_v47 = vld [vmem:[#allocation2 + $0x48c] sm:$0xf]  ;;  %v9612_v57 = vor.u32 %v14036_v44, %v9609_v46 }
 0x214   :  { %v9865_v49 = vld [vmem:[#allocation2 + $0x4a8] sm:$0xf0] }
 0x215   :  { %5234 = vmatpush.bf16.msrb.mxu3 %v10220_v4  ;;  %5209 = vmatpush.bf16.msrb.mxu1 %v9676_v21  ;;  %v14164_v52 = vld [vmem:[#allocation2 + $0x68c] sm:$0xf]  ;;  %v9868_v58 = vor.u32 %v14100_v47, %v9865_v49  ;;  %v4983_v17 = vpop.f32.mrf.mxu3 }
 0x216   :  { %v10121_v54 = vld [vmem:[#allocation2 + $0x6a8] sm:$0xf0] }
 0x217   :  { %5222 = vmatpush.bf16.msrb.mxu2 %v9932_v12  ;;  %5197 = vmatpush.bf16.msrb.mxu0 %v9388_v30  ;;  %v13964_v59 = vld [vmem:[#allocation2 + $0x4c] sm:$0xf]  ;;  %v10124_v63 = vor.u32 %v14164_v52, %v10121_v54  ;;  %v4970_v12 = vpop.f32.mrf.mxu2 }
 0x218   :  { %v9321_v60 = vld [vmem:[#allocation2 + $0x68] sm:$0xf0] }
 0x219   :  { %5235 = vmatpush.bf16.msrb.mxu3 %v10188_v19  ;;  %5210 = vmatpush.bf16.msrb.mxu1 %v9644_v31  ;;  %v14028_v61 = vld [vmem:[#allocation2 + $0x24c] sm:$0xf]  ;;  %v9324_v5 = vor.u32 %v13964_v59, %v9321_v60 }
 0x21a   :  { %v9577_v0 = vld [vmem:[#allocation2 + $0x268] sm:$0xf0] }
 0x21b   :  { %5223 = vmatpush.bf16.msrb.mxu2 %v9900_v32  ;;  %v14092_v1 = vld [vmem:[#allocation2 + $0x44c] sm:$0xf]  ;;  %5198 = vmatpush.bf16.msrb.mxu0 %v9356_v55  ;;  %v9580_v8 = vor.u32 %v14028_v61, %v9577_v0 }
 0x21c   :  { %v9833_v2 = vld [vmem:[#allocation2 + $0x468] sm:$0xf0] }
 0x21d   :  { %5236 = vmatpush.bf16.msrb.mxu3 %v10156_v48  ;;  %v14156_v3 = vld [vmem:[#allocation2 + $0x64c] sm:$0xf]  ;;  %5211 = vmatpush.bf16.msrb.mxu1 %v9612_v57  ;;  %v9836_v9 = vor.u32 %v14092_v1, %v9833_v2 }
 0x21e   :  { %v10089_v4 = vld [vmem:[#allocation2 + $0x668] sm:$0xf0] }
 0x21f   :  { %v13956_v6 = vld [vmem:[#allocation2 + $0xc] sm:$0xf]  ;;  %5224 = vmatpush.bf16.msrb.mxu2 %v9868_v58  ;;  %v10092_v13 = vor.u32 %v14156_v3, %v10089_v4  ;;  %5199 = vmatpush.bf16.msrb.mxu0 %v9324_v5 }
 0x220   :  { %v9289_v7 = vld [vmem:[#allocation2 + $0x28] sm:$0xf0] }
 0x221   :  { %v14020_v10 = vld [vmem:[#allocation2 + $0x20c] sm:$0xf]  ;;  %5237 = vmatpush.bf16.msrb.mxu3 %v10124_v63  ;;  %v9292_v25 = vor.u32 %v13956_v6, %v9289_v7  ;;  %5212 = vmatpush.bf16.msrb.mxu1 %v9580_v8 }
 0x222   :  { %v9545_v11 = vld [vmem:[#allocation2 + $0x228] sm:$0xf0] }
 0x223   :  { %v14084_v21 = vld [vmem:[#allocation2 + $0x40c] sm:$0xf]  ;;  %5225 = vmatpush.bf16.msrb.mxu2 %v9836_v9  ;;  %v9548_v30 = vor.u32 %v14020_v10, %v9545_v11  ;;  %5200 = vmatpush.bf16.msrb.mxu0 %v9292_v25 }
 0x224   :  { %v9801_v14 = vld [vmem:[#allocation2 + $0x428] sm:$0xf0] }
 0x225   :  { %v14148_v15 = vld [vmem:[#allocation2 + $0x60c] sm:$0xf]  ;;  %v9804_v31 = vor.u32 %v14084_v21, %v9801_v14  ;;  %5238 = vmatpush.bf16.msrb.mxu3 %v10092_v13  ;;  %5213 = vmatpush.bf16.msrb.mxu1 %v9548_v30  ;;  %v4994_v14 = vpop.f32.mrf.mxu0 }
 0x226   :  { %v10057_v16 = vld [vmem:[#allocation2 + $0x628] sm:$0xf0]  ;;  %5201 = vmatmul.bf16.vlgmr.msrb.gmra.mxu0 %v15220_v36  ;;  %v4995_v17 = vadd.f32 %v4994_v14, %v15296_v56 }
 0x227   :  { %v14268_v19 = vld [vmem:[#allocation2 + $0x9cc] sm:$0xf]  ;;  %v10060_v40 = vor.u32 %v14148_v15, %v10057_v16  ;;  %5226 = vmatpush.bf16.msrb.mxu2 %v9804_v31 }
 0x228   :  { %v10537_v20 = vld [vmem:[#allocation2 + $0x9e8] sm:$0xf0]  ;;  %5214 = vmatmul.bf16.vlgmr.msrb.gmra.mxu1 %v15224_v43 }
 0x229   :  { %v14332_v24 = vld [vmem:[#allocation2 + $0xbcc] sm:$0xf]  ;;  %v10540_v44 = vor.u32 %v14268_v19, %v10537_v20  ;;  %5239 = vmatpush.bf16.msrb.mxu3 %v10060_v40  ;;  %v5007_v20 = vpop.f32.mrf.mxu1 }
 0x22a   :  { %v10793_v27 = vld [vmem:[#allocation2 + $0xbe8] sm:$0xf0]  ;;  %5227 = vmatmul.bf16.vlgmr.msrb.gmra.mxu2 %v15218_v35  ;;  %v5008_v31 = vadd.f32 %v5007_v20, %v4995_v17 }
 0x22b   :  { %v14396_v28 = vld [vmem:[#allocation2 + $0xdcc] sm:$0xf]  ;;  %v10796_v45 = vor.u32 %v14332_v24, %v10793_v27  ;;  %5245 = vmatpush.bf16.msra.mxu0 %v10540_v44 }
 0x22c   :  { %v11049_v29 = vld [vmem:[#allocation2 + $0xde8] sm:$0xf0]  ;;  %5240 = vmatmul.bf16.vlgmr.msrb.gmra.mxu3 %v15222_v42 }
 0x22d   :  { %v14460_v32 = vld [vmem:[#allocation2 + $0xfcc] sm:$0xf]  ;;  %v11052_v48 = vor.u32 %v14396_v28, %v11049_v29  ;;  %5258 = vmatpush.bf16.msra.mxu1 %v10796_v45 }
 0x22e   :  { %v11305_v37 = vld [vmem:[#allocation2 + $0xfe8] sm:$0xf0] }
 0x22f   :  { %v14260_v46 = vld [vmem:[#allocation2 + $0x98c] sm:$0xf]  ;;  %v11308_v50 = vor.u32 %v14460_v32, %v11305_v37  ;;  %5271 = vmatpush.bf16.msra.mxu2 %v11052_v48 }
 0x230   :  { %v10505_v47 = vld [vmem:[#allocation2 + $0x9a8] sm:$0xf0] }
 0x231   :  { %v14324_v49 = vld [vmem:[#allocation2 + $0xb8c] sm:$0xf]  ;;  %v10508_v57 = vor.u32 %v14260_v46, %v10505_v47  ;;  %5284 = vmatpush.bf16.msra.mxu3 %v11308_v50 }
 0x232   :  { %v10761_v51 = vld [vmem:[#allocation2 + $0xba8] sm:$0xf0] }
 0x233   :  { %v14388_v52 = vld [vmem:[#allocation2 + $0xd8c] sm:$0xf]  ;;  %v10764_v58 = vor.u32 %v14324_v49, %v10761_v51  ;;  %5246 = vmatpush.bf16.msra.mxu0 %v10508_v57 }
 0x234   :  { %v11017_v54 = vld [vmem:[#allocation2 + $0xda8] sm:$0xf0] }
 0x235   :  { %v14452_v55 = vld [vmem:[#allocation2 + $0xf8c] sm:$0xf]  ;;  %v11020_v59 = vor.u32 %v14388_v52, %v11017_v54  ;;  %5259 = vmatpush.bf16.msra.mxu1 %v10764_v58  ;;  %v5020_v52 = vpop.f32.mrf.mxu2  ;;  %v5033_v58 = vpop.f32.mrf.mxu3 }
 0x236   :  { %v11273_v53 = vld [vmem:[#allocation2 + $0xfa8] sm:$0xf0]  ;;  %v5021_v57 = vadd.f32 %v5020_v52, %v5008_v31 }
 0x237   :  { %v14252_v60 = vld [vmem:[#allocation2 + $0x94c] sm:$0xf]  ;;  %v11276_v63 = vor.u32 %v14452_v55, %v11273_v53  ;;  %5272 = vmatpush.bf16.msra.mxu2 %v11020_v59 }
 0x238   :  { %v10473_v61 = vld [vmem:[#allocation2 + $0x968] sm:$0xf0] }
 0x239   :  { %v14316_v62 = vld [vmem:[#allocation2 + $0xb4c] sm:$0xf]  ;;  %v10476_v5 = vor.u32 %v14252_v60, %v10473_v61  ;;  %5285 = vmatpush.bf16.msra.mxu3 %v11276_v63  ;;  %v4996_v61 = vpop.f32.mrf.mxu0  ;;  %v5009_v63 = vpop.f32.mrf.mxu1 }
 0x23a   :  { %v10729_v0 = vld [vmem:[#allocation2 + $0xb68] sm:$0xf0] }
 0x23b   :  { %v14380_v1 = vld [vmem:[#allocation2 + $0xd4c] sm:$0xf]  ;;  %v10732_v6 = vor.u32 %v14316_v62, %v10729_v0  ;;  %5247 = vmatpush.bf16.msra.mxu0 %v10476_v5  ;;  %v15303_v0 = vadd.f32 %v5033_v58, %v5021_v57 }
 0x23c   :  { %v10985_v2 = vld [vmem:[#allocation2 + $0xd68] sm:$0xf0] }
 0x23d   :  { %v14444_v3 = vld [vmem:[#allocation2 + $0xf4c] sm:$0xf]  ;;  %v10988_v7 = vor.u32 %v14380_v1, %v10985_v2  ;;  %5260 = vmatpush.bf16.msra.mxu1 %v10732_v6 }
 0x23e   :  { %v11241_v4 = vld [vmem:[#allocation2 + $0xf68] sm:$0xf0] }
 0x23f   :  { %v14244_v8 = vld [vmem:[#allocation2 + $0x90c] sm:$0xf]  ;;  %v11244_v11 = vor.u32 %v14444_v3, %v11241_v4  ;;  %5273 = vmatpush.bf16.msra.mxu2 %v10988_v7 }
 0x240   :  { %v10441_v9 = vld [vmem:[#allocation2 + $0x928] sm:$0xf0] }
 0x241   :  { %v14308_v10 = vld [vmem:[#allocation2 + $0xb0c] sm:$0xf]  ;;  %v10444_v19 = vor.u32 %v14244_v8, %v10441_v9  ;;  %5286 = vmatpush.bf16.msra.mxu3 %v11244_v11 }
 0x242   :  { %v10697_v21 = vld [vmem:[#allocation2 + $0xb28] sm:$0xf0] }
 0x243   :  { %v14372_v12 = vld [vmem:[#allocation2 + $0xd0c] sm:$0xf]  ;;  %v10700_v24 = vor.u32 %v14308_v10, %v10697_v21  ;;  %5248 = vmatpush.bf16.msra.mxu0 %v10444_v19 }
 0x244   :  { %v10953_v13 = vld [vmem:[#allocation2 + $0xd28] sm:$0xf0] }
 0x245   :  { %v14436_v15 = vld [vmem:[#allocation2 + $0xf0c] sm:$0xf]  ;;  %v10956_v25 = vor.u32 %v14372_v12, %v10953_v13  ;;  %5261 = vmatpush.bf16.msra.mxu1 %v10700_v24 }
 0x246   :  { %v11209_v16 = vld [vmem:[#allocation2 + $0xf28] sm:$0xf0] }
 0x247   :  { %v14236_v27 = vld [vmem:[#allocation2 + $0x8cc] sm:$0xf]  ;;  %v11212_v30 = vor.u32 %v14436_v15, %v11209_v16  ;;  %5274 = vmatpush.bf16.msra.mxu2 %v10956_v25 }
 0x248   :  { %v10409_v28 = vld [vmem:[#allocation2 + $0x8e8] sm:$0xf0] }
 0x249   :  { %v14300_v29 = vld [vmem:[#allocation2 + $0xacc] sm:$0xf]  ;;  %v10412_v48 = vor.u32 %v14236_v27, %v10409_v28  ;;  %5287 = vmatpush.bf16.msra.mxu3 %v11212_v30  ;;  %v5022_v28 = vpop.f32.mrf.mxu2 }
 0x24a   :  { %v10665_v32 = vld [vmem:[#allocation2 + $0xae8] sm:$0xf0] }
 0x24b   :  { %v14364_v37 = vld [vmem:[#allocation2 + $0xccc] sm:$0xf]  ;;  %v10668_v56 = vor.u32 %v14300_v29, %v10665_v32  ;;  %5249 = vmatpush.bf16.msra.mxu0 %v10412_v48  ;;  %v5035_v32 = vpop.f32.mrf.mxu3 }
 0x24c   :  { %v10921_v40 = vld [vmem:[#allocation2 + $0xce8] sm:$0xf0]  ;;  %v5046_v32 = vpop.f32.mrf.mxu0 }
 0x24d   :  { %v14428_v44 = vld [vmem:[#allocation2 + $0xecc] sm:$0xf]  ;;  %v10924_v46 = vor.u32 %v14364_v37, %v10921_v40  ;;  %5262 = vmatpush.bf16.msra.mxu1 %v10668_v56 }
 0x24e   :  { %v11177_v45 = vld [vmem:[#allocation2 + $0xee8] sm:$0xf0] }
 0x24f   :  { %v14228_v47 = vld [vmem:[#allocation2 + $0x88c] sm:$0xf]  ;;  %v11180_v51 = vor.u32 %v14428_v44, %v11177_v45  ;;  %5275 = vmatpush.bf16.msra.mxu2 %v10924_v46 }
 0x250   :  { %v10377_v49 = vld [vmem:[#allocation2 + $0x8a8] sm:$0xf0] }
 0x251   :  { %v14292_v50 = vld [vmem:[#allocation2 + $0xa8c] sm:$0xf]  ;;  %v10380_v62 = vor.u32 %v14228_v47, %v10377_v49  ;;  %5288 = vmatpush.bf16.msra.mxu3 %v11180_v51 }
 0x252   :  { %v10633_v54 = vld [vmem:[#allocation2 + $0xaa8] sm:$0xf0] }
 0x253   :  { %v14356_v55 = vld [vmem:[#allocation2 + $0xc8c] sm:$0xf]  ;;  %v10636_v1 = vor.u32 %v14292_v50, %v10633_v54  ;;  %5250 = vmatpush.bf16.msra.mxu0 %v10380_v62 }
 0x254   :  { %v10889_v53 = vld [vmem:[#allocation2 + $0xca8] sm:$0xf0] }
 0x255   :  { %v14420_v59 = vld [vmem:[#allocation2 + $0xe8c] sm:$0xf]  ;;  %v10892_v2 = vor.u32 %v14356_v55, %v10889_v53  ;;  %5263 = vmatpush.bf16.msra.mxu1 %v10636_v1 }
 0x256   :  { %v11145_v60 = vld [vmem:[#allocation2 + $0xea8] sm:$0xf0] }
 0x257   :  { %v14220_v3 = vld [vmem:[#allocation2 + $0x84c] sm:$0xf]  ;;  %v11148_v6 = vor.u32 %v14420_v59, %v11145_v60  ;;  %5276 = vmatpush.bf16.msra.mxu2 %v10892_v2 }
 0x258   :  { %v10345_v4 = vld [vmem:[#allocation2 + $0x868] sm:$0xf0] }
 0x259   :  { %v14284_v5 = vld [vmem:[#allocation2 + $0xa4c] sm:$0xf]  ;;  %v10348_v21 = vor.u32 %v14220_v3, %v10345_v4  ;;  %5289 = vmatpush.bf16.msra.mxu3 %v11148_v6 }
 0x25a   :  { %v10601_v7 = vld [vmem:[#allocation2 + $0xa68] sm:$0xf0] }
 0x25b   :  { %v14348_v8 = vld [vmem:[#allocation2 + $0xc4c] sm:$0xf]  ;;  %v10604_v14 = vor.u32 %v14284_v5, %v10601_v7  ;;  %5251 = vmatpush.bf16.msra.mxu0 %v10348_v21  ;;  %v15308_v7 = vld [vmem:[%s17985_s5 + $0x8] sm:$0xff] }
 0x25c   :  { %v10857_v9 = vld [vmem:[#allocation2 + $0xc68] sm:$0xf0] }
 0x25d   :  { %v14412_v10 = vld [vmem:[#allocation2 + $0xe4c] sm:$0xf]  ;;  %v10860_v15 = vor.u32 %v14348_v8, %v10857_v9  ;;  %5264 = vmatpush.bf16.msra.mxu1 %v10604_v14 }
 0x25e   :  { %v11113_v11 = vld [vmem:[#allocation2 + $0xe68] sm:$0xf0] }
 0x25f   :  { %v14212_v12 = vld [vmem:[#allocation2 + $0x80c] sm:$0xf]  ;;  %v11116_v20 = vor.u32 %v14412_v10, %v11113_v11  ;;  %5277 = vmatpush.bf16.msra.mxu2 %v10860_v15  ;;  %v863_v11 = vperm.slane %v15308_v7, 0 }
 0x260   :  { %v10313_v13 = vld [vmem:[#allocation2 + $0x828] sm:$0xf0] }
 0x261   :  { %v14276_v16 = vld [vmem:[#allocation2 + $0xa0c] sm:$0xf]  ;;  %v10316_v37 = vor.u32 %v14212_v12, %v10313_v13  ;;  %5290 = vmatpush.bf16.msra.mxu3 %v11116_v20  ;;  %v879_v20 = vperm.slane %v863_v11, 0  ;;  %v5048_v11 = vpop.f32.mrf.mxu0 }
 0x262   :  { %v10569_v17 = vld [vmem:[#allocation2 + $0xa28] sm:$0xf0]  ;;  %v14137_v11 = vld [vmem:[#allocation2 + $0x5ac] sm:$0xf0] }
 0x263   :  { %v14340_v19 = vld [vmem:[#allocation2 + $0xc0c] sm:$0xf]  ;;  %v10572_v48 = vor.u32 %v14276_v16, %v10569_v17  ;;  %5252 = vmatpush.bf16.msra.mxu0 %v10316_v37 }
 0x264   :  { %v10825_v24 = vld [vmem:[#allocation2 + $0xc28] sm:$0xf0] }
 0x265   :  { %v14404_v25 = vld [vmem:[#allocation2 + $0xe0c] sm:$0xf]  ;;  %v10828_v56 = vor.u32 %v14340_v19, %v10825_v24  ;;  %5265 = vmatpush.bf16.msra.mxu1 %v10572_v48 }
 0x266   :  { %v11081_v27 = vld [vmem:[#allocation2 + $0xe28] sm:$0xf0]  ;;  %5253 = vmatmul.bf16.vlgmr.msra.gmra.mxu0 %v15235_v38 }
 0x267   :  { %v14524_v29 = vld [vmem:[#allocation2 + $0x11cc] sm:$0xf]  ;;  %v11084_v49 = vor.u32 %v14404_v25, %v11081_v27  ;;  %5278 = vmatpush.bf16.msra.mxu2 %v10828_v56  ;;  %v5047_v56 = vadd.f32 %v5046_v32, %v879_v20 }
 0x268   :  { %v11561_v30 = vld [vmem:[#allocation2 + $0x11e8] sm:$0xf0]  ;;  %5266 = vmatmul.bf16.vlgmr.msra.gmra.mxu1 %v15239_v41 }
 0x269   :  { %v14588_v31 = vld [vmem:[#allocation2 + $0x13cc] sm:$0xf]  ;;  %v11564_v50 = vor.u32 %v14524_v29, %v11561_v30  ;;  %5291 = vmatpush.bf16.msra.mxu3 %v11084_v49 }
 0x26a   :  { %v11817_v40 = vld [vmem:[#allocation2 + $0x13e8] sm:$0xf0]  ;;  %5279 = vmatmul.bf16.vlgmr.msra.gmra.mxu2 %v15233_v33 }
 0x26b   :  { %v14652_v44 = vld [vmem:[#allocation2 + $0x15cc] sm:$0xf]  ;;  %v11820_v51 = vor.u32 %v14588_v31, %v11817_v40  ;;  %5297 = vmatpush.bf16.msrb.mxu0 %v11564_v50 }
 0x26c   :  { %v12073_v45 = vld [vmem:[#allocation2 + $0x15e8] sm:$0xf0]  ;;  %5292 = vmatmul.bf16.vlgmr.msra.gmra.mxu3 %v15237_v39 }
 0x26d   :  { %v14716_v46 = vld [vmem:[#allocation2 + $0x17cc] sm:$0xf]  ;;  %v12076_v52 = vor.u32 %v14652_v44, %v12073_v45  ;;  %5310 = vmatpush.bf16.msrb.mxu1 %v11820_v51 }
 0x26e   :  { %v12329_v47 = vld [vmem:[#allocation2 + $0x17e8] sm:$0xf0] }
 0x26f   :  { %v14516_v54 = vld [vmem:[#allocation2 + $0x118c] sm:$0xf]  ;;  %v12332_v57 = vor.u32 %v14716_v46, %v12329_v47  ;;  %5323 = vmatpush.bf16.msrb.mxu2 %v12076_v52  ;;  %v5059_v46 = vpop.f32.mrf.mxu1 }
 0x270   :  { %v11529_v55 = vld [vmem:[#allocation2 + $0x11a8] sm:$0xf0] }
 0x271   :  { %v14580_v53 = vld [vmem:[#allocation2 + $0x138c] sm:$0xf]  ;;  %v11532_v63 = vor.u32 %v14516_v54, %v11529_v55  ;;  %5336 = vmatpush.bf16.msrb.mxu3 %v12332_v57  ;;  %v5060_v55 = vadd.f32 %v5059_v46, %v5047_v56 }
 0x272   :  { %v11785_v58 = vld [vmem:[#allocation2 + $0x13a8] sm:$0xf0] }
 0x273   :  { %v14644_v59 = vld [vmem:[#allocation2 + $0x158c] sm:$0xf]  ;;  %v11788_v3 = vor.u32 %v14580_v53, %v11785_v58  ;;  %5298 = vmatpush.bf16.msrb.mxu0 %v11532_v63 }
 0x274   :  { %v12041_v60 = vld [vmem:[#allocation2 + $0x15a8] sm:$0xf0] }
 0x275   :  { %v14708_v61 = vld [vmem:[#allocation2 + $0x178c] sm:$0xf]  ;;  %v12044_v4 = vor.u32 %v14644_v59, %v12041_v60  ;;  %5311 = vmatpush.bf16.msrb.mxu1 %v11788_v3 }
 0x276   :  { %v12297_v62 = vld [vmem:[#allocation2 + $0x17a8] sm:$0xf0] }
 0x277   :  { %v14508_v1 = vld [vmem:[#allocation2 + $0x114c] sm:$0xf]  ;;  %v12300_v8 = vor.u32 %v14708_v61, %v12297_v62  ;;  %5324 = vmatpush.bf16.msrb.mxu2 %v12044_v4  ;;  %v5072_v62 = vpop.f32.mrf.mxu2 }
 0x278   :  { %v11497_v2 = vld [vmem:[#allocation2 + $0x1168] sm:$0xf0]  ;;  %v5073_v4 = vadd.f32 %v5072_v62, %v5060_v55  ;;  %v14081_v55 = vld [vmem:[#allocation2 + $0x3ec] sm:$0xf0] }
 0x279   :  { %v14572_v5 = vld [vmem:[#allocation2 + $0x134c] sm:$0xf]  ;;  %v11500_v13 = vor.u32 %v14508_v1, %v11497_v2  ;;  %5337 = vmatpush.bf16.msrb.mxu3 %v12300_v8 }
 0x27a   :  { %v11753_v6 = vld [vmem:[#allocation2 + $0x1368] sm:$0xf0] }
 0x27b   :  { %v14636_v9 = vld [vmem:[#allocation2 + $0x154c] sm:$0xf]  ;;  %v11756_v15 = vor.u32 %v14572_v5, %v11753_v6  ;;  %5299 = vmatpush.bf16.msrb.mxu0 %v11500_v13  ;;  %v5085_v5 = vpop.f32.mrf.mxu3 }
 0x27c   :  { %v12009_v10 = vld [vmem:[#allocation2 + $0x1568] sm:$0xf0] }
 0x27d   :  { %v14700_v21 = vld [vmem:[#allocation2 + $0x174c] sm:$0xf]  ;;  %v12012_v16 = vor.u32 %v14636_v9, %v12009_v10  ;;  %5312 = vmatpush.bf16.msrb.mxu1 %v11756_v15  ;;  %v15315_v10 = vadd.f32 %v5085_v5, %v5073_v4  ;;  %v14009_v4 = vld [vmem:[#allocation2 + $0x1ac] sm:$0xf0] }
 0x27e   :  { %v12265_v12 = vld [vmem:[#allocation2 + $0x1768] sm:$0xf0]  ;;  %v9743_v5 = vld [vmem:[#allocation2 + $0x390] sm:$0xf] }
 0x27f   :  { %v14500_v14 = vld [vmem:[#allocation2 + $0x110c] sm:$0xf]  ;;  %v12268_v24 = vor.u32 %v14700_v21, %v12265_v12  ;;  %5325 = vmatpush.bf16.msrb.mxu2 %v12012_v16  ;;  %v5061_v16 = vpop.f32.mrf.mxu1 }
 0x280   :  { %v11465_v17 = vld [vmem:[#allocation2 + $0x1128] sm:$0xf0]  ;;  %v9455_v16 = vld [vmem:[#allocation2 + $0x150] sm:$0xf] }
 0x281   :  { %v14564_v19 = vld [vmem:[#allocation2 + $0x130c] sm:$0xf]  ;;  %v11468_v31 = vor.u32 %v14500_v14, %v11465_v17  ;;  %5338 = vmatpush.bf16.msrb.mxu3 %v12268_v24 }
 0x282   :  { %v11721_v25 = vld [vmem:[#allocation2 + $0x1328] sm:$0xf0] }
 0x283   :  { %v14628_v27 = vld [vmem:[#allocation2 + $0x150c] sm:$0xf]  ;;  %v11724_v37 = vor.u32 %v14564_v19, %v11721_v25  ;;  %5300 = vmatpush.bf16.msrb.mxu0 %v11468_v31 }
 0x284   :  { %v11977_v28 = vld [vmem:[#allocation2 + $0x1528] sm:$0xf0] }
 0x285   :  { %v14692_v29 = vld [vmem:[#allocation2 + $0x170c] sm:$0xf]  ;;  %v11980_v40 = vor.u32 %v14628_v27, %v11977_v28  ;;  %5313 = vmatpush.bf16.msrb.mxu1 %v11724_v37 }
 0x286   :  { %v12233_v30 = vld [vmem:[#allocation2 + $0x1728] sm:$0xf0] }
 0x287   :  { %v14492_v44 = vld [vmem:[#allocation2 + $0x10cc] sm:$0xf]  ;;  %v12236_v47 = vor.u32 %v14692_v29, %v12233_v30  ;;  %5326 = vmatpush.bf16.msrb.mxu2 %v11980_v40 }
 0x288   :  { %v11433_v45 = vld [vmem:[#allocation2 + $0x10e8] sm:$0xf0] }
 0x289   :  { %v14556_v48 = vld [vmem:[#allocation2 + $0x12cc] sm:$0xf]  ;;  %v11436_v53 = vor.u32 %v14492_v44, %v11433_v45  ;;  %5339 = vmatpush.bf16.msrb.mxu3 %v12236_v47  ;;  %v5074_v45 = vpop.f32.mrf.mxu2 }
 0x28a   :  { %v11689_v49 = vld [vmem:[#allocation2 + $0x12e8] sm:$0xf0] }
 0x28b   :  { %v14620_v50 = vld [vmem:[#allocation2 + $0x14cc] sm:$0xf]  ;;  %v11692_v57 = vor.u32 %v14556_v48, %v11689_v49  ;;  %5301 = vmatpush.bf16.msrb.mxu0 %v11436_v53  ;;  %v5087_v49 = vpop.f32.mrf.mxu3  ;;  %v10031_v53 = vld [vmem:[#allocation2 + $0x5d0] sm:$0xf] }
 0x28c   :  { %v11945_v51 = vld [vmem:[#allocation2 + $0x14e8] sm:$0xf0]  ;;  %v14185_v49 = vld [vmem:[#allocation2 + $0x72c] sm:$0xf0] }
 0x28d   :  { %v14684_v52 = vld [vmem:[#allocation2 + $0x16cc] sm:$0xf]  ;;  %v11948_v58 = vor.u32 %v14620_v50, %v11945_v51  ;;  %5314 = vmatpush.bf16.msrb.mxu1 %v11692_v57  ;;  %v9519_v50 = vld [vmem:[#allocation2 + $0x1d0] sm:$0xf] }
 0x28e   :  { %v12201_v54 = vld [vmem:[#allocation2 + $0x16e8] sm:$0xf0]  ;;  %v14017_v51 = vld [vmem:[#allocation2 + $0x1ec] sm:$0xf0] }
 0x28f   :  { %v14484_v59 = vld [vmem:[#allocation2 + $0x108c] sm:$0xf]  ;;  %v12204_v63 = vor.u32 %v14684_v52, %v12201_v54  ;;  %5327 = vmatpush.bf16.msrb.mxu2 %v11948_v58  ;;  %v9775_v52 = vld [vmem:[#allocation2 + $0x3d0] sm:$0xf] }
 0x290   :  { %v11401_v60 = vld [vmem:[#allocation2 + $0x10a8] sm:$0xf0]  ;;  %v14145_v57 = vld [vmem:[#allocation2 + $0x5ec] sm:$0xf0] }
 0x291   :  { %v14548_v61 = vld [vmem:[#allocation2 + $0x128c] sm:$0xf]  ;;  %v11404_v9 = vor.u32 %v14484_v59, %v11401_v60  ;;  %5340 = vmatpush.bf16.msrb.mxu3 %v12204_v63  ;;  %v10287_v60 = vld [vmem:[#allocation2 + $0x7d0] sm:$0xf]  ;;  %v9520_v63 = vor.u32 %v14017_v51, %v9519_v50  ;;  %v5098_v51 = vpop.f32.mrf.mxu0 }
 0x292   :  { %v11657_v1 = vld [vmem:[#allocation2 + $0x12a8] sm:$0xf0] }
 0x293   :  { %v14612_v2 = vld [vmem:[#allocation2 + $0x148c] sm:$0xf]  ;;  %v11660_v21 = vor.u32 %v14548_v61, %v11657_v1  ;;  %5302 = vmatpush.bf16.msrb.mxu0 %v11404_v9  ;;  %v14209_v61 = vld [vmem:[#allocation2 + $0x7ec] sm:$0xf0]  ;;  %v9776_v1 = vor.u32 %v14081_v55, %v9775_v52 }
 0x294   :  { %v11913_v3 = vld [vmem:[#allocation2 + $0x14a8] sm:$0xf0]  ;;  %v9999_v9 = vld [vmem:[#allocation2 + $0x590] sm:$0xf] }
 0x295   :  { %v14676_v6 = vld [vmem:[#allocation2 + $0x168c] sm:$0xf]  ;;  %v11916_v12 = vor.u32 %v14612_v2, %v11913_v3  ;;  %5315 = vmatpush.bf16.msrb.mxu1 %v11660_v21  ;;  %v10032_v2 = vor.u32 %v14145_v57, %v10031_v53  ;;  %v9487_v3 = vld [vmem:[#allocation2 + $0x190] sm:$0xf] }
 0x296   :  { %v12169_v8 = vld [vmem:[#allocation2 + $0x16a8] sm:$0xf0]  ;;  %v10255_v21 = vld [vmem:[#allocation2 + $0x790] sm:$0xf] }
 0x297   :  { %v14476_v13 = vld [vmem:[#allocation2 + $0x104c] sm:$0xf]  ;;  %v12172_v17 = vor.u32 %v14676_v6, %v12169_v8  ;;  %5328 = vmatpush.bf16.msrb.mxu2 %v11916_v12  ;;  %v10288_v6 = vor.u32 %v14209_v61, %v10287_v60  ;;  %v14073_v8 = vld [vmem:[#allocation2 + $0x3ac] sm:$0xf0] }
 0x298   :  { %v11369_v14 = vld [vmem:[#allocation2 + $0x1068] sm:$0xf0]  ;;  %v14201_v12 = vld [vmem:[#allocation2 + $0x7ac] sm:$0xf0] }
 0x299   :  { %v14540_v15 = vld [vmem:[#allocation2 + $0x124c] sm:$0xf]  ;;  %v11372_v28 = vor.u32 %v14476_v13, %v11369_v14  ;;  %5341 = vmatpush.bf16.msrb.mxu3 %v12172_v17  ;;  %v9488_v13 = vor.u32 %v14009_v4, %v9487_v3  ;;  %v9744_v14 = vor.u32 %v14073_v8, %v9743_v5  ;;  %v14001_v17 = vld [vmem:[#allocation2 + $0x16c] sm:$0xf0] }
 0x29a   :  { %v11625_v19 = vld [vmem:[#allocation2 + $0x1268] sm:$0xf0]  ;;  %v9391_v55 = vld [vmem:[#allocation2 + $0xd0] sm:$0xf] }
 0x29b   :  { %v14604_v20 = vld [vmem:[#allocation2 + $0x144c] sm:$0xf]  ;;  %v11628_v31 = vor.u32 %v14540_v15, %v11625_v19  ;;  %5303 = vmatpush.bf16.msrb.mxu0 %v11372_v28  ;;  %v10000_v15 = vor.u32 %v14137_v11, %v9999_v9  ;;  %v9711_v19 = vld [vmem:[#allocation2 + $0x350] sm:$0xf] }
 0x29c   :  { %v11881_v24 = vld [vmem:[#allocation2 + $0x1468] sm:$0xf0]  ;;  %v10223_v28 = vld [vmem:[#allocation2 + $0x750] sm:$0xf] }
 0x29d   :  { %v14668_v25 = vld [vmem:[#allocation2 + $0x164c] sm:$0xf]  ;;  %v11884_v32 = vor.u32 %v14604_v20, %v11881_v24  ;;  %5316 = vmatpush.bf16.msrb.mxu1 %v11628_v31  ;;  %v10256_v20 = vor.u32 %v14201_v12, %v10255_v21  ;;  %v14065_v24 = vld [vmem:[#allocation2 + $0x36c] sm:$0xf0]  ;;  %v5124_v21 = vpop.f32.mrf.mxu2 }
 0x29e   :  { %v12137_v27 = vld [vmem:[#allocation2 + $0x1668] sm:$0xf0]  ;;  %v9712_v31 = vor.u32 %v14065_v24, %v9711_v19  ;;  %v13985_v53 = vld [vmem:[#allocation2 + $0xec] sm:$0xf0] }
 0x29f   :  { %v14468_v29 = vld [vmem:[#allocation2 + $0x100c] sm:$0xf]  ;;  %v12140_v48 = vor.u32 %v14668_v25, %v12137_v27  ;;  %5329 = vmatpush.bf16.msrb.mxu2 %v11884_v32  ;;  %v9967_v25 = vld [vmem:[#allocation2 + $0x550] sm:$0xf]  ;;  %v9392_v4 = vor.u32 %v13985_v53, %v9391_v55 }
 0x2a0   :  { %v11337_v30 = vld [vmem:[#allocation2 + $0x1028] sm:$0xf0]  ;;  %v14129_v27 = vld [vmem:[#allocation2 + $0x56c] sm:$0xf0] }
 0x2a1   :  { %v14532_v37 = vld [vmem:[#allocation2 + $0x120c] sm:$0xf]  ;;  %v11340_v54 = vor.u32 %v14468_v29, %v11337_v30  ;;  %5342 = vmatpush.bf16.msrb.mxu3 %v12140_v48  ;;  %v14193_v29 = vld [vmem:[#allocation2 + $0x76c] sm:$0xf0]  ;;  %v9456_v30 = vor.u32 %v14001_v17, %v9455_v16  ;;  %v9968_v32 = vor.u32 %v14129_v27, %v9967_v25  ;;  %v5137_v16 = vpop.f32.mrf.mxu3  ;;  %v5100_v25 = vpop.f32.mrf.mxu0 }
 0x2a2   :  { %v11593_v40 = vld [vmem:[#allocation2 + $0x1228] sm:$0xf0]  ;;  %v10224_v45 = vor.u32 %v14193_v29, %v10223_v28  ;;  %v14057_v48 = vld [vmem:[#allocation2 + $0x32c] sm:$0xf0] }
 0x2a3   :  { %v14596_v44 = vld [vmem:[#allocation2 + $0x140c] sm:$0xf]  ;;  %v11596_v58 = vor.u32 %v14532_v37, %v11593_v40  ;;  %5304 = vmatpush.bf16.msrb.mxu0 %v11340_v54  ;;  %v9423_v37 = vld [vmem:[#allocation2 + $0x110] sm:$0xf] }
 0x2a4   :  { %v11849_v56 = vld [vmem:[#allocation2 + $0x1428] sm:$0xf0]  ;;  %v13993_v40 = vld [vmem:[#allocation2 + $0x12c] sm:$0xf0] }
 0x2a5   :  { %v14660_v46 = vld [vmem:[#allocation2 + $0x160c] sm:$0xf]  ;;  %v11852_v59 = vor.u32 %v14596_v44, %v11849_v56  ;;  %5317 = vmatpush.bf16.msrb.mxu1 %v11596_v58  ;;  %v9679_v44 = vld [vmem:[#allocation2 + $0x310] sm:$0xf]  ;;  %v9424_v50 = vor.u32 %v13993_v40, %v9423_v37  ;;  %v5099_v58 = vadd.f32 %v5098_v51, %v15315_v10  ;;  %v5126_v53 = vpop.f32.mrf.mxu2 }
 0x2a6   :  { %v12105_v47 = vld [vmem:[#allocation2 + $0x1628] sm:$0xf0]  ;;  %5305 = vmatmul.bf16.vlgmr.msrb.gmra.mxu0 %v15245_v18  ;;  %v9935_v56 = vld [vmem:[#allocation2 + $0x510] sm:$0xf]  ;;  %v9680_v52 = vor.u32 %v14057_v48, %v9679_v44 }
 0x2a7   :  { %v12108_v62 = vor.u32 %v14660_v46, %v12105_v47  ;;  %5330 = vmatpush.bf16.msrb.mxu2 %v11852_v59  ;;  %5349 = vmatpush.bf16.msra.mxu0 %v9520_v63  ;;  %v14121_v46 = vld [vmem:[#allocation2 + $0x52c] sm:$0xf0]  ;;  %v5111_v59 = vpop.f32.mrf.mxu1 }
 0x2a8   :  { %5318 = vmatmul.bf16.vlgmr.msrb.gmra.mxu1 %v15249_v23  ;;  %v10191_v47 = vld [vmem:[#allocation2 + $0x710] sm:$0xf]  ;;  %v9936_v54 = vor.u32 %v14121_v46, %v9935_v56  ;;  %v5112_v3 = vadd.f32 %v5111_v59, %v5099_v58 }
 0x2a9   :  { %5343 = vmatpush.bf16.msrb.mxu3 %v12108_v62  ;;  %5362 = vmatpush.bf16.msra.mxu1 %v9776_v1  ;;  %v9647_v57 = vld [vmem:[#allocation2 + $0x2d0] sm:$0xf]  ;;  %v10192_v60 = vor.u32 %v14185_v49, %v10191_v47 }
 0x2aa   :  { %5331 = vmatmul.bf16.vlgmr.msrb.gmra.mxu2 %v15247_v22  ;;  %v14049_v61 = vld [vmem:[#allocation2 + $0x2ec] sm:$0xf0] }
 0x2ab   :  { %5375 = vmatpush.bf16.msra.mxu2 %v10032_v2  ;;  %5350 = vmatpush.bf16.msra.mxu0 %v9488_v13  ;;  %v9903_v62 = vld [vmem:[#allocation2 + $0x4d0] sm:$0xf]  ;;  %v9648_v5 = vor.u32 %v14049_v61, %v9647_v57  ;;  %v5139_v61 = vpop.f32.mrf.mxu3 }
 0x2ac   :  { %5344 = vmatmul.bf16.vlgmr.msrb.gmra.mxu3 %v15251_v26  ;;  %v14113_v63 = vld [vmem:[#allocation2 + $0x4ec] sm:$0xf0] }
 0x2ad   :  { %5388 = vmatpush.bf16.msra.mxu3 %v10288_v6  ;;  %5363 = vmatpush.bf16.msra.mxu1 %v9744_v14  ;;  %v10159_v1 = vld [vmem:[#allocation2 + $0x6d0] sm:$0xf]  ;;  %v9904_v6 = vor.u32 %v14113_v63, %v9903_v62 }
 0x2ae   :  { %v14177_v2 = vld [vmem:[#allocation2 + $0x6ec] sm:$0xf0] }
 0x2af   :  { %5376 = vmatpush.bf16.msra.mxu2 %v10000_v15  ;;  %5351 = vmatpush.bf16.msra.mxu0 %v9456_v30  ;;  %v9359_v8 = vld [vmem:[#allocation2 + $0x90] sm:$0xf]  ;;  %v10160_v10 = vor.u32 %v14177_v2, %v10159_v1  ;;  %v5125_v15 = vadd.f32 %v5124_v21, %v5112_v3 }
 0x2b0   :  { %v13977_v9 = vld [vmem:[#allocation2 + $0xac] sm:$0xf0] }
 0x2b1   :  { %5389 = vmatpush.bf16.msra.mxu3 %v10256_v20  ;;  %5364 = vmatpush.bf16.msra.mxu1 %v9712_v31  ;;  %v9615_v11 = vld [vmem:[#allocation2 + $0x290] sm:$0xf]  ;;  %v9360_v20 = vor.u32 %v13977_v9, %v9359_v8  ;;  %v15322_v24 = vadd.f32 %v5137_v16, %v5125_v15 }
 0x2b2   :  { %v14041_v12 = vld [vmem:[#allocation2 + $0x2ac] sm:$0xf0] }
 0x2b3   :  { %5377 = vmatpush.bf16.msra.mxu2 %v9968_v32  ;;  %5352 = vmatpush.bf16.msra.mxu0 %v9424_v50  ;;  %v9871_v13 = vld [vmem:[#allocation2 + $0x490] sm:$0xf]  ;;  %v9616_v27 = vor.u32 %v14041_v12, %v9615_v11  ;;  %v5113_v32 = vpop.f32.mrf.mxu1 }
 0x2b4   :  { %v14105_v14 = vld [vmem:[#allocation2 + $0x4ac] sm:$0xf0] }
 0x2b5   :  { %5390 = vmatpush.bf16.msra.mxu3 %v10224_v45  ;;  %5365 = vmatpush.bf16.msra.mxu1 %v9680_v52  ;;  %v10127_v17 = vld [vmem:[#allocation2 + $0x690] sm:$0xf]  ;;  %v9872_v28 = vor.u32 %v14105_v14, %v9871_v13 }
 0x2b6   :  { %v14169_v19 = vld [vmem:[#allocation2 + $0x6ac] sm:$0xf0] }
 0x2b7   :  { %5378 = vmatpush.bf16.msra.mxu2 %v9936_v54  ;;  %5353 = vmatpush.bf16.msra.mxu0 %v9392_v4  ;;  %v9327_v29 = vld [vmem:[#allocation2 + $0x50] sm:$0xf]  ;;  %v10128_v37 = vor.u32 %v14169_v19, %v10127_v17 }
 0x2b8   :  { %v13969_v30 = vld [vmem:[#allocation2 + $0x6c] sm:$0xf0] }
 0x2b9   :  { %5391 = vmatpush.bf16.msra.mxu3 %v10192_v60  ;;  %5366 = vmatpush.bf16.msra.mxu1 %v9648_v5  ;;  %v9583_v31 = vld [vmem:[#allocation2 + $0x250] sm:$0xf]  ;;  %v9328_v46 = vor.u32 %v13969_v30, %v9327_v29 }
 0x2ba   :  { %v14033_v40 = vld [vmem:[#allocation2 + $0x26c] sm:$0xf0] }
 0x2bb   :  { %5379 = vmatpush.bf16.msra.mxu2 %v9904_v6  ;;  %v9839_v44 = vld [vmem:[#allocation2 + $0x450] sm:$0xf]  ;;  %5354 = vmatpush.bf16.msra.mxu0 %v9360_v20  ;;  %v9584_v50 = vor.u32 %v14033_v40, %v9583_v31 }
 0x2bc   :  { %v14097_v45 = vld [vmem:[#allocation2 + $0x46c] sm:$0xf0] }
 0x2bd   :  { %5392 = vmatpush.bf16.msra.mxu3 %v10160_v10  ;;  %v10095_v48 = vld [vmem:[#allocation2 + $0x650] sm:$0xf]  ;;  %5367 = vmatpush.bf16.msra.mxu1 %v9616_v27  ;;  %v9840_v51 = vor.u32 %v14097_v45, %v9839_v44 }
 0x2be   :  { %v14161_v56 = vld [vmem:[#allocation2 + $0x66c] sm:$0xf0] }
 0x2bf   :  { %v9295_v47 = vld [vmem:[#allocation2 + $0x10] sm:$0xf]  ;;  %5380 = vmatpush.bf16.msra.mxu2 %v9872_v28  ;;  %v10096_v57 = vor.u32 %v14161_v56, %v10095_v48  ;;  %5355 = vmatpush.bf16.msra.mxu0 %v9328_v46 }
 0x2c0   :  { %v13961_v49 = vld [vmem:[#allocation2 + $0x2c] sm:$0xf0] }
 0x2c1   :  { %v9551_v52 = vld [vmem:[#allocation2 + $0x210] sm:$0xf]  ;;  %5393 = vmatpush.bf16.msra.mxu3 %v10128_v37  ;;  %v9296_v2 = vor.u32 %v13961_v49, %v9295_v47  ;;  %5368 = vmatpush.bf16.msra.mxu1 %v9584_v50 }
 0x2c2   :  { %v14025_v54 = vld [vmem:[#allocation2 + $0x22c] sm:$0xf0] }
 0x2c3   :  { %v9807_v55 = vld [vmem:[#allocation2 + $0x410] sm:$0xf]  ;;  %5381 = vmatpush.bf16.msra.mxu2 %v9840_v51  ;;  %v9552_v6 = vor.u32 %v14025_v54, %v9551_v52  ;;  %5356 = vmatpush.bf16.msra.mxu0 %v9296_v2  ;;  %v5163_v2 = vpop.f32.mrf.mxu1 }
 0x2c4   :  { %v14089_v58 = vld [vmem:[#allocation2 + $0x42c] sm:$0xf0] }
 0x2c5   :  { %v10063_v59 = vld [vmem:[#allocation2 + $0x610] sm:$0xf]  ;;  %v9808_v8 = vor.u32 %v14089_v58, %v9807_v55  ;;  %5394 = vmatpush.bf16.msra.mxu3 %v10096_v57  ;;  %5369 = vmatpush.bf16.msra.mxu1 %v9552_v6 }
 0x2c6   :  { %v14153_v60 = vld [vmem:[#allocation2 + $0x62c] sm:$0xf0]  ;;  %5357 = vmatmul.bf16.vlgmr.msra.gmra.mxu0 %v15220_v36 }
 0x2c7   :  { %v10543_v62 = vld [vmem:[#allocation2 + $0x9d0] sm:$0xf]  ;;  %v10064_v21 = vor.u32 %v14153_v60, %v10063_v59  ;;  %5382 = vmatpush.bf16.msra.mxu2 %v9808_v8  ;;  %v5150_v60 = vpop.f32.mrf.mxu0 }
 0x2c8   :  { %v14273_v63 = vld [vmem:[#allocation2 + $0x9ec] sm:$0xf0]  ;;  %5370 = vmatmul.bf16.vlgmr.msra.gmra.mxu1 %v15224_v43 }
 0x2c9   :  { %v10799_v1 = vld [vmem:[#allocation2 + $0xbd0] sm:$0xf]  ;;  %v10544_v10 = vor.u32 %v14273_v63, %v10543_v62  ;;  %5395 = vmatpush.bf16.msra.mxu3 %v10064_v21  ;;  %v5151_v63 = vadd.f32 %v5150_v60, %v15322_v24 }
 0x2ca   :  { %v14337_v3 = vld [vmem:[#allocation2 + $0xbec] sm:$0xf0]  ;;  %5383 = vmatmul.bf16.vlgmr.msra.gmra.mxu2 %v15218_v35 }
 0x2cb   :  { %v11055_v4 = vld [vmem:[#allocation2 + $0xdd0] sm:$0xf]  ;;  %v10800_v12 = vor.u32 %v14337_v3, %v10799_v1  ;;  %5401 = vmatpush.bf16.msrb.mxu0 %v10544_v10 }
 0x2cc   :  { %v14401_v5 = vld [vmem:[#allocation2 + $0xdec] sm:$0xf0]  ;;  %5396 = vmatmul.bf16.vlgmr.msra.gmra.mxu3 %v15222_v42 }
 0x2cd   :  { %v11311_v9 = vld [vmem:[#allocation2 + $0xfd0] sm:$0xf]  ;;  %v11056_v13 = vor.u32 %v14401_v5, %v11055_v4  ;;  %5414 = vmatpush.bf16.msrb.mxu1 %v10800_v12 }
 0x2ce   :  { %v14465_v11 = vld [vmem:[#allocation2 + $0xfec] sm:$0xf0] }
 0x2cf   :  { %v10511_v14 = vld [vmem:[#allocation2 + $0x990] sm:$0xf]  ;;  %v11312_v17 = vor.u32 %v14465_v11, %v11311_v9  ;;  %5427 = vmatpush.bf16.msrb.mxu2 %v11056_v13  ;;  %v5164_v11 = vadd.f32 %v5163_v2, %v5151_v63 }
 0x2d0   :  { %v14265_v15 = vld [vmem:[#allocation2 + $0x9ac] sm:$0xf0] }
 0x2d1   :  { %v10767_v16 = vld [vmem:[#allocation2 + $0xb90] sm:$0xf]  ;;  %v10512_v29 = vor.u32 %v14265_v15, %v10511_v14  ;;  %5440 = vmatpush.bf16.msrb.mxu3 %v11312_v17 }
 0x2d2   :  { %v14329_v19 = vld [vmem:[#allocation2 + $0xbac] sm:$0xf0] }
 0x2d3   :  { %v11023_v20 = vld [vmem:[#allocation2 + $0xd90] sm:$0xf]  ;;  %v10768_v30 = vor.u32 %v14329_v19, %v10767_v16  ;;  %5402 = vmatpush.bf16.msrb.mxu0 %v10512_v29 }
 0x2d4   :  { %v14393_v25 = vld [vmem:[#allocation2 + $0xdac] sm:$0xf0] }
 0x2d5   :  { %v11279_v27 = vld [vmem:[#allocation2 + $0xf90] sm:$0xf]  ;;  %v11024_v31 = vor.u32 %v14393_v25, %v11023_v20  ;;  %5415 = vmatpush.bf16.msrb.mxu1 %v10768_v30 }
 0x2d6   :  { %v14457_v28 = vld [vmem:[#allocation2 + $0xfac] sm:$0xf0] }
 0x2d7   :  { %v10479_v32 = vld [vmem:[#allocation2 + $0x950] sm:$0xf]  ;;  %v11280_v44 = vor.u32 %v14457_v28, %v11279_v27  ;;  %5428 = vmatpush.bf16.msrb.mxu2 %v11024_v31  ;;  %v5176_v27 = vpop.f32.mrf.mxu2 }
 0x2d8   :  { %v14257_v37 = vld [vmem:[#allocation2 + $0x96c] sm:$0xf0]  ;;  %v5177_v31 = vadd.f32 %v5176_v27, %v5164_v11 }
 0x2d9   :  { %v10735_v40 = vld [vmem:[#allocation2 + $0xb50] sm:$0xf]  ;;  %v10480_v49 = vor.u32 %v14257_v37, %v10479_v32  ;;  %5441 = vmatpush.bf16.msrb.mxu3 %v11280_v44  ;;  %v5189_v32 = vpop.f32.mrf.mxu3  ;;  %v5152_v44 = vpop.f32.mrf.mxu0 }
 0x2da   :  { %v14321_v45 = vld [vmem:[#allocation2 + $0xb6c] sm:$0xf0] }
 0x2db   :  { %v10991_v48 = vld [vmem:[#allocation2 + $0xd50] sm:$0xf]  ;;  %v10736_v50 = vor.u32 %v14321_v45, %v10735_v40  ;;  %5403 = vmatpush.bf16.msrb.mxu0 %v10480_v49 }
 0x2dc   :  { %v14385_v56 = vld [vmem:[#allocation2 + $0xd6c] sm:$0xf0] }
 0x2dd   :  { %v11247_v46 = vld [vmem:[#allocation2 + $0xf50] sm:$0xf]  ;;  %v10992_v51 = vor.u32 %v14385_v56, %v10991_v48  ;;  %5416 = vmatpush.bf16.msrb.mxu1 %v10736_v50  ;;  %v5165_v48 = vpop.f32.mrf.mxu1  ;;  %v15329_v56 = vadd.f32 %v5189_v32, %v5177_v31 }
 0x2de   :  { %v14449_v47 = vld [vmem:[#allocation2 + $0xf6c] sm:$0xf0] }
 0x2df   :  { %v10447_v52 = vld [vmem:[#allocation2 + $0x910] sm:$0xf]  ;;  %v11248_v53 = vor.u32 %v14449_v47, %v11247_v46  ;;  %5429 = vmatpush.bf16.msrb.mxu2 %v10992_v51 }
 0x2e0   :  { %v14249_v54 = vld [vmem:[#allocation2 + $0x92c] sm:$0xf0] }
 0x2e1   :  { %v10703_v55 = vld [vmem:[#allocation2 + $0xb10] sm:$0xf]  ;;  %v10448_v1 = vor.u32 %v14249_v54, %v10447_v52  ;;  %5442 = vmatpush.bf16.msrb.mxu3 %v11248_v53 }
 0x2e2   :  { %v14313_v57 = vld [vmem:[#allocation2 + $0xb2c] sm:$0xf0] }
 0x2e3   :  { %v10959_v58 = vld [vmem:[#allocation2 + $0xd10] sm:$0xf]  ;;  %v10704_v3 = vor.u32 %v14313_v57, %v10703_v55  ;;  %5404 = vmatpush.bf16.msrb.mxu0 %v10448_v1 }
 0x2e4   :  { %v14377_v59 = vld [vmem:[#allocation2 + $0xd2c] sm:$0xf0] }
 0x2e5   :  { %v11215_v61 = vld [vmem:[#allocation2 + $0xf10] sm:$0xf]  ;;  %v10960_v4 = vor.u32 %v14377_v59, %v10959_v58  ;;  %5417 = vmatpush.bf16.msrb.mxu1 %v10704_v3 }
 0x2e6   :  { %v14441_v62 = vld [vmem:[#allocation2 + $0xf2c] sm:$0xf0] }
 0x2e7   :  { %v10415_v5 = vld [vmem:[#allocation2 + $0x8d0] sm:$0xf]  ;;  %v11216_v9 = vor.u32 %v14441_v62, %v11215_v61  ;;  %5430 = vmatpush.bf16.msrb.mxu2 %v10960_v4 }
 0x2e8   :  { %v14241_v6 = vld [vmem:[#allocation2 + $0x8ec] sm:$0xf0] }
 0x2e9   :  { %v10671_v8 = vld [vmem:[#allocation2 + $0xad0] sm:$0xf]  ;;  %v10416_v15 = vor.u32 %v14241_v6, %v10415_v5  ;;  %5443 = vmatpush.bf16.msrb.mxu3 %v11216_v9  ;;  %v5178_v9 = vpop.f32.mrf.mxu2 }
 0x2ea   :  { %v14305_v21 = vld [vmem:[#allocation2 + $0xaec] sm:$0xf0] }
 0x2eb   :  { %v10927_v10 = vld [vmem:[#allocation2 + $0xcd0] sm:$0xf]  ;;  %v10672_v24 = vor.u32 %v14305_v21, %v10671_v8  ;;  %5405 = vmatpush.bf16.msrb.mxu0 %v10416_v15 }
 0x2ec   :  { %v14369_v12 = vld [vmem:[#allocation2 + $0xcec] sm:$0xf0] }
 0x2ed   :  { %v11183_v13 = vld [vmem:[#allocation2 + $0xed0] sm:$0xf]  ;;  %v10928_v16 = vor.u32 %v14369_v12, %v10927_v10  ;;  %5418 = vmatpush.bf16.msrb.mxu1 %v10672_v24  ;;  %v5191_v12 = vpop.f32.mrf.mxu3 }
 0x2ee   :  { %v14433_v14 = vld [vmem:[#allocation2 + $0xeec] sm:$0xf0]  ;;  %v5202_v12 = vpop.f32.mrf.mxu0 }
 0x2ef   :  { %v10383_v17 = vld [vmem:[#allocation2 + $0x890] sm:$0xf]  ;;  %v11184_v25 = vor.u32 %v14433_v14, %v11183_v13  ;;  %5431 = vmatpush.bf16.msrb.mxu2 %v10928_v16 }
 0x2f0   :  { %v14233_v19 = vld [vmem:[#allocation2 + $0x8ac] sm:$0xf0] }
 0x2f1   :  { %v10639_v20 = vld [vmem:[#allocation2 + $0xa90] sm:$0xf]  ;;  %v10384_v45 = vor.u32 %v14233_v19, %v10383_v17  ;;  %5444 = vmatpush.bf16.msrb.mxu3 %v11184_v25 }
 0x2f2   :  { %v14297_v28 = vld [vmem:[#allocation2 + $0xaac] sm:$0xf0] }
 0x2f3   :  { %v10895_v29 = vld [vmem:[#allocation2 + $0xc90] sm:$0xf]  ;;  %v10640_v46 = vor.u32 %v14297_v28, %v10639_v20  ;;  %5406 = vmatpush.bf16.msrb.mxu0 %v10384_v45 }
 0x2f4   :  { %v14361_v30 = vld [vmem:[#allocation2 + $0xcac] sm:$0xf0] }
 0x2f5   :  { %v11151_v37 = vld [vmem:[#allocation2 + $0xe90] sm:$0xf]  ;;  %v10896_v47 = vor.u32 %v14361_v30, %v10895_v29  ;;  %5419 = vmatpush.bf16.msrb.mxu1 %v10640_v46 }
 0x2f6   :  { %v14425_v40 = vld [vmem:[#allocation2 + $0xeac] sm:$0xf0] }
 0x2f7   :  { %v10351_v49 = vld [vmem:[#allocation2 + $0x850] sm:$0xf]  ;;  %v11152_v52 = vor.u32 %v14425_v40, %v11151_v37  ;;  %5432 = vmatpush.bf16.msrb.mxu2 %v10896_v47 }
 0x2f8   :  { %v14225_v50 = vld [vmem:[#allocation2 + $0x86c] sm:$0xf0] }
 0x2f9   :  { %v10607_v51 = vld [vmem:[#allocation2 + $0xa50] sm:$0xf]  ;;  %v10352_v59 = vor.u32 %v14225_v50, %v10351_v49  ;;  %5445 = vmatpush.bf16.msrb.mxu3 %v11152_v52 }
 0x2fa   :  { %v14289_v54 = vld [vmem:[#allocation2 + $0xa6c] sm:$0xf0] }
 0x2fb   :  { %v10863_v55 = vld [vmem:[#allocation2 + $0xc50] sm:$0xf]  ;;  %v10608_v62 = vor.u32 %v14289_v54, %v10607_v51  ;;  %5407 = vmatpush.bf16.msrb.mxu0 %v10352_v59 }
 0x2fc   :  { %v14353_v53 = vld [vmem:[#allocation2 + $0xc6c] sm:$0xf0] }
 0x2fd   :  { %v11119_v57 = vld [vmem:[#allocation2 + $0xe50] sm:$0xf]  ;;  %v10864_v63 = vor.u32 %v14353_v53, %v10863_v55  ;;  %5420 = vmatpush.bf16.msrb.mxu1 %v10608_v62  ;;  %v864_v55 = vperm.slane %v15308_v7, 4 }
 0x2fe   :  { %v14417_v58 = vld [vmem:[#allocation2 + $0xe6c] sm:$0xf0] }
 0x2ff   :  { %v10319_v60 = vld [vmem:[#allocation2 + $0x810] sm:$0xf]  ;;  %v11120_v4 = vor.u32 %v14417_v58, %v11119_v57  ;;  %5433 = vmatpush.bf16.msrb.mxu2 %v10864_v63 }
 0x300   :  { %v14217_v61 = vld [vmem:[#allocation2 + $0x82c] sm:$0xf0] }
 0x301   :  { %v10575_v1 = vld [vmem:[#allocation2 + $0xa10] sm:$0xf]  ;;  %v10320_v13 = vor.u32 %v14217_v61, %v10319_v60  ;;  %5446 = vmatpush.bf16.msrb.mxu3 %v11120_v4  ;;  %v880_v4 = vperm.slane %v864_v55, 0 }
 0x302   :  { %v14281_v2 = vld [vmem:[#allocation2 + $0xa2c] sm:$0xf0] }
 0x303   :  { %v10831_v3 = vld [vmem:[#allocation2 + $0xc10] sm:$0xf]  ;;  %v10576_v16 = vor.u32 %v14281_v2, %v10575_v1  ;;  %5408 = vmatpush.bf16.msrb.mxu0 %v10320_v13 }
 0x304   :  { %v14345_v5 = vld [vmem:[#allocation2 + $0xc2c] sm:$0xf0] }
 0x305   :  { %v11087_v6 = vld [vmem:[#allocation2 + $0xe10] sm:$0xf]  ;;  %v10832_v17 = vor.u32 %v14345_v5, %v10831_v3  ;;  %5421 = vmatpush.bf16.msrb.mxu1 %v10576_v16 }
 0x306   :  { %v14409_v8 = vld [vmem:[#allocation2 + $0xe2c] sm:$0xf0]  ;;  %5409 = vmatmul.bf16.vlgmr.msrb.gmra.mxu0 %v15235_v38 }
 0x307   :  { %v11567_v11 = vld [vmem:[#allocation2 + $0x11d0] sm:$0xf]  ;;  %v11088_v25 = vor.u32 %v14409_v8, %v11087_v6  ;;  %5434 = vmatpush.bf16.msrb.mxu2 %v10832_v17  ;;  %v5203_v17 = vadd.f32 %v5202_v12, %v880_v4 }
 0x308   :  { %v14529_v21 = vld [vmem:[#allocation2 + $0x11ec] sm:$0xf0]  ;;  %5422 = vmatmul.bf16.vlgmr.msrb.gmra.mxu1 %v15239_v41 }
 0x309   :  { %v11823_v10 = vld [vmem:[#allocation2 + $0x13d0] sm:$0xf]  ;;  %v11568_v27 = vor.u32 %v14529_v21, %v11567_v11  ;;  %5447 = vmatpush.bf16.msrb.mxu3 %v11088_v25 }
 0x30a   :  { %v14593_v14 = vld [vmem:[#allocation2 + $0x13ec] sm:$0xf0]  ;;  %5435 = vmatmul.bf16.vlgmr.msrb.gmra.mxu2 %v15233_v33 }
 0x30b   :  { %v12079_v15 = vld [vmem:[#allocation2 + $0x15d0] sm:$0xf]  ;;  %v11824_v28 = vor.u32 %v14593_v14, %v11823_v10  ;;  %5453 = vmatpush.bf16.msra.mxu0 %v11568_v27 }
 0x30c   :  { %v14657_v24 = vld [vmem:[#allocation2 + $0x15ec] sm:$0xf0]  ;;  %5448 = vmatmul.bf16.vlgmr.msrb.gmra.mxu3 %v15237_v39 }
 0x30d   :  { %v12335_v19 = vld [vmem:[#allocation2 + $0x17d0] sm:$0xf]  ;;  %v12080_v29 = vor.u32 %v14657_v24, %v12079_v15  ;;  %5466 = vmatpush.bf16.msra.mxu1 %v11824_v28 }
 0x30e   :  { %v14721_v20 = vld [vmem:[#allocation2 + $0x17ec] sm:$0xf0] }
 0x30f   :  { %v11535_v30 = vld [vmem:[#allocation2 + $0x1190] sm:$0xf]  ;;  %v12336_v37 = vor.u32 %v14721_v20, %v12335_v19  ;;  %5479 = vmatpush.bf16.msra.mxu2 %v12080_v29  ;;  %v5215_v19 = vpop.f32.mrf.mxu1 }
 0x310   :  { %v14521_v31 = vld [vmem:[#allocation2 + $0x11ac] sm:$0xf0] }
 0x311   :  { %v11791_v32 = vld [vmem:[#allocation2 + $0x1390] sm:$0xf]  ;;  %v11536_v47 = vor.u32 %v14521_v31, %v11535_v30  ;;  %5492 = vmatpush.bf16.msra.mxu3 %v12336_v37  ;;  %v5216_v31 = vadd.f32 %v5215_v19, %v5203_v17 }
 0x312   :  { %v14585_v40 = vld [vmem:[#allocation2 + $0x13ac] sm:$0xf0] }
 0x313   :  { %v12047_v44 = vld [vmem:[#allocation2 + $0x1590] sm:$0xf]  ;;  %v11792_v50 = vor.u32 %v14585_v40, %v11791_v32  ;;  %5454 = vmatpush.bf16.msra.mxu0 %v11536_v47 }
 0x314   :  { %v14649_v45 = vld [vmem:[#allocation2 + $0x15ac] sm:$0xf0] }
 0x315   :  { %v12303_v48 = vld [vmem:[#allocation2 + $0x1790] sm:$0xf]  ;;  %v12048_v51 = vor.u32 %v14649_v45, %v12047_v44  ;;  %5467 = vmatpush.bf16.msra.mxu1 %v11792_v50 }
 0x316   :  { %v14713_v46 = vld [vmem:[#allocation2 + $0x17ac] sm:$0xf0] }
 0x317   :  { %v11503_v49 = vld [vmem:[#allocation2 + $0x1150] sm:$0xf]  ;;  %v12304_v53 = vor.u32 %v14713_v46, %v12303_v48  ;;  %5480 = vmatpush.bf16.msra.mxu2 %v12048_v51  ;;  %v5228_v46 = vpop.f32.mrf.mxu2 }
 0x318   :  { %v14513_v52 = vld [vmem:[#allocation2 + $0x116c] sm:$0xf0] }
 0x319   :  { %v11759_v54 = vld [vmem:[#allocation2 + $0x1350] sm:$0xf]  ;;  %v11504_v62 = vor.u32 %v14513_v52, %v11503_v49  ;;  %5493 = vmatpush.bf16.msra.mxu3 %v12304_v53  ;;  %v5229_v52 = vadd.f32 %v5228_v46, %v5216_v31  ;;  %v9777_v31 = vld [vmem:[#allocation2 + $0x3f0] sm:$0xf0] }
 0x31a   :  { %v14577_v57 = vld [vmem:[#allocation2 + $0x136c] sm:$0xf0] }
 0x31b   :  { %v12015_v58 = vld [vmem:[#allocation2 + $0x1550] sm:$0xf]  ;;  %v11760_v7 = vor.u32 %v14577_v57, %v11759_v54  ;;  %5455 = vmatpush.bf16.msra.mxu0 %v11504_v62  ;;  %v5241_v54 = vpop.f32.mrf.mxu3 }
 0x31c   :  { %v14641_v59 = vld [vmem:[#allocation2 + $0x156c] sm:$0xf0] }
 0x31d   :  { %v12271_v60 = vld [vmem:[#allocation2 + $0x1750] sm:$0xf]  ;;  %v12016_v1 = vor.u32 %v14641_v59, %v12015_v58  ;;  %5468 = vmatpush.bf16.msra.mxu1 %v11760_v7  ;;  %v15336_v58 = vadd.f32 %v5241_v54, %v5229_v52  ;;  %v5204_v59 = vpop.f32.mrf.mxu0  ;;  %v9489_v52 = vld [vmem:[#allocation2 + $0x1b0] sm:$0xf0] }
 0x31e   :  { %v14705_v61 = vld [vmem:[#allocation2 + $0x176c] sm:$0xf0]  ;;  %v14069_v54 = vld [vmem:[#allocation2 + $0x394] sm:$0xf] }
 0x31f   :  { %v11471_v63 = vld [vmem:[#allocation2 + $0x1110] sm:$0xf]  ;;  %v12272_v5 = vor.u32 %v14705_v61, %v12271_v60  ;;  %5481 = vmatpush.bf16.msra.mxu2 %v12016_v1  ;;  %v5217_v1 = vpop.f32.mrf.mxu1  ;;  %v10001_v59 = vld [vmem:[#allocation2 + $0x5b0] sm:$0xf0] }
 0x320   :  { %v14505_v2 = vld [vmem:[#allocation2 + $0x112c] sm:$0xf0]  ;;  %v13997_v1 = vld [vmem:[#allocation2 + $0x154] sm:$0xf] }
 0x321   :  { %v11727_v3 = vld [vmem:[#allocation2 + $0x1310] sm:$0xf]  ;;  %v11472_v10 = vor.u32 %v14505_v2, %v11471_v63  ;;  %5494 = vmatpush.bf16.msra.mxu3 %v12272_v5 }
 0x322   :  { %v14569_v6 = vld [vmem:[#allocation2 + $0x132c] sm:$0xf0] }
 0x323   :  { %v11983_v8 = vld [vmem:[#allocation2 + $0x1510] sm:$0xf]  ;;  %v11728_v13 = vor.u32 %v14569_v6, %v11727_v3  ;;  %5456 = vmatpush.bf16.msra.mxu0 %v11472_v10 }
 0x324   :  { %v14633_v9 = vld [vmem:[#allocation2 + $0x152c] sm:$0xf0] }
 0x325   :  { %v12239_v11 = vld [vmem:[#allocation2 + $0x1710] sm:$0xf]  ;;  %v11984_v14 = vor.u32 %v14633_v9, %v11983_v8  ;;  %5469 = vmatpush.bf16.msra.mxu1 %v11728_v13 }
 0x326   :  { %v14697_v21 = vld [vmem:[#allocation2 + $0x172c] sm:$0xf0] }
 0x327   :  { %v11439_v15 = vld [vmem:[#allocation2 + $0x10d0] sm:$0xf]  ;;  %v12240_v20 = vor.u32 %v14697_v21, %v12239_v11  ;;  %5482 = vmatpush.bf16.msra.mxu2 %v11984_v14 }
 0x328   :  { %v14497_v24 = vld [vmem:[#allocation2 + $0x10ec] sm:$0xf0] }
 0x329   :  { %v11695_v16 = vld [vmem:[#allocation2 + $0x12d0] sm:$0xf]  ;;  %v11440_v32 = vor.u32 %v14497_v24, %v11439_v15  ;;  %5495 = vmatpush.bf16.msra.mxu3 %v12240_v20  ;;  %v5230_v24 = vpop.f32.mrf.mxu2 }
 0x32a   :  { %v14561_v25 = vld [vmem:[#allocation2 + $0x12ec] sm:$0xf0] }
 0x32b   :  { %v11951_v27 = vld [vmem:[#allocation2 + $0x14d0] sm:$0xf]  ;;  %v11696_v37 = vor.u32 %v14561_v25, %v11695_v16  ;;  %5457 = vmatpush.bf16.msra.mxu0 %v11440_v32  ;;  %v5243_v25 = vpop.f32.mrf.mxu3  ;;  %v14141_v32 = vld [vmem:[#allocation2 + $0x5d4] sm:$0xf] }
 0x32c   :  { %v14625_v28 = vld [vmem:[#allocation2 + $0x14ec] sm:$0xf0]  ;;  %v10193_v25 = vld [vmem:[#allocation2 + $0x730] sm:$0xf0] }
 0x32d   :  { %v12207_v29 = vld [vmem:[#allocation2 + $0x16d0] sm:$0xf]  ;;  %v11952_v40 = vor.u32 %v14625_v28, %v11951_v27  ;;  %5470 = vmatpush.bf16.msra.mxu1 %v11696_v37  ;;  %v14013_v27 = vld [vmem:[#allocation2 + $0x1d4] sm:$0xf] }
 0x32e   :  { %v14689_v30 = vld [vmem:[#allocation2 + $0x16ec] sm:$0xf0]  ;;  %v9521_v28 = vld [vmem:[#allocation2 + $0x1f0] sm:$0xf0] }
 0x32f   :  { %v11407_v44 = vld [vmem:[#allocation2 + $0x1090] sm:$0xf]  ;;  %v12208_v47 = vor.u32 %v14689_v30, %v12207_v29  ;;  %5483 = vmatpush.bf16.msra.mxu2 %v11952_v40  ;;  %v14077_v29 = vld [vmem:[#allocation2 + $0x3d4] sm:$0xf] }
 0x330   :  { %v14489_v45 = vld [vmem:[#allocation2 + $0x10ac] sm:$0xf0]  ;;  %v10033_v37 = vld [vmem:[#allocation2 + $0x5f0] sm:$0xf0] }
 0x331   :  { %v11663_v48 = vld [vmem:[#allocation2 + $0x1290] sm:$0xf]  ;;  %v11408_v57 = vor.u32 %v14489_v45, %v11407_v44  ;;  %5496 = vmatpush.bf16.msra.mxu3 %v12208_v47  ;;  %v14205_v45 = vld [vmem:[#allocation2 + $0x7d4] sm:$0xf]  ;;  %v9524_v47 = vor.u32 %v14013_v27, %v9521_v28  ;;  %v5254_v28 = vpop.f32.mrf.mxu0 }
 0x332   :  { %v14553_v49 = vld [vmem:[#allocation2 + $0x12ac] sm:$0xf0] }
 0x333   :  { %v11919_v50 = vld [vmem:[#allocation2 + $0x1490] sm:$0xf]  ;;  %v11664_v60 = vor.u32 %v14553_v49, %v11663_v48  ;;  %5458 = vmatpush.bf16.msra.mxu0 %v11408_v57  ;;  %v10289_v48 = vld [vmem:[#allocation2 + $0x7f0] sm:$0xf0]  ;;  %v9780_v49 = vor.u32 %v14077_v29, %v9777_v31 }
 0x334   :  { %v14617_v51 = vld [vmem:[#allocation2 + $0x14ac] sm:$0xf0]  ;;  %v14133_v57 = vld [vmem:[#allocation2 + $0x594] sm:$0xf] }
 0x335   :  { %v12175_v55 = vld [vmem:[#allocation2 + $0x1690] sm:$0xf]  ;;  %v11920_v61 = vor.u32 %v14617_v51, %v11919_v50  ;;  %5471 = vmatpush.bf16.msra.mxu1 %v11664_v60  ;;  %v10036_v50 = vor.u32 %v14141_v32, %v10033_v37  ;;  %v14005_v51 = vld [vmem:[#allocation2 + $0x194] sm:$0xf] }
 0x336   :  { %v14681_v53 = vld [vmem:[#allocation2 + $0x16ac] sm:$0xf0]  ;;  %v14197_v60 = vld [vmem:[#allocation2 + $0x794] sm:$0xf] }
 0x337   :  { %v11375_v62 = vld [vmem:[#allocation2 + $0x1050] sm:$0xf]  ;;  %v12176_v2 = vor.u32 %v14681_v53, %v12175_v55  ;;  %5484 = vmatpush.bf16.msra.mxu2 %v11920_v61  ;;  %v10292_v55 = vor.u32 %v14205_v45, %v10289_v48  ;;  %v9745_v53 = vld [vmem:[#allocation2 + $0x3b0] sm:$0xf0] }
 0x338   :  { %v14481_v63 = vld [vmem:[#allocation2 + $0x106c] sm:$0xf0]  ;;  %v10257_v61 = vld [vmem:[#allocation2 + $0x7b0] sm:$0xf0] }
 0x339   :  { %v11631_v7 = vld [vmem:[#allocation2 + $0x1250] sm:$0xf]  ;;  %v11376_v9 = vor.u32 %v14481_v63, %v11375_v62  ;;  %5497 = vmatpush.bf16.msra.mxu3 %v12176_v2  ;;  %v9492_v62 = vor.u32 %v14005_v51, %v9489_v52  ;;  %v9748_v63 = vor.u32 %v14069_v54, %v9745_v53  ;;  %v9457_v2 = vld [vmem:[#allocation2 + $0x170] sm:$0xf0] }
 0x33a   :  { %v14545_v3 = vld [vmem:[#allocation2 + $0x126c] sm:$0xf0]  ;;  %v13981_v31 = vld [vmem:[#allocation2 + $0xd4] sm:$0xf] }
 0x33b   :  { %v11887_v4 = vld [vmem:[#allocation2 + $0x1450] sm:$0xf]  ;;  %v11632_v10 = vor.u32 %v14545_v3, %v11631_v7  ;;  %5459 = vmatpush.bf16.msra.mxu0 %v11376_v9  ;;  %v10004_v7 = vor.u32 %v14133_v57, %v10001_v59  ;;  %v14061_v3 = vld [vmem:[#allocation2 + $0x354] sm:$0xf] }
 0x33c   :  { %v14609_v5 = vld [vmem:[#allocation2 + $0x146c] sm:$0xf0]  ;;  %v14189_v9 = vld [vmem:[#allocation2 + $0x754] sm:$0xf] }
 0x33d   :  { %v12143_v6 = vld [vmem:[#allocation2 + $0x1650] sm:$0xf]  ;;  %v11888_v12 = vor.u32 %v14609_v5, %v11887_v4  ;;  %5472 = vmatpush.bf16.msra.mxu1 %v11632_v10  ;;  %v10260_v4 = vor.u32 %v14197_v60, %v10257_v61  ;;  %v9713_v5 = vld [vmem:[#allocation2 + $0x370] sm:$0xf0]  ;;  %v5280_v60 = vpop.f32.mrf.mxu2 }
 0x33e   :  { %v14673_v8 = vld [vmem:[#allocation2 + $0x166c] sm:$0xf0]  ;;  %v9716_v10 = vor.u32 %v14061_v3, %v9713_v5  ;;  %v9393_v32 = vld [vmem:[#allocation2 + $0xf0] sm:$0xf0] }
 0x33f   :  { %v11343_v11 = vld [vmem:[#allocation2 + $0x1010] sm:$0xf]  ;;  %v12144_v16 = vor.u32 %v14673_v8, %v12143_v6  ;;  %5485 = vmatpush.bf16.msra.mxu2 %v11888_v12  ;;  %v14125_v6 = vld [vmem:[#allocation2 + $0x554] sm:$0xf]  ;;  %v9396_v52 = vor.u32 %v13981_v31, %v9393_v32 }
 0x340   :  { %v14473_v21 = vld [vmem:[#allocation2 + $0x102c] sm:$0xf0]  ;;  %v9969_v8 = vld [vmem:[#allocation2 + $0x570] sm:$0xf0] }
 0x341   :  { %v11599_v13 = vld [vmem:[#allocation2 + $0x1210] sm:$0xf]  ;;  %v11344_v30 = vor.u32 %v14473_v21, %v11343_v11  ;;  %5498 = vmatpush.bf16.msra.mxu3 %v12144_v16  ;;  %v10225_v11 = vld [vmem:[#allocation2 + $0x770] sm:$0xf0]  ;;  %v9460_v21 = vor.u32 %v13997_v1, %v9457_v2  ;;  %v9972_v12 = vor.u32 %v14125_v6, %v9969_v8  ;;  %v5293_v1 = vpop.f32.mrf.mxu3  ;;  %v5256_v6 = vpop.f32.mrf.mxu0 }
 0x342   :  { %v14537_v14 = vld [vmem:[#allocation2 + $0x122c] sm:$0xf0]  ;;  %v10228_v24 = vor.u32 %v14189_v9, %v10225_v11  ;;  %v9681_v16 = vld [vmem:[#allocation2 + $0x330] sm:$0xf0] }
 0x343   :  { %v11855_v15 = vld [vmem:[#allocation2 + $0x1410] sm:$0xf]  ;;  %v11600_v40 = vor.u32 %v14537_v14, %v11599_v13  ;;  %5460 = vmatpush.bf16.msra.mxu0 %v11344_v30  ;;  %v13989_v13 = vld [vmem:[#allocation2 + $0x114] sm:$0xf] }
 0x344   :  { %v14601_v17 = vld [vmem:[#allocation2 + $0x142c] sm:$0xf0]  ;;  %v9425_v14 = vld [vmem:[#allocation2 + $0x130] sm:$0xf0] }
 0x345   :  { %v12111_v19 = vld [vmem:[#allocation2 + $0x1610] sm:$0xf]  ;;  %v11856_v44 = vor.u32 %v14601_v17, %v11855_v15  ;;  %5473 = vmatpush.bf16.msra.mxu1 %v11600_v40  ;;  %v14053_v15 = vld [vmem:[#allocation2 + $0x314] sm:$0xf]  ;;  %v9428_v27 = vor.u32 %v13989_v13, %v9425_v14  ;;  %v5255_v40 = vadd.f32 %v5254_v28, %v15336_v58  ;;  %v5282_v32 = vpop.f32.mrf.mxu2 }
 0x346   :  { %v14665_v20 = vld [vmem:[#allocation2 + $0x162c] sm:$0xf0]  ;;  %5461 = vmatmul.bf16.vlgmr.msra.gmra.mxu0 %v15245_v18  ;;  %v14117_v17 = vld [vmem:[#allocation2 + $0x514] sm:$0xf]  ;;  %v9684_v29 = vor.u32 %v14053_v15, %v9681_v16 }
 0x347   :  { %v12112_v46 = vor.u32 %v14665_v20, %v12111_v19  ;;  %5486 = vmatpush.bf16.msra.mxu2 %v11856_v44  ;;  %5505 = vmatpush.bf16.msrb.mxu0 %v9524_v47  ;;  %v9937_v19 = vld [vmem:[#allocation2 + $0x530] sm:$0xf0]  ;;  %v5267_v44 = vpop.f32.mrf.mxu1 }
 0x348   :  { %5474 = vmatmul.bf16.vlgmr.msra.gmra.mxu1 %v15249_v23  ;;  %v14181_v20 = vld [vmem:[#allocation2 + $0x714] sm:$0xf]  ;;  %v9940_v30 = vor.u32 %v14117_v17, %v9937_v19  ;;  %v5268_v51 = vadd.f32 %v5267_v44, %v5255_v40 }
 0x349   :  { %5499 = vmatpush.bf16.msra.mxu3 %v12112_v46  ;;  %5518 = vmatpush.bf16.msrb.mxu1 %v9780_v49  ;;  %v14045_v37 = vld [vmem:[#allocation2 + $0x2d4] sm:$0xf]  ;;  %v10196_v45 = vor.u32 %v14181_v20, %v10193_v25 }
 0x34a   :  { %5487 = vmatmul.bf16.vlgmr.msra.gmra.mxu2 %v15247_v22  ;;  %v9649_v48 = vld [vmem:[#allocation2 + $0x2f0] sm:$0xf0] }
 0x34b   :  { %5531 = vmatpush.bf16.msrb.mxu2 %v10036_v50  ;;  %5506 = vmatpush.bf16.msrb.mxu0 %v9492_v62  ;;  %v14109_v46 = vld [vmem:[#allocation2 + $0x4d4] sm:$0xf]  ;;  %v9652_v54 = vor.u32 %v14045_v37, %v9649_v48  ;;  %v5295_v48 = vpop.f32.mrf.mxu3 }
 0x34c   :  { %5500 = vmatmul.bf16.vlgmr.msra.gmra.mxu3 %v15251_v26  ;;  %v9905_v47 = vld [vmem:[#allocation2 + $0x4f0] sm:$0xf0] }
 0x34d   :  { %5544 = vmatpush.bf16.msrb.mxu3 %v10292_v55  ;;  %5519 = vmatpush.bf16.msrb.mxu1 %v9748_v63  ;;  %v14173_v49 = vld [vmem:[#allocation2 + $0x6d4] sm:$0xf]  ;;  %v9908_v55 = vor.u32 %v14109_v46, %v9905_v47 }
 0x34e   :  { %v10161_v50 = vld [vmem:[#allocation2 + $0x6f0] sm:$0xf0] }
 0x34f   :  { %5532 = vmatpush.bf16.msrb.mxu2 %v10004_v7  ;;  %5507 = vmatpush.bf16.msrb.mxu0 %v9460_v21  ;;  %v13973_v53 = vld [vmem:[#allocation2 + $0x94] sm:$0xf]  ;;  %v10164_v58 = vor.u32 %v14173_v49, %v10161_v50  ;;  %v5281_v7 = vadd.f32 %v5280_v60, %v5268_v51 }
 0x350   :  { %v9361_v57 = vld [vmem:[#allocation2 + $0xb0] sm:$0xf0] }
 0x351   :  { %5545 = vmatpush.bf16.msrb.mxu3 %v10260_v4  ;;  %5520 = vmatpush.bf16.msrb.mxu1 %v9716_v10  ;;  %v14037_v59 = vld [vmem:[#allocation2 + $0x294] sm:$0xf]  ;;  %v9364_v4 = vor.u32 %v13973_v53, %v9361_v57  ;;  %v15343_v5 = vadd.f32 %v5293_v1, %v5281_v7 }
 0x352   :  { %v9617_v61 = vld [vmem:[#allocation2 + $0x2b0] sm:$0xf0] }
 0x353   :  { %5533 = vmatpush.bf16.msrb.mxu2 %v9972_v12  ;;  %5508 = vmatpush.bf16.msrb.mxu0 %v9428_v27  ;;  %v14101_v62 = vld [vmem:[#allocation2 + $0x494] sm:$0xf]  ;;  %v9620_v8 = vor.u32 %v14037_v59, %v9617_v61  ;;  %v5269_v12 = vpop.f32.mrf.mxu1 }
 0x354   :  { %v9873_v63 = vld [vmem:[#allocation2 + $0x4b0] sm:$0xf0] }
 0x355   :  { %5546 = vmatpush.bf16.msrb.mxu3 %v10228_v24  ;;  %5521 = vmatpush.bf16.msrb.mxu1 %v9684_v29  ;;  %v14165_v2 = vld [vmem:[#allocation2 + $0x694] sm:$0xf]  ;;  %v9876_v9 = vor.u32 %v14101_v62, %v9873_v63 }
 0x356   :  { %v10129_v3 = vld [vmem:[#allocation2 + $0x6b0] sm:$0xf0] }
 0x357   :  { %5534 = vmatpush.bf16.msrb.mxu2 %v9940_v30  ;;  %5509 = vmatpush.bf16.msrb.mxu0 %v9396_v52  ;;  %v13965_v11 = vld [vmem:[#allocation2 + $0x54] sm:$0xf]  ;;  %v10132_v13 = vor.u32 %v14165_v2, %v10129_v3 }
 0x358   :  { %v9329_v21 = vld [vmem:[#allocation2 + $0x70] sm:$0xf0] }
 0x359   :  { %5547 = vmatpush.bf16.msrb.mxu3 %v10196_v45  ;;  %5522 = vmatpush.bf16.msrb.mxu1 %v9652_v54  ;;  %v14029_v10 = vld [vmem:[#allocation2 + $0x254] sm:$0xf]  ;;  %v9332_v19 = vor.u32 %v13965_v11, %v9329_v21 }
 0x35a   :  { %v9585_v14 = vld [vmem:[#allocation2 + $0x270] sm:$0xf0] }
 0x35b   :  { %5535 = vmatpush.bf16.msrb.mxu2 %v9908_v55  ;;  %v14093_v15 = vld [vmem:[#allocation2 + $0x454] sm:$0xf]  ;;  %5510 = vmatpush.bf16.msrb.mxu0 %v9364_v4  ;;  %v9588_v27 = vor.u32 %v14029_v10, %v9585_v14 }
 0x35c   :  { %v9841_v24 = vld [vmem:[#allocation2 + $0x470] sm:$0xf0] }
 0x35d   :  { %5548 = vmatpush.bf16.msrb.mxu3 %v10164_v58  ;;  %v14157_v16 = vld [vmem:[#allocation2 + $0x654] sm:$0xf]  ;;  %5523 = vmatpush.bf16.msrb.mxu1 %v9620_v8  ;;  %v9844_v28 = vor.u32 %v14093_v15, %v9841_v24 }
 0x35e   :  { %v10097_v17 = vld [vmem:[#allocation2 + $0x670] sm:$0xf0] }
 0x35f   :  { %v13957_v20 = vld [vmem:[#allocation2 + $0x14] sm:$0xf]  ;;  %5536 = vmatpush.bf16.msrb.mxu2 %v9876_v9  ;;  %v10100_v37 = vor.u32 %v14157_v16, %v10097_v17  ;;  %5511 = vmatpush.bf16.msrb.mxu0 %v9332_v19 }
 0x360   :  { %v9297_v25 = vld [vmem:[#allocation2 + $0x30] sm:$0xf0] }
 0x361   :  { %v14021_v29 = vld [vmem:[#allocation2 + $0x214] sm:$0xf]  ;;  %5549 = vmatpush.bf16.msrb.mxu3 %v10132_v13  ;;  %v9300_v50 = vor.u32 %v13957_v20, %v9297_v25  ;;  %5524 = vmatpush.bf16.msrb.mxu1 %v9588_v27 }
 0x362   :  { %v9553_v30 = vld [vmem:[#allocation2 + $0x230] sm:$0xf0] }
 0x363   :  { %v14085_v31 = vld [vmem:[#allocation2 + $0x414] sm:$0xf]  ;;  %5537 = vmatpush.bf16.msrb.mxu2 %v9844_v28  ;;  %v9556_v55 = vor.u32 %v14021_v29, %v9553_v30  ;;  %5512 = vmatpush.bf16.msrb.mxu0 %v9300_v50  ;;  %v5319_v50 = vpop.f32.mrf.mxu1 }
 0x364   :  { %v9809_v40 = vld [vmem:[#allocation2 + $0x430] sm:$0xf0] }
 0x365   :  { %v14149_v44 = vld [vmem:[#allocation2 + $0x614] sm:$0xf]  ;;  %v9812_v53 = vor.u32 %v14085_v31, %v9809_v40  ;;  %5550 = vmatpush.bf16.msrb.mxu3 %v10100_v37  ;;  %5525 = vmatpush.bf16.msrb.mxu1 %v9556_v55 }
 0x366   :  { %v10065_v45 = vld [vmem:[#allocation2 + $0x630] sm:$0xf0]  ;;  %5513 = vmatmul.bf16.vlgmr.msrb.gmra.mxu0 %v15220_v36 }
 0x367   :  { %v14269_v46 = vld [vmem:[#allocation2 + $0x9d4] sm:$0xf]  ;;  %v10068_v60 = vor.u32 %v14149_v44, %v10065_v45  ;;  %5538 = vmatpush.bf16.msrb.mxu2 %v9812_v53  ;;  %v5306_v45 = vpop.f32.mrf.mxu0 }
 0x368   :  { %v10545_v47 = vld [vmem:[#allocation2 + $0x9f0] sm:$0xf0]  ;;  %5526 = vmatmul.bf16.vlgmr.msrb.gmra.mxu1 %v15224_v43 }
 0x369   :  { %v14333_v49 = vld [vmem:[#allocation2 + $0xbd4] sm:$0xf]  ;;  %v10548_v58 = vor.u32 %v14269_v46, %v10545_v47  ;;  %5551 = vmatpush.bf16.msrb.mxu3 %v10068_v60  ;;  %v5307_v47 = vadd.f32 %v5306_v45, %v15343_v5 }
 0x36a   :  { %v10801_v51 = vld [vmem:[#allocation2 + $0xbf0] sm:$0xf0]  ;;  %5539 = vmatmul.bf16.vlgmr.msrb.gmra.mxu2 %v15218_v35 }
 0x36b   :  { %v14397_v52 = vld [vmem:[#allocation2 + $0xdd4] sm:$0xf]  ;;  %v10804_v61 = vor.u32 %v14333_v49, %v10801_v51  ;;  %5557 = vmatpush.bf16.msra.mxu0 %v10548_v58 }
 0x36c   :  { %v11057_v54 = vld [vmem:[#allocation2 + $0xdf0] sm:$0xf0]  ;;  %5552 = vmatmul.bf16.vlgmr.msrb.gmra.mxu3 %v15222_v42 }
 0x36d   :  { %v14461_v57 = vld [vmem:[#allocation2 + $0xfd4] sm:$0xf]  ;;  %v11060_v62 = vor.u32 %v14397_v52, %v11057_v54  ;;  %5570 = vmatpush.bf16.msra.mxu1 %v10804_v61 }
 0x36e   :  { %v11313_v59 = vld [vmem:[#allocation2 + $0xff0] sm:$0xf0] }
 0x36f   :  { %v14261_v63 = vld [vmem:[#allocation2 + $0x994] sm:$0xf]  ;;  %v11316_v2 = vor.u32 %v14461_v57, %v11313_v59  ;;  %5583 = vmatpush.bf16.msra.mxu2 %v11060_v62  ;;  %v5320_v59 = vadd.f32 %v5319_v50, %v5307_v47 }
 0x370   :  { %v10513_v7 = vld [vmem:[#allocation2 + $0x9b0] sm:$0xf0] }
 0x371   :  { %v14325_v1 = vld [vmem:[#allocation2 + $0xb94] sm:$0xf]  ;;  %v10516_v11 = vor.u32 %v14261_v63, %v10513_v7  ;;  %5596 = vmatpush.bf16.msra.mxu3 %v11316_v2 }
 0x372   :  { %v10769_v3 = vld [vmem:[#allocation2 + $0xbb0] sm:$0xf0] }
 0x373   :  { %v14389_v4 = vld [vmem:[#allocation2 + $0xd94] sm:$0xf]  ;;  %v10772_v21 = vor.u32 %v14325_v1, %v10769_v3  ;;  %5558 = vmatpush.bf16.msra.mxu0 %v10516_v11 }
 0x374   :  { %v11025_v6 = vld [vmem:[#allocation2 + $0xdb0] sm:$0xf0] }
 0x375   :  { %v14453_v8 = vld [vmem:[#allocation2 + $0xf94] sm:$0xf]  ;;  %v11028_v10 = vor.u32 %v14389_v4, %v11025_v6  ;;  %5571 = vmatpush.bf16.msra.mxu1 %v10772_v21 }
 0x376   :  { %v11281_v9 = vld [vmem:[#allocation2 + $0xfb0] sm:$0xf0] }
 0x377   :  { %v14253_v12 = vld [vmem:[#allocation2 + $0x954] sm:$0xf]  ;;  %v11284_v15 = vor.u32 %v14453_v8, %v11281_v9  ;;  %5584 = vmatpush.bf16.msra.mxu2 %v11028_v10  ;;  %v5332_v8 = vpop.f32.mrf.mxu2 }
 0x378   :  { %v10481_v13 = vld [vmem:[#allocation2 + $0x970] sm:$0xf0]  ;;  %v5333_v10 = vadd.f32 %v5332_v8, %v5320_v59 }
 0x379   :  { %v14317_v14 = vld [vmem:[#allocation2 + $0xb54] sm:$0xf]  ;;  %v10484_v25 = vor.u32 %v14253_v12, %v10481_v13  ;;  %5597 = vmatpush.bf16.msra.mxu3 %v11284_v15  ;;  %v5345_v12 = vpop.f32.mrf.mxu3  ;;  %v5308_v15 = vpop.f32.mrf.mxu0 }
 0x37a   :  { %v10737_v24 = vld [vmem:[#allocation2 + $0xb70] sm:$0xf0] }
 0x37b   :  { %v14381_v16 = vld [vmem:[#allocation2 + $0xd54] sm:$0xf]  ;;  %v10740_v27 = vor.u32 %v14317_v14, %v10737_v24  ;;  %5559 = vmatpush.bf16.msra.mxu0 %v10484_v25 }
 0x37c   :  { %v10993_v17 = vld [vmem:[#allocation2 + $0xd70] sm:$0xf0] }
 0x37d   :  { %v14445_v19 = vld [vmem:[#allocation2 + $0xf54] sm:$0xf]  ;;  %v10996_v28 = vor.u32 %v14381_v16, %v10993_v17  ;;  %5572 = vmatpush.bf16.msra.mxu1 %v10740_v27  ;;  %v5321_v16 = vpop.f32.mrf.mxu1  ;;  %v15350_v17 = vadd.f32 %v5345_v12, %v5333_v10 }
 0x37e   :  { %v11249_v20 = vld [vmem:[#allocation2 + $0xf70] sm:$0xf0] }
 0x37f   :  { %v14245_v29 = vld [vmem:[#allocation2 + $0x914] sm:$0xf]  ;;  %v11252_v32 = vor.u32 %v14445_v19, %v11249_v20  ;;  %5585 = vmatpush.bf16.msra.mxu2 %v10996_v28 }
 0x380   :  { %v10449_v30 = vld [vmem:[#allocation2 + $0x930] sm:$0xf0] }
 0x381   :  { %v14309_v31 = vld [vmem:[#allocation2 + $0xb14] sm:$0xf]  ;;  %v10452_v49 = vor.u32 %v14245_v29, %v10449_v30  ;;  %5598 = vmatpush.bf16.msra.mxu3 %v11252_v32 }
 0x382   :  { %v10705_v37 = vld [vmem:[#allocation2 + $0xb30] sm:$0xf0] }
 0x383   :  { %v14373_v40 = vld [vmem:[#allocation2 + $0xd14] sm:$0xf]  ;;  %v10708_v51 = vor.u32 %v14309_v31, %v10705_v37  ;;  %5560 = vmatpush.bf16.msra.mxu0 %v10452_v49 }
 0x384   :  { %v10961_v44 = vld [vmem:[#allocation2 + $0xd30] sm:$0xf0] }
 0x385   :  { %v14437_v48 = vld [vmem:[#allocation2 + $0xf14] sm:$0xf]  ;;  %v10964_v52 = vor.u32 %v14373_v40, %v10961_v44  ;;  %5573 = vmatpush.bf16.msra.mxu1 %v10708_v51 }
 0x386   :  { %v11217_v46 = vld [vmem:[#allocation2 + $0xf30] sm:$0xf0] }
 0x387   :  { %v14237_v54 = vld [vmem:[#allocation2 + $0x8d4] sm:$0xf]  ;;  %v11220_v57 = vor.u32 %v14437_v48, %v11217_v46  ;;  %5586 = vmatpush.bf16.msra.mxu2 %v10964_v52 }
 0x388   :  { %v10417_v55 = vld [vmem:[#allocation2 + $0x8f0] sm:$0xf0] }
 0x389   :  { %v14301_v53 = vld [vmem:[#allocation2 + $0xad4] sm:$0xf]  ;;  %v10420_v7 = vor.u32 %v14237_v54, %v10417_v55  ;;  %5599 = vmatpush.bf16.msra.mxu3 %v11220_v57  ;;  %v5334_v57 = vpop.f32.mrf.mxu2 }
 0x38a   :  { %v10673_v60 = vld [vmem:[#allocation2 + $0xaf0] sm:$0xf0] }
 0x38b   :  { %v14365_v58 = vld [vmem:[#allocation2 + $0xcd4] sm:$0xf]  ;;  %v10676_v5 = vor.u32 %v14301_v53, %v10673_v60  ;;  %5561 = vmatpush.bf16.msra.mxu0 %v10420_v7 }
 0x38c   :  { %v10929_v61 = vld [vmem:[#allocation2 + $0xcf0] sm:$0xf0] }
 0x38d   :  { %v14429_v62 = vld [vmem:[#allocation2 + $0xed4] sm:$0xf]  ;;  %v10932_v1 = vor.u32 %v14365_v58, %v10929_v61  ;;  %5574 = vmatpush.bf16.msra.mxu1 %v10676_v5  ;;  %v5347_v61 = vpop.f32.mrf.mxu3 }
 0x38e   :  { %v11185_v63 = vld [vmem:[#allocation2 + $0xef0] sm:$0xf0] }
 0x38f   :  { %v14229_v2 = vld [vmem:[#allocation2 + $0x894] sm:$0xf]  ;;  %v11188_v6 = vor.u32 %v14429_v62, %v11185_v63  ;;  %5587 = vmatpush.bf16.msra.mxu2 %v10932_v1 }
 0x390   :  { %v10385_v3 = vld [vmem:[#allocation2 + $0x8b0] sm:$0xf0] }
 0x391   :  { %v14293_v4 = vld [vmem:[#allocation2 + $0xa94] sm:$0xf]  ;;  %v10388_v24 = vor.u32 %v14229_v2, %v10385_v3  ;;  %5600 = vmatpush.bf16.msra.mxu3 %v11188_v6 }
 0x392   :  { %v10641_v9 = vld [vmem:[#allocation2 + $0xab0] sm:$0xf0] }
 0x393   :  { %v14357_v11 = vld [vmem:[#allocation2 + $0xc94] sm:$0xf]  ;;  %v10644_v19 = vor.u32 %v14293_v4, %v10641_v9  ;;  %5562 = vmatpush.bf16.msra.mxu0 %v10388_v24 }
 0x394   :  { %v10897_v21 = vld [vmem:[#allocation2 + $0xcb0] sm:$0xf0] }
 0x395   :  { %v14421_v13 = vld [vmem:[#allocation2 + $0xe94] sm:$0xf]  ;;  %v10900_v20 = vor.u32 %v14357_v11, %v10897_v21  ;;  %5575 = vmatpush.bf16.msra.mxu1 %v10644_v19 }
 0x396   :  { %v11153_v14 = vld [vmem:[#allocation2 + $0xeb0] sm:$0xf0] }
 0x397   :  { %v14221_v25 = vld [vmem:[#allocation2 + $0x854] sm:$0xf]  ;;  %v11156_v29 = vor.u32 %v14421_v13, %v11153_v14  ;;  %5588 = vmatpush.bf16.msra.mxu2 %v10900_v20 }
 0x398   :  { %v10353_v27 = vld [vmem:[#allocation2 + $0x870] sm:$0xf0] }
 0x399   :  { %v14285_v28 = vld [vmem:[#allocation2 + $0xa54] sm:$0xf]  ;;  %v10356_v44 = vor.u32 %v14221_v25, %v10353_v27  ;;  %5601 = vmatpush.bf16.msra.mxu3 %v11156_v29 }
 0x39a   :  { %v10609_v30 = vld [vmem:[#allocation2 + $0xa70] sm:$0xf0] }
 0x39b   :  { %v14349_v31 = vld [vmem:[#allocation2 + $0xc54] sm:$0xf]  ;;  %v10612_v46 = vor.u32 %v14285_v28, %v10609_v30  ;;  %5563 = vmatpush.bf16.msra.mxu0 %v10356_v44 }
 0x39c   :  { %v10865_v32 = vld [vmem:[#allocation2 + $0xc70] sm:$0xf0] }
 0x39d   :  { %v14413_v37 = vld [vmem:[#allocation2 + $0xe54] sm:$0xf]  ;;  %v10868_v47 = vor.u32 %v14349_v31, %v10865_v32  ;;  %5576 = vmatpush.bf16.msra.mxu1 %v10612_v46  ;;  %v15355_v32 = vld [vmem:[%s17985_s5 + $0x10] sm:$0xff] }
 0x39e   :  { %v11121_v40 = vld [vmem:[#allocation2 + $0xe70] sm:$0xf0] }
 0x39f   :  { %v14213_v45 = vld [vmem:[#allocation2 + $0x814] sm:$0xf]  ;;  %v11124_v52 = vor.u32 %v14413_v37, %v11121_v40  ;;  %5589 = vmatpush.bf16.msra.mxu2 %v10868_v47 }
 0x3a0   :  { %v10321_v48 = vld [vmem:[#allocation2 + $0x830] sm:$0xf0] }
 0x3a1   :  { %v14277_v49 = vld [vmem:[#allocation2 + $0xa14] sm:$0xf]  ;;  %v10324_v62 = vor.u32 %v14213_v45, %v10321_v48  ;;  %5602 = vmatpush.bf16.msra.mxu3 %v11124_v52  ;;  %v865_v45 = vperm.slane %v15355_v32, 0 }
 0x3a2   :  { %v10577_v50 = vld [vmem:[#allocation2 + $0xa30] sm:$0xf0] }
 0x3a3   :  { %v14341_v51 = vld [vmem:[#allocation2 + $0xc14] sm:$0xf]  ;;  %v10580_v1 = vor.u32 %v14277_v49, %v10577_v50  ;;  %5564 = vmatpush.bf16.msra.mxu0 %v10324_v62 }
 0x3a4   :  { %v10833_v54 = vld [vmem:[#allocation2 + $0xc30] sm:$0xf0] }
 0x3a5   :  { %v14405_v55 = vld [vmem:[#allocation2 + $0xe14] sm:$0xf]  ;;  %v10836_v2 = vor.u32 %v14341_v51, %v10833_v54  ;;  %5577 = vmatpush.bf16.msra.mxu1 %v10580_v1 }
 0x3a6   :  { %v11089_v53 = vld [vmem:[#allocation2 + $0xe30] sm:$0xf0]  ;;  %5565 = vmatmul.bf16.vlgmr.msra.gmra.mxu0 %v15235_v38 }
 0x3a7   :  { %v14525_v59 = vld [vmem:[#allocation2 + $0x11d4] sm:$0xf]  ;;  %v11092_v6 = vor.u32 %v14405_v55, %v11089_v53  ;;  %5590 = vmatpush.bf16.msra.mxu2 %v10836_v2  ;;  %v881_v55 = vperm.slane %v865_v45, 0 }
 0x3a8   :  { %v11569_v60 = vld [vmem:[#allocation2 + $0x11f0] sm:$0xf0]  ;;  %5578 = vmatmul.bf16.vlgmr.msra.gmra.mxu1 %v15239_v41 }
 0x3a9   :  { %v14589_v58 = vld [vmem:[#allocation2 + $0x13d4] sm:$0xf]  ;;  %v11572_v8 = vor.u32 %v14525_v59, %v11569_v60  ;;  %5603 = vmatpush.bf16.msra.mxu3 %v11092_v6  ;;  %v5371_v6 = vpop.f32.mrf.mxu1 }
 0x3aa   :  { %v11825_v63 = vld [vmem:[#allocation2 + $0x13f0] sm:$0xf0]  ;;  %5591 = vmatmul.bf16.vlgmr.msra.gmra.mxu2 %v15233_v33 }
 0x3ab   :  { %v14653_v7 = vld [vmem:[#allocation2 + $0x15d4] sm:$0xf]  ;;  %v11828_v9 = vor.u32 %v14589_v58, %v11825_v63  ;;  %5609 = vmatpush.bf16.msrb.mxu0 %v11572_v8  ;;  %v5358_v63 = vpop.f32.mrf.mxu0 }
 0x3ac   :  { %v12081_v5 = vld [vmem:[#allocation2 + $0x15f0] sm:$0xf0]  ;;  %5604 = vmatmul.bf16.vlgmr.msra.gmra.mxu3 %v15237_v39 }
 0x3ad   :  { %v14717_v3 = vld [vmem:[#allocation2 + $0x17d4] sm:$0xf]  ;;  %v12084_v11 = vor.u32 %v14653_v7, %v12081_v5  ;;  %5622 = vmatpush.bf16.msrb.mxu1 %v11828_v9 }
 0x3ae   :  { %v12337_v4 = vld [vmem:[#allocation2 + $0x17f0] sm:$0xf0] }
 0x3af   :  { %v14517_v21 = vld [vmem:[#allocation2 + $0x1194] sm:$0xf]  ;;  %v12340_v13 = vor.u32 %v14717_v3, %v12337_v4  ;;  %5635 = vmatpush.bf16.msrb.mxu2 %v12084_v11  ;;  %v5359_v4 = vadd.f32 %v5358_v63, %v881_v55 }
 0x3b0   :  { %v11537_v10 = vld [vmem:[#allocation2 + $0x11b0] sm:$0xf0] }
 0x3b1   :  { %v14581_v12 = vld [vmem:[#allocation2 + $0x1394] sm:$0xf]  ;;  %v11540_v20 = vor.u32 %v14517_v21, %v11537_v10  ;;  %5648 = vmatpush.bf16.msrb.mxu3 %v12340_v13  ;;  %v5372_v13 = vadd.f32 %v5371_v6, %v5359_v4 }
 0x3b2   :  { %v11793_v14 = vld [vmem:[#allocation2 + $0x13b0] sm:$0xf0] }
 0x3b3   :  { %v14645_v15 = vld [vmem:[#allocation2 + $0x1594] sm:$0xf]  ;;  %v11796_v28 = vor.u32 %v14581_v12, %v11793_v14  ;;  %5610 = vmatpush.bf16.msrb.mxu0 %v11540_v20 }
 0x3b4   :  { %v12049_v24 = vld [vmem:[#allocation2 + $0x15b0] sm:$0xf0] }
 0x3b5   :  { %v14709_v16 = vld [vmem:[#allocation2 + $0x1794] sm:$0xf]  ;;  %v12052_v29 = vor.u32 %v14645_v15, %v12049_v24  ;;  %5623 = vmatpush.bf16.msrb.mxu1 %v11796_v28 }
 0x3b6   :  { %v12305_v19 = vld [vmem:[#allocation2 + $0x17b0] sm:$0xf0] }
 0x3b7   :  { %v14509_v25 = vld [vmem:[#allocation2 + $0x1154] sm:$0xf]  ;;  %v12308_v37 = vor.u32 %v14709_v16, %v12305_v19  ;;  %5636 = vmatpush.bf16.msrb.mxu2 %v12052_v29 }
 0x3b8   :  { %v11505_v27 = vld [vmem:[#allocation2 + $0x1170] sm:$0xf0] }
 0x3b9   :  { %v14573_v30 = vld [vmem:[#allocation2 + $0x1354] sm:$0xf]  ;;  %v11508_v47 = vor.u32 %v14509_v25, %v11505_v27  ;;  %5649 = vmatpush.bf16.msrb.mxu3 %v12308_v37  ;;  %v5384_v25 = vpop.f32.mrf.mxu2  ;;  %v5397_v37 = vpop.f32.mrf.mxu3 }
 0x3ba   :  { %v11761_v31 = vld [vmem:[#allocation2 + $0x1370] sm:$0xf0] }
 0x3bb   :  { %v14637_v40 = vld [vmem:[#allocation2 + $0x1554] sm:$0xf]  ;;  %v11764_v50 = vor.u32 %v14573_v30, %v11761_v31  ;;  %5611 = vmatpush.bf16.msrb.mxu0 %v11508_v47  ;;  %v5385_v31 = vadd.f32 %v5384_v25, %v5372_v13  ;;  %v9783_v13 = vld [vmem:[#allocation2 + $0x3d8] sm:$0xf] }
 0x3bc   :  { %v12017_v44 = vld [vmem:[#allocation2 + $0x1570] sm:$0xf0]  ;;  %v10295_v25 = vld [vmem:[#allocation2 + $0x7d8] sm:$0xf] }
 0x3bd   :  { %v14701_v48 = vld [vmem:[#allocation2 + $0x1754] sm:$0xf]  ;;  %v12020_v51 = vor.u32 %v14637_v40, %v12017_v44  ;;  %5624 = vmatpush.bf16.msrb.mxu1 %v11764_v50 }
 0x3be   :  { %v12273_v46 = vld [vmem:[#allocation2 + $0x1770] sm:$0xf0] }
 0x3bf   :  { %v14501_v49 = vld [vmem:[#allocation2 + $0x1114] sm:$0xf]  ;;  %v12276_v53 = vor.u32 %v14701_v48, %v12273_v46  ;;  %5637 = vmatpush.bf16.msrb.mxu2 %v12020_v51  ;;  %v15362_v48 = vadd.f32 %v5397_v37, %v5385_v31  ;;  %v5360_v46 = vpop.f32.mrf.mxu0  ;;  %v9495_v37 = vld [vmem:[#allocation2 + $0x198] sm:$0xf] }
 0x3c0   :  { %v11473_v52 = vld [vmem:[#allocation2 + $0x1130] sm:$0xf0]  ;;  %v14074_v46 = vld [vmem:[#allocation2 + $0x3b4] sm:$0xf0] }
 0x3c1   :  { %v14565_v54 = vld [vmem:[#allocation2 + $0x1314] sm:$0xf]  ;;  %v11476_v62 = vor.u32 %v14501_v49, %v11473_v52  ;;  %5650 = vmatpush.bf16.msrb.mxu3 %v12276_v53  ;;  %v5386_v4 = vpop.f32.mrf.mxu2 }
 0x3c2   :  { %v11729_v57 = vld [vmem:[#allocation2 + $0x1330] sm:$0xf0]  ;;  %v13994_v4 = vld [vmem:[#allocation2 + $0x134] sm:$0xf0] }
 0x3c3   :  { %v14629_v59 = vld [vmem:[#allocation2 + $0x1514] sm:$0xf]  ;;  %v11732_v7 = vor.u32 %v14565_v54, %v11729_v57  ;;  %5612 = vmatpush.bf16.msrb.mxu0 %v11476_v62  ;;  %v5373_v54 = vpop.f32.mrf.mxu1 }
 0x3c4   :  { %v11985_v60 = vld [vmem:[#allocation2 + $0x1530] sm:$0xf0] }
 0x3c5   :  { %v14693_v58 = vld [vmem:[#allocation2 + $0x1714] sm:$0xf]  ;;  %v11988_v5 = vor.u32 %v14629_v59, %v11985_v60  ;;  %5625 = vmatpush.bf16.msrb.mxu1 %v11732_v7 }
 0x3c6   :  { %v12241_v61 = vld [vmem:[#allocation2 + $0x1730] sm:$0xf0] }
 0x3c7   :  { %v14493_v1 = vld [vmem:[#allocation2 + $0x10d4] sm:$0xf]  ;;  %v12244_v8 = vor.u32 %v14693_v58, %v12241_v61  ;;  %5638 = vmatpush.bf16.msrb.mxu2 %v11988_v5 }
 0x3c8   :  { %v11441_v2 = vld [vmem:[#allocation2 + $0x10f0] sm:$0xf0] }
 0x3c9   :  { %v14557_v3 = vld [vmem:[#allocation2 + $0x12d4] sm:$0xf]  ;;  %v11444_v14 = vor.u32 %v14493_v1, %v11441_v2  ;;  %5651 = vmatpush.bf16.msrb.mxu3 %v12244_v8 }
 0x3ca   :  { %v11697_v9 = vld [vmem:[#allocation2 + $0x12f0] sm:$0xf0] }
 0x3cb   :  { %v14621_v11 = vld [vmem:[#allocation2 + $0x14d4] sm:$0xf]  ;;  %v11700_v15 = vor.u32 %v14557_v3, %v11697_v9  ;;  %5613 = vmatpush.bf16.msrb.mxu0 %v11444_v14 }
 0x3cc   :  { %v11953_v21 = vld [vmem:[#allocation2 + $0x14f0] sm:$0xf0] }
 0x3cd   :  { %v14685_v10 = vld [vmem:[#allocation2 + $0x16d4] sm:$0xf]  ;;  %v11956_v24 = vor.u32 %v14621_v11, %v11953_v21  ;;  %5626 = vmatpush.bf16.msrb.mxu1 %v11700_v15  ;;  %v5399_v21 = vpop.f32.mrf.mxu3  ;;  %v14082_v15 = vld [vmem:[#allocation2 + $0x3f4] sm:$0xf0] }
 0x3ce   :  { %v12209_v12 = vld [vmem:[#allocation2 + $0x16f0] sm:$0xf0]  ;;  %v14122_v21 = vld [vmem:[#allocation2 + $0x534] sm:$0xf0] }
 0x3cf   :  { %v14485_v16 = vld [vmem:[#allocation2 + $0x1094] sm:$0xf]  ;;  %v12212_v27 = vor.u32 %v14685_v10, %v12209_v12  ;;  %5639 = vmatpush.bf16.msrb.mxu2 %v11956_v24  ;;  %v9527_v10 = vld [vmem:[#allocation2 + $0x1d8] sm:$0xf] }
 0x3d0   :  { %v11409_v19 = vld [vmem:[#allocation2 + $0x10b0] sm:$0xf0]  ;;  %v14018_v12 = vld [vmem:[#allocation2 + $0x1f4] sm:$0xf0] }
 0x3d1   :  { %v14549_v20 = vld [vmem:[#allocation2 + $0x1294] sm:$0xf]  ;;  %v11412_v45 = vor.u32 %v14485_v16, %v11409_v19  ;;  %5652 = vmatpush.bf16.msrb.mxu3 %v12212_v27  ;;  %v10039_v24 = vld [vmem:[#allocation2 + $0x5d8] sm:$0xf] }
 0x3d2   :  { %v11665_v28 = vld [vmem:[#allocation2 + $0x12b0] sm:$0xf0]  ;;  %v14146_v16 = vld [vmem:[#allocation2 + $0x5f4] sm:$0xf0] }
 0x3d3   :  { %v14613_v29 = vld [vmem:[#allocation2 + $0x1494] sm:$0xf]  ;;  %v11668_v47 = vor.u32 %v14549_v20, %v11665_v28  ;;  %5614 = vmatpush.bf16.msrb.mxu0 %v11412_v45  ;;  %v14210_v27 = vld [vmem:[#allocation2 + $0x7f4] sm:$0xf0]  ;;  %v10040_v31 = vor.u32 %v14146_v16, %v10039_v24 }
 0x3d4   :  { %v11921_v30 = vld [vmem:[#allocation2 + $0x14b0] sm:$0xf0]  ;;  %v10296_v45 = vor.u32 %v14210_v27, %v10295_v25  ;;  %v9399_v16 = vld [vmem:[#allocation2 + $0xd8] sm:$0xf]  ;;  %v5423_v27 = vpop.f32.mrf.mxu1 }
 0x3d5   :  { %v14677_v40 = vld [vmem:[#allocation2 + $0x1694] sm:$0xf]  ;;  %v11924_v49 = vor.u32 %v14613_v29, %v11921_v30  ;;  %5627 = vmatpush.bf16.msrb.mxu1 %v11668_v47  ;;  %v9528_v29 = vor.u32 %v14018_v12, %v9527_v10  ;;  %v9784_v30 = vor.u32 %v14082_v15, %v9783_v13  ;;  %v10007_v47 = vld [vmem:[#allocation2 + $0x598] sm:$0xf] }
 0x3d6   :  { %v12177_v44 = vld [vmem:[#allocation2 + $0x16b0] sm:$0xf0]  ;;  %v10199_v10 = vld [vmem:[#allocation2 + $0x718] sm:$0xf] }
 0x3d7   :  { %v14477_v50 = vld [vmem:[#allocation2 + $0x1054] sm:$0xf]  ;;  %v12180_v55 = vor.u32 %v14677_v40, %v12177_v44  ;;  %5640 = vmatpush.bf16.msrb.mxu2 %v11924_v49  ;;  %v14010_v40 = vld [vmem:[#allocation2 + $0x1b4] sm:$0xf0] }
 0x3d8   :  { %v11377_v51 = vld [vmem:[#allocation2 + $0x1070] sm:$0xf0]  ;;  %v9751_v44 = vld [vmem:[#allocation2 + $0x398] sm:$0xf] }
 0x3d9   :  { %v14541_v52 = vld [vmem:[#allocation2 + $0x1254] sm:$0xf]  ;;  %v11380_v61 = vor.u32 %v14477_v50, %v11377_v51  ;;  %5653 = vmatpush.bf16.msrb.mxu3 %v12180_v55  ;;  %v14138_v49 = vld [vmem:[#allocation2 + $0x5b4] sm:$0xf0]  ;;  %v9752_v54 = vor.u32 %v14074_v46, %v9751_v44 }
 0x3da   :  { %v11633_v53 = vld [vmem:[#allocation2 + $0x1270] sm:$0xf0]  ;;  %v10263_v50 = vld [vmem:[#allocation2 + $0x798] sm:$0xf]  ;;  %v10008_v55 = vor.u32 %v14138_v49, %v10007_v47 }
 0x3db   :  { %v14605_v57 = vld [vmem:[#allocation2 + $0x1454] sm:$0xf]  ;;  %v11636_v7 = vor.u32 %v14541_v52, %v11633_v53  ;;  %5615 = vmatpush.bf16.msrb.mxu0 %v11380_v61  ;;  %v14202_v51 = vld [vmem:[#allocation2 + $0x7b4] sm:$0xf0]  ;;  %v9496_v52 = vor.u32 %v14010_v40, %v9495_v37 }
 0x3dc   :  { %v11889_v59 = vld [vmem:[#allocation2 + $0x1470] sm:$0xf0]  ;;  %v9463_v53 = vld [vmem:[#allocation2 + $0x158] sm:$0xf] }
 0x3dd   :  { %v14669_v60 = vld [vmem:[#allocation2 + $0x1654] sm:$0xf]  ;;  %v11892_v5 = vor.u32 %v14605_v57, %v11889_v59  ;;  %5628 = vmatpush.bf16.msrb.mxu1 %v11636_v7  ;;  %v14002_v57 = vld [vmem:[#allocation2 + $0x174] sm:$0xf0] }
 0x3de   :  { %v12145_v58 = vld [vmem:[#allocation2 + $0x1670] sm:$0xf0]  ;;  %v9719_v59 = vld [vmem:[#allocation2 + $0x358] sm:$0xf] }
 0x3df   :  { %v14469_v62 = vld [vmem:[#allocation2 + $0x1014] sm:$0xf]  ;;  %v12148_v6 = vor.u32 %v14669_v60, %v12145_v58  ;;  %5641 = vmatpush.bf16.msrb.mxu2 %v11892_v5  ;;  %v10264_v60 = vor.u32 %v14202_v51, %v10263_v50  ;;  %v14066_v58 = vld [vmem:[#allocation2 + $0x374] sm:$0xf0]  ;;  %v9464_v5 = vor.u32 %v14002_v57, %v9463_v53 }
 0x3e0   :  { %v11345_v63 = vld [vmem:[#allocation2 + $0x1030] sm:$0xf0]  ;;  %v9975_v61 = vld [vmem:[#allocation2 + $0x558] sm:$0xf] }
 0x3e1   :  { %v14533_v1 = vld [vmem:[#allocation2 + $0x1214] sm:$0xf]  ;;  %v11348_v14 = vor.u32 %v14469_v62, %v11345_v63  ;;  %5654 = vmatpush.bf16.msrb.mxu3 %v12148_v6  ;;  %v14130_v62 = vld [vmem:[#allocation2 + $0x574] sm:$0xf0] }
 0x3e2   :  { %v11601_v2 = vld [vmem:[#allocation2 + $0x1230] sm:$0xf0]  ;;  %v10231_v63 = vld [vmem:[#allocation2 + $0x758] sm:$0xf] }
 0x3e3   :  { %v14597_v3 = vld [vmem:[#allocation2 + $0x1414] sm:$0xf]  ;;  %v11604_v19 = vor.u32 %v14533_v1, %v11601_v2  ;;  %5616 = vmatpush.bf16.msrb.mxu0 %v11348_v14  ;;  %v14194_v7 = vld [vmem:[#allocation2 + $0x774] sm:$0xf0]  ;;  %v9720_v1 = vor.u32 %v14066_v58, %v9719_v59  ;;  %v9976_v2 = vor.u32 %v14130_v62, %v9975_v61  ;;  %v5410_v14 = vpop.f32.mrf.mxu0  ;;  %v5449_v59 = vpop.f32.mrf.mxu3 }
 0x3e4   :  { %v11857_v8 = vld [vmem:[#allocation2 + $0x1430] sm:$0xf0]  ;;  %v9687_v6 = vld [vmem:[#allocation2 + $0x318] sm:$0xf]  ;;  %v5411_v25 = vadd.f32 %v5410_v14, %v15362_v48 }
 0x3e5   :  { %v14661_v9 = vld [vmem:[#allocation2 + $0x1614] sm:$0xf]  ;;  %v11860_v20 = vor.u32 %v14597_v3, %v11857_v8  ;;  %5629 = vmatpush.bf16.msrb.mxu1 %v11604_v19  ;;  %v9431_v3 = vld [vmem:[#allocation2 + $0x118] sm:$0xf]  ;;  %v10232_v8 = vor.u32 %v14194_v7, %v10231_v63 }
 0x3e6   :  { %v12113_v11 = vld [vmem:[#allocation2 + $0x1630] sm:$0xf0]  ;;  %5617 = vmatmul.bf16.vlgmr.msrb.gmra.mxu0 %v15245_v18  ;;  %v14186_v12 = vld [vmem:[#allocation2 + $0x734] sm:$0xf0]  ;;  %v9432_v13 = vor.u32 %v13994_v4, %v9431_v3  ;;  %v5424_v44 = vadd.f32 %v5423_v27, %v5411_v25  ;;  %v5425_v4 = vpop.f32.mrf.mxu1 }
 0x3e7   :  { %v12116_v28 = vor.u32 %v14661_v9, %v12113_v11  ;;  %5642 = vmatpush.bf16.msrb.mxu2 %v11860_v20  ;;  %5661 = vmatpush.bf16.msra.mxu0 %v9528_v29  ;;  %v14058_v9 = vld [vmem:[#allocation2 + $0x334] sm:$0xf0] }
 0x3e8   :  { %5630 = vmatmul.bf16.vlgmr.msrb.gmra.mxu1 %v15249_v23  ;;  %v9943_v11 = vld [vmem:[#allocation2 + $0x518] sm:$0xf]  ;;  %v9688_v15 = vor.u32 %v14058_v9, %v9687_v6 }
 0x3e9   :  { %5655 = vmatpush.bf16.msrb.mxu3 %v12116_v28  ;;  %5674 = vmatpush.bf16.msra.mxu1 %v9784_v30  ;;  %v9944_v24 = vor.u32 %v14122_v21, %v9943_v11  ;;  %v13986_v19 = vld [vmem:[#allocation2 + $0xf4] sm:$0xf0]  ;;  %v10200_v28 = vor.u32 %v14186_v12, %v10199_v10 }
 0x3ea   :  { %5643 = vmatmul.bf16.vlgmr.msrb.gmra.mxu2 %v15247_v22  ;;  %v9655_v20 = vld [vmem:[#allocation2 + $0x2d8] sm:$0xf] }
 0x3eb   :  { %5687 = vmatpush.bf16.msra.mxu2 %v10040_v31  ;;  %5662 = vmatpush.bf16.msra.mxu0 %v9496_v52  ;;  %v14050_v29 = vld [vmem:[#allocation2 + $0x2f4] sm:$0xf0]  ;;  %v5436_v52 = vpop.f32.mrf.mxu2  ;;  %v5412_v63 = vpop.f32.mrf.mxu0 }
 0x3ec   :  { %5656 = vmatmul.bf16.vlgmr.msrb.gmra.mxu3 %v15251_v26  ;;  %v9911_v30 = vld [vmem:[#allocation2 + $0x4d8] sm:$0xf]  ;;  %v9656_v46 = vor.u32 %v14050_v29, %v9655_v20  ;;  %v5437_v57 = vadd.f32 %v5436_v52, %v5424_v44 }
 0x3ed   :  { %5700 = vmatpush.bf16.msra.mxu3 %v10296_v45  ;;  %5675 = vmatpush.bf16.msra.mxu1 %v9752_v54  ;;  %v14114_v31 = vld [vmem:[#allocation2 + $0x4f4] sm:$0xf0]  ;;  %v9400_v45 = vor.u32 %v13986_v19, %v9399_v16 }
 0x3ee   :  { %v10167_v37 = vld [vmem:[#allocation2 + $0x6d8] sm:$0xf]  ;;  %v9912_v47 = vor.u32 %v14114_v31, %v9911_v30  ;;  %v15369_v62 = vadd.f32 %v5449_v59, %v5437_v57  ;;  %v5451_v31 = vpop.f32.mrf.mxu3 }
 0x3ef   :  { %5688 = vmatpush.bf16.msra.mxu2 %v10008_v55  ;;  %5663 = vmatpush.bf16.msra.mxu0 %v9464_v5  ;;  %v14178_v40 = vld [vmem:[#allocation2 + $0x6f4] sm:$0xf0] }
 0x3f0   :  { %v9367_v49 = vld [vmem:[#allocation2 + $0x98] sm:$0xf]  ;;  %v10168_v48 = vor.u32 %v14178_v40, %v10167_v37 }
 0x3f1   :  { %5701 = vmatpush.bf16.msra.mxu3 %v10264_v60  ;;  %5676 = vmatpush.bf16.msra.mxu1 %v9720_v1  ;;  %v13978_v50 = vld [vmem:[#allocation2 + $0xb4] sm:$0xf0] }
 0x3f2   :  { %v9623_v51 = vld [vmem:[#allocation2 + $0x298] sm:$0xf]  ;;  %v9368_v61 = vor.u32 %v13978_v50, %v9367_v49 }
 0x3f3   :  { %5689 = vmatpush.bf16.msra.mxu2 %v9976_v2  ;;  %5664 = vmatpush.bf16.msra.mxu0 %v9432_v13  ;;  %v14042_v54 = vld [vmem:[#allocation2 + $0x2b4] sm:$0xf0]  ;;  %v5438_v25 = vpop.f32.mrf.mxu2 }
 0x3f4   :  { %v9879_v55 = vld [vmem:[#allocation2 + $0x498] sm:$0xf]  ;;  %v9624_v7 = vor.u32 %v14042_v54, %v9623_v51 }
 0x3f5   :  { %5702 = vmatpush.bf16.msra.mxu3 %v10232_v8  ;;  %5677 = vmatpush.bf16.msra.mxu1 %v9688_v15  ;;  %v14106_v53 = vld [vmem:[#allocation2 + $0x4b4] sm:$0xf0] }
 0x3f6   :  { %v10135_v60 = vld [vmem:[#allocation2 + $0x698] sm:$0xf]  ;;  %v9880_v5 = vor.u32 %v14106_v53, %v9879_v55 }
 0x3f7   :  { %5690 = vmatpush.bf16.msra.mxu2 %v9944_v24  ;;  %v14170_v58 = vld [vmem:[#allocation2 + $0x6b4] sm:$0xf0]  ;;  %5665 = vmatpush.bf16.msra.mxu0 %v9400_v45 }
 0x3f8   :  { %v9335_v1 = vld [vmem:[#allocation2 + $0x58] sm:$0xf]  ;;  %v10136_v6 = vor.u32 %v14170_v58, %v10135_v60 }
 0x3f9   :  { %5703 = vmatpush.bf16.msra.mxu3 %v10200_v28  ;;  %5678 = vmatpush.bf16.msra.mxu1 %v9656_v46  ;;  %v13970_v2 = vld [vmem:[#allocation2 + $0x74] sm:$0xf0] }
 0x3fa   :  { %v9591_v3 = vld [vmem:[#allocation2 + $0x258] sm:$0xf]  ;;  %v9336_v12 = vor.u32 %v13970_v2, %v9335_v1 }
 0x3fb   :  { %5691 = vmatpush.bf16.msra.mxu2 %v9912_v47  ;;  %v14034_v8 = vld [vmem:[#allocation2 + $0x274] sm:$0xf0]  ;;  %5666 = vmatpush.bf16.msra.mxu0 %v9368_v61 }
 0x3fc   :  { %v9847_v9 = vld [vmem:[#allocation2 + $0x458] sm:$0xf]  ;;  %v9592_v15 = vor.u32 %v14034_v8, %v9591_v3 }
 0x3fd   :  { %5704 = vmatpush.bf16.msra.mxu3 %v10168_v48  ;;  %v14098_v11 = vld [vmem:[#allocation2 + $0x474] sm:$0xf0]  ;;  %5679 = vmatpush.bf16.msra.mxu1 %v9624_v7 }
 0x3fe   :  { %v10103_v21 = vld [vmem:[#allocation2 + $0x658] sm:$0xf]  ;;  %v9848_v24 = vor.u32 %v14098_v11, %v9847_v9 }
 0x3ff   :  { %v14162_v10 = vld [vmem:[#allocation2 + $0x674] sm:$0xf0]  ;;  %5692 = vmatpush.bf16.msra.mxu2 %v9880_v5  ;;  %5667 = vmatpush.bf16.msra.mxu0 %v9336_v12 }
 0x400   :  { %v9303_v13 = vld [vmem:[#allocation2 + $0x18] sm:$0xf]  ;;  %v10104_v27 = vor.u32 %v14162_v10, %v10103_v21 }
 0x401   :  { %v13962_v14 = vld [vmem:[#allocation2 + $0x34] sm:$0xf0]  ;;  %5705 = vmatpush.bf16.msra.mxu3 %v10136_v6  ;;  %5680 = vmatpush.bf16.msra.mxu1 %v9592_v15 }
 0x402   :  { %v9559_v16 = vld [vmem:[#allocation2 + $0x218] sm:$0xf]  ;;  %v9304_v45 = vor.u32 %v13962_v14, %v9303_v13 }
 0x403   :  { %v14026_v19 = vld [vmem:[#allocation2 + $0x234] sm:$0xf0]  ;;  %5693 = vmatpush.bf16.msra.mxu2 %v9848_v24 }
 0x404   :  { %v9815_v20 = vld [vmem:[#allocation2 + $0x418] sm:$0xf]  ;;  %v9560_v50 = vor.u32 %v14026_v19, %v9559_v16  ;;  %5668 = vmatpush.bf16.msra.mxu0 %v9304_v45 }
 0x405   :  { %v14090_v28 = vld [vmem:[#allocation2 + $0x434] sm:$0xf0]  ;;  %5706 = vmatpush.bf16.msra.mxu3 %v10104_v27 }
 0x406   :  { %v10071_v29 = vld [vmem:[#allocation2 + $0x618] sm:$0xf]  ;;  %v9816_v51 = vor.u32 %v14090_v28, %v9815_v20  ;;  %5681 = vmatpush.bf16.msra.mxu1 %v9560_v50 }
 0x407   :  { %v14154_v30 = vld [vmem:[#allocation2 + $0x634] sm:$0xf0]  ;;  %5669 = vmatmul.bf16.vlgmr.msra.gmra.mxu0 %v15220_v36 }
 0x408   :  { %v10551_v37 = vld [vmem:[#allocation2 + $0x9d8] sm:$0xf]  ;;  %v10072_v54 = vor.u32 %v14154_v30, %v10071_v29  ;;  %5694 = vmatpush.bf16.msra.mxu2 %v9816_v51 }
 0x409   :  { %v14274_v40 = vld [vmem:[#allocation2 + $0x9f4] sm:$0xf0]  ;;  %5682 = vmatmul.bf16.vlgmr.msra.gmra.mxu1 %v15224_v43 }
 0x40a   :  { %v10807_v44 = vld [vmem:[#allocation2 + $0xbd8] sm:$0xf]  ;;  %v10552_v55 = vor.u32 %v14274_v40, %v10551_v37  ;;  %5707 = vmatpush.bf16.msra.mxu3 %v10072_v54  ;;  %v5462_v37 = vpop.f32.mrf.mxu0 }
 0x40b   :  { %v14338_v46 = vld [vmem:[#allocation2 + $0xbf4] sm:$0xf0]  ;;  %5695 = vmatmul.bf16.vlgmr.msra.gmra.mxu2 %v15218_v35  ;;  %v5463_v45 = vadd.f32 %v5462_v37, %v15369_v62 }
 0x40c   :  { %v11063_v47 = vld [vmem:[#allocation2 + $0xdd8] sm:$0xf]  ;;  %v10808_v53 = vor.u32 %v14338_v46, %v10807_v44  ;;  %5713 = vmatpush.bf16.msrb.mxu0 %v10552_v55 }
 0x40d   :  { %v14402_v49 = vld [vmem:[#allocation2 + $0xdf4] sm:$0xf0]  ;;  %5708 = vmatmul.bf16.vlgmr.msra.gmra.mxu3 %v15222_v42 }
 0x40e   :  { %v11319_v52 = vld [vmem:[#allocation2 + $0xfd8] sm:$0xf]  ;;  %v11064_v57 = vor.u32 %v14402_v49, %v11063_v47  ;;  %5726 = vmatpush.bf16.msrb.mxu1 %v10808_v53  ;;  %v5475_v47 = vpop.f32.mrf.mxu1 }
 0x40f   :  { %v14466_v48 = vld [vmem:[#allocation2 + $0xff4] sm:$0xf0]  ;;  %v5476_v55 = vadd.f32 %v5475_v47, %v5463_v45 }
 0x410   :  { %v10519_v59 = vld [vmem:[#allocation2 + $0x998] sm:$0xf]  ;;  %v11320_v61 = vor.u32 %v14466_v48, %v11319_v52  ;;  %5739 = vmatpush.bf16.msrb.mxu2 %v11064_v57 }
 0x411   :  { %v14266_v60 = vld [vmem:[#allocation2 + $0x9b4] sm:$0xf0] }
 0x412   :  { %v10775_v58 = vld [vmem:[#allocation2 + $0xb98] sm:$0xf]  ;;  %v10520_v3 = vor.u32 %v14266_v60, %v10519_v59  ;;  %5752 = vmatpush.bf16.msrb.mxu3 %v11320_v61 }
 0x413   :  { %v14330_v63 = vld [vmem:[#allocation2 + $0xbb4] sm:$0xf0] }
 0x414   :  { %v11031_v7 = vld [vmem:[#allocation2 + $0xd98] sm:$0xf]  ;;  %v10776_v4 = vor.u32 %v14330_v63, %v10775_v58  ;;  %5714 = vmatpush.bf16.msrb.mxu0 %v10520_v3  ;;  %v5488_v3 = vpop.f32.mrf.mxu2 }
 0x415   :  { %v14394_v5 = vld [vmem:[#allocation2 + $0xdb4] sm:$0xf0] }
 0x416   :  { %v11287_v1 = vld [vmem:[#allocation2 + $0xf98] sm:$0xf]  ;;  %v11032_v6 = vor.u32 %v14394_v5, %v11031_v7  ;;  %5727 = vmatpush.bf16.msrb.mxu1 %v10776_v4 }
 0x417   :  { %v14458_v2 = vld [vmem:[#allocation2 + $0xfb4] sm:$0xf0] }
 0x418   :  { %v10487_v8 = vld [vmem:[#allocation2 + $0x958] sm:$0xf]  ;;  %v11288_v21 = vor.u32 %v14458_v2, %v11287_v1  ;;  %5740 = vmatpush.bf16.msrb.mxu2 %v11032_v6 }
 0x419   :  { %v14258_v9 = vld [vmem:[#allocation2 + $0x974] sm:$0xf0] }
 0x41a   :  { %v10743_v11 = vld [vmem:[#allocation2 + $0xb58] sm:$0xf]  ;;  %v10488_v24 = vor.u32 %v14258_v9, %v10487_v8  ;;  %5753 = vmatpush.bf16.msrb.mxu3 %v11288_v21  ;;  %v5489_v9 = vadd.f32 %v5488_v3, %v5476_v55 }
 0x41b   :  { %v14322_v10 = vld [vmem:[#allocation2 + $0xb74] sm:$0xf0] }
 0x41c   :  { %v10999_v12 = vld [vmem:[#allocation2 + $0xd58] sm:$0xf]  ;;  %v10744_v16 = vor.u32 %v14322_v10, %v10743_v11  ;;  %5715 = vmatpush.bf16.msrb.mxu0 %v10488_v24  ;;  %v5501_v11 = vpop.f32.mrf.mxu3 }
 0x41d   :  { %v14386_v13 = vld [vmem:[#allocation2 + $0xd74] sm:$0xf0] }
 0x41e   :  { %v11255_v14 = vld [vmem:[#allocation2 + $0xf58] sm:$0xf]  ;;  %v11000_v19 = vor.u32 %v14386_v13, %v10999_v12  ;;  %5728 = vmatpush.bf16.msrb.mxu1 %v10744_v16  ;;  %v5464_v12 = vpop.f32.mrf.mxu0 }
 0x41f   :  { %v14450_v15 = vld [vmem:[#allocation2 + $0xf74] sm:$0xf0] }
 0x420   :  { %v10455_v20 = vld [vmem:[#allocation2 + $0x918] sm:$0xf]  ;;  %v11256_v28 = vor.u32 %v14450_v15, %v11255_v14  ;;  %5741 = vmatpush.bf16.msrb.mxu2 %v11000_v19  ;;  %v5477_v14 = vpop.f32.mrf.mxu1  ;;  %v15376_v15 = vadd.f32 %v5501_v11, %v5489_v9 }
 0x421   :  { %v14250_v25 = vld [vmem:[#allocation2 + $0x934] sm:$0xf0] }
 0x422   :  { %v10711_v27 = vld [vmem:[#allocation2 + $0xb18] sm:$0xf]  ;;  %v10456_v46 = vor.u32 %v14250_v25, %v10455_v20  ;;  %5754 = vmatpush.bf16.msrb.mxu3 %v11256_v28 }
 0x423   :  { %v14314_v29 = vld [vmem:[#allocation2 + $0xb34] sm:$0xf0] }
 0x424   :  { %v10967_v30 = vld [vmem:[#allocation2 + $0xd18] sm:$0xf]  ;;  %v10712_v49 = vor.u32 %v14314_v29, %v10711_v27  ;;  %5716 = vmatpush.bf16.msrb.mxu0 %v10456_v46 }
 0x425   :  { %v14378_v31 = vld [vmem:[#allocation2 + $0xd34] sm:$0xf0] }
 0x426   :  { %v11223_v40 = vld [vmem:[#allocation2 + $0xf18] sm:$0xf]  ;;  %v10968_v50 = vor.u32 %v14378_v31, %v10967_v30  ;;  %5729 = vmatpush.bf16.msrb.mxu1 %v10712_v49 }
 0x427   :  { %v14442_v44 = vld [vmem:[#allocation2 + $0xf34] sm:$0xf0] }
 0x428   :  { %v10423_v51 = vld [vmem:[#allocation2 + $0x8d8] sm:$0xf]  ;;  %v11224_v54 = vor.u32 %v14442_v44, %v11223_v40  ;;  %5742 = vmatpush.bf16.msrb.mxu2 %v10968_v50 }
 0x429   :  { %v14242_v52 = vld [vmem:[#allocation2 + $0x8f4] sm:$0xf0] }
 0x42a   :  { %v10679_v48 = vld [vmem:[#allocation2 + $0xad8] sm:$0xf]  ;;  %v10424_v61 = vor.u32 %v14242_v52, %v10423_v51  ;;  %5755 = vmatpush.bf16.msrb.mxu3 %v11224_v54 }
 0x42b   :  { %v14306_v53 = vld [vmem:[#allocation2 + $0xaf4] sm:$0xf0] }
 0x42c   :  { %v10935_v57 = vld [vmem:[#allocation2 + $0xcd8] sm:$0xf]  ;;  %v10680_v62 = vor.u32 %v14306_v53, %v10679_v48  ;;  %5717 = vmatpush.bf16.msrb.mxu0 %v10424_v61  ;;  %v5490_v53 = vpop.f32.mrf.mxu2 }
 0x42d   :  { %v14370_v59 = vld [vmem:[#allocation2 + $0xcf4] sm:$0xf0] }
 0x42e   :  { %v11191_v60 = vld [vmem:[#allocation2 + $0xed8] sm:$0xf]  ;;  %v10936_v63 = vor.u32 %v14370_v59, %v10935_v57  ;;  %5730 = vmatpush.bf16.msrb.mxu1 %v10680_v62 }
 0x42f   :  { %v14434_v58 = vld [vmem:[#allocation2 + $0xef4] sm:$0xf0] }
 0x430   :  { %v10391_v7 = vld [vmem:[#allocation2 + $0x898] sm:$0xf]  ;;  %v11192_v2 = vor.u32 %v14434_v58, %v11191_v60  ;;  %5743 = vmatpush.bf16.msrb.mxu2 %v10936_v63  ;;  %v5503_v58 = vpop.f32.mrf.mxu3 }
 0x431   :  { %v14234_v5 = vld [vmem:[#allocation2 + $0x8b4] sm:$0xf0] }
 0x432   :  { %v10647_v1 = vld [vmem:[#allocation2 + $0xa98] sm:$0xf]  ;;  %v10392_v13 = vor.u32 %v14234_v5, %v10391_v7  ;;  %5756 = vmatpush.bf16.msrb.mxu3 %v11192_v2 }
 0x433   :  { %v14298_v4 = vld [vmem:[#allocation2 + $0xab4] sm:$0xf0] }
 0x434   :  { %v10903_v6 = vld [vmem:[#allocation2 + $0xc98] sm:$0xf]  ;;  %v10648_v24 = vor.u32 %v14298_v4, %v10647_v1  ;;  %5718 = vmatpush.bf16.msrb.mxu0 %v10392_v13 }
 0x435   :  { %v14362_v8 = vld [vmem:[#allocation2 + $0xcb4] sm:$0xf0] }
 0x436   :  { %v11159_v21 = vld [vmem:[#allocation2 + $0xe98] sm:$0xf]  ;;  %v10904_v16 = vor.u32 %v14362_v8, %v10903_v6  ;;  %5731 = vmatpush.bf16.msrb.mxu1 %v10648_v24 }
 0x437   :  { %v14426_v10 = vld [vmem:[#allocation2 + $0xeb4] sm:$0xf0] }
 0x438   :  { %v10359_v19 = vld [vmem:[#allocation2 + $0x858] sm:$0xf]  ;;  %v11160_v27 = vor.u32 %v14426_v10, %v11159_v21  ;;  %5744 = vmatpush.bf16.msrb.mxu2 %v10904_v16 }
 0x439   :  { %v14226_v20 = vld [vmem:[#allocation2 + $0x874] sm:$0xf0] }
 0x43a   :  { %v10615_v25 = vld [vmem:[#allocation2 + $0xa58] sm:$0xf]  ;;  %v10360_v40 = vor.u32 %v14226_v20, %v10359_v19  ;;  %5757 = vmatpush.bf16.msrb.mxu3 %v11160_v27 }
 0x43b   :  { %v14290_v28 = vld [vmem:[#allocation2 + $0xa74] sm:$0xf0] }
 0x43c   :  { %v10871_v29 = vld [vmem:[#allocation2 + $0xc58] sm:$0xf]  ;;  %v10616_v46 = vor.u32 %v14290_v28, %v10615_v25  ;;  %5719 = vmatpush.bf16.msrb.mxu0 %v10360_v40 }
 0x43d   :  { %v14354_v30 = vld [vmem:[#allocation2 + $0xc74] sm:$0xf0] }
 0x43e   :  { %v11127_v31 = vld [vmem:[#allocation2 + $0xe58] sm:$0xf]  ;;  %v10872_v47 = vor.u32 %v14354_v30, %v10871_v29  ;;  %5732 = vmatpush.bf16.msrb.mxu1 %v10616_v46 }
 0x43f   :  { %v14418_v37 = vld [vmem:[#allocation2 + $0xe74] sm:$0xf0] }
 0x440   :  { %v10327_v44 = vld [vmem:[#allocation2 + $0x818] sm:$0xf]  ;;  %v11128_v52 = vor.u32 %v14418_v37, %v11127_v31  ;;  %5745 = vmatpush.bf16.msrb.mxu2 %v10872_v47  ;;  %v866_v31 = vperm.slane %v15355_v32, 4 }
 0x441   :  { %v14218_v45 = vld [vmem:[#allocation2 + $0x834] sm:$0xf0] }
 0x442   :  { %v10583_v49 = vld [vmem:[#allocation2 + $0xa18] sm:$0xf]  ;;  %v10328_v61 = vor.u32 %v14218_v45, %v10327_v44  ;;  %5758 = vmatpush.bf16.msrb.mxu3 %v11128_v52 }
 0x443   :  { %v14282_v50 = vld [vmem:[#allocation2 + $0xa34] sm:$0xf0] }
 0x444   :  { %v10839_v51 = vld [vmem:[#allocation2 + $0xc18] sm:$0xf]  ;;  %v10584_v5 = vor.u32 %v14282_v50, %v10583_v49  ;;  %5720 = vmatpush.bf16.msrb.mxu0 %v10328_v61 }
 0x445   :  { %v14346_v48 = vld [vmem:[#allocation2 + $0xc34] sm:$0xf0] }
 0x446   :  { %v11095_v54 = vld [vmem:[#allocation2 + $0xe18] sm:$0xf]  ;;  %v10840_v1 = vor.u32 %v14346_v48, %v10839_v51  ;;  %5733 = vmatpush.bf16.msrb.mxu1 %v10584_v5 }
 0x447   :  { %v14410_v55 = vld [vmem:[#allocation2 + $0xe34] sm:$0xf0]  ;;  %5721 = vmatmul.bf16.vlgmr.msrb.gmra.mxu0 %v15235_v38 }
 0x448   :  { %v11575_v57 = vld [vmem:[#allocation2 + $0x11d8] sm:$0xf]  ;;  %v11096_v4 = vor.u32 %v14410_v55, %v11095_v54  ;;  %5746 = vmatpush.bf16.msrb.mxu2 %v10840_v1  ;;  %v882_v54 = vperm.slane %v866_v31, 0 }
 0x449   :  { %v14530_v59 = vld [vmem:[#allocation2 + $0x11f4] sm:$0xf0]  ;;  %5734 = vmatmul.bf16.vlgmr.msrb.gmra.mxu1 %v15239_v41 }
 0x44a   :  { %v11831_v60 = vld [vmem:[#allocation2 + $0x13d8] sm:$0xf]  ;;  %v11576_v6 = vor.u32 %v14530_v59, %v11575_v57  ;;  %5759 = vmatpush.bf16.msrb.mxu3 %v11096_v4  ;;  %v5527_v4 = vpop.f32.mrf.mxu1 }
 0x44b   :  { %v14594_v62 = vld [vmem:[#allocation2 + $0x13f4] sm:$0xf0]  ;;  %5747 = vmatmul.bf16.vlgmr.msrb.gmra.mxu2 %v15233_v33 }
 0x44c   :  { %v12087_v63 = vld [vmem:[#allocation2 + $0x15d8] sm:$0xf]  ;;  %v11832_v8 = vor.u32 %v14594_v62, %v11831_v60  ;;  %5765 = vmatpush.bf16.msra.mxu0 %v11576_v6  ;;  %v5514_v62 = vpop.f32.mrf.mxu0 }
 0x44d   :  { %v14658_v7 = vld [vmem:[#allocation2 + $0x15f4] sm:$0xf0]  ;;  %5760 = vmatmul.bf16.vlgmr.msrb.gmra.mxu3 %v15237_v39 }
 0x44e   :  { %v12343_v2 = vld [vmem:[#allocation2 + $0x17d8] sm:$0xf]  ;;  %v12088_v9 = vor.u32 %v14658_v7, %v12087_v63  ;;  %5778 = vmatpush.bf16.msra.mxu1 %v11832_v8 }
 0x44f   :  { %v14722_v3 = vld [vmem:[#allocation2 + $0x17f4] sm:$0xf0] }
 0x450   :  { %v11543_v11 = vld [vmem:[#allocation2 + $0x1198] sm:$0xf]  ;;  %v12344_v12 = vor.u32 %v14722_v3, %v12343_v2  ;;  %5791 = vmatpush.bf16.msra.mxu2 %v12088_v9  ;;  %v5515_v3 = vadd.f32 %v5514_v62, %v882_v54 }
 0x451   :  { %v14522_v21 = vld [vmem:[#allocation2 + $0x11b4] sm:$0xf0] }
 0x452   :  { %v11799_v10 = vld [vmem:[#allocation2 + $0x1398] sm:$0xf]  ;;  %v11544_v20 = vor.u32 %v14522_v21, %v11543_v11  ;;  %5804 = vmatpush.bf16.msra.mxu3 %v12344_v12  ;;  %v5528_v12 = vadd.f32 %v5527_v4, %v5515_v3 }
 0x453   :  { %v14586_v13 = vld [vmem:[#allocation2 + $0x13b4] sm:$0xf0] }
 0x454   :  { %v12055_v14 = vld [vmem:[#allocation2 + $0x1598] sm:$0xf]  ;;  %v11800_v27 = vor.u32 %v14586_v13, %v11799_v10  ;;  %5766 = vmatpush.bf16.msra.mxu0 %v11544_v20 }
 0x455   :  { %v14650_v24 = vld [vmem:[#allocation2 + $0x15b4] sm:$0xf0] }
 0x456   :  { %v12311_v16 = vld [vmem:[#allocation2 + $0x1798] sm:$0xf]  ;;  %v12056_v28 = vor.u32 %v14650_v24, %v12055_v14  ;;  %5779 = vmatpush.bf16.msra.mxu1 %v11800_v27 }
 0x457   :  { %v14714_v19 = vld [vmem:[#allocation2 + $0x17b4] sm:$0xf0] }
 0x458   :  { %v11511_v25 = vld [vmem:[#allocation2 + $0x1158] sm:$0xf]  ;;  %v12312_v37 = vor.u32 %v14714_v19, %v12311_v16  ;;  %5792 = vmatpush.bf16.msra.mxu2 %v12056_v28 }
 0x459   :  { %v14514_v29 = vld [vmem:[#allocation2 + $0x1174] sm:$0xf0] }
 0x45a   :  { %v11767_v30 = vld [vmem:[#allocation2 + $0x1358] sm:$0xf]  ;;  %v11512_v49 = vor.u32 %v14514_v29, %v11511_v25  ;;  %5805 = vmatpush.bf16.msra.mxu3 %v12312_v37  ;;  %v5540_v25 = vpop.f32.mrf.mxu2  ;;  %v5553_v37 = vpop.f32.mrf.mxu3 }
 0x45b   :  { %v14578_v40 = vld [vmem:[#allocation2 + $0x1374] sm:$0xf0]  ;;  %v5541_v31 = vadd.f32 %v5540_v25, %v5528_v12  ;;  %v14078_v12 = vld [vmem:[#allocation2 + $0x3dc] sm:$0xf] }
 0x45c   :  { %v12023_v44 = vld [vmem:[#allocation2 + $0x1558] sm:$0xf]  ;;  %v11768_v32 = vor.u32 %v14578_v40, %v11767_v30  ;;  %5767 = vmatpush.bf16.msra.mxu0 %v11512_v49  ;;  %v14206_v25 = vld [vmem:[#allocation2 + $0x7dc] sm:$0xf] }
 0x45d   :  { %v14642_v45 = vld [vmem:[#allocation2 + $0x1574] sm:$0xf0] }
 0x45e   :  { %v12279_v46 = vld [vmem:[#allocation2 + $0x1758] sm:$0xf]  ;;  %v12024_v51 = vor.u32 %v14642_v45, %v12023_v44  ;;  %5780 = vmatpush.bf16.msra.mxu1 %v11768_v32 }
 0x45f   :  { %v14706_v47 = vld [vmem:[#allocation2 + $0x1774] sm:$0xf0] }
 0x460   :  { %v11479_v50 = vld [vmem:[#allocation2 + $0x1118] sm:$0xf]  ;;  %v12280_v55 = vor.u32 %v14706_v47, %v12279_v46  ;;  %5793 = vmatpush.bf16.msra.mxu2 %v12024_v51  ;;  %v15383_v46 = vadd.f32 %v5553_v37, %v5541_v31  ;;  %v5516_v47 = vpop.f32.mrf.mxu0  ;;  %v14006_v37 = vld [vmem:[#allocation2 + $0x19c] sm:$0xf] }
 0x461   :  { %v14506_v52 = vld [vmem:[#allocation2 + $0x1134] sm:$0xf0]  ;;  %v9753_v47 = vld [vmem:[#allocation2 + $0x3b8] sm:$0xf0] }
 0x462   :  { %v11735_v48 = vld [vmem:[#allocation2 + $0x1318] sm:$0xf]  ;;  %v11480_v61 = vor.u32 %v14506_v52, %v11479_v50  ;;  %5806 = vmatpush.bf16.msra.mxu3 %v12280_v55  ;;  %v5542_v3 = vpop.f32.mrf.mxu2 }
 0x463   :  { %v14570_v53 = vld [vmem:[#allocation2 + $0x1334] sm:$0xf0]  ;;  %v9433_v3 = vld [vmem:[#allocation2 + $0x138] sm:$0xf0] }
 0x464   :  { %v11991_v57 = vld [vmem:[#allocation2 + $0x1518] sm:$0xf]  ;;  %v11736_v63 = vor.u32 %v14570_v53, %v11735_v48  ;;  %5768 = vmatpush.bf16.msra.mxu0 %v11480_v61  ;;  %v5529_v48 = vpop.f32.mrf.mxu1 }
 0x465   :  { %v14634_v59 = vld [vmem:[#allocation2 + $0x1534] sm:$0xf0] }
 0x466   :  { %v12247_v60 = vld [vmem:[#allocation2 + $0x1718] sm:$0xf]  ;;  %v11992_v7 = vor.u32 %v14634_v59, %v11991_v57  ;;  %5781 = vmatpush.bf16.msra.mxu1 %v11736_v63 }
 0x467   :  { %v14698_v58 = vld [vmem:[#allocation2 + $0x1734] sm:$0xf0] }
 0x468   :  { %v11447_v5 = vld [vmem:[#allocation2 + $0x10d8] sm:$0xf]  ;;  %v12248_v6 = vor.u32 %v14698_v58, %v12247_v60  ;;  %5794 = vmatpush.bf16.msra.mxu2 %v11992_v7 }
 0x469   :  { %v14498_v1 = vld [vmem:[#allocation2 + $0x10f4] sm:$0xf0] }
 0x46a   :  { %v11703_v2 = vld [vmem:[#allocation2 + $0x12d8] sm:$0xf]  ;;  %v11448_v13 = vor.u32 %v14498_v1, %v11447_v5  ;;  %5807 = vmatpush.bf16.msra.mxu3 %v12248_v6 }
 0x46b   :  { %v14562_v8 = vld [vmem:[#allocation2 + $0x12f4] sm:$0xf0] }
 0x46c   :  { %v11959_v9 = vld [vmem:[#allocation2 + $0x14d8] sm:$0xf]  ;;  %v11704_v14 = vor.u32 %v14562_v8, %v11703_v2  ;;  %5769 = vmatpush.bf16.msra.mxu0 %v11448_v13 }
 0x46d   :  { %v14626_v11 = vld [vmem:[#allocation2 + $0x14f4] sm:$0xf0] }
 0x46e   :  { %v12215_v21 = vld [vmem:[#allocation2 + $0x16d8] sm:$0xf]  ;;  %v11960_v24 = vor.u32 %v14626_v11, %v11959_v9  ;;  %5782 = vmatpush.bf16.msra.mxu1 %v11704_v14  ;;  %v5555_v11 = vpop.f32.mrf.mxu3  ;;  %v9785_v14 = vld [vmem:[#allocation2 + $0x3f8] sm:$0xf0] }
 0x46f   :  { %v14690_v10 = vld [vmem:[#allocation2 + $0x16f4] sm:$0xf0]  ;;  %v9945_v11 = vld [vmem:[#allocation2 + $0x538] sm:$0xf0] }
 0x470   :  { %v11415_v16 = vld [vmem:[#allocation2 + $0x1098] sm:$0xf]  ;;  %v12216_v27 = vor.u32 %v14690_v10, %v12215_v21  ;;  %5795 = vmatpush.bf16.msra.mxu2 %v11960_v24  ;;  %v14014_v21 = vld [vmem:[#allocation2 + $0x1dc] sm:$0xf] }
 0x471   :  { %v14490_v19 = vld [vmem:[#allocation2 + $0x10b4] sm:$0xf0]  ;;  %v9529_v10 = vld [vmem:[#allocation2 + $0x1f8] sm:$0xf0] }
 0x472   :  { %v11671_v20 = vld [vmem:[#allocation2 + $0x1298] sm:$0xf]  ;;  %v11416_v45 = vor.u32 %v14490_v19, %v11415_v16  ;;  %5808 = vmatpush.bf16.msra.mxu3 %v12216_v27  ;;  %v14142_v24 = vld [vmem:[#allocation2 + $0x5dc] sm:$0xf] }
 0x473   :  { %v14554_v28 = vld [vmem:[#allocation2 + $0x12b4] sm:$0xf0]  ;;  %v10041_v16 = vld [vmem:[#allocation2 + $0x5f8] sm:$0xf0] }
 0x474   :  { %v11927_v29 = vld [vmem:[#allocation2 + $0x1498] sm:$0xf]  ;;  %v11672_v49 = vor.u32 %v14554_v28, %v11671_v20  ;;  %5770 = vmatpush.bf16.msra.mxu0 %v11416_v45  ;;  %v10297_v27 = vld [vmem:[#allocation2 + $0x7f8] sm:$0xf0]  ;;  %v10044_v31 = vor.u32 %v14142_v24, %v10041_v16 }
 0x475   :  { %v14618_v30 = vld [vmem:[#allocation2 + $0x14b4] sm:$0xf0]  ;;  %v10300_v45 = vor.u32 %v14206_v25, %v10297_v27  ;;  %v13982_v16 = vld [vmem:[#allocation2 + $0xdc] sm:$0xf]  ;;  %v5579_v27 = vpop.f32.mrf.mxu1 }
 0x476   :  { %v12183_v40 = vld [vmem:[#allocation2 + $0x1698] sm:$0xf]  ;;  %v11928_v50 = vor.u32 %v14618_v30, %v11927_v29  ;;  %5783 = vmatpush.bf16.msra.mxu1 %v11672_v49  ;;  %v9532_v29 = vor.u32 %v14014_v21, %v9529_v10  ;;  %v9788_v30 = vor.u32 %v14078_v12, %v9785_v14  ;;  %v14134_v49 = vld [vmem:[#allocation2 + $0x59c] sm:$0xf] }
 0x477   :  { %v14682_v44 = vld [vmem:[#allocation2 + $0x16b4] sm:$0xf0]  ;;  %v14182_v21 = vld [vmem:[#allocation2 + $0x71c] sm:$0xf] }
 0x478   :  { %v11383_v32 = vld [vmem:[#allocation2 + $0x1058] sm:$0xf]  ;;  %v12184_v54 = vor.u32 %v14682_v44, %v12183_v40  ;;  %5796 = vmatpush.bf16.msra.mxu2 %v11928_v50  ;;  %v9497_v40 = vld [vmem:[#allocation2 + $0x1b8] sm:$0xf0] }
 0x479   :  { %v14482_v51 = vld [vmem:[#allocation2 + $0x1074] sm:$0xf0]  ;;  %v14070_v44 = vld [vmem:[#allocation2 + $0x39c] sm:$0xf] }
 0x47a   :  { %v11639_v52 = vld [vmem:[#allocation2 + $0x1258] sm:$0xf]  ;;  %v11384_v58 = vor.u32 %v14482_v51, %v11383_v32  ;;  %5809 = vmatpush.bf16.msra.mxu3 %v12184_v54  ;;  %v10009_v50 = vld [vmem:[#allocation2 + $0x5b8] sm:$0xf0]  ;;  %v9756_v48 = vor.u32 %v14070_v44, %v9753_v47 }
 0x47b   :  { %v14546_v55 = vld [vmem:[#allocation2 + $0x1274] sm:$0xf0]  ;;  %v14198_v32 = vld [vmem:[#allocation2 + $0x79c] sm:$0xf]  ;;  %v10012_v54 = vor.u32 %v14134_v49, %v10009_v50 }
 0x47c   :  { %v11895_v53 = vld [vmem:[#allocation2 + $0x1458] sm:$0xf]  ;;  %v11640_v63 = vor.u32 %v14546_v55, %v11639_v52  ;;  %5771 = vmatpush.bf16.msra.mxu0 %v11384_v58  ;;  %v10265_v51 = vld [vmem:[#allocation2 + $0x7b8] sm:$0xf0]  ;;  %v9500_v52 = vor.u32 %v14006_v37, %v9497_v40 }
 0x47d   :  { %v14610_v57 = vld [vmem:[#allocation2 + $0x1474] sm:$0xf0]  ;;  %v13998_v55 = vld [vmem:[#allocation2 + $0x15c] sm:$0xf] }
 0x47e   :  { %v12151_v59 = vld [vmem:[#allocation2 + $0x1658] sm:$0xf]  ;;  %v11896_v7 = vor.u32 %v14610_v57, %v11895_v53  ;;  %5784 = vmatpush.bf16.msra.mxu1 %v11640_v63  ;;  %v9465_v53 = vld [vmem:[#allocation2 + $0x178] sm:$0xf0] }
 0x47f   :  { %v14674_v60 = vld [vmem:[#allocation2 + $0x1674] sm:$0xf0]  ;;  %v14062_v57 = vld [vmem:[#allocation2 + $0x35c] sm:$0xf] }
 0x480   :  { %v11351_v61 = vld [vmem:[#allocation2 + $0x1018] sm:$0xf]  ;;  %v12152_v4 = vor.u32 %v14674_v60, %v12151_v59  ;;  %5797 = vmatpush.bf16.msra.mxu2 %v11896_v7  ;;  %v10268_v59 = vor.u32 %v14198_v32, %v10265_v51  ;;  %v9721_v60 = vld [vmem:[#allocation2 + $0x378] sm:$0xf0]  ;;  %v9468_v7 = vor.u32 %v13998_v55, %v9465_v53 }
 0x481   :  { %v14474_v62 = vld [vmem:[#allocation2 + $0x1034] sm:$0xf0]  ;;  %v14126_v58 = vld [vmem:[#allocation2 + $0x55c] sm:$0xf] }
 0x482   :  { %v11607_v5 = vld [vmem:[#allocation2 + $0x1218] sm:$0xf]  ;;  %v11352_v13 = vor.u32 %v14474_v62, %v11351_v61  ;;  %5810 = vmatpush.bf16.msra.mxu3 %v12152_v4  ;;  %v9977_v61 = vld [vmem:[#allocation2 + $0x578] sm:$0xf0] }
 0x483   :  { %v14538_v1 = vld [vmem:[#allocation2 + $0x1234] sm:$0xf0]  ;;  %v14190_v62 = vld [vmem:[#allocation2 + $0x75c] sm:$0xf] }
 0x484   :  { %v11863_v2 = vld [vmem:[#allocation2 + $0x1418] sm:$0xf]  ;;  %v11608_v19 = vor.u32 %v14538_v1, %v11607_v5  ;;  %5772 = vmatpush.bf16.msra.mxu0 %v11352_v13  ;;  %v10233_v63 = vld [vmem:[#allocation2 + $0x778] sm:$0xf0]  ;;  %v9724_v5 = vor.u32 %v14062_v57, %v9721_v60  ;;  %v9980_v1 = vor.u32 %v14126_v58, %v9977_v61  ;;  %v5566_v13 = vpop.f32.mrf.mxu0  ;;  %v5605_v57 = vpop.f32.mrf.mxu3 }
 0x485   :  { %v14602_v6 = vld [vmem:[#allocation2 + $0x1434] sm:$0xf0]  ;;  %v14054_v4 = vld [vmem:[#allocation2 + $0x31c] sm:$0xf]  ;;  %v5567_v25 = vadd.f32 %v5566_v13, %v15383_v46 }
 0x486   :  { %v12119_v8 = vld [vmem:[#allocation2 + $0x1618] sm:$0xf]  ;;  %v11864_v20 = vor.u32 %v14602_v6, %v11863_v2  ;;  %5785 = vmatpush.bf16.msra.mxu1 %v11608_v19  ;;  %v13990_v2 = vld [vmem:[#allocation2 + $0x11c] sm:$0xf]  ;;  %v10236_v6 = vor.u32 %v14190_v62, %v10233_v63 }
 0x487   :  { %v14666_v9 = vld [vmem:[#allocation2 + $0x1634] sm:$0xf0]  ;;  %5773 = vmatmul.bf16.vlgmr.msra.gmra.mxu0 %v15245_v18  ;;  %v10201_v10 = vld [vmem:[#allocation2 + $0x738] sm:$0xf0]  ;;  %v9436_v12 = vor.u32 %v13990_v2, %v9433_v3  ;;  %v5580_v44 = vadd.f32 %v5579_v27, %v5567_v25  ;;  %v5581_v3 = vpop.f32.mrf.mxu1 }
 0x488   :  { %v12120_v28 = vor.u32 %v14666_v9, %v12119_v8  ;;  %5798 = vmatpush.bf16.msra.mxu2 %v11864_v20  ;;  %5817 = vmatpush.bf16.msrb.mxu0 %v9532_v29  ;;  %v9689_v8 = vld [vmem:[#allocation2 + $0x338] sm:$0xf0] }
 0x489   :  { %5786 = vmatmul.bf16.vlgmr.msra.gmra.mxu1 %v15249_v23  ;;  %v14118_v9 = vld [vmem:[#allocation2 + $0x51c] sm:$0xf]  ;;  %v9692_v14 = vor.u32 %v14054_v4, %v9689_v8 }
 0x48a   :  { %5811 = vmatpush.bf16.msra.mxu3 %v12120_v28  ;;  %5830 = vmatpush.bf16.msrb.mxu1 %v9788_v30  ;;  %v9948_v24 = vor.u32 %v14118_v9, %v9945_v11  ;;  %v9401_v19 = vld [vmem:[#allocation2 + $0xf8] sm:$0xf0]  ;;  %v10204_v28 = vor.u32 %v14182_v21, %v10201_v10 }
 0x48b   :  { %5799 = vmatmul.bf16.vlgmr.msra.gmra.mxu2 %v15247_v22  ;;  %v14046_v20 = vld [vmem:[#allocation2 + $0x2dc] sm:$0xf] }
 0x48c   :  { %5843 = vmatpush.bf16.msrb.mxu2 %v10044_v31  ;;  %5818 = vmatpush.bf16.msrb.mxu0 %v9500_v52  ;;  %v9657_v29 = vld [vmem:[#allocation2 + $0x2f8] sm:$0xf0]  ;;  %v5592_v52 = vpop.f32.mrf.mxu2  ;;  %v5568_v62 = vpop.f32.mrf.mxu0 }
 0x48d   :  { %5812 = vmatmul.bf16.vlgmr.msra.gmra.mxu3 %v15251_v26  ;;  %v14110_v30 = vld [vmem:[#allocation2 + $0x4dc] sm:$0xf]  ;;  %v9660_v47 = vor.u32 %v14046_v20, %v9657_v29  ;;  %v5593_v53 = vadd.f32 %v5592_v52, %v5580_v44 }
 0x48e   :  { %5856 = vmatpush.bf16.msrb.mxu3 %v10300_v45  ;;  %5831 = vmatpush.bf16.msrb.mxu1 %v9756_v48  ;;  %v9913_v31 = vld [vmem:[#allocation2 + $0x4f8] sm:$0xf0]  ;;  %v9404_v45 = vor.u32 %v13982_v16, %v9401_v19 }
 0x48f   :  { %v14174_v37 = vld [vmem:[#allocation2 + $0x6dc] sm:$0xf]  ;;  %v9916_v49 = vor.u32 %v14110_v30, %v9913_v31  ;;  %v15390_v61 = vadd.f32 %v5605_v57, %v5593_v53  ;;  %v5607_v31 = vpop.f32.mrf.mxu3 }
 0x490   :  { %5844 = vmatpush.bf16.msrb.mxu2 %v10012_v54  ;;  %5819 = vmatpush.bf16.msrb.mxu0 %v9468_v7  ;;  %v10169_v40 = vld [vmem:[#allocation2 + $0x6f8] sm:$0xf0] }
 0x491   :  { %v13974_v50 = vld [vmem:[#allocation2 + $0x9c] sm:$0xf]  ;;  %v10172_v46 = vor.u32 %v14174_v37, %v10169_v40 }
 0x492   :  { %5857 = vmatpush.bf16.msrb.mxu3 %v10268_v59  ;;  %5832 = vmatpush.bf16.msrb.mxu1 %v9724_v5  ;;  %v9369_v32 = vld [vmem:[#allocation2 + $0xb8] sm:$0xf0] }
 0x493   :  { %v14038_v51 = vld [vmem:[#allocation2 + $0x29c] sm:$0xf]  ;;  %v9372_v58 = vor.u32 %v13974_v50, %v9369_v32 }
 0x494   :  { %5845 = vmatpush.bf16.msrb.mxu2 %v9980_v1  ;;  %5820 = vmatpush.bf16.msrb.mxu0 %v9436_v12  ;;  %v9625_v48 = vld [vmem:[#allocation2 + $0x2b8] sm:$0xf0]  ;;  %v5594_v25 = vpop.f32.mrf.mxu2  ;;  %v5618_v31 = vpop.f32.mrf.mxu0 }
 0x495   :  { %v14102_v54 = vld [vmem:[#allocation2 + $0x49c] sm:$0xf]  ;;  %v9628_v63 = vor.u32 %v14038_v51, %v9625_v48 }
 0x496   :  { %5858 = vmatpush.bf16.msrb.mxu3 %v10236_v6  ;;  %5833 = vmatpush.bf16.msrb.mxu1 %v9692_v14  ;;  %v9881_v55 = vld [vmem:[#allocation2 + $0x4b8] sm:$0xf0] }
 0x497   :  { %v14166_v59 = vld [vmem:[#allocation2 + $0x69c] sm:$0xf]  ;;  %v9884_v7 = vor.u32 %v14102_v54, %v9881_v55 }
 0x498   :  { %5846 = vmatpush.bf16.msrb.mxu2 %v9948_v24  ;;  %v10137_v60 = vld [vmem:[#allocation2 + $0x6b8] sm:$0xf0]  ;;  %5821 = vmatpush.bf16.msrb.mxu0 %v9404_v45 }
 0x499   :  { %v13966_v5 = vld [vmem:[#allocation2 + $0x5c] sm:$0xf]  ;;  %v10140_v4 = vor.u32 %v14166_v59, %v10137_v60 }
 0x49a   :  { %5859 = vmatpush.bf16.msrb.mxu3 %v10204_v28  ;;  %5834 = vmatpush.bf16.msrb.mxu1 %v9660_v47  ;;  %v9337_v1 = vld [vmem:[#allocation2 + $0x78] sm:$0xf0] }
 0x49b   :  { %v14030_v2 = vld [vmem:[#allocation2 + $0x25c] sm:$0xf]  ;;  %v9340_v10 = vor.u32 %v13966_v5, %v9337_v1 }
 0x49c   :  { %5847 = vmatpush.bf16.msrb.mxu2 %v9916_v49  ;;  %v9593_v6 = vld [vmem:[#allocation2 + $0x278] sm:$0xf0]  ;;  %5822 = vmatpush.bf16.msrb.mxu0 %v9372_v58 }
 0x49d   :  { %v14094_v8 = vld [vmem:[#allocation2 + $0x45c] sm:$0xf]  ;;  %v9596_v14 = vor.u32 %v14030_v2, %v9593_v6 }
 0x49e   :  { %5860 = vmatpush.bf16.msrb.mxu3 %v10172_v46  ;;  %v9849_v9 = vld [vmem:[#allocation2 + $0x478] sm:$0xf0]  ;;  %5835 = vmatpush.bf16.msrb.mxu1 %v9628_v63 }
 0x49f   :  { %v14158_v11 = vld [vmem:[#allocation2 + $0x65c] sm:$0xf]  ;;  %v9852_v24 = vor.u32 %v14094_v8, %v9849_v9 }
 0x4a0   :  { %v10105_v21 = vld [vmem:[#allocation2 + $0x678] sm:$0xf0]  ;;  %5848 = vmatpush.bf16.msrb.mxu2 %v9884_v7  ;;  %5823 = vmatpush.bf16.msrb.mxu0 %v9340_v10 }
 0x4a1   :  { %v13958_v12 = vld [vmem:[#allocation2 + $0x1c] sm:$0xf]  ;;  %v10108_v27 = vor.u32 %v14158_v11, %v10105_v21 }
 0x4a2   :  { %v9305_v13 = vld [vmem:[#allocation2 + $0x38] sm:$0xf0]  ;;  %5861 = vmatpush.bf16.msrb.mxu3 %v10140_v4  ;;  %5836 = vmatpush.bf16.msrb.mxu1 %v9596_v14 }
 0x4a3   :  { %v14022_v16 = vld [vmem:[#allocation2 + $0x21c] sm:$0xf]  ;;  %v9308_v45 = vor.u32 %v13958_v12, %v9305_v13 }
 0x4a4   :  { %v9561_v19 = vld [vmem:[#allocation2 + $0x238] sm:$0xf0]  ;;  %5849 = vmatpush.bf16.msrb.mxu2 %v9852_v24 }
 0x4a5   :  { %v14086_v20 = vld [vmem:[#allocation2 + $0x41c] sm:$0xf]  ;;  %v9564_v32 = vor.u32 %v14022_v16, %v9561_v19  ;;  %5824 = vmatpush.bf16.msrb.mxu0 %v9308_v45 }
 0x4a6   :  { %v9817_v28 = vld [vmem:[#allocation2 + $0x438] sm:$0xf0]  ;;  %5862 = vmatpush.bf16.msrb.mxu3 %v10108_v27 }
 0x4a7   :  { %v14150_v29 = vld [vmem:[#allocation2 + $0x61c] sm:$0xf]  ;;  %v9820_v51 = vor.u32 %v14086_v20, %v9817_v28  ;;  %5837 = vmatpush.bf16.msrb.mxu1 %v9564_v32 }
 0x4a8   :  { %v10073_v30 = vld [vmem:[#allocation2 + $0x638] sm:$0xf0]  ;;  %5825 = vmatmul.bf16.vlgmr.msrb.gmra.mxu0 %v15220_v36 }
 0x4a9   :  { %v14270_v37 = vld [vmem:[#allocation2 + $0x9dc] sm:$0xf]  ;;  %v10076_v48 = vor.u32 %v14150_v29, %v10073_v30  ;;  %5850 = vmatpush.bf16.msrb.mxu2 %v9820_v51 }
 0x4aa   :  { %v10553_v40 = vld [vmem:[#allocation2 + $0x9f8] sm:$0xf0]  ;;  %5838 = vmatmul.bf16.vlgmr.msrb.gmra.mxu1 %v15224_v43  ;;  %v5631_v43 = vpop.f32.mrf.mxu1 }
 0x4ab   :  { %v14334_v44 = vld [vmem:[#allocation2 + $0xbdc] sm:$0xf]  ;;  %v10556_v54 = vor.u32 %v14270_v37, %v10553_v40  ;;  %5863 = vmatpush.bf16.msrb.mxu3 %v10076_v48 }
 0x4ac   :  { %v10809_v47 = vld [vmem:[#allocation2 + $0xbf8] sm:$0xf0]  ;;  %5851 = vmatmul.bf16.vlgmr.msrb.gmra.mxu2 %v15218_v35 }
 0x4ad   :  { %v14398_v49 = vld [vmem:[#allocation2 + $0xddc] sm:$0xf]  ;;  %v10812_v55 = vor.u32 %v14334_v44, %v10809_v47  ;;  %5869 = vmatpush.bf16.msra.mxu0 %v10556_v54 }
 0x4ae   :  { %v11065_v50 = vld [vmem:[#allocation2 + $0xdf8] sm:$0xf0]  ;;  %5864 = vmatmul.bf16.vlgmr.msrb.gmra.mxu3 %v15222_v42  ;;  %v5619_v42 = vadd.f32 %v5618_v31, %v15390_v61 }
 0x4af   :  { %v14462_v52 = vld [vmem:[#allocation2 + $0xfdc] sm:$0xf]  ;;  %v11068_v53 = vor.u32 %v14398_v49, %v11065_v50  ;;  %5882 = vmatpush.bf16.msra.mxu1 %v10812_v55 }
 0x4b0   :  { %v11321_v46 = vld [vmem:[#allocation2 + $0xff8] sm:$0xf0]  ;;  %v5632_v51 = vadd.f32 %v5631_v43, %v5619_v42 }
 0x4b1   :  { %v14262_v57 = vld [vmem:[#allocation2 + $0x99c] sm:$0xf]  ;;  %v11324_v58 = vor.u32 %v14462_v52, %v11321_v46  ;;  %5895 = vmatpush.bf16.msra.mxu2 %v11068_v53 }
 0x4b2   :  { %v10521_v59 = vld [vmem:[#allocation2 + $0x9b8] sm:$0xf0] }
 0x4b3   :  { %v14326_v60 = vld [vmem:[#allocation2 + $0xb9c] sm:$0xf]  ;;  %v10524_v2 = vor.u32 %v14262_v57, %v10521_v59  ;;  %5908 = vmatpush.bf16.msra.mxu3 %v11324_v58 }
 0x4b4   :  { %v10777_v62 = vld [vmem:[#allocation2 + $0xbb8] sm:$0xf0] }
 0x4b5   :  { %v14390_v63 = vld [vmem:[#allocation2 + $0xd9c] sm:$0xf]  ;;  %v10780_v3 = vor.u32 %v14326_v60, %v10777_v62  ;;  %5870 = vmatpush.bf16.msra.mxu0 %v10524_v2 }
 0x4b6   :  { %v11033_v7 = vld [vmem:[#allocation2 + $0xdb8] sm:$0xf0] }
 0x4b7   :  { %v14454_v5 = vld [vmem:[#allocation2 + $0xf9c] sm:$0xf]  ;;  %v11036_v4 = vor.u32 %v14390_v63, %v11033_v7  ;;  %5883 = vmatpush.bf16.msra.mxu1 %v10780_v3  ;;  %v5644_v63 = vpop.f32.mrf.mxu2  ;;  %v5657_v3 = vpop.f32.mrf.mxu3 }
 0x4b8   :  { %v11289_v1 = vld [vmem:[#allocation2 + $0xfb8] sm:$0xf0]  ;;  %v5645_v2 = vadd.f32 %v5644_v63, %v5632_v51 }
 0x4b9   :  { %v14254_v6 = vld [vmem:[#allocation2 + $0x95c] sm:$0xf]  ;;  %v11292_v11 = vor.u32 %v14454_v5, %v11289_v1  ;;  %5896 = vmatpush.bf16.msra.mxu2 %v11036_v4 }
 0x4ba   :  { %v10489_v8 = vld [vmem:[#allocation2 + $0x978] sm:$0xf0] }
 0x4bb   :  { %v14318_v9 = vld [vmem:[#allocation2 + $0xb5c] sm:$0xf]  ;;  %v10492_v24 = vor.u32 %v14254_v6, %v10489_v8  ;;  %5909 = vmatpush.bf16.msra.mxu3 %v11292_v11  ;;  %v5620_v8 = vpop.f32.mrf.mxu0  ;;  %v5633_v11 = vpop.f32.mrf.mxu1 }
 0x4bc   :  { %v10745_v21 = vld [vmem:[#allocation2 + $0xb78] sm:$0xf0] }
 0x4bd   :  { %v14382_v10 = vld [vmem:[#allocation2 + $0xd5c] sm:$0xf]  ;;  %v10748_v16 = vor.u32 %v14318_v9, %v10745_v21  ;;  %5871 = vmatpush.bf16.msra.mxu0 %v10492_v24  ;;  %v15397_v21 = vadd.f32 %v5657_v3, %v5645_v2 }
 0x4be   :  { %v11001_v12 = vld [vmem:[#allocation2 + $0xd78] sm:$0xf0] }
 0x4bf   :  { %v14446_v13 = vld [vmem:[#allocation2 + $0xf5c] sm:$0xf]  ;;  %v11004_v19 = vor.u32 %v14382_v10, %v11001_v12  ;;  %5884 = vmatpush.bf16.msra.mxu1 %v10748_v16 }
 0x4c0   :  { %v11257_v14 = vld [vmem:[#allocation2 + $0xf78] sm:$0xf0] }
 0x4c1   :  { %v14246_v20 = vld [vmem:[#allocation2 + $0x91c] sm:$0xf]  ;;  %v11260_v28 = vor.u32 %v14446_v13, %v11257_v14  ;;  %5897 = vmatpush.bf16.msra.mxu2 %v11004_v19 }
 0x4c2   :  { %v10457_v25 = vld [vmem:[#allocation2 + $0x938] sm:$0xf0] }
 0x4c3   :  { %v14310_v27 = vld [vmem:[#allocation2 + $0xb1c] sm:$0xf]  ;;  %v10460_v40 = vor.u32 %v14246_v20, %v10457_v25  ;;  %5910 = vmatpush.bf16.msra.mxu3 %v11260_v28 }
 0x4c4   :  { %v10713_v35 = vld [vmem:[#allocation2 + $0xb38] sm:$0xf0] }
 0x4c5   :  { %v14374_v29 = vld [vmem:[#allocation2 + $0xd1c] sm:$0xf]  ;;  %v10716_v44 = vor.u32 %v14310_v27, %v10713_v35  ;;  %5872 = vmatpush.bf16.msra.mxu0 %v10460_v40 }
 0x4c6   :  { %v10969_v30 = vld [vmem:[#allocation2 + $0xd38] sm:$0xf0] }
 0x4c7   :  { %v14438_v36 = vld [vmem:[#allocation2 + $0xf1c] sm:$0xf]  ;;  %v10972_v45 = vor.u32 %v14374_v29, %v10969_v30  ;;  %5885 = vmatpush.bf16.msra.mxu1 %v10716_v44 }
 0x4c8   :  { %v11225_v37 = vld [vmem:[#allocation2 + $0xf38] sm:$0xf0] }
 0x4c9   :  { %v14238_v47 = vld [vmem:[#allocation2 + $0x8dc] sm:$0xf]  ;;  %v11228_v32 = vor.u32 %v14438_v36, %v11225_v37  ;;  %5898 = vmatpush.bf16.msra.mxu2 %v10972_v45 }
 0x4ca   :  { %v10425_v49 = vld [vmem:[#allocation2 + $0x8f8] sm:$0xf0] }
 0x4cb   :  { %v14302_v50 = vld [vmem:[#allocation2 + $0xadc] sm:$0xf]  ;;  %v10428_v53 = vor.u32 %v14238_v47, %v10425_v49  ;;  %5911 = vmatpush.bf16.msra.mxu3 %v11228_v32  ;;  %v5646_v49 = vpop.f32.mrf.mxu2 }
 0x4cc   :  { %v10681_v52 = vld [vmem:[#allocation2 + $0xaf8] sm:$0xf0] }
 0x4cd   :  { %v14366_v46 = vld [vmem:[#allocation2 + $0xcdc] sm:$0xf]  ;;  %v10684_v61 = vor.u32 %v14302_v50, %v10681_v52  ;;  %5873 = vmatpush.bf16.msra.mxu0 %v10428_v53  ;;  %v5659_v52 = vpop.f32.mrf.mxu3 }
 0x4ce   :  { %v10937_v48 = vld [vmem:[#allocation2 + $0xcf8] sm:$0xf0] }
 0x4cf   :  { %v14430_v54 = vld [vmem:[#allocation2 + $0xedc] sm:$0xf]  ;;  %v10940_v57 = vor.u32 %v14366_v46, %v10937_v48  ;;  %5886 = vmatpush.bf16.msra.mxu1 %v10684_v61 }
 0x4d0   :  { %v11193_v55 = vld [vmem:[#allocation2 + $0xef8] sm:$0xf0] }
 0x4d1   :  { %v14230_v59 = vld [vmem:[#allocation2 + $0x89c] sm:$0xf]  ;;  %v11196_v62 = vor.u32 %v14430_v54, %v11193_v55  ;;  %5899 = vmatpush.bf16.msra.mxu2 %v10940_v57 }
 0x4d2   :  { %v10393_v60 = vld [vmem:[#allocation2 + $0x8b8] sm:$0xf0] }
 0x4d3   :  { %v14294_v58 = vld [vmem:[#allocation2 + $0xa9c] sm:$0xf]  ;;  %v10396_v9 = vor.u32 %v14230_v59, %v10393_v60  ;;  %5912 = vmatpush.bf16.msra.mxu3 %v11196_v62 }
 0x4d4   :  { %v10649_v7 = vld [vmem:[#allocation2 + $0xab8] sm:$0xf0] }
 0x4d5   :  { %v14358_v5 = vld [vmem:[#allocation2 + $0xc9c] sm:$0xf]  ;;  %v10652_v10 = vor.u32 %v14294_v58, %v10649_v7  ;;  %5874 = vmatpush.bf16.msra.mxu0 %v10396_v9 }
 0x4d6   :  { %v10905_v1 = vld [vmem:[#allocation2 + $0xcb8] sm:$0xf0] }
 0x4d7   :  { %v14422_v4 = vld [vmem:[#allocation2 + $0xe9c] sm:$0xf]  ;;  %v10908_v12 = vor.u32 %v14358_v5, %v10905_v1  ;;  %5887 = vmatpush.bf16.msra.mxu1 %v10652_v10 }
 0x4d8   :  { %v11161_v6 = vld [vmem:[#allocation2 + $0xeb8] sm:$0xf0] }
 0x4d9   :  { %v14222_v13 = vld [vmem:[#allocation2 + $0x85c] sm:$0xf]  ;;  %v11164_v16 = vor.u32 %v14422_v4, %v11161_v6  ;;  %5900 = vmatpush.bf16.msra.mxu2 %v10908_v12 }
 0x4da   :  { %v10361_v14 = vld [vmem:[#allocation2 + $0x878] sm:$0xf0] }
 0x4db   :  { %v14286_v24 = vld [vmem:[#allocation2 + $0xa5c] sm:$0xf]  ;;  %v10364_v35 = vor.u32 %v14222_v13, %v10361_v14  ;;  %5913 = vmatpush.bf16.msra.mxu3 %v11164_v16 }
 0x4dc   :  { %v10617_v19 = vld [vmem:[#allocation2 + $0xa78] sm:$0xf0] }
 0x4dd   :  { %v14350_v20 = vld [vmem:[#allocation2 + $0xc5c] sm:$0xf]  ;;  %v10620_v31 = vor.u32 %v14286_v24, %v10617_v19  ;;  %5875 = vmatpush.bf16.msra.mxu0 %v10364_v35 }
 0x4de   :  { %v10873_v25 = vld [vmem:[#allocation2 + $0xc78] sm:$0xf0] }
 0x4df   :  { %v14414_v27 = vld [vmem:[#allocation2 + $0xe5c] sm:$0xf]  ;;  %v10876_v36 = vor.u32 %v14350_v20, %v10873_v25  ;;  %5888 = vmatpush.bf16.msra.mxu1 %v10620_v31 }
 0x4e0   :  { %v11129_v28 = vld [vmem:[#allocation2 + $0xe78] sm:$0xf0] }
 0x4e1   :  { %v14214_v29 = vld [vmem:[#allocation2 + $0x81c] sm:$0xf]  ;;  %v11132_v43 = vor.u32 %v14414_v27, %v11129_v28  ;;  %5901 = vmatpush.bf16.msra.mxu2 %v10876_v36 }
 0x4e2   :  { %v10329_v30 = vld [vmem:[#allocation2 + $0x838] sm:$0xf0] }
 0x4e3   :  { %v14278_v37 = vld [vmem:[#allocation2 + $0xa1c] sm:$0xf]  ;;  %v10332_v46 = vor.u32 %v14214_v29, %v10329_v30  ;;  %5914 = vmatpush.bf16.msra.mxu3 %v11132_v43 }
 0x4e4   :  { %v10585_v42 = vld [vmem:[#allocation2 + $0xa38] sm:$0xf0] }
 0x4e5   :  { %v14342_v40 = vld [vmem:[#allocation2 + $0xc1c] sm:$0xf]  ;;  %v10588_v53 = vor.u32 %v14278_v37, %v10585_v42  ;;  %5876 = vmatpush.bf16.msra.mxu0 %v10332_v46 }
 0x4e6   :  { %v10841_v44 = vld [vmem:[#allocation2 + $0xc38] sm:$0xf0] }
 0x4e7   :  { %v14406_v45 = vld [vmem:[#allocation2 + $0xe1c] sm:$0xf]  ;;  %v10844_v61 = vor.u32 %v14342_v40, %v10841_v44  ;;  %5889 = vmatpush.bf16.msra.mxu1 %v10588_v53 }
 0x4e8   :  { %v11097_v47 = vld [vmem:[#allocation2 + $0xe38] sm:$0xf0]  ;;  %5877 = vmatmul.bf16.vlgmr.msra.gmra.mxu0 %v15235_v38 }
 0x4e9   :  { %v14526_v50 = vld [vmem:[#allocation2 + $0x11dc] sm:$0xf]  ;;  %v11100_v60 = vor.u32 %v14406_v45, %v11097_v47  ;;  %5902 = vmatpush.bf16.msra.mxu2 %v10844_v61  ;;  %v15403_v45 = vpop.f32.mrf.mxu0 }
 0x4ea   :  { %v11577_v32 = vld [vmem:[#allocation2 + $0x11f8] sm:$0xf0]  ;;  %5890 = vmatmul.bf16.vlgmr.msra.gmra.mxu1 %v15239_v41 }
 0x4eb   :  { %v14590_v51 = vld [vmem:[#allocation2 + $0x13dc] sm:$0xf]  ;;  %v11580_v58 = vor.u32 %v14526_v50, %v11577_v32  ;;  %5915 = vmatpush.bf16.msra.mxu3 %v11100_v60 }
 0x4ec   :  { %v11833_v48 = vld [vmem:[#allocation2 + $0x13f8] sm:$0xf0]  ;;  %5903 = vmatmul.bf16.vlgmr.msra.gmra.mxu2 %v15233_v33 }
 0x4ed   :  { %v14654_v54 = vld [vmem:[#allocation2 + $0x15dc] sm:$0xf]  ;;  %v11836_v62 = vor.u32 %v14590_v51, %v11833_v48  ;;  %5921 = vmatpush.bf16.msrb.mxu0 %v11580_v58  ;;  %v15405_v51 = vpop.f32.mrf.mxu1 }
 0x4ee   :  { %v12089_v55 = vld [vmem:[#allocation2 + $0x15f8] sm:$0xf0]  ;;  %5916 = vmatmul.bf16.vlgmr.msra.gmra.mxu3 %v15237_v39 }
 0x4ef   :  { %v14718_v57 = vld [vmem:[#allocation2 + $0x17dc] sm:$0xf]  ;;  %v12092_v63 = vor.u32 %v14654_v54, %v12089_v55  ;;  %5934 = vmatpush.bf16.msrb.mxu1 %v11836_v62 }
 0x4f0   :  { %v12345_v59 = vld [vmem:[#allocation2 + $0x17f8] sm:$0xf0] }
 0x4f1   :  { %v14518_v7 = vld [vmem:[#allocation2 + $0x119c] sm:$0xf]  ;;  %v12348_v2 = vor.u32 %v14718_v57, %v12345_v59  ;;  %5947 = vmatpush.bf16.msrb.mxu2 %v12092_v63  ;;  %v15407_v63 = vpop.f32.mrf.mxu2 }
 0x4f2   :  { %v11545_v5 = vld [vmem:[#allocation2 + $0x11b8] sm:$0xf0] }
 0x4f3   :  { %v14582_v1 = vld [vmem:[#allocation2 + $0x139c] sm:$0xf]  ;;  %v11548_v11 = vor.u32 %v14518_v7, %v11545_v5  ;;  %5960 = vmatpush.bf16.msrb.mxu3 %v12348_v2 }
 0x4f4   :  { %v11801_v3 = vld [vmem:[#allocation2 + $0x13b8] sm:$0xf0] }
 0x4f5   :  { %v14646_v4 = vld [vmem:[#allocation2 + $0x159c] sm:$0xf]  ;;  %v11804_v10 = vor.u32 %v14582_v1, %v11801_v3  ;;  %5922 = vmatpush.bf16.msrb.mxu0 %v11548_v11  ;;  %v15409_v3 = vpop.f32.mrf.mxu3 }
 0x4f6   :  { %v12057_v6 = vld [vmem:[#allocation2 + $0x15b8] sm:$0xf0] }
 0x4f7   :  { %v14710_v8 = vld [vmem:[#allocation2 + $0x179c] sm:$0xf]  ;;  %v12060_v12 = vor.u32 %v14646_v4, %v12057_v6  ;;  %5935 = vmatpush.bf16.msrb.mxu1 %v11804_v10 }
 0x4f8   :  { %v12313_v9 = vld [vmem:[#allocation2 + $0x17b8] sm:$0xf0] }
 0x4f9   :  { %v14510_v13 = vld [vmem:[#allocation2 + $0x115c] sm:$0xf]  ;;  %v12316_v16 = vor.u32 %v14710_v8, %v12313_v9  ;;  %5948 = vmatpush.bf16.msrb.mxu2 %v12060_v12  ;;  %v5672_v9 = vpop.f32.mrf.mxu0 }
 0x4fa   :  { %v11513_v14 = vld [vmem:[#allocation2 + $0x1178] sm:$0xf0] }
 0x4fb   :  { %v14574_v24 = vld [vmem:[#allocation2 + $0x135c] sm:$0xf]  ;;  %v11516_v35 = vor.u32 %v14510_v13, %v11513_v14  ;;  %5961 = vmatpush.bf16.msrb.mxu3 %v12316_v16 }
 0x4fc   :  { %v11769_v19 = vld [vmem:[#allocation2 + $0x1378] sm:$0xf0] }
 0x4fd   :  { %v14638_v20 = vld [vmem:[#allocation2 + $0x155c] sm:$0xf]  ;;  %v11772_v29 = vor.u32 %v14574_v24, %v11769_v19  ;;  %5923 = vmatpush.bf16.msrb.mxu0 %v11516_v35  ;;  %v5685_v24 = vpop.f32.mrf.mxu1 }
 0x4fe   :  { %v12025_v25 = vld [vmem:[#allocation2 + $0x1578] sm:$0xf0]  ;;  %v14750_v24 = vld [vmem:[%s17982_s2 + $0xd8] sm:$0xf0] }
 0x4ff   :  { %v14702_v27 = vld [vmem:[#allocation2 + $0x175c] sm:$0xf]  ;;  %v12028_v30 = vor.u32 %v14638_v20, %v12025_v25  ;;  %5936 = vmatpush.bf16.msrb.mxu1 %v11772_v29 }
 0x500   :  { %v12281_v28 = vld [vmem:[#allocation2 + $0x1778] sm:$0xf0] }
 0x501   :  { %v14502_v31 = vld [vmem:[#allocation2 + $0x111c] sm:$0xf]  ;;  %v12284_v37 = vor.u32 %v14702_v27, %v12281_v28  ;;  %5949 = vmatpush.bf16.msrb.mxu2 %v12028_v30 }
 0x502   :  { %v11481_v36 = vld [vmem:[#allocation2 + $0x1138] sm:$0xf0] }
 0x503   :  { %v14566_v33 = vld [vmem:[#allocation2 + $0x131c] sm:$0xf]  ;;  %v11484_v39 = vor.u32 %v14502_v31, %v11481_v36  ;;  %5962 = vmatpush.bf16.msrb.mxu3 %v12284_v37 }
 0x504   :  { %v11737_v42 = vld [vmem:[#allocation2 + $0x1338] sm:$0xf0] }
 0x505   :  { %v14630_v40 = vld [vmem:[#allocation2 + $0x151c] sm:$0xf]  ;;  %v11740_v41 = vor.u32 %v14566_v33, %v11737_v42  ;;  %5924 = vmatpush.bf16.msrb.mxu0 %v11484_v39 }
 0x506   :  { %v11993_v43 = vld [vmem:[#allocation2 + $0x1538] sm:$0xf0] }
 0x507   :  { %v14694_v44 = vld [vmem:[#allocation2 + $0x171c] sm:$0xf]  ;;  %v11996_v47 = vor.u32 %v14630_v40, %v11993_v43  ;;  %5937 = vmatpush.bf16.msrb.mxu1 %v11740_v41  ;;  %v5698_v40 = vpop.f32.mrf.mxu2  ;;  %v5711_v41 = vpop.f32.mrf.mxu3 }
 0x508   :  { %v12249_v38 = vld [vmem:[#allocation2 + $0x1738] sm:$0xf0]  ;;  %v12911_v40 = vld [vmem:[%s17982_s2 + $0x460] sm:$0xf] }
 0x509   :  { %v14494_v49 = vld [vmem:[#allocation2 + $0x10dc] sm:$0xf]  ;;  %v12252_v52 = vor.u32 %v14694_v44, %v12249_v38  ;;  %5950 = vmatpush.bf16.msrb.mxu2 %v11996_v47  ;;  %v12491_v47 = vld [vmem:[%s17982_s2 + $0x118] sm:$0xf] }
 0x50a   :  { %v11449_v50 = vld [vmem:[#allocation2 + $0x10f8] sm:$0xf0] }
 0x50b   :  { %v14558_v32 = vld [vmem:[#allocation2 + $0x12dc] sm:$0xf]  ;;  %v11452_v61 = vor.u32 %v14494_v49, %v11449_v50  ;;  %5963 = vmatpush.bf16.msrb.mxu3 %v12252_v52  ;;  %v14760_v49 = vld [vmem:[%s17982_s2 + $0x128] sm:$0xf0]  ;;  %v12651_v50 = vld [vmem:[%s17982_s2 + $0x258] sm:$0xf] }
 0x50c   :  { %v11705_v46 = vld [vmem:[#allocation2 + $0x12f8] sm:$0xf0]  ;;  %v14800_v52 = vld [vmem:[%s17982_s2 + $0x268] sm:$0xf0] }
 0x50d   :  { %v14622_v48 = vld [vmem:[#allocation2 + $0x14dc] sm:$0xf]  ;;  %v11708_v57 = vor.u32 %v14558_v32, %v11705_v46  ;;  %5925 = vmatpush.bf16.msrb.mxu0 %v11452_v61  ;;  %v12811_v46 = vld [vmem:[%s17982_s2 + $0x398] sm:$0xf]  ;;  %v14880_v61 = vld [vmem:[%s17982_s2 + $0x4e8] sm:$0xf0] }
 0x50e   :  { %v11961_v54 = vld [vmem:[#allocation2 + $0x14f8] sm:$0xf0] }
 0x50f   :  { %v14686_v55 = vld [vmem:[#allocation2 + $0x16dc] sm:$0xf]  ;;  %v11964_v59 = vor.u32 %v14622_v48, %v11961_v54  ;;  %5938 = vmatpush.bf16.msrb.mxu1 %v11708_v57  ;;  %v14840_v48 = vld [vmem:[%s17982_s2 + $0x3a8] sm:$0xf0] }
 0x510   :  { %v12217_v53 = vld [vmem:[#allocation2 + $0x16f8] sm:$0xf0] }
 0x511   :  { %v14486_v60 = vld [vmem:[#allocation2 + $0x109c] sm:$0xf]  ;;  %v12220_v7 = vor.u32 %v14686_v55, %v12217_v53  ;;  %5951 = vmatpush.bf16.msrb.mxu2 %v11964_v59  ;;  %v12971_v53 = vld [vmem:[%s17982_s2 + $0x4d8] sm:$0xf]  ;;  %v12492_v59 = vor.u32 %v14760_v49, %v12491_v47 }
 0x512   :  { %v11417_v58 = vld [vmem:[#allocation2 + $0x10b8] sm:$0xf0]  ;;  %v12411_v49 = vld [vmem:[%s17982_s2 + $0x78] sm:$0xf] }
 0x513   :  { %v14550_v62 = vld [vmem:[#allocation2 + $0x129c] sm:$0xf]  ;;  %v11420_v8 = vor.u32 %v14486_v60, %v11417_v58  ;;  %5964 = vmatpush.bf16.msrb.mxu3 %v12220_v7  ;;  %v12652_v60 = vor.u32 %v14800_v52, %v12651_v50  ;;  %v12812_v58 = vor.u32 %v14840_v48, %v12811_v46  ;;  %v14740_v50 = vld [vmem:[%s17982_s2 + $0x88] sm:$0xf0]  ;;  %v15528_v52 = vpop.f32.mrf.mxu1 }
 0x514   :  { %v11673_v5 = vld [vmem:[#allocation2 + $0x12b8] sm:$0xf0]  ;;  %v14780_v48 = vld [vmem:[%s17982_s2 + $0x1c8] sm:$0xf0] }
 0x515   :  { %v14614_v1 = vld [vmem:[#allocation2 + $0x149c] sm:$0xf]  ;;  %v11676_v11 = vor.u32 %v14550_v62, %v11673_v5  ;;  %5926 = vmatpush.bf16.msrb.mxu0 %v11420_v8  ;;  %v12471_v62 = vld [vmem:[%s17982_s2 + $0xf0] sm:$0xf] }
 0x516   :  { %v11929_v2 = vld [vmem:[#allocation2 + $0x14b8] sm:$0xf0]  ;;  %v12631_v5 = vld [vmem:[%s17982_s2 + $0x230] sm:$0xf] }
 0x517   :  { %v14678_v4 = vld [vmem:[#allocation2 + $0x169c] sm:$0xf]  ;;  %v11932_v10 = vor.u32 %v14614_v1, %v11929_v2  ;;  %5939 = vmatpush.bf16.msrb.mxu1 %v11676_v11  ;;  %v12972_v1 = vor.u32 %v14880_v61, %v12971_v53  ;;  %v12951_v8 = vld [vmem:[%s17982_s2 + $0x4b0] sm:$0xf]  ;;  %v15462_v11 = vld [vmem:[%s17985_s5 + $0x18] sm:$0xff] }
 0x518   :  { %v12185_v6 = vld [vmem:[#allocation2 + $0x16b8] sm:$0xf0]  ;;  %v12891_v53 = vld [vmem:[%s17982_s2 + $0x438] sm:$0xf]  ;;  %v14860_v61 = vld [vmem:[%s17982_s2 + $0x448] sm:$0xf0] }
 0x519   :  { %v14478_v12 = vld [vmem:[#allocation2 + $0x105c] sm:$0xf]  ;;  %v12188_v16 = vor.u32 %v14678_v4, %v12185_v6  ;;  %5952 = vmatpush.bf16.msrb.mxu2 %v11932_v10  ;;  %v12791_v4 = vld [vmem:[%s17982_s2 + $0x370] sm:$0xf] }
 0x51a   :  { %v11385_v13 = vld [vmem:[#allocation2 + $0x1078] sm:$0xf0] }
 0x51b   :  { %v14542_v14 = vld [vmem:[#allocation2 + $0x125c] sm:$0xf]  ;;  %v11388_v35 = vor.u32 %v14478_v12, %v11385_v13  ;;  %5965 = vmatpush.bf16.msrb.mxu3 %v12188_v16  ;;  %v12611_v16 = vld [vmem:[%s17982_s2 + $0x208] sm:$0xf] }
 0x51c   :  { %v11641_v19 = vld [vmem:[#allocation2 + $0x1278] sm:$0xf0] }
 0x51d   :  { %v14606_v20 = vld [vmem:[#allocation2 + $0x145c] sm:$0xf]  ;;  %v11644_v31 = vor.u32 %v14542_v14, %v11641_v19  ;;  %5927 = vmatpush.bf16.msrb.mxu0 %v11388_v35  ;;  %v12451_v14 = vld [vmem:[%s17982_s2 + $0xc8] sm:$0xf]  ;;  %v867_v35 = vperm.slane %v15462_v11, 0 }
 0x51e   :  { %v11897_v25 = vld [vmem:[#allocation2 + $0x1478] sm:$0xf0] }
 0x51f   :  { %v14670_v27 = vld [vmem:[#allocation2 + $0x165c] sm:$0xf]  ;;  %v11900_v36 = vor.u32 %v14606_v20, %v11897_v25  ;;  %5940 = vmatpush.bf16.msrb.mxu1 %v11644_v31  ;;  %v14790_v20 = vld [vmem:[%s17982_s2 + $0x218] sm:$0xf0]  ;;  %v12771_v25 = vld [vmem:[%s17982_s2 + $0x348] sm:$0xf] }
 0x520   :  { %v12153_v28 = vld [vmem:[#allocation2 + $0x1678] sm:$0xf0]  ;;  %v14745_v31 = vld [vmem:[%s17982_s2 + $0xb0] sm:$0xf0] }
 0x521   :  { %v14470_v29 = vld [vmem:[#allocation2 + $0x101c] sm:$0xf]  ;;  %v12156_v43 = vor.u32 %v14670_v27, %v12153_v28  ;;  %5953 = vmatpush.bf16.msrb.mxu2 %v11900_v36  ;;  %v14830_v27 = vld [vmem:[%s17982_s2 + $0x358] sm:$0xf0] }
 0x522   :  { %v11353_v30 = vld [vmem:[#allocation2 + $0x1038] sm:$0xf0]  ;;  %v14870_v28 = vld [vmem:[%s17982_s2 + $0x498] sm:$0xf0] }
 0x523   :  { %v14534_v33 = vld [vmem:[#allocation2 + $0x121c] sm:$0xf]  ;;  %v11356_v32 = vor.u32 %v14470_v29, %v11353_v30  ;;  %5966 = vmatpush.bf16.msrb.mxu3 %v12156_v43  ;;  %v12452_v29 = vor.u32 %v14750_v24, %v12451_v14  ;;  %v12612_v30 = vor.u32 %v14790_v20, %v12611_v16  ;;  %v14865_v43 = vld [vmem:[%s17982_s2 + $0x470] sm:$0xf0]  ;;  %v14730_v20 = vld [vmem:[%s17982_s2 + $0x38] sm:$0xf0] }
 0x524   :  { %v11609_v37 = vld [vmem:[#allocation2 + $0x1238] sm:$0xf0]  ;;  %v12912_v46 = vor.u32 %v14865_v43, %v12911_v40 }
 0x525   :  { %v14598_v42 = vld [vmem:[#allocation2 + $0x141c] sm:$0xf]  ;;  %v11612_v54 = vor.u32 %v14534_v33, %v11609_v37  ;;  %5928 = vmatpush.bf16.msrb.mxu0 %v11356_v32  ;;  %v14785_v33 = vld [vmem:[%s17982_s2 + $0x1f0] sm:$0xf0]  ;;  %v12751_v37 = vld [vmem:[%s17982_s2 + $0x320] sm:$0xf] }
 0x526   :  { %v11865_v44 = vld [vmem:[#allocation2 + $0x1438] sm:$0xf0]  ;;  %v12571_v32 = vld [vmem:[%s17982_s2 + $0x1b8] sm:$0xf] }
 0x527   :  { %v14662_v38 = vld [vmem:[#allocation2 + $0x161c] sm:$0xf]  ;;  %v11868_v55 = vor.u32 %v14598_v42, %v11865_v44  ;;  %5941 = vmatpush.bf16.msrb.mxu1 %v11612_v54  ;;  %v14825_v42 = vld [vmem:[%s17982_s2 + $0x330] sm:$0xf0]  ;;  %v883_v44 = vperm.slane %v867_v35, 0 }
 0x528   :  { %v12121_v39 = vld [vmem:[#allocation2 + $0x1638] sm:$0xf0]  ;;  %5929 = vmatmul.bf16.vlgmr.msrb.gmra.mxu0 %v15245_v18  ;;  %v12931_v18 = vld [vmem:[%s17982_s2 + $0x488] sm:$0xf]  ;;  %v12752_v47 = vor.u32 %v14825_v42, %v12751_v37  ;;  %v12731_v54 = vld [vmem:[%s17982_s2 + $0x2f8] sm:$0xf] }
 0x529   :  { %v12124_v57 = vor.u32 %v14662_v38, %v12121_v39  ;;  %v14755_v7 = vld [vmem:[%s17982_s2 + $0x100] sm:$0xf0]  ;;  %5954 = vmatpush.bf16.msrb.mxu2 %v11868_v55  ;;  %8052 = vmatpush.bf16.msra.mxu0 %v12492_v59  ;;  %v12932_v36 = vor.u32 %v14870_v28, %v12931_v18  ;;  %v15517_v39 = vpop.f32.mrf.mxu0  ;;  %v14820_v55 = vld [vmem:[%s17982_s2 + $0x308] sm:$0xf0]  ;;  %v12412_v59 = vor.u32 %v14740_v50, %v12411_v49  ;;  %v14770_v18 = vld [vmem:[%s17982_s2 + $0x178] sm:$0xf0] }
 0x52a   :  { %v14795_v2 = vld [vmem:[%s17982_s2 + $0x240] sm:$0xf0]  ;;  %v12472_v10 = vor.u32 %v14755_v7, %v12471_v62  ;;  %5942 = vmatmul.bf16.vlgmr.msrb.gmra.mxu1 %v15249_v23  ;;  %v12772_v23 = vor.u32 %v14830_v27, %v12771_v25  ;;  %v12391_v62 = vld [vmem:[%s17982_s2 + $0x50] sm:$0xf]  ;;  %v12531_v25 = vld [vmem:[%s17982_s2 + $0x168] sm:$0xf] }
 0x52b   :  { %v14835_v6 = vld [vmem:[%s17982_s2 + $0x380] sm:$0xf0]  ;;  %5967 = vmatpush.bf16.msrb.mxu3 %v12124_v57  ;;  %8065 = vmatpush.bf16.msra.mxu1 %v12652_v60  ;;  %v12632_v12 = vor.u32 %v14795_v2, %v12631_v5  ;;  %v5671_v57 = vadd.f32 %v15403_v45, %v883_v44  ;;  %v12572_v60 = vor.u32 %v14780_v48, %v12571_v32  ;;  %v12551_v5 = vld [vmem:[%s17982_s2 + $0x190] sm:$0xf]  ;;  %v12691_v28 = vld [vmem:[%s17982_s2 + $0x2a8] sm:$0xf] }
 0x52c   :  { %v14875_v9 = vld [vmem:[%s17982_s2 + $0x4c0] sm:$0xf0]  ;;  %v12792_v13 = vor.u32 %v14835_v6, %v12791_v4  ;;  %5955 = vmatmul.bf16.vlgmr.msrb.gmra.mxu2 %v15247_v22  ;;  %v12431_v22 = vld [vmem:[%s17982_s2 + $0xa0] sm:$0xf]  ;;  %v12892_v45 = vor.u32 %v14860_v61, %v12891_v53  ;;  %v12711_v4 = vld [vmem:[%s17982_s2 + $0x2d0] sm:$0xf] }
 0x52d   :  { %8078 = vmatpush.bf16.msra.mxu2 %v12812_v58  ;;  %v12952_v19 = vor.u32 %v14875_v9, %v12951_v8  ;;  %8053 = vmatpush.bf16.msra.mxu0 %v12472_v10  ;;  %v12432_v38 = vor.u32 %v14745_v31, %v12431_v22  ;;  %v12732_v58 = vor.u32 %v14820_v55, %v12731_v54  ;;  %v14735_v7 = vld [vmem:[%s17982_s2 + $0x60] sm:$0xf0]  ;;  %v15566_v8 = vpop.f32.mrf.mxu3  ;;  %v12871_v9 = vld [vmem:[%s17982_s2 + $0x410] sm:$0xf]  ;;  %v14810_v35 = vld [vmem:[%s17982_s2 + $0x2b8] sm:$0xf0] }
 0x52e   :  { %5968 = vmatmul.bf16.vlgmr.msrb.gmra.mxu3 %v15251_v26  ;;  %v12591_v26 = vld [vmem:[%s17982_s2 + $0x1e0] sm:$0xf]  ;;  %v14775_v2 = vld [vmem:[%s17982_s2 + $0x1a0] sm:$0xf0]  ;;  %v14805_v44 = vld [vmem:[%s17982_s2 + $0x290] sm:$0xf0] }
 0x52f   :  { %8091 = vmatpush.bf16.msra.mxu3 %v12972_v1  ;;  %8066 = vmatpush.bf16.msra.mxu1 %v12632_v12  ;;  %v12592_v41 = vor.u32 %v14785_v33, %v12591_v26  ;;  %v15555_v1 = vpop.f32.mrf.mxu2  ;;  %v14815_v6 = vld [vmem:[%s17982_s2 + $0x2e0] sm:$0xf0]  ;;  %v5684_v12 = vadd.f32 %v15405_v51, %v5671_v57  ;;  %v12552_v24 = vor.u32 %v14775_v2, %v12551_v5  ;;  %v5737_v51 = vpop.f32.mrf.mxu1  ;;  %v12351_v31 = vld [vmem:[%s17982_s2] sm:$0xf]  ;;  %v14725_v26 = vld [vmem:[%s17982_s2 + $0x10] sm:$0xf0] }
 0x530   :  { %v14855_v10 = vld [vmem:[%s17982_s2 + $0x420] sm:$0xf0]  ;;  %v12712_v16 = vor.u32 %v14815_v6, %v12711_v4  ;;  %v12692_v33 = vor.u32 %v14810_v35, %v12691_v28  ;;  %v12511_v37 = vld [vmem:[%s17982_s2 + $0x140] sm:$0xf]  ;;  %v13131_v49 = vld [vmem:[%s17982_s2 + $0x618] sm:$0xf]  ;;  %v12352_v48 = vor.u32 %v14725_v26, %v12351_v31 }
 0x531   :  { %8079 = vmatpush.bf16.msra.mxu2 %v12792_v13  ;;  %8054 = vmatpush.bf16.msra.mxu0 %v12452_v29  ;;  %v12392_v13 = vor.u32 %v14735_v7, %v12391_v62  ;;  %v5724_v14 = vpop.f32.mrf.mxu0  ;;  %v12872_v27 = vor.u32 %v14855_v10, %v12871_v9  ;;  %v12851_v29 = vld [vmem:[%s17982_s2 + $0x3e8] sm:$0xf]  ;;  %v12671_v42 = vld [vmem:[%s17982_s2 + $0x280] sm:$0xf]  ;;  %v14920_v50 = vld [vmem:[%s17982_s2 + $0x628] sm:$0xf0] }
 0x532   :  { %v13291_v32 = vld [vmem:[%s17982_s2 + $0x758] sm:$0xf]  ;;  %v14960_v54 = vld [vmem:[%s17982_s2 + $0x768] sm:$0xf0]  ;;  %v5973_v61 = vmax.f32 %v15282_v34, 0.0  ;;  %v5974_v57 = vmax.f32 %v15303_v0, 0.0  ;;  %v13132_v7 = vor.u32 %v14920_v50, %v13131_v49 }
 0x533   :  { %8092 = vmatpush.bf16.msra.mxu3 %v12952_v19  ;;  %8067 = vmatpush.bf16.msra.mxu1 %v12612_v30  ;;  %v12371_v19 = vld [vmem:[%s17982_s2 + $0x28] sm:$0xf]  ;;  %v14850_v30 = vld [vmem:[%s17982_s2 + $0x3f8] sm:$0xf0]  ;;  %v13451_v55 = vld [vmem:[%s17982_s2 + $0x898] sm:$0xf]  ;;  %v13292_v5 = vor.u32 %v14960_v54, %v13291_v32 }
 0x534   :  { %v12372_v22 = vor.u32 %v14730_v20, %v12371_v19  ;;  %v12852_v43 = vor.u32 %v14850_v30, %v12851_v29  ;;  %v15000_v53 = vld [vmem:[%s17982_s2 + $0x8a8] sm:$0xf0]  ;;  %v13111_v2 = vld [vmem:[%s17982_s2 + $0x5f0] sm:$0xf]  ;;  %v14915_v34 = vld [vmem:[%s17982_s2 + $0x600] sm:$0xf0]  ;;  %v15666_v9 = vpack.c.bf16 %v5973_v61, %v5973_v61  ;;  %v15668_v10 = vpack.c.bf16 %v5974_v57, %v5974_v57 }
 0x535   :  { %8080 = vmatpush.bf16.msra.mxu2 %v12772_v23  ;;  %8055 = vmatpush.bf16.msra.mxu0 %v12432_v38  ;;  %v5697_v23 = vadd.f32 %v15407_v63, %v5684_v12  ;;  %v14765_v63 = vld [vmem:[%s17982_s2 + $0x150] sm:$0xf0]  ;;  %v12831_v38 = vld [vmem:[%s17982_s2 + $0x3c0] sm:$0xf]  ;;  %v13271_v0 = vld [vmem:[%s17982_s2 + $0x730] sm:$0xf]  ;;  %v13112_v12 = vor.u32 %v14915_v34, %v13111_v2 }
 0x536   :  { %v13431_v4 = vld [vmem:[%s17982_s2 + $0x870] sm:$0xf]  ;;  %v14995_v6 = vld [vmem:[%s17982_s2 + $0x880] sm:$0xf0]  ;;  %v14910_v19 = vld [vmem:[%s17982_s2 + $0x5d8] sm:$0xf0] }
 0x537   :  { %8093 = vmatpush.bf16.msra.mxu3 %v12932_v36  ;;  %8068 = vmatpush.bf16.msra.mxu1 %v12592_v41  ;;  %v12532_v36 = vor.u32 %v14770_v18, %v12531_v25  ;;  %v5750_v40 = vpop.f32.mrf.mxu2  ;;  %v14845_v41 = vld [vmem:[%s17982_s2 + $0x3d0] sm:$0xf0]  ;;  %v13251_v20 = vld [vmem:[%s17982_s2 + $0x708] sm:$0xf]  ;;  %v14950_v51 = vld [vmem:[%s17982_s2 + $0x718] sm:$0xf0] }
 0x538   :  { %v12832_v62 = vor.u32 %v14845_v41, %v12831_v38  ;;  %v14990_v18 = vld [vmem:[%s17982_s2 + $0x858] sm:$0xf0]  ;;  %v13252_v28 = vor.u32 %v14950_v51, %v13251_v20  ;;  %v13071_v29 = vld [vmem:[%s17982_s2 + $0x5a0] sm:$0xf]  ;;  %v14905_v30 = vld [vmem:[%s17982_s2 + $0x5b0] sm:$0xf0] }
 0x539   :  { %8081 = vmatpush.bf16.msra.mxu2 %v12752_v47  ;;  %8056 = vmatpush.bf16.msra.mxu0 %v12412_v59  ;;  %v5763_v47 = vpop.f32.mrf.mxu3  ;;  %v12672_v59 = vor.u32 %v14805_v44, %v12671_v42  ;;  %v14945_v31 = vld [vmem:[%s17982_s2 + $0x6f0] sm:$0xf0]  ;;  %v13391_v26 = vld [vmem:[%s17982_s2 + $0x820] sm:$0xf]  ;;  %v13051_v40 = vld [vmem:[%s17982_s2 + $0x578] sm:$0xf] }
 0x53a   :  { %v13211_v44 = vld [vmem:[%s17982_s2 + $0x6b8] sm:$0xf]  ;;  %v14940_v41 = vld [vmem:[%s17982_s2 + $0x6c8] sm:$0xf0]  ;;  %v14895_v54 = vld [vmem:[%s17982_s2 + $0x560] sm:$0xf0] }
 0x53b   :  { %8094 = vmatpush.bf16.msra.mxu3 %v12912_v46  ;;  %8069 = vmatpush.bf16.msra.mxu1 %v12572_v60  ;;  %v5710_v46 = vadd.f32 %v15409_v3, %v5697_v23  ;;  %v12512_v3 = vor.u32 %v14765_v63, %v12511_v37  ;;  %v5975_v60 = vmax.f32 %v15329_v56, 0.0  ;;  %v13231_v23 = vld [vmem:[%s17982_s2 + $0x6e0] sm:$0xf]  ;;  %v13072_v37 = vor.u32 %v14905_v30, %v13071_v29  ;;  %v5787_v63 = vpop.f32.mrf.mxu1  ;;  %v13371_v47 = vld [vmem:[%s17982_s2 + $0x7f8] sm:$0xf] }
 0x53c   :  { %v13232_v42 = vor.u32 %v14945_v31, %v13231_v23  ;;  %v14980_v49 = vld [vmem:[%s17982_s2 + $0x808] sm:$0xf0]  ;;  %v14935_v61 = vld [vmem:[%s17982_s2 + $0x6a0] sm:$0xf0]  ;;  %v13351_v57 = vld [vmem:[%s17982_s2 + $0x7d0] sm:$0xf] }
 0x53d   :  { %8082 = vmatpush.bf16.msra.mxu2 %v12732_v58  ;;  %8057 = vmatpush.bf16.msra.mxu0 %v12392_v13  ;;  %v5976_v58 = vmax.f32 %v15350_v17, 0.0  ;;  %v5723_v56 = vadd.f32 %v15517_v39, %v5710_v46  ;;  %v14955_v17 = vld [vmem:[%s17982_s2 + $0x740] sm:$0xf0]  ;;  %v15670_v39 = vpack.c.bf16 %v5975_v60, %v5975_v60  ;;  %v13212_v46 = vor.u32 %v14940_v41, %v13211_v44  ;;  %v13011_v2 = vld [vmem:[%s17982_s2 + $0x528] sm:$0xf] }
 0x53e   :  { %v13272_v14 = vor.u32 %v14955_v17, %v13271_v0  ;;  %v14890_v34 = vld [vmem:[%s17982_s2 + $0x538] sm:$0xf0]  ;;  %v13171_v0 = vld [vmem:[%s17982_s2 + $0x668] sm:$0xf]  ;;  %v13311_v51 = vld [vmem:[%s17982_s2 + $0x780] sm:$0xf] }
 0x53f   :  { %8095 = vmatpush.bf16.msra.mxu3 %v12892_v45  ;;  %8070 = vmatpush.bf16.msra.mxu1 %v12552_v24  ;;  %v13452_v45 = vor.u32 %v15000_v53, %v13451_v55  ;;  %v15672_v13 = vpack.c.bf16 %v5976_v58, %v5976_v58  ;;  %v13432_v24 = vor.u32 %v14995_v6, %v13431_v4  ;;  %v13191_v55 = vld [vmem:[%s17982_s2 + $0x690] sm:$0xf]  ;;  %v5800_v53 = vpop.f32.mrf.mxu2  ;;  %v14930_v17 = vld [vmem:[%s17982_s2 + $0x678] sm:$0xf0]  ;;  %v13331_v4 = vld [vmem:[%s17982_s2 + $0x7a8] sm:$0xf] }
 0x540   :  { %v5736_v25 = vadd.f32 %v15528_v52, %v5723_v56  ;;  %v14970_v6 = vld [vmem:[%s17982_s2 + $0x7b8] sm:$0xf0]  ;;  %v15040_v29 = vld [vmem:[%s17982_s2 + $0x9e8] sm:$0xf0]  ;;  %v12493_v30 = vld [vmem:[%s17982_s2 + $0x12c] sm:$0xf0] }
 0x541   :  { %8083 = vmatpush.bf16.msra.mxu2 %v12712_v16  ;;  %8058 = vmatpush.bf16.msra.mxu0 %v12372_v22  ;;  %v13091_v16 = vld [vmem:[%s17982_s2 + $0x5c8] sm:$0xf]  ;;  %v13332_v20 = vor.u32 %v14970_v6, %v13331_v4  ;;  %v14798_v23 = vld [vmem:[%s17982_s2 + $0x25c] sm:$0xf]  ;;  %v13551_v4 = vld [vmem:[%s17982_s2 + $0x960] sm:$0xf] }
 0x542   :  { %v13092_v52 = vor.u32 %v14910_v19, %v13091_v16  ;;  %v5749_v22 = vadd.f32 %v15555_v1, %v5736_v25  ;;  %v13151_v16 = vld [vmem:[%s17982_s2 + $0x640] sm:$0xf]  ;;  %v13172_v19 = vor.u32 %v14930_v17, %v13171_v0  ;;  %v14925_v25 = vld [vmem:[%s17982_s2 + $0x650] sm:$0xf0]  ;;  %v14743_v17 = vld [vmem:[%s17982_s2 + $0xa4] sm:$0xf] }
 0x543   :  { %8096 = vmatpush.bf16.msra.mxu3 %v12872_v27  ;;  %8071 = vmatpush.bf16.msra.mxu1 %v12532_v36  ;;  %v13411_v27 = vld [vmem:[%s17982_s2 + $0x848] sm:$0xf]  ;;  %v14985_v36 = vld [vmem:[%s17982_s2 + $0x830] sm:$0xf0] }
 0x544   :  { %v13412_v35 = vor.u32 %v14990_v18, %v13411_v27  ;;  %v13392_v1 = vor.u32 %v14985_v36, %v13391_v26  ;;  %v5762_v38 = vadd.f32 %v15566_v8, %v5749_v22  ;;  %v13031_v8 = vld [vmem:[%s17982_s2 + $0x550] sm:$0xf]  ;;  %v14965_v27 = vld [vmem:[%s17982_s2 + $0x790] sm:$0xf0] }
 0x545   :  { %8084 = vmatpush.bf16.msra.mxu2 %v12692_v33  ;;  %8059 = vmatpush.bf16.msra.mxu0 %v12352_v48  ;;  %v5774_v33 = vpop.f32.mrf.mxu0  ;;  %v13372_v48 = vor.u32 %v14980_v49, %v13371_v47  ;;  %v12653_v22 = vld [vmem:[%s17982_s2 + $0x26c] sm:$0xf0]  ;;  %v12473_v47 = vld [vmem:[%s17982_s2 + $0x104] sm:$0xf0]  ;;  %v15025_v6 = vld [vmem:[%s17982_s2 + $0x970] sm:$0xf0] }
 0x546   :  { %v5775_v50 = vadd.f32 %v5774_v33, %v5762_v38  ;;  %v14838_v33 = vld [vmem:[%s17982_s2 + $0x39c] sm:$0xf]  ;;  %v12656_v41 = vor.u32 %v14798_v23, %v12653_v22  ;;  %v12633_v49 = vld [vmem:[%s17982_s2 + $0x244] sm:$0xf0]  ;;  %v12573_v22 = vld [vmem:[%s17982_s2 + $0x1cc] sm:$0xf0] }
 0x547   :  { %8097 = vmatpush.bf16.msra.mxu3 %v12852_v43  ;;  %8072 = vmatpush.bf16.msra.mxu1 %v12512_v3  ;;  %v14900_v43 = vld [vmem:[%s17982_s2 + $0x588] sm:$0xf0]  ;;  %v14975_v3 = vld [vmem:[%s17982_s2 + $0x7e0] sm:$0xf0]  ;;  %v14778_v23 = vld [vmem:[%s17982_s2 + $0x1bc] sm:$0xf] }
 0x548   :  { %8060 = vmatmul.bf16.vlgmr.msra.gmra.mxu0 %v15666_v9  ;;  %v13052_v32 = vor.u32 %v14900_v43, %v13051_v40  ;;  %v5788_v58 = vadd.f32 %v5787_v63, %v5775_v50  ;;  %v5977_v63 = vmax.f32 %v15376_v15, 0.0  ;;  %v13312_v40 = vor.u32 %v14965_v27, %v13311_v51  ;;  %v14753_v43 = vld [vmem:[%s17982_s2 + $0xf4] sm:$0xf]  ;;  %v13591_v50 = vld [vmem:[%s17982_s2 + $0x9b0] sm:$0xf] }
 0x549   :  { %8085 = vmatpush.bf16.msra.mxu2 %v12672_v59  ;;  %8104 = vmatpush.bf16.msrb.mxu0 %v13132_v7  ;;  %v5813_v59 = vpop.f32.mrf.mxu3  ;;  %v5789_v7 = vpop.f32.mrf.mxu1  ;;  %v14793_v15 = vld [vmem:[%s17982_s2 + $0x234] sm:$0xf] }
 0x54a   :  { %8073 = vmatmul.bf16.vlgmr.msra.gmra.mxu1 %v15668_v10  ;;  %v5801_v56 = vadd.f32 %v5800_v53, %v5788_v58  ;;  %v13571_v7 = vld [vmem:[%s17982_s2 + $0x988] sm:$0xf] }
 0x54b   :  { %8098 = vmatpush.bf16.msra.mxu3 %v12832_v62  ;;  %8117 = vmatpush.bf16.msrb.mxu1 %v13292_v5  ;;  %v13032_v62 = vor.u32 %v14895_v54, %v13031_v8  ;;  %v13192_v5 = vor.u32 %v14935_v61, %v13191_v55  ;;  %v15839_v8 = vpack.c.bf16 %v5977_v63, %v5977_v63 }
 0x54c   :  { %8086 = vmatmul.bf16.vlgmr.msra.gmra.mxu2 %v15670_v39  ;;  %v5814_v18 = vadd.f32 %v5813_v59, %v5801_v56  ;;  %v12476_v61 = vor.u32 %v14753_v43, %v12473_v47  ;;  %v12453_v59 = vld [vmem:[%s17982_s2 + $0xdc] sm:$0xf0]  ;;  %v12576_v63 = vor.u32 %v14778_v23, %v12573_v22 }
 0x54d   :  { %8130 = vmatpush.bf16.msrb.mxu2 %v13452_v45  ;;  %8105 = vmatpush.bf16.msrb.mxu0 %v13112_v12  ;;  %v5776_v60 = vpop.f32.mrf.mxu0  ;;  %v13352_v45 = vor.u32 %v14975_v3, %v13351_v57  ;;  %v13012_v12 = vor.u32 %v14890_v34, %v13011_v2  ;;  %v12636_v57 = vor.u32 %v14793_v15, %v12633_v49  ;;  %v14748_v3 = vld [vmem:[%s17982_s2 + $0xcc] sm:$0xf]  ;;  %v12773_v2 = vld [vmem:[%s17982_s2 + $0x35c] sm:$0xf0]  ;;  %v14813_v15 = vld [vmem:[%s17982_s2 + $0x2d4] sm:$0xf] }
 0x54e   :  { %8099 = vmatmul.bf16.vlgmr.msra.gmra.mxu3 %v15672_v13  ;;  %v5979_v44 = vmax.f32 %v5814_v18, 0.0  ;;  %v14788_v60 = vld [vmem:[%s17982_s2 + $0x20c] sm:$0xf]  ;;  %v12456_v0 = vor.u32 %v14748_v3, %v12453_v59  ;;  %v14738_v18 = vld [vmem:[%s17982_s2 + $0x7c] sm:$0xf] }
 0x54f   :  { %8118 = vmatpush.bf16.msrb.mxu1 %v13272_v14  ;;  %v12991_v14 = vld [vmem:[%s17982_s2 + $0x500] sm:$0xf] }
 0x550   :  { %v15843_v53 = vpack.c.bf16 %v5979_v44, %v5979_v44  ;;  %v12393_v44 = vld [vmem:[%s17982_s2 + $0x64] sm:$0xf0]  ;;  %v12373_v59 = vld [vmem:[%s17982_s2 + $0x3c] sm:$0xf0] }
 0x551   :  { %8131 = vmatpush.bf16.msrb.mxu2 %v13432_v24  ;;  %8106 = vmatpush.bf16.msrb.mxu0 %v13092_v52  ;;  %v14885_v24 = vld [vmem:[%s17982_s2 + $0x510] sm:$0xf0]  ;;  %v14758_v52 = vld [vmem:[%s17982_s2 + $0x11c] sm:$0xf]  ;;  %v5815_v31 = vpop.f32.mrf.mxu3 }
 0x552   :  { %v12992_v36 = vor.u32 %v14885_v24, %v12991_v14  ;;  %v12496_v38 = vor.u32 %v14758_v52, %v12493_v30  ;;  %v12433_v14 = vld [vmem:[%s17982_s2 + $0xb4] sm:$0xf0]  ;;  %v14783_v24 = vld [vmem:[%s17982_s2 + $0x1e4] sm:$0xf]  ;;  %v12413_v30 = vld [vmem:[%s17982_s2 + $0x8c] sm:$0xf0]  ;;  %v15916_v31 = vpop.f32.mrf.mxu1 }
 0x553   :  { %8119 = vmatpush.bf16.msrb.mxu1 %v13252_v28  ;;  %v5802_v28 = vpop.f32.mrf.mxu2  ;;  %v12436_v51 = vor.u32 %v14743_v17, %v12433_v14  ;;  %v14763_v17 = vld [vmem:[%s17982_s2 + $0x144] sm:$0xf]  ;;  %v12513_v14 = vld [vmem:[%s17982_s2 + $0x154] sm:$0xf0] }
 0x554   :  { %v13531_v28 = vld [vmem:[%s17982_s2 + $0x938] sm:$0xf]  ;;  %v12516_v23 = vor.u32 %v14763_v17, %v12513_v14 }
 0x555   :  { %8132 = vmatpush.bf16.msrb.mxu2 %v13412_v35  ;;  %8107 = vmatpush.bf16.msrb.mxu0 %v13072_v37  ;;  %v13611_v35 = vld [vmem:[%s17982_s2 + $0x9d8] sm:$0xf]  ;;  %v12813_v37 = vld [vmem:[%s17982_s2 + $0x3ac] sm:$0xf0]  ;;  %v15899_v52 = vpop.f32.mrf.mxu0 }
 0x556   :  { %v13612_v26 = vor.u32 %v15040_v29, %v13611_v35  ;;  %v15020_v35 = vld [vmem:[%s17982_s2 + $0x948] sm:$0xf0]  ;;  %v13233_v17 = vld [vmem:[%s17982_s2 + $0x6f4] sm:$0xf0] }
 0x557   :  { %8120 = vmatpush.bf16.msrb.mxu1 %v13232_v42  ;;  %v5978_v42 = vmax.f32 %v15397_v21, 0.0  ;;  %v12816_v21 = vor.u32 %v14838_v33, %v12813_v37  ;;  %v13532_v33 = vor.u32 %v15020_v35, %v13531_v28  ;;  %v12416_v37 = vor.u32 %v14738_v18, %v12413_v30  ;;  %v13293_v18 = vld [vmem:[%s17982_s2 + $0x76c] sm:$0xf0]  ;;  %v14998_v28 = vld [vmem:[%s17982_s2 + $0x89c] sm:$0xf] }
 0x558   :  { %8143 = vmatpush.bf16.msrb.mxu3 %v13612_v26  ;;  %v14818_v26 = vld [vmem:[%s17982_s2 + $0x2fc] sm:$0xf]  ;;  %v13453_v35 = vld [vmem:[%s17982_s2 + $0x8ac] sm:$0xf0] }
 0x559   :  { %8133 = vmatpush.bf16.msrb.mxu2 %v13392_v1  ;;  %8108 = vmatpush.bf16.msrb.mxu0 %v13052_v32  ;;  %v13152_v1 = vor.u32 %v14925_v25, %v13151_v16  ;;  %v15035_v32 = vld [vmem:[%s17982_s2 + $0x9c0] sm:$0xf0]  ;;  %v15841_v54 = vpack.c.bf16 %v5978_v42, %v5978_v42  ;;  %v12593_v16 = vld [vmem:[%s17982_s2 + $0x1f4] sm:$0xf0]  ;;  %v13552_v25 = vor.u32 %v15025_v6, %v13551_v4  ;;  %v14733_v42 = vld [vmem:[%s17982_s2 + $0x54] sm:$0xf]  ;;  %v15950_v49 = vpop.f32.mrf.mxu3 }
 0x55a   :  { %v13592_v55 = vor.u32 %v15035_v32, %v13591_v50  ;;  %v12596_v27 = vor.u32 %v14783_v24, %v12593_v16  ;;  %v12396_v32 = vor.u32 %v14733_v42, %v12393_v44  ;;  %v13471_v4 = vld [vmem:[%s17982_s2 + $0x8c0] sm:$0xf]  ;;  %v15005_v6 = vld [vmem:[%s17982_s2 + $0x8d0] sm:$0xf0]  ;;  %v14803_v24 = vld [vmem:[%s17982_s2 + $0x284] sm:$0xf] }
 0x55b   :  { %8121 = vmatpush.bf16.msrb.mxu1 %v13212_v46  ;;  %v14833_v46 = vld [vmem:[%s17982_s2 + $0x374] sm:$0xf]  ;;  %v15942_v47 = vpop.f32.mrf.mxu2  ;;  %v12673_v16 = vld [vmem:[%s17982_s2 + $0x294] sm:$0xf0] }
 0x55c   :  { %8144 = vmatpush.bf16.msrb.mxu3 %v13592_v55  ;;  %v12676_v22 = vor.u32 %v14803_v24, %v12673_v16  ;;  %v14913_v42 = vld [vmem:[%s17982_s2 + $0x5f4] sm:$0xf]  ;;  %v14863_v24 = vld [vmem:[%s17982_s2 + $0x464] sm:$0xf]  ;;  %v12913_v16 = vld [vmem:[%s17982_s2 + $0x474] sm:$0xf0] }
 0x55d   :  { %8134 = vmatpush.bf16.msrb.mxu2 %v13372_v48  ;;  %8109 = vmatpush.bf16.msrb.mxu0 %v13032_v62  ;;  %v12793_v48 = vld [vmem:[%s17982_s2 + $0x384] sm:$0xf0]  ;;  %v12613_v62 = vld [vmem:[%s17982_s2 + $0x21c] sm:$0xf0]  ;;  %v5828_v55 = vpop.f32.mrf.mxu0  ;;  %v14993_v44 = vld [vmem:[%s17982_s2 + $0x874] sm:$0xf] }
 0x55e   :  { %v12796_v58 = vor.u32 %v14833_v46, %v12793_v48  ;;  %v12616_v56 = vor.u32 %v14788_v60, %v12613_v62  ;;  %v14728_v48 = vld [vmem:[%s17982_s2 + $0x2c] sm:$0xf]  ;;  %v5841_v62 = vpop.f32.mrf.mxu1 }
 0x55f   :  { %8122 = vmatpush.bf16.msrb.mxu1 %v13192_v5  ;;  %v15030_v5 = vld [vmem:[%s17982_s2 + $0x998] sm:$0xf0]  ;;  %v14768_v60 = vld [vmem:[%s17982_s2 + $0x16c] sm:$0xf] }
 0x560   :  { %v13572_v34 = vor.u32 %v15030_v5, %v13571_v7  ;;  %v14808_v7 = vld [vmem:[%s17982_s2 + $0x2ac] sm:$0xf]  ;;  %v12693_v5 = vld [vmem:[%s17982_s2 + $0x2bc] sm:$0xf0] }
 0x561   :  { %8135 = vmatpush.bf16.msrb.mxu2 %v13352_v45  ;;  %8110 = vmatpush.bf16.msrb.mxu0 %v13012_v12  ;;  %v14828_v45 = vld [vmem:[%s17982_s2 + $0x34c] sm:$0xf] }
 0x562   :  { %v12776_v12 = vor.u32 %v14828_v45, %v12773_v2  ;;  %8145 = vmatpush.bf16.msrb.mxu3 %v13572_v34  ;;  %v14723_v45 = vld [vmem:[%s17982_s2 + $0x4] sm:$0xf]  ;;  %v12353_v2 = vld [vmem:[%s17982_s2 + $0x14] sm:$0xf0]  ;;  %v14908_v55 = vld [vmem:[%s17982_s2 + $0x5cc] sm:$0xf] }
 0x563   :  { %8123 = vmatpush.bf16.msrb.mxu1 %v13172_v19  ;;  %v14823_v19 = vld [vmem:[%s17982_s2 + $0x324] sm:$0xf]  ;;  %v12356_v30 = vor.u32 %v14723_v45, %v12353_v2 }
 0x565   :  { %8136 = vmatpush.bf16.msrb.mxu2 %v13332_v20  ;;  %8111 = vmatpush.bf16.msrb.mxu0 %v12992_v36  ;;  %v12753_v20 = vld [vmem:[%s17982_s2 + $0x334] sm:$0xf0]  ;;  %v12733_v36 = vld [vmem:[%s17982_s2 + $0x30c] sm:$0xf0] }
 0x566   :  { %v12756_v29 = vor.u32 %v14823_v19, %v12753_v20  ;;  %8146 = vmatpush.bf16.msrb.mxu3 %v13552_v25  ;;  %v12736_v43 = vor.u32 %v14818_v26, %v12733_v36  ;;  %v5854_v19 = vpop.f32.mrf.mxu2  ;;  %v14918_v20 = vld [vmem:[%s17982_s2 + $0x61c] sm:$0xf]  ;;  %v13133_v25 = vld [vmem:[%s17982_s2 + $0x62c] sm:$0xf0] }
 0x567   :  { %8124 = vmatpush.bf16.msrb.mxu1 %v13152_v1  ;;  %v13511_v1 = vld [vmem:[%s17982_s2 + $0x910] sm:$0xf]  ;;  %v13136_v26 = vor.u32 %v14918_v20, %v13133_v25  ;;  %v14878_v36 = vld [vmem:[%s17982_s2 + $0x4dc] sm:$0xf] }
 0x568   :  { %8112 = vmatmul.bf16.vlgmr.msrb.gmra.mxu0 %v15839_v8  ;;  %v14898_v25 = vld [vmem:[%s17982_s2 + $0x57c] sm:$0xf] }
 0x569   :  { %8137 = vmatpush.bf16.msrb.mxu2 %v13312_v40  ;;  %8156 = vmatpush.bf16.msra.mxu0 %v12496_v38  ;;  %v15015_v40 = vld [vmem:[%s17982_s2 + $0x920] sm:$0xf0]  ;;  %v14773_v38 = vld [vmem:[%s17982_s2 + $0x194] sm:$0xf] }
 0x56a   :  { %8125 = vmatmul.bf16.vlgmr.msrb.gmra.mxu1 %v15841_v54  ;;  %8147 = vmatpush.bf16.msrb.mxu3 %v13532_v33  ;;  %v13512_v50 = vor.u32 %v15015_v40, %v13511_v1  ;;  %v12973_v33 = vld [vmem:[%s17982_s2 + $0x4ec] sm:$0xf0]  ;;  %v13113_v1 = vld [vmem:[%s17982_s2 + $0x604] sm:$0xf0]  ;;  %v14953_v40 = vld [vmem:[%s17982_s2 + $0x734] sm:$0xf] }
 0x56b   :  { %8169 = vmatpush.bf16.msra.mxu1 %v12656_v41  ;;  %v12553_v41 = vld [vmem:[%s17982_s2 + $0x1a4] sm:$0xf0] }
 0x56c   :  { %8138 = vmatmul.bf16.vlgmr.msrb.gmra.mxu2 %v15843_v53  ;;  %v12556_v46 = vor.u32 %v14773_v38, %v12553_v41  ;;  %v13433_v38 = vld [vmem:[%s17982_s2 + $0x884] sm:$0xf0]  ;;  %v12976_v41 = vor.u32 %v14878_v36, %v12973_v33  ;;  %v12893_v36 = vld [vmem:[%s17982_s2 + $0x44c] sm:$0xf0] }
 0x56d   :  { %8182 = vmatpush.bf16.msra.mxu2 %v12816_v21  ;;  %8157 = vmatpush.bf16.msra.mxu0 %v12476_v61  ;;  %v12713_v21 = vld [vmem:[%s17982_s2 + $0x2e4] sm:$0xf0] }
 0x56e   :  { %v13491_v61 = vld [vmem:[%s17982_s2 + $0x8e8] sm:$0xf]  ;;  %v12716_v3 = vor.u32 %v14813_v15, %v12713_v21  ;;  %8148 = vmatpush.bf16.msrb.mxu3 %v13512_v50  ;;  %v868_v15 = vperm.slane %v15462_v11, 4  ;;  %v13116_v21 = vor.u32 %v14913_v42, %v13113_v1  ;;  %v14873_v50 = vld [vmem:[%s17982_s2 + $0x4b4] sm:$0xf] }
 0x56f   :  { %8170 = vmatpush.bf16.msra.mxu1 %v12636_v57  ;;  %v15010_v57 = vld [vmem:[%s17982_s2 + $0x8f8] sm:$0xf0]  ;;  %v13093_v11 = vld [vmem:[%s17982_s2 + $0x5dc] sm:$0xf0]  ;;  %v13033_v42 = vld [vmem:[%s17982_s2 + $0x564] sm:$0xf0] }
 0x570   :  { %v13492_v34 = vor.u32 %v15010_v57, %v13491_v61  ;;  %v14948_v61 = vld [vmem:[%s17982_s2 + $0x70c] sm:$0xf]  ;;  %v13253_v57 = vld [vmem:[%s17982_s2 + $0x71c] sm:$0xf0]  ;;  %v13096_v62 = vor.u32 %v14908_v55, %v13093_v11  ;;  %v14933_v1 = vld [vmem:[%s17982_s2 + $0x694] sm:$0xf] }
 0x571   :  { %8183 = vmatpush.bf16.msra.mxu2 %v12796_v58  ;;  %8158 = vmatpush.bf16.msra.mxu0 %v12456_v0  ;;  %v12533_v58 = vld [vmem:[%s17982_s2 + $0x17c] sm:$0xf0]  ;;  %v12376_v0 = vor.u32 %v14728_v48, %v12373_v59  ;;  %v13436_v48 = vor.u32 %v14993_v44, %v13433_v38  ;;  %v13256_v45 = vor.u32 %v14948_v61, %v13253_v57  ;;  %v14973_v44 = vld [vmem:[%s17982_s2 + $0x7d4] sm:$0xf]  ;;  %v13353_v38 = vld [vmem:[%s17982_s2 + $0x7e4] sm:$0xf0] }
 0x572   :  { %8149 = vmatpush.bf16.msrb.mxu3 %v13492_v34  ;;  %v13413_v59 = vld [vmem:[%s17982_s2 + $0x85c] sm:$0xf0]  ;;  %v14903_v34 = vld [vmem:[%s17982_s2 + $0x5a4] sm:$0xf]  ;;  %v14888_v55 = vld [vmem:[%s17982_s2 + $0x52c] sm:$0xf] }
 0x573   :  { %8171 = vmatpush.bf16.msra.mxu1 %v12616_v56  ;;  %v12536_v56 = vor.u32 %v14768_v60, %v12533_v58  ;;  %v884_v58 = vperm.slane %v868_v15, 0  ;;  %v13013_v11 = vld [vmem:[%s17982_s2 + $0x53c] sm:$0xf0]  ;;  %v14928_v61 = vld [vmem:[%s17982_s2 + $0x66c] sm:$0xf] }
 0x575   :  { %8184 = vmatpush.bf16.msra.mxu2 %v12776_v12  ;;  %8159 = vmatpush.bf16.msra.mxu0 %v12436_v51  ;;  %v12696_v12 = vor.u32 %v14808_v7, %v12693_v5  ;;  %v14958_v51 = vld [vmem:[%s17982_s2 + $0x75c] sm:$0xf]  ;;  %v14868_v7 = vld [vmem:[%s17982_s2 + $0x48c] sm:$0xf]  ;;  %v12933_v5 = vld [vmem:[%s17982_s2 + $0x49c] sm:$0xf0] }
 0x577   :  { %8172 = vmatpush.bf16.msra.mxu1 %v12596_v27  ;;  %v5867_v27 = vpop.f32.mrf.mxu3 }
 0x578   :  { %v14938_v27 = vld [vmem:[%s17982_s2 + $0x6bc] sm:$0xf] }
 0x579   :  { %8185 = vmatpush.bf16.msra.mxu2 %v12756_v29  ;;  %8160 = vmatpush.bf16.msra.mxu0 %v12416_v37  ;;  %v13472_v29 = vor.u32 %v15005_v6, %v13471_v4  ;;  %v13296_v37 = vor.u32 %v14958_v51, %v13293_v18  ;;  %v14983_v4 = vld [vmem:[%s17982_s2 + $0x824] sm:$0xf]  ;;  %v13393_v6 = vld [vmem:[%s17982_s2 + $0x834] sm:$0xf0]  ;;  %v13053_v51 = vld [vmem:[%s17982_s2 + $0x58c] sm:$0xf0]  ;;  %v16109_v18 = vpop.f32.mrf.mxu0 }
 0x57a   :  { %v13396_v20 = vor.u32 %v14983_v4, %v13393_v6  ;;  %v13153_v4 = vld [vmem:[%s17982_s2 + $0x654] sm:$0xf0] }
 0x57b   :  { %8173 = vmatpush.bf16.msra.mxu1 %v12576_v63  ;;  %v13456_v63 = vor.u32 %v14998_v28, %v13453_v35  ;;  %8150 = vmatpush.bf16.msrb.mxu3 %v13472_v29  ;;  %v5827_v28 = vadd.f32 %v15899_v52, %v884_v58  ;;  %v13213_v35 = vld [vmem:[%s17982_s2 + $0x6cc] sm:$0xf0]  ;;  %v14978_v29 = vld [vmem:[%s17982_s2 + $0x7fc] sm:$0xf]  ;;  %v13333_v58 = vld [vmem:[%s17982_s2 + $0x7bc] sm:$0xf0] }
 0x57c   :  { %v14858_v52 = vld [vmem:[%s17982_s2 + $0x43c] sm:$0xf]  ;;  %v13216_v33 = vor.u32 %v14938_v27, %v13213_v35  ;;  %v14841_v35 = vld [vmem:[%s17982_s2 + $0x3b0] sm:$0xf0] }
 0x57d   :  { %8186 = vmatpush.bf16.msra.mxu2 %v12736_v43  ;;  %8161 = vmatpush.bf16.msra.mxu0 %v12396_v32  ;;  %v13273_v43 = vld [vmem:[%s17982_s2 + $0x744] sm:$0xf0] }
 0x57e   :  { %v12953_v32 = vld [vmem:[%s17982_s2 + $0x4c4] sm:$0xf0] }
 0x57f   :  { %8174 = vmatpush.bf16.msra.mxu1 %v12556_v46  ;;  %v13276_v46 = vor.u32 %v14953_v40, %v13273_v43  ;;  %8195 = vmatpush.bf16.msra.mxu3 %v12976_v41  ;;  %v12956_v60 = vor.u32 %v14873_v50, %v12953_v32  ;;  %v5840_v40 = vadd.f32 %v15916_v31, %v5827_v28  ;;  %v13193_v43 = vld [vmem:[%s17982_s2 + $0x6a4] sm:$0xf0]  ;;  %v16148_v41 = vpop.f32.mrf.mxu2  ;;  %v16150_v15 = vpop.f32.mrf.mxu3  ;;  %v14853_v50 = vld [vmem:[%s17982_s2 + $0x414] sm:$0xf]  ;;  %v12819_v28 = vld [vmem:[%s17982_s2 + $0x3a0] sm:$0xf] }
 0x580   :  { %v12873_v32 = vld [vmem:[%s17982_s2 + $0x424] sm:$0xf0] }
 0x581   :  { %8187 = vmatpush.bf16.msra.mxu2 %v12716_v3  ;;  %8162 = vmatpush.bf16.msra.mxu0 %v12376_v0  ;;  %v14988_v3 = vld [vmem:[%s17982_s2 + $0x84c] sm:$0xf]  ;;  %v13073_v0 = vld [vmem:[%s17982_s2 + $0x5b4] sm:$0xf0]  ;;  %v5880_v57 = vpop.f32.mrf.mxu0 }
 0x582   :  { %v13416_v2 = vor.u32 %v14988_v3, %v13413_v59  ;;  %v13076_v14 = vor.u32 %v14903_v34, %v13073_v0  ;;  %v5853_v3 = vadd.f32 %v15942_v47, %v5840_v40  ;;  %v13173_v59 = vld [vmem:[%s17982_s2 + $0x67c] sm:$0xf0]  ;;  %v14883_v47 = vld [vmem:[%s17982_s2 + $0x504] sm:$0xf]  ;;  %v12799_v40 = vld [vmem:[%s17982_s2 + $0x378] sm:$0xf] }
 0x583   :  { %8175 = vmatpush.bf16.msra.mxu1 %v12536_v56  ;;  %v14943_v56 = vld [vmem:[%s17982_s2 + $0x6e4] sm:$0xf]  ;;  %8196 = vmatpush.bf16.msra.mxu3 %v12956_v60  ;;  %v14968_v60 = vld [vmem:[%s17982_s2 + $0x7ac] sm:$0xf]  ;;  %v13176_v34 = vor.u32 %v14928_v61, %v13173_v59  ;;  %v12439_v59 = vld [vmem:[%s17982_s2 + $0xa8] sm:$0xf] }
 0x584   :  { %v13236_v19 = vor.u32 %v14943_v56, %v13233_v17  ;;  %v13336_v0 = vor.u32 %v14968_v60, %v13333_v58  ;;  %v12993_v56 = vld [vmem:[%s17982_s2 + $0x514] sm:$0xf0]  ;;  %v14923_v17 = vld [vmem:[%s17982_s2 + $0x644] sm:$0xf]  ;;  %v5866_v6 = vadd.f32 %v15950_v49, %v5853_v3  ;;  %v12659_v49 = vld [vmem:[%s17982_s2 + $0x260] sm:$0xf] }
 0x585   :  { %8188 = vmatpush.bf16.msra.mxu2 %v12696_v12  ;;  %8163 = vmatpush.bf16.msra.mxu0 %v12356_v30  ;;  %v12936_v12 = vor.u32 %v14868_v7, %v12933_v5  ;;  %v13373_v30 = vld [vmem:[%s17982_s2 + $0x80c] sm:$0xf0]  ;;  %v12876_v7 = vor.u32 %v14853_v50, %v12873_v32  ;;  %v13016_v5 = vor.u32 %v14888_v55, %v13013_v11  ;;  %v14831_v11 = vld [vmem:[%s17982_s2 + $0x360] sm:$0xf0]  ;;  %v14746_v58 = vld [vmem:[%s17982_s2 + $0xb8] sm:$0xf0] }
 0x586   :  { %v12996_v27 = vor.u32 %v14883_v47, %v12993_v56  ;;  %v12459_v50 = vld [vmem:[%s17982_s2 + $0xd0] sm:$0xf] }
 0x587   :  { %8176 = vmatpush.bf16.msra.mxu1 %v12516_v23  ;;  %v16121_v23 = vpop.f32.mrf.mxu1  ;;  %8197 = vmatpush.bf16.msra.mxu3 %v12936_v12  ;;  %v14963_v12 = vld [vmem:[%s17982_s2 + $0x784] sm:$0xf]  ;;  %v12779_v55 = vld [vmem:[%s17982_s2 + $0x350] sm:$0xf] }
 0x588   :  { %8164 = vmatmul.bf16.vlgmr.msra.gmra.mxu0 %v15666_v9  ;;  %v12780_v60 = vor.u32 %v14831_v11, %v12779_v55  ;;  %v12519_v55 = vld [vmem:[%s17982_s2 + $0x148] sm:$0xf] }
 0x589   :  { %8189 = vmatpush.bf16.msra.mxu2 %v12676_v22  ;;  %8208 = vmatpush.bf16.msrb.mxu0 %v13136_v26  ;;  %v12916_v22 = vor.u32 %v14863_v24, %v12913_v16  ;;  %v13056_v26 = vor.u32 %v14898_v25, %v13053_v51  ;;  %v12499_v24 = vld [vmem:[%s17982_s2 + $0x120] sm:$0xf]  ;;  %v5906_v16 = vpop.f32.mrf.mxu2  ;;  %v5919_v25 = vpop.f32.mrf.mxu3 }
 0x58a   :  { %8177 = vmatmul.bf16.vlgmr.msra.gmra.mxu1 %v15668_v10  ;;  %v14736_v25 = vld [vmem:[%s17982_s2 + $0x68] sm:$0xf0] }
 0x58b   :  { %8221 = vmatpush.bf16.msrb.mxu1 %v13296_v37  ;;  %v13376_v37 = vor.u32 %v14978_v29, %v13373_v30  ;;  %8198 = vmatpush.bf16.msra.mxu3 %v12916_v22  ;;  %v13156_v29 = vor.u32 %v14923_v17, %v13153_v4  ;;  %v5879_v22 = vadd.f32 %v16109_v18, %v5866_v6  ;;  %v12639_v18 = vld [vmem:[%s17982_s2 + $0x238] sm:$0xf]  ;;  %v14741_v4 = vld [vmem:[%s17982_s2 + $0x90] sm:$0xf0] }
 0x58c   :  { %8190 = vmatmul.bf16.vlgmr.msra.gmra.mxu2 %v15670_v39  ;;  %v14781_v6 = vld [vmem:[%s17982_s2 + $0x1d0] sm:$0xf0] }
 0x58d   :  { %8234 = vmatpush.bf16.msrb.mxu2 %v13456_v63  ;;  %8209 = vmatpush.bf16.msrb.mxu0 %v13116_v21  ;;  %v14893_v63 = vld [vmem:[%s17982_s2 + $0x554] sm:$0xf]  ;;  %v12896_v21 = vor.u32 %v14858_v52, %v12893_v36  ;;  %v12479_v36 = vld [vmem:[%s17982_s2 + $0xf8] sm:$0xf] }
 0x58e   :  { %v13036_v31 = vor.u32 %v14893_v63, %v13033_v42  ;;  %v12820_v63 = vor.u32 %v14841_v35, %v12819_v28  ;;  %v14756_v42 = vld [vmem:[%s17982_s2 + $0x108] sm:$0xf0]  ;;  %v12719_v35 = vld [vmem:[%s17982_s2 + $0x2d8] sm:$0xf] }
 0x58f   :  { %8222 = vmatpush.bf16.msrb.mxu1 %v13276_v46  ;;  %v13196_v46 = vor.u32 %v14933_v1, %v13193_v43  ;;  %8199 = vmatpush.bf16.msra.mxu3 %v12896_v21  ;;  %v14796_v1 = vld [vmem:[%s17982_s2 + $0x248] sm:$0xf0]  ;;  %v12480_v21 = vor.u32 %v14756_v42, %v12479_v36 }
 0x590   :  { %v14836_v43 = vld [vmem:[%s17982_s2 + $0x388] sm:$0xf0] }
 0x591   :  { %8235 = vmatpush.bf16.msrb.mxu2 %v13436_v48  ;;  %8210 = vmatpush.bf16.msrb.mxu0 %v13096_v62  ;;  %v13356_v48 = vor.u32 %v14973_v44, %v13353_v38  ;;  %v5893_v62 = vpop.f32.mrf.mxu1  ;;  %v5892_v38 = vadd.f32 %v16121_v23, %v5879_v22  ;;  %v12800_v32 = vor.u32 %v14836_v43, %v12799_v40  ;;  %v12619_v23 = vld [vmem:[%s17982_s2 + $0x210] sm:$0xf]  ;;  %v14771_v40 = vld [vmem:[%s17982_s2 + $0x180] sm:$0xf0] }
 0x592   :  { %v12599_v62 = vld [vmem:[%s17982_s2 + $0x1e8] sm:$0xf] }
 0x593   :  { %8223 = vmatpush.bf16.msrb.mxu1 %v13256_v45  ;;  %v14848_v45 = vld [vmem:[%s17982_s2 + $0x3ec] sm:$0xf]  ;;  %8200 = vmatpush.bf16.msra.mxu3 %v12876_v7  ;;  %v5905_v61 = vadd.f32 %v16148_v41, %v5892_v38  ;;  %v14786_v41 = vld [vmem:[%s17982_s2 + $0x1f8] sm:$0xf0]  ;;  %v12759_v7 = vld [vmem:[%s17982_s2 + $0x328] sm:$0xf] }
 0x594   :  { %v14811_v38 = vld [vmem:[%s17982_s2 + $0x2c0] sm:$0xf0] }
 0x595   :  { %8236 = vmatpush.bf16.msrb.mxu2 %v13416_v2  ;;  %8211 = vmatpush.bf16.msrb.mxu0 %v13076_v14  ;;  %v12853_v2 = vld [vmem:[%s17982_s2 + $0x3fc] sm:$0xf0]  ;;  %v13313_v14 = vld [vmem:[%s17982_s2 + $0x794] sm:$0xf0]  ;;  %v5918_v47 = vadd.f32 %v16150_v15, %v5905_v61  ;;  %v14766_v61 = vld [vmem:[%s17982_s2 + $0x158] sm:$0xf0] }
 0x596   :  { %v12856_v51 = vor.u32 %v14848_v45, %v12853_v2  ;;  %v13316_v30 = vor.u32 %v14963_v12, %v13313_v14  ;;  %v12440_v2 = vor.u32 %v14746_v58, %v12439_v59  ;;  %v12579_v15 = vld [vmem:[%s17982_s2 + $0x1c0] sm:$0xf] }
 0x597   :  { %8224 = vmatpush.bf16.msrb.mxu1 %v13236_v19  ;;  %v14761_v19 = vld [vmem:[%s17982_s2 + $0x130] sm:$0xf0]  ;;  %v12739_v14 = vld [vmem:[%s17982_s2 + $0x300] sm:$0xf] }
 0x598   :  { %8201 = vmatpush.bf16.msra.mxu3 %v12856_v51  ;;  %v12559_v51 = vld [vmem:[%s17982_s2 + $0x198] sm:$0xf]  ;;  %v13139_v58 = vld [vmem:[%s17982_s2 + $0x620] sm:$0xf] }
 0x599   :  { %8237 = vmatpush.bf16.msrb.mxu2 %v13396_v20  ;;  %8212 = vmatpush.bf16.msrb.mxu0 %v13056_v26  ;;  %v14801_v20 = vld [vmem:[%s17982_s2 + $0x270] sm:$0xf0]  ;;  %v12500_v26 = vor.u32 %v14761_v19, %v12499_v24  ;;  %v12580_v19 = vor.u32 %v14781_v6, %v12579_v15 }
 0x59a   :  { %v12660_v52 = vor.u32 %v14801_v20, %v12659_v49  ;;  %v14821_v24 = vld [vmem:[%s17982_s2 + $0x310] sm:$0xf0]  ;;  %v12399_v49 = vld [vmem:[%s17982_s2 + $0x58] sm:$0xf] }
 0x59b   :  { %8225 = vmatpush.bf16.msrb.mxu1 %v13216_v33  ;;  %v14843_v33 = vld [vmem:[%s17982_s2 + $0x3c4] sm:$0xf]  ;;  %v12740_v20 = vor.u32 %v14821_v24, %v12739_v14  ;;  %v12400_v36 = vor.u32 %v14736_v25, %v12399_v49  ;;  %v13119_v14 = vld [vmem:[%s17982_s2 + $0x5f8] sm:$0xf]  ;;  %v14916_v24 = vld [vmem:[%s17982_s2 + $0x608] sm:$0xf0] }
 0x59c   :  { %v14956_v49 = vld [vmem:[%s17982_s2 + $0x748] sm:$0xf0] }
 0x59d   :  { %8238 = vmatpush.bf16.msrb.mxu2 %v13376_v37  ;;  %8213 = vmatpush.bf16.msrb.mxu0 %v13036_v31  ;;  %v12833_v37 = vld [vmem:[%s17982_s2 + $0x3d4] sm:$0xf0]  ;;  %v12640_v31 = vor.u32 %v14796_v1, %v12639_v18  ;;  %v14731_v18 = vld [vmem:[%s17982_s2 + $0x40] sm:$0xf0]  ;;  %v12539_v1 = vld [vmem:[%s17982_s2 + $0x170] sm:$0xf] }
 0x59e   :  { %v12836_v44 = vor.u32 %v14843_v33, %v12833_v37  ;;  %v12379_v37 = vld [vmem:[%s17982_s2 + $0x30] sm:$0xf]  ;;  %v14996_v25 = vld [vmem:[%s17982_s2 + $0x888] sm:$0xf0] }
 0x59f   :  { %8226 = vmatpush.bf16.msrb.mxu1 %v13196_v46  ;;  %v14751_v46 = vld [vmem:[%s17982_s2 + $0xe0] sm:$0xf0] }
 0x5a0   :  { %8202 = vmatpush.bf16.msra.mxu3 %v12836_v44  ;;  %v12460_v57 = vor.u32 %v14751_v46, %v12459_v50  ;;  %v12699_v44 = vld [vmem:[%s17982_s2 + $0x2b0] sm:$0xf]  ;;  %v12359_v50 = vld [vmem:[%s17982_s2 + $0x8] sm:$0xf]  ;;  %v12380_v46 = vor.u32 %v14731_v18, %v12379_v37  ;;  %v14951_v37 = vld [vmem:[%s17982_s2 + $0x720] sm:$0xf0] }
 0x5a1   :  { %8239 = vmatpush.bf16.msrb.mxu2 %v13356_v48  ;;  %8214 = vmatpush.bf16.msrb.mxu0 %v13016_v5  ;;  %v14791_v48 = vld [vmem:[%s17982_s2 + $0x220] sm:$0xf0]  ;;  %v14826_v5 = vld [vmem:[%s17982_s2 + $0x338] sm:$0xf0]  ;;  %v12700_v11 = vor.u32 %v14811_v38, %v12699_v44 }
 0x5a2   :  { %v12620_v3 = vor.u32 %v14791_v48, %v12619_v23  ;;  %v12760_v17 = vor.u32 %v14826_v5, %v12759_v7  ;;  %v12540_v23 = vor.u32 %v14771_v40, %v12539_v1  ;;  %v14726_v48 = vld [vmem:[%s17982_s2 + $0x18] sm:$0xf0]  ;;  %v14961_v5 = vld [vmem:[%s17982_s2 + $0x770] sm:$0xf0]  ;;  %v15023_v18 = vld [vmem:[%s17982_s2 + $0x964] sm:$0xf] }
 0x5a3   :  { %8227 = vmatpush.bf16.msrb.mxu1 %v13176_v34  ;;  %v12600_v34 = vor.u32 %v14786_v41, %v12599_v62  ;;  %v14921_v62 = vld [vmem:[%s17982_s2 + $0x630] sm:$0xf0]  ;;  %v13299_v41 = vld [vmem:[%s17982_s2 + $0x760] sm:$0xf]  ;;  %v13553_v1 = vld [vmem:[%s17982_s2 + $0x974] sm:$0xf0] }
 0x5a4   :  { %v13140_v15 = vor.u32 %v14921_v62, %v13139_v58  ;;  %v13300_v6 = vor.u32 %v14961_v5, %v13299_v41  ;;  %v13059_v62 = vld [vmem:[%s17982_s2 + $0x580] sm:$0xf]  ;;  %v14901_v41 = vld [vmem:[%s17982_s2 + $0x590] sm:$0xf0] }
 0x5a5   :  { %8240 = vmatpush.bf16.msrb.mxu2 %v13336_v0  ;;  %8215 = vmatpush.bf16.msrb.mxu0 %v12996_v27  ;;  %v5930_v45 = vpop.f32.mrf.mxu0  ;;  %v12419_v0 = vld [vmem:[%s17982_s2 + $0x80] sm:$0xf]  ;;  %v14776_v27 = vld [vmem:[%s17982_s2 + $0x1a8] sm:$0xf0] }
 0x5a6   :  { %v5931_v12 = vadd.f32 %v5930_v45, %v5918_v47  ;;  %v12420_v16 = vor.u32 %v14741_v4, %v12419_v0  ;;  %v12560_v33 = vor.u32 %v14776_v27, %v12559_v51  ;;  %v13459_v47 = vld [vmem:[%s17982_s2 + $0x8a0] sm:$0xf]  ;;  %v15001_v45 = vld [vmem:[%s17982_s2 + $0x8b0] sm:$0xf0]  ;;  %v12520_v0 = vor.u32 %v14766_v61, %v12519_v55  ;;  %v15028_v51 = vld [vmem:[%s17982_s2 + $0x98c] sm:$0xf] }
 0x5a7   :  { %8228 = vmatpush.bf16.msrb.mxu1 %v13156_v29  ;;  %v5943_v56 = vpop.f32.mrf.mxu1  ;;  %v14816_v29 = vld [vmem:[%s17982_s2 + $0x2e8] sm:$0xf0]  ;;  %v13573_v27 = vld [vmem:[%s17982_s2 + $0x99c] sm:$0xf0]  ;;  %v15018_v55 = vld [vmem:[%s17982_s2 + $0x93c] sm:$0xf] }
 0x5a8   :  { %8216 = vmatmul.bf16.vlgmr.msrb.gmra.mxu0 %v15839_v8  ;;  %v5944_v28 = vadd.f32 %v5943_v56, %v5931_v12  ;;  %v12720_v42 = vor.u32 %v14816_v29, %v12719_v35  ;;  %v15033_v56 = vld [vmem:[%s17982_s2 + $0x9b4] sm:$0xf]  ;;  %v13460_v12 = vor.u32 %v15001_v45, %v13459_v47  ;;  %v13099_v35 = vld [vmem:[%s17982_s2 + $0x5d0] sm:$0xf] }
 0x5a9   :  { %8241 = vmatpush.bf16.msrb.mxu2 %v13316_v30  ;;  %8260 = vmatpush.bf16.msra.mxu0 %v12500_v26  ;;  %v14941_v45 = vld [vmem:[%s17982_s2 + $0x6d0] sm:$0xf0] }
 0x5aa   :  { %8229 = vmatmul.bf16.vlgmr.msrb.gmra.mxu1 %v15841_v54 }
 0x5ab   :  { %8273 = vmatpush.bf16.msra.mxu1 %v12660_v52 }
 0x5ac   :  { %8242 = vmatmul.bf16.vlgmr.msrb.gmra.mxu2 %v15843_v53 }
 0x5ad   :  { %8286 = vmatpush.bf16.msra.mxu2 %v12820_v63  ;;  %8261 = vmatpush.bf16.msra.mxu0 %v12480_v21  ;;  %v5932_v52 = vpop.f32.mrf.mxu0  ;;  %v15038_v21 = vld [vmem:[%s17982_s2 + $0x9dc] sm:$0xf] }
 0x5ae   :  { %v16428_v52 = vld [vmem:[%s17985_s5] sm:$0xff] }
 0x5af   :  { %8274 = vmatpush.bf16.msra.mxu1 %v12640_v31  ;;  %v5956_v30 = vpop.f32.mrf.mxu2  ;;  %v5945_v63 = vpop.f32.mrf.mxu1  ;;  %v13613_v31 = vld [vmem:[%s17982_s2 + $0x9ec] sm:$0xf0] }
 0x5b0   :  { %v5957_v22 = vadd.f32 %v5956_v30, %v5944_v28  ;;  %v13120_v28 = vor.u32 %v14916_v24, %v13119_v14  ;;  %v13419_v63 = vld [vmem:[%s17982_s2 + $0x850] sm:$0xf]  ;;  %v14896_v14 = vld [vmem:[%s17982_s2 + $0x568] sm:$0xf0]  ;;  %v13199_v24 = vld [vmem:[%s17982_s2 + $0x698] sm:$0xf] }
 0x5b1   :  { %8287 = vmatpush.bf16.msra.mxu2 %v12800_v32  ;;  %8262 = vmatpush.bf16.msra.mxu0 %v12460_v57  ;;  %v5969_v26 = vpop.f32.mrf.mxu3  ;;  %v12679_v57 = vld [vmem:[%s17982_s2 + $0x288] sm:$0xf] }
 0x5b2   :  { %v5970_v43 = vadd.f32 %v5969_v26, %v5957_v22  ;;  %v14911_v22 = vld [vmem:[%s17982_s2 + $0x5e0] sm:$0xf0]  ;;  %v13259_v26 = vld [vmem:[%s17982_s2 + $0x710] sm:$0xf] }
 0x5b3   :  { %8275 = vmatpush.bf16.msra.mxu1 %v12620_v3  ;;  %v14806_v3 = vld [vmem:[%s17982_s2 + $0x298] sm:$0xf0]  ;;  %v13100_v40 = vor.u32 %v14911_v22, %v13099_v35  ;;  %v13260_v44 = vor.u32 %v14951_v37, %v13259_v26  ;;  %v14891_v37 = vld [vmem:[%s17982_s2 + $0x540] sm:$0xf0] }
 0x5b4   :  { %v5980_v32 = vmax.f32 %v5970_v43, 0.0  ;;  %v12680_v4 = vor.u32 %v14806_v3, %v12679_v57  ;;  %v13079_v43 = vld [vmem:[%s17982_s2 + $0x5a8] sm:$0xf] }
 0x5b5   :  { %8288 = vmatpush.bf16.msra.mxu2 %v12780_v60  ;;  %8263 = vmatpush.bf16.msra.mxu0 %v12440_v2  ;;  %v13616_v60 = vor.u32 %v15038_v21, %v13613_v31  ;;  %v14906_v31 = vld [vmem:[%s17982_s2 + $0x5b8] sm:$0xf0] }
 0x5b6   :  { %v16365_v59 = vpack.c.bf16 %v5980_v32, %v5980_v32  ;;  %v13556_v32 = vor.u32 %v15023_v18, %v13553_v1  ;;  %v13080_v61 = vor.u32 %v14906_v31, %v13079_v43  ;;  %v14931_v18 = vld [vmem:[%s17982_s2 + $0x680] sm:$0xf0]  ;;  %v13339_v1 = vld [vmem:[%s17982_s2 + $0x7b0] sm:$0xf]  ;;  %v12979_v31 = vld [vmem:[%s17982_s2 + $0x4e0] sm:$0xf] }
 0x5b7   :  { %8276 = vmatpush.bf16.msra.mxu1 %v12600_v34  ;;  %v5958_v7 = vpop.f32.mrf.mxu2  ;;  %v12360_v34 = vor.u32 %v14726_v48, %v12359_v50  ;;  %v13239_v50 = vld [vmem:[%s17982_s2 + $0x6e8] sm:$0xf]  ;;  %v14986_v48 = vld [vmem:[%s17982_s2 + $0x838] sm:$0xf0] }
 0x5b8   :  { %8151 = vmatmul.bf16.vlgmr.msrb.gmra.mxu3 %v16365_v59  ;;  %v13219_v7 = vld [vmem:[%s17982_s2 + $0x6c0] sm:$0xf] }
 0x5b9   :  { %8289 = vmatpush.bf16.msra.mxu2 %v12760_v17  ;;  %8264 = vmatpush.bf16.msra.mxu0 %v12420_v16  ;;  %v5971_v2 = vpop.f32.mrf.mxu3  ;;  %v13593_v17 = vld [vmem:[%s17982_s2 + $0x9c4] sm:$0xf0]  ;;  %v13279_v16 = vld [vmem:[%s17982_s2 + $0x738] sm:$0xf] }
 0x5ba   :  { %8247 = vmatpush.bf16.msrb.mxu3 %v13616_v60  ;;  %v13280_v29 = vor.u32 %v14956_v49, %v13279_v16  ;;  %v13379_v2 = vld [vmem:[%s17982_s2 + $0x800] sm:$0xf]  ;;  %v13359_v49 = vld [vmem:[%s17982_s2 + $0x7d8] sm:$0xf] }
 0x5bb   :  { %8277 = vmatpush.bf16.msra.mxu1 %v12580_v19  ;;  %v13596_v19 = vor.u32 %v15033_v56, %v13593_v17  ;;  %v13513_v56 = vld [vmem:[%s17982_s2 + $0x924] sm:$0xf0] }
 0x5bd   :  { %8290 = vmatpush.bf16.msra.mxu2 %v12740_v20  ;;  %8265 = vmatpush.bf16.msra.mxu0 %v12400_v36  ;;  %v13439_v20 = vld [vmem:[%s17982_s2 + $0x878] sm:$0xf]  ;;  %v6373_v36 = vperm.slane %v16428_v52, 1 }
 0x5be   :  { %v13440_v30 = vor.u32 %v14996_v25, %v13439_v20  ;;  %8248 = vmatpush.bf16.msrb.mxu3 %v13596_v19  ;;  %v14936_v19 = vld [vmem:[%s17982_s2 + $0x6a8] sm:$0xf0] }
 0x5bf   :  { %8278 = vmatpush.bf16.msra.mxu1 %v12560_v33  ;;  %v13576_v33 = vor.u32 %v15028_v51, %v13573_v27  ;;  %v6383_v21 = vperm.slane %v6373_v36, 1  ;;  %v14976_v20 = vld [vmem:[%s17982_s2 + $0x7e8] sm:$0xf0]  ;;  %v13493_v51 = vld [vmem:[%s17982_s2 + $0x8fc] sm:$0xf0]  ;;  %v13200_v26 = vor.u32 %v14936_v19, %v13199_v24 }
 0x5c0   :  { %v15008_v25 = vld [vmem:[%s17982_s2 + $0x8ec] sm:$0xf]  ;;  %v13360_v36 = vor.u32 %v14976_v20, %v13359_v49  ;;  %v12481_v24 = vld [vmem:[%s17982_s2 + $0x10c] sm:$0xf0]  ;;  %v14834_v20 = vld [vmem:[%s17982_s2 + $0x37c] sm:$0xf] }
 0x5c1   :  { %8291 = vmatpush.bf16.msra.mxu2 %v12720_v42  ;;  %8266 = vmatpush.bf16.msra.mxu0 %v12380_v46  ;;  %v14991_v42 = vld [vmem:[%s17982_s2 + $0x860] sm:$0xf0]  ;;  %v14946_v46 = vld [vmem:[%s17982_s2 + $0x6f8] sm:$0xf0]  ;;  %v12641_v49 = vld [vmem:[%s17982_s2 + $0x24c] sm:$0xf0] }
 0x5c2   :  { %v13420_v38 = vor.u32 %v14991_v42, %v13419_v63  ;;  %8249 = vmatpush.bf16.msrb.mxu3 %v13576_v33  ;;  %v13240_v60 = vor.u32 %v14946_v46, %v13239_v50  ;;  %v13019_v33 = vld [vmem:[%s17982_s2 + $0x530] sm:$0xf]  ;;  %v13496_v42 = vor.u32 %v15008_v25, %v13493_v51  ;;  %v14881_v50 = vld [vmem:[%s17982_s2 + $0x4f0] sm:$0xf0] }
 0x5c3   :  { %8279 = vmatpush.bf16.msra.mxu1 %v12540_v23  ;;  %v13399_v23 = vld [vmem:[%s17982_s2 + $0x828] sm:$0xf]  ;;  %v13179_v63 = vld [vmem:[%s17982_s2 + $0x670] sm:$0xf] }
 0x5c4   :  { %v13400_v58 = vor.u32 %v14986_v48, %v13399_v23  ;;  %v12999_v23 = vld [vmem:[%s17982_s2 + $0x508] sm:$0xf]  ;;  %v14886_v48 = vld [vmem:[%s17982_s2 + $0x518] sm:$0xf0]  ;;  %v12801_v25 = vld [vmem:[%s17982_s2 + $0x38c] sm:$0xf0] }
 0x5c5   :  { %8292 = vmatpush.bf16.msra.mxu2 %v12700_v11  ;;  %8267 = vmatpush.bf16.msra.mxu0 %v12360_v34  ;;  %v13533_v11 = vld [vmem:[%s17982_s2 + $0x94c] sm:$0xf0]  ;;  %v8061_v57 = vpop.f32.mrf.mxu0  ;;  %v14981_v34 = vld [vmem:[%s17982_s2 + $0x810] sm:$0xf0] }
 0x5c6   :  { %8250 = vmatpush.bf16.msrb.mxu3 %v13556_v32  ;;  %v8062_v5 = vadd.f32 %v8061_v57, %v6383_v21  ;;  %v13536_v47 = vor.u32 %v15018_v55, %v13533_v11  ;;  %v13020_v21 = vor.u32 %v14891_v37, %v13019_v33  ;;  %v13180_v32 = vor.u32 %v14931_v18, %v13179_v63  ;;  %v13159_v55 = vld [vmem:[%s17982_s2 + $0x648] sm:$0xf]  ;;  %v12939_v51 = vld [vmem:[%s17982_s2 + $0x490] sm:$0xf]  ;;  %v14829_v37 = vld [vmem:[%s17982_s2 + $0x354] sm:$0xf] }
 0x5c7   :  { %8280 = vmatpush.bf16.msra.mxu1 %v12520_v0  ;;  %v8074_v3 = vpop.f32.mrf.mxu1  ;;  %v15013_v0 = vld [vmem:[%s17982_s2 + $0x914] sm:$0xf]  ;;  %v13319_v57 = vld [vmem:[%s17982_s2 + $0x788] sm:$0xf]  ;;  %v14866_v18 = vld [vmem:[%s17982_s2 + $0x478] sm:$0xf0] }
 0x5c8   :  { %8268 = vmatmul.bf16.vlgmr.msra.gmra.mxu0 %v15666_v9  ;;  %v8075_v17 = vadd.f32 %v8074_v3, %v8062_v5  ;;  %8203 = vmatmul.bf16.vlgmr.msra.gmra.mxu3 %v15672_v13  ;;  %v13516_v16 = vor.u32 %v15013_v0, %v13513_v56  ;;  %v14966_v3 = vld [vmem:[%s17982_s2 + $0x798] sm:$0xf0]  ;;  %v12621_v33 = vld [vmem:[%s17982_s2 + $0x224] sm:$0xf0] }
 0x5c9   :  { %8293 = vmatpush.bf16.msra.mxu2 %v12680_v4  ;;  %8312 = vmatpush.bf16.msrb.mxu0 %v13140_v15  ;;  %v13060_v4 = vor.u32 %v14901_v41, %v13059_v62  ;;  %v13220_v15 = vor.u32 %v14941_v45, %v13219_v7  ;;  %v12501_v62 = vld [vmem:[%s17982_s2 + $0x134] sm:$0xf0]  ;;  %v14799_v41 = vld [vmem:[%s17982_s2 + $0x264] sm:$0xf]  ;;  %v13320_v56 = vor.u32 %v14966_v3, %v13319_v57  ;;  %v12781_v63 = vld [vmem:[%s17982_s2 + $0x364] sm:$0xf0] }
 0x5ca   :  { %8281 = vmatmul.bf16.vlgmr.msra.gmra.mxu1 %v15668_v10  ;;  %8251 = vmatpush.bf16.msrb.mxu3 %v13536_v47  ;;  %v13000_v47 = vor.u32 %v14886_v48, %v12999_v23  ;;  %v12661_v45 = vld [vmem:[%s17982_s2 + $0x274] sm:$0xf0]  ;;  %v12761_v23 = vld [vmem:[%s17982_s2 + $0x33c] sm:$0xf0] }
 0x5cb   :  { %8325 = vmatpush.bf16.msrb.mxu1 %v13300_v6  ;;  %v13380_v6 = vor.u32 %v14981_v34, %v13379_v2  ;;  %v14839_v2 = vld [vmem:[%s17982_s2 + $0x3a4] sm:$0xf]  ;;  %v12821_v34 = vld [vmem:[%s17982_s2 + $0x3b4] sm:$0xf0]  ;;  %v12899_v48 = vld [vmem:[%s17982_s2 + $0x440] sm:$0xf] }
 0x5cc   :  { %8294 = vmatmul.bf16.vlgmr.msra.gmra.mxu2 %v15670_v39 }
 0x5cd   :  { %8338 = vmatpush.bf16.msrb.mxu2 %v13460_v12  ;;  %8313 = vmatpush.bf16.msrb.mxu0 %v13120_v28  ;;  %v13039_v12 = vld [vmem:[%s17982_s2 + $0x558] sm:$0xf] }
 0x5ce   :  { %v13040_v35 = vor.u32 %v14896_v14, %v13039_v12  ;;  %8252 = vmatpush.bf16.msrb.mxu3 %v13516_v16  ;;  %v12824_v12 = vor.u32 %v14839_v2, %v12821_v34  ;;  %v14754_v14 = vld [vmem:[%s17982_s2 + $0xfc] sm:$0xf]  ;;  %v12879_v34 = vld [vmem:[%s17982_s2 + $0x418] sm:$0xf] }
 0x5cf   :  { %8326 = vmatpush.bf16.msrb.mxu1 %v13280_v29  ;;  %v8087_v27 = vpop.f32.mrf.mxu2  ;;  %v8076_v22 = vpop.f32.mrf.mxu1  ;;  %v14794_v16 = vld [vmem:[%s17982_s2 + $0x23c] sm:$0xf] }
 0x5d0   :  { %v8088_v29 = vadd.f32 %v8087_v27, %v8075_v17  ;;  %v12959_v17 = vld [vmem:[%s17982_s2 + $0x4b8] sm:$0xf]  ;;  %v14871_v27 = vld [vmem:[%s17982_s2 + $0x4a0] sm:$0xf0]  ;;  %v12461_v22 = vld [vmem:[%s17982_s2 + $0xe4] sm:$0xf0] }
 0x5d1   :  { %8339 = vmatpush.bf16.msrb.mxu2 %v13440_v30  ;;  %8314 = vmatpush.bf16.msrb.mxu0 %v13100_v40  ;;  %v8100_v28 = vpop.f32.mrf.mxu3  ;;  %v8063_v30 = vpop.f32.mrf.mxu0  ;;  %v14971_v40 = vld [vmem:[%s17982_s2 + $0x7c0] sm:$0xf0] }
 0x5d2   :  { %v16540_v43 = vadd.f32 %v8100_v28, %v8088_v29  ;;  %v13340_v46 = vor.u32 %v14971_v40, %v13339_v1  ;;  %8253 = vmatpush.bf16.msrb.mxu3 %v13496_v42  ;;  %v12484_v28 = vor.u32 %v14754_v14, %v12481_v24  ;;  %v12804_v29 = vor.u32 %v14834_v20, %v12801_v25  ;;  %v14749_v30 = vld [vmem:[%s17982_s2 + $0xd4] sm:$0xf]  ;;  %v12919_v42 = vld [vmem:[%s17982_s2 + $0x468] sm:$0xf]  ;;  %v12561_v24 = vld [vmem:[%s17982_s2 + $0x1ac] sm:$0xf0] }
 0x5d3   :  { %8327 = vmatpush.bf16.msrb.mxu1 %v13260_v44  ;;  %v15003_v44 = vld [vmem:[%s17982_s2 + $0x8c4] sm:$0xf]  ;;  %v12464_v1 = vor.u32 %v14749_v30, %v12461_v22  ;;  %v12859_v20 = vld [vmem:[%s17982_s2 + $0x3f0] sm:$0xf]  ;;  %v14729_v22 = vld [vmem:[%s17982_s2 + $0x34] sm:$0xf] }
 0x5d4   :  { %v14851_v25 = vld [vmem:[%s17982_s2 + $0x400] sm:$0xf0] }
 0x5d5   :  { %8340 = vmatpush.bf16.msrb.mxu2 %v13420_v38  ;;  %8315 = vmatpush.bf16.msrb.mxu0 %v13080_v61  ;;  %v13473_v38 = vld [vmem:[%s17982_s2 + $0x8d4] sm:$0xf0]  ;;  %v14926_v61 = vld [vmem:[%s17982_s2 + $0x658] sm:$0xf0] }
 0x5d6   :  { %v13476_v11 = vor.u32 %v15003_v44, %v13473_v38  ;;  %v13160_v0 = vor.u32 %v14926_v61, %v13159_v55  ;;  %v12784_v44 = vor.u32 %v14829_v37, %v12781_v63  ;;  %v14744_v38 = vld [vmem:[%s17982_s2 + $0xac] sm:$0xf]  ;;  %v14861_v55 = vld [vmem:[%s17982_s2 + $0x450] sm:$0xf0]  ;;  %v12541_v37 = vld [vmem:[%s17982_s2 + $0x184] sm:$0xf0] }
 0x5d7   :  { %8328 = vmatpush.bf16.msrb.mxu1 %v13240_v60  ;;  %v12980_v60 = vor.u32 %v14881_v50, %v12979_v31  ;;  %v8089_v7 = vpop.f32.mrf.mxu2  ;;  %v14784_v31 = vld [vmem:[%s17982_s2 + $0x1ec] sm:$0xf]  ;;  %v12920_v50 = vor.u32 %v14866_v18, %v12919_v42  ;;  %v14809_v63 = vld [vmem:[%s17982_s2 + $0x2b4] sm:$0xf]  ;;  %v12701_v42 = vld [vmem:[%s17982_s2 + $0x2c4] sm:$0xf0] }
 0x5d8   :  { %8254 = vmatpush.bf16.msrb.mxu3 %v13476_v11  ;;  %v14779_v7 = vld [vmem:[%s17982_s2 + $0x1c4] sm:$0xf]  ;;  %v12839_v18 = vld [vmem:[%s17982_s2 + $0x3c8] sm:$0xf] }
 0x5d9   :  { %8341 = vmatpush.bf16.msrb.mxu2 %v13400_v58  ;;  %8316 = vmatpush.bf16.msrb.mxu0 %v13060_v4  ;;  %v14759_v58 = vld [vmem:[%s17982_s2 + $0x124] sm:$0xf]  ;;  %v8102_v5 = vpop.f32.mrf.mxu3  ;;  %v14876_v4 = vld [vmem:[%s17982_s2 + $0x4c8] sm:$0xf0] }
 0x5da   :  { %v12960_v19 = vor.u32 %v14876_v4, %v12959_v17  ;;  %v12900_v5 = vor.u32 %v14861_v55, %v12899_v48  ;;  %v12521_v48 = vld [vmem:[%s17982_s2 + $0x15c] sm:$0xf0]  ;;  %v14804_v55 = vld [vmem:[%s17982_s2 + $0x28c] sm:$0xf] }
 0x5db   :  { %8329 = vmatpush.bf16.msrb.mxu1 %v13220_v15  ;;  %v12504_v15 = vor.u32 %v14759_v58, %v12501_v62  ;;  %8255 = vmatmul.bf16.vlgmr.msrb.gmra.mxu3 %v16365_v59  ;;  %v14739_v62 = vld [vmem:[%s17982_s2 + $0x84] sm:$0xf] }
 0x5dc   :  { %8299 = vmatpush.bf16.msra.mxu3 %v12980_v60 }
 0x5dd   :  { %8342 = vmatpush.bf16.msrb.mxu2 %v13380_v6  ;;  %8317 = vmatpush.bf16.msrb.mxu0 %v13040_v35  ;;  %v12664_v6 = vor.u32 %v14799_v41, %v12661_v45  ;;  %v12644_v35 = vor.u32 %v14794_v16, %v12641_v49  ;;  %v12421_v41 = vld [vmem:[%s17982_s2 + $0x94] sm:$0xf0]  ;;  %v14814_v16 = vld [vmem:[%s17982_s2 + $0x2dc] sm:$0xf] }
 0x5de   :  { %v12741_v45 = vld [vmem:[%s17982_s2 + $0x314] sm:$0xf0] }
 0x5df   :  { %8330 = vmatpush.bf16.msrb.mxu1 %v13200_v26  ;;  %v14789_v26 = vld [vmem:[%s17982_s2 + $0x214] sm:$0xf] }
 0x5e0   :  { %8300 = vmatpush.bf16.msra.mxu3 %v12960_v19  ;;  %v12624_v40 = vor.u32 %v14789_v26, %v12621_v33  ;;  %v12721_v19 = vld [vmem:[%s17982_s2 + $0x2ec] sm:$0xf0]  ;;  %v12381_v26 = vld [vmem:[%s17982_s2 + $0x44] sm:$0xf0]  ;;  %v12860_v33 = vor.u32 %v14851_v25, %v12859_v20  ;;  %v14909_v20 = vld [vmem:[%s17982_s2 + $0x5d4] sm:$0xf] }
 0x5e1   :  { %8343 = vmatpush.bf16.msrb.mxu2 %v13360_v36  ;;  %8318 = vmatpush.bf16.msrb.mxu0 %v13020_v21  ;;  %v12940_v36 = vor.u32 %v14871_v27, %v12939_v51  ;;  %v12441_v21 = vld [vmem:[%s17982_s2 + $0xbc] sm:$0xf0]  ;;  %v12724_v30 = vor.u32 %v14814_v16, %v12721_v19  ;;  %v13579_v16 = vld [vmem:[%s17982_s2 + $0x990] sm:$0xf]  ;;  %v15031_v19 = vld [vmem:[%s17982_s2 + $0x9a0] sm:$0xf0] }
 0x5e2   :  { %v12444_v61 = vor.u32 %v14744_v38, %v12441_v21  ;;  %v15041_v38 = vld [vmem:[%s17982_s2 + $0x9f0] sm:$0xf0] }
 0x5e3   :  { %8331 = vmatpush.bf16.msrb.mxu1 %v13180_v32  ;;  %v12601_v32 = vld [vmem:[%s17982_s2 + $0x1fc] sm:$0xf0] }
 0x5e4   :  { %8301 = vmatpush.bf16.msra.mxu3 %v12940_v36  ;;  %v12604_v60 = vor.u32 %v14784_v31, %v12601_v32  ;;  %v14769_v36 = vld [vmem:[%s17982_s2 + $0x174] sm:$0xf]  ;;  %v12704_v31 = vor.u32 %v14809_v63, %v12701_v42  ;;  %v12361_v32 = vld [vmem:[%s17982_s2 + $0x1c] sm:$0xf0]  ;;  %v14904_v63 = vld [vmem:[%s17982_s2 + $0x5ac] sm:$0xf] }
 0x5e5   :  { %8344 = vmatpush.bf16.msrb.mxu2 %v13340_v46  ;;  %8319 = vmatpush.bf16.msrb.mxu0 %v13000_v47  ;;  %v14824_v46 = vld [vmem:[%s17982_s2 + $0x32c] sm:$0xf]  ;;  %v8113_v11 = vpop.f32.mrf.mxu0  ;;  %v14819_v47 = vld [vmem:[%s17982_s2 + $0x304] sm:$0xf]  ;;  %v12544_v21 = vor.u32 %v14769_v36, %v12541_v37  ;;  %v13421_v36 = vld [vmem:[%s17982_s2 + $0x864] sm:$0xf0] }
 0x5e6   :  { %v8114_v57 = vadd.f32 %v8113_v11, %v16540_v43  ;;  %v12764_v58 = vor.u32 %v14824_v46, %v12761_v23  ;;  %v12581_v43 = vld [vmem:[%s17982_s2 + $0x1d4] sm:$0xf0]  ;;  %v12744_v4 = vor.u32 %v14819_v47, %v12741_v45  ;;  %v14764_v46 = vld [vmem:[%s17982_s2 + $0x14c] sm:$0xf]  ;;  %v12681_v11 = vld [vmem:[%s17982_s2 + $0x29c] sm:$0xf0] }
 0x5e7   :  { %8332 = vmatpush.bf16.msrb.mxu1 %v13160_v0  ;;  %v8126_v3 = vpop.f32.mrf.mxu1  ;;  %v14856_v0 = vld [vmem:[%s17982_s2 + $0x428] sm:$0xf0]  ;;  %v12584_v17 = vor.u32 %v14779_v7, %v12581_v43  ;;  %v14999_v7 = vld [vmem:[%s17982_s2 + $0x8a4] sm:$0xf]  ;;  %v12524_v43 = vor.u32 %v14764_v46, %v12521_v48  ;;  %v13599_v47 = vld [vmem:[%s17982_s2 + $0x9b8] sm:$0xf] }
 0x5e8   :  { %8320 = vmatmul.bf16.vlgmr.msrb.gmra.mxu0 %v15839_v8  ;;  %8302 = vmatpush.bf16.msra.mxu3 %v12920_v50  ;;  %v8127_v2 = vadd.f32 %v8126_v3, %v8114_v57  ;;  %v12880_v14 = vor.u32 %v14856_v0, %v12879_v34  ;;  %v14724_v50 = vld [vmem:[%s17982_s2 + $0xc] sm:$0xf]  ;;  %v14919_v3 = vld [vmem:[%s17982_s2 + $0x624] sm:$0xf]  ;;  %v15021_v46 = vld [vmem:[%s17982_s2 + $0x950] sm:$0xf0] }
 0x5e9   :  { %8345 = vmatpush.bf16.msrb.mxu2 %v13320_v56  ;;  %8364 = vmatpush.bf16.msra.mxu0 %v12504_v15  ;;  %v12424_v56 = vor.u32 %v14739_v62, %v12421_v41  ;;  %v14734_v15 = vld [vmem:[%s17982_s2 + $0x5c] sm:$0xf]  ;;  %v12364_v62 = vor.u32 %v14724_v50, %v12361_v32  ;;  %v13301_v41 = vld [vmem:[%s17982_s2 + $0x774] sm:$0xf0]  ;;  %v15036_v45 = vld [vmem:[%s17982_s2 + $0x9c8] sm:$0xf0] }
 0x5ea   :  { %8333 = vmatmul.bf16.vlgmr.msrb.gmra.mxu1 %v15841_v54  ;;  %v13401_v50 = vld [vmem:[%s17982_s2 + $0x83c] sm:$0xf0] }
 0x5eb   :  { %8377 = vmatpush.bf16.msra.mxu1 %v12664_v6  ;;  %v12401_v6 = vld [vmem:[%s17982_s2 + $0x6c] sm:$0xf0]  ;;  %v13539_v32 = vld [vmem:[%s17982_s2 + $0x940] sm:$0xf] }
 0x5ec   :  { %8346 = vmatmul.bf16.vlgmr.msrb.gmra.mxu2 %v15843_v53  ;;  %8303 = vmatpush.bf16.msra.mxu3 %v12900_v5  ;;  %v13461_v5 = vld [vmem:[%s17982_s2 + $0x8b4] sm:$0xf0] }
 0x5ed   :  { %8390 = vmatpush.bf16.msra.mxu2 %v12824_v12  ;;  %8365 = vmatpush.bf16.msra.mxu0 %v12484_v28  ;;  %v14774_v12 = vld [vmem:[%s17982_s2 + $0x19c] sm:$0xf]  ;;  %v8115_v27 = vpop.f32.mrf.mxu0  ;;  %v12404_v28 = vor.u32 %v14734_v15, %v12401_v6  ;;  %v13600_v6 = vor.u32 %v15036_v45, %v13599_v47  ;;  %v13519_v47 = vld [vmem:[%s17982_s2 + $0x918] sm:$0xf]  ;;  %v15016_v45 = vld [vmem:[%s17982_s2 + $0x928] sm:$0xf0] }
 0x5ee   :  { %v14954_v15 = vld [vmem:[%s17982_s2 + $0x73c] sm:$0xf] }
 0x5ef   :  { %8378 = vmatpush.bf16.msra.mxu1 %v12644_v35  ;;  %v8139_v49 = vpop.f32.mrf.mxu2  ;;  %v8128_v35 = vpop.f32.mrf.mxu1 }
 0x5f0   :  { %v16721_v51 = vadd.f32 %v8139_v49, %v8127_v2  ;;  %8304 = vmatpush.bf16.msra.mxu3 %v12880_v14  ;;  %v12684_v2 = vor.u32 %v14804_v55, %v12681_v11  ;;  %v14994_v14 = vld [vmem:[%s17982_s2 + $0x87c] sm:$0xf]  ;;  %v14949_v35 = vld [vmem:[%s17982_s2 + $0x714] sm:$0xf] }
 0x5f1   :  { %8391 = vmatpush.bf16.msra.mxu2 %v12804_v29  ;;  %8366 = vmatpush.bf16.msra.mxu0 %v12464_v1  ;;  %v12564_v29 = vor.u32 %v14774_v12, %v12561_v24  ;;  %v14846_v1 = vld [vmem:[%s17982_s2 + $0x3d8] sm:$0xf0]  ;;  %v13281_v12 = vld [vmem:[%s17982_s2 + $0x74c] sm:$0xf0] }
 0x5f2   :  { %v12840_v23 = vor.u32 %v14846_v1, %v12839_v18  ;;  %v13441_v24 = vld [vmem:[%s17982_s2 + $0x88c] sm:$0xf0]  ;;  %v13284_v25 = vor.u32 %v14954_v15, %v13281_v12  ;;  %v13520_v15 = vor.u32 %v15016_v45, %v13519_v47  ;;  %v14974_v12 = vld [vmem:[%s17982_s2 + $0x7dc] sm:$0xf] }
 0x5f3   :  { %8379 = vmatpush.bf16.msra.mxu1 %v12624_v40  ;;  %v12384_v40 = vor.u32 %v14729_v22, %v12381_v26  ;;  %v13444_v27 = vor.u32 %v14994_v14, %v13441_v24  ;;  %v13261_v22 = vld [vmem:[%s17982_s2 + $0x724] sm:$0xf0]  ;;  %v14989_v26 = vld [vmem:[%s17982_s2 + $0x854] sm:$0xf]  ;;  %v13361_v14 = vld [vmem:[%s17982_s2 + $0x7ec] sm:$0xf0] }
 0x5f4   :  { %8305 = vmatpush.bf16.msra.mxu3 %v12860_v33  ;;  %v15026_v33 = vld [vmem:[%s17982_s2 + $0x978] sm:$0xf0]  ;;  %v13264_v42 = vor.u32 %v14949_v35, %v13261_v22  ;;  %v13424_v18 = vor.u32 %v14989_v26, %v13421_v36  ;;  %v13364_v35 = vor.u32 %v14974_v12, %v13361_v14  ;;  %v14929_v22 = vld [vmem:[%s17982_s2 + $0x674] sm:$0xf]  ;;  %v13181_v36 = vld [vmem:[%s17982_s2 + $0x684] sm:$0xf0] }
 0x5f5   :  { %8392 = vmatpush.bf16.msra.mxu2 %v12784_v44  ;;  %8367 = vmatpush.bf16.msra.mxu0 %v12444_v61  ;;  %v13619_v44 = vld [vmem:[%s17982_s2 + $0x9e0] sm:$0xf]  ;;  %v14869_v12 = vld [vmem:[%s17982_s2 + $0x494] sm:$0xf]  ;;  %v12941_v14 = vld [vmem:[%s17982_s2 + $0x4a4] sm:$0xf0] }
 0x5f6   :  { %v13620_v57 = vor.u32 %v15041_v38, %v13619_v44  ;;  %v14944_v44 = vld [vmem:[%s17982_s2 + $0x6ec] sm:$0xf] }
 0x5f7   :  { %8380 = vmatpush.bf16.msra.mxu1 %v12604_v60  ;;  %v8141_v61 = vpop.f32.mrf.mxu2  ;;  %v13141_v60 = vld [vmem:[%s17982_s2 + $0x634] sm:$0xf0] }
 0x5f8   :  { %8306 = vmatpush.bf16.msra.mxu3 %v12840_v23  ;;  %v13144_v34 = vor.u32 %v14919_v3, %v13141_v60  ;;  %v14899_v3 = vld [vmem:[%s17982_s2 + $0x584] sm:$0xf]  ;;  %v13061_v60 = vld [vmem:[%s17982_s2 + $0x594] sm:$0xf0] }
 0x5f9   :  { %8393 = vmatpush.bf16.msra.mxu2 %v12764_v58  ;;  %8368 = vmatpush.bf16.msra.mxu0 %v12424_v56  ;;  %v14959_v58 = vld [vmem:[%s17982_s2 + $0x764] sm:$0xf]  ;;  %v13464_v56 = vor.u32 %v14999_v7, %v13461_v5  ;;  %v13381_v5 = vld [vmem:[%s17982_s2 + $0x814] sm:$0xf0] }
 0x5fa   :  { %v13304_v0 = vor.u32 %v14959_v58, %v13301_v41  ;;  %v14939_v58 = vld [vmem:[%s17982_s2 + $0x6c4] sm:$0xf]  ;;  %v13221_v41 = vld [vmem:[%s17982_s2 + $0x6d4] sm:$0xf0] }
 0x5fb   :  { %8381 = vmatpush.bf16.msra.mxu1 %v12584_v17  ;;  %v14914_v17 = vld [vmem:[%s17982_s2 + $0x5fc] sm:$0xf]  ;;  %8307 = vmatmul.bf16.vlgmr.msra.gmra.mxu3 %v15672_v13  ;;  %v14979_v7 = vld [vmem:[%s17982_s2 + $0x804] sm:$0xf] }
 0x5fc   :  { %8351 = vmatpush.bf16.msrb.mxu3 %v13620_v57 }
 0x5fd   :  { %8394 = vmatpush.bf16.msra.mxu2 %v12744_v4  ;;  %8369 = vmatpush.bf16.msra.mxu0 %v12404_v28  ;;  %v13121_v4 = vld [vmem:[%s17982_s2 + $0x60c] sm:$0xf0]  ;;  %v13101_v28 = vld [vmem:[%s17982_s2 + $0x5e4] sm:$0xf0] }
 0x5fe   :  { %v13124_v49 = vor.u32 %v14914_v17, %v13121_v4  ;;  %v13104_v37 = vor.u32 %v14909_v20, %v13101_v28  ;;  %v13041_v17 = vld [vmem:[%s17982_s2 + $0x56c] sm:$0xf0]  ;;  %v14934_v4 = vld [vmem:[%s17982_s2 + $0x69c] sm:$0xf] }
 0x5ff   :  { %8382 = vmatpush.bf16.msra.mxu1 %v12564_v29  ;;  %v6374_v29 = vperm.slane %v16428_v52, 5  ;;  %v13559_v52 = vld [vmem:[%s17982_s2 + $0x968] sm:$0xf] }
 0x600   :  { %8352 = vmatpush.bf16.msrb.mxu3 %v13600_v6  ;;  %v13560_v38 = vor.u32 %v15026_v33, %v13559_v52  ;;  %v13201_v6 = vld [vmem:[%s17982_s2 + $0x6ac] sm:$0xf0]  ;;  %v14969_v52 = vld [vmem:[%s17982_s2 + $0x7b4] sm:$0xf]  ;;  %v13341_v33 = vld [vmem:[%s17982_s2 + $0x7c4] sm:$0xf0] }
 0x601   :  { %8395 = vmatpush.bf16.msra.mxu2 %v12724_v30  ;;  %8370 = vmatpush.bf16.msra.mxu0 %v12384_v40  ;;  %v13580_v30 = vor.u32 %v15031_v19, %v13579_v16  ;;  %v6384_v1 = vperm.slane %v6374_v29, 1  ;;  %v13081_v40 = vld [vmem:[%s17982_s2 + $0x5bc] sm:$0xf0]  ;;  %v13499_v16 = vld [vmem:[%s17982_s2 + $0x8f0] sm:$0xf]  ;;  %v13204_v28 = vor.u32 %v14934_v4, %v13201_v6 }
 0x602   :  { %v13084_v55 = vor.u32 %v14904_v63, %v13081_v40  ;;  %v15011_v19 = vld [vmem:[%s17982_s2 + $0x900] sm:$0xf0]  ;;  %v14889_v29 = vld [vmem:[%s17982_s2 + $0x534] sm:$0xf]  ;;  %v15006_v63 = vld [vmem:[%s17982_s2 + $0x8d8] sm:$0xf0]  ;;  %v13184_v40 = vor.u32 %v14929_v22, %v13181_v36 }
 0x603   :  { %8383 = vmatpush.bf16.msra.mxu1 %v12544_v21  ;;  %v13241_v21 = vld [vmem:[%s17982_s2 + $0x6fc] sm:$0xf0]  ;;  %v13500_v26 = vor.u32 %v15011_v19, %v13499_v16  ;;  %v14797_v4 = vld [vmem:[%s17982_s2 + $0x250] sm:$0xf0]  ;;  %v14864_v22 = vld [vmem:[%s17982_s2 + $0x46c] sm:$0xf] }
 0x604   :  { %8353 = vmatpush.bf16.msrb.mxu3 %v13580_v30  ;;  %v13244_v61 = vor.u32 %v14944_v44, %v13241_v21  ;;  %v13021_v30 = vld [vmem:[%s17982_s2 + $0x544] sm:$0xf0]  ;;  %v13344_v44 = vor.u32 %v14969_v52, %v13341_v33  ;;  %v13001_v21 = vld [vmem:[%s17982_s2 + $0x51c] sm:$0xf0]  ;;  %v14837_v6 = vld [vmem:[%s17982_s2 + $0x390] sm:$0xf0] }
 0x605   :  { %8396 = vmatpush.bf16.msra.mxu2 %v12704_v31  ;;  %8371 = vmatpush.bf16.msra.mxu0 %v12364_v62  ;;  %v14984_v31 = vld [vmem:[%s17982_s2 + $0x82c] sm:$0xf]  ;;  %v8165_v23 = vpop.f32.mrf.mxu0  ;;  %v13540_v62 = vor.u32 %v15021_v46, %v13539_v32  ;;  %v13161_v32 = vld [vmem:[%s17982_s2 + $0x65c] sm:$0xf0] }
 0x606   :  { %v8166_v11 = vadd.f32 %v8165_v23, %v6384_v1  ;;  %v13404_v57 = vor.u32 %v14984_v31, %v13401_v50  ;;  %v12981_v1 = vld [vmem:[%s17982_s2 + $0x4f4] sm:$0xf0]  ;;  %v14924_v31 = vld [vmem:[%s17982_s2 + $0x64c] sm:$0xf]  ;;  %v13321_v23 = vld [vmem:[%s17982_s2 + $0x79c] sm:$0xf0] }
 0x607   :  { %8384 = vmatpush.bf16.msra.mxu1 %v12524_v43  ;;  %v8178_v48 = vpop.f32.mrf.mxu1  ;;  %v14964_v46 = vld [vmem:[%s17982_s2 + $0x78c] sm:$0xf] }
 0x608   :  { %8372 = vmatmul.bf16.vlgmr.msra.gmra.mxu0 %v15666_v9  ;;  %8354 = vmatpush.bf16.msrb.mxu3 %v13560_v38  ;;  %v8179_v43 = vadd.f32 %v8178_v48, %v8166_v11  ;;  %v14884_v38 = vld [vmem:[%s17982_s2 + $0x50c] sm:$0xf]  ;;  %v12507_v11 = vld [vmem:[%s17982_s2 + $0x128] sm:$0xf] }
 0x609   :  { %8397 = vmatpush.bf16.msra.mxu2 %v12684_v2  ;;  %8416 = vmatpush.bf16.msrb.mxu0 %v13144_v34  ;;  %v13064_v2 = vor.u32 %v14899_v3, %v13061_v60  ;;  %v13224_v34 = vor.u32 %v14939_v58, %v13221_v41  ;;  %v13004_v3 = vor.u32 %v14884_v38, %v13001_v21  ;;  %v14802_v60 = vld [vmem:[%s17982_s2 + $0x278] sm:$0xf0]  ;;  %v12827_v58 = vld [vmem:[%s17982_s2 + $0x3a8] sm:$0xf]  ;;  %v14859_v21 = vld [vmem:[%s17982_s2 + $0x444] sm:$0xf] }
 0x60a   :  { %8385 = vmatmul.bf16.vlgmr.msra.gmra.mxu1 %v15668_v10  ;;  %v13164_v41 = vor.u32 %v14924_v31, %v13161_v32  ;;  %v12901_v31 = vld [vmem:[%s17982_s2 + $0x454] sm:$0xf0] }
 0x60b   :  { %8429 = vmatpush.bf16.msrb.mxu1 %v13304_v0  ;;  %v13384_v0 = vor.u32 %v14979_v7, %v13381_v5  ;;  %v14874_v7 = vld [vmem:[%s17982_s2 + $0x4bc] sm:$0xf]  ;;  %v12961_v5 = vld [vmem:[%s17982_s2 + $0x4cc] sm:$0xf0] }
 0x60c   :  { %8398 = vmatmul.bf16.vlgmr.msra.gmra.mxu2 %v15670_v39  ;;  %8355 = vmatpush.bf16.msrb.mxu3 %v13540_v62  ;;  %v14842_v62 = vld [vmem:[%s17982_s2 + $0x3b8] sm:$0xf0] }
 0x60d   :  { %8442 = vmatpush.bf16.msrb.mxu2 %v13464_v56  ;;  %8417 = vmatpush.bf16.msrb.mxu0 %v13124_v49  ;;  %v14894_v56 = vld [vmem:[%s17982_s2 + $0x55c] sm:$0xf]  ;;  %v8167_v20 = vpop.f32.mrf.mxu0 }
 0x60e   :  { %v12467_v20 = vld [vmem:[%s17982_s2 + $0xd8] sm:$0xf] }
 0x60f   :  { %8430 = vmatpush.bf16.msrb.mxu1 %v13284_v25  ;;  %v8191_v24 = vpop.f32.mrf.mxu2  ;;  %v8180_v25 = vpop.f32.mrf.mxu1 }
 0x610   :  { %v16920_v49 = vadd.f32 %v8191_v24, %v8179_v43  ;;  %8356 = vmatpush.bf16.msrb.mxu3 %v13520_v15  ;;  %v13324_v43 = vor.u32 %v14964_v46, %v13321_v23  ;;  %v12807_v15 = vld [vmem:[%s17982_s2 + $0x380] sm:$0xf]  ;;  %v14752_v25 = vld [vmem:[%s17982_s2 + $0xe8] sm:$0xf0] }
 0x611   :  { %8443 = vmatpush.bf16.msrb.mxu2 %v13444_v27  ;;  %8418 = vmatpush.bf16.msrb.mxu0 %v13104_v37  ;;  %v13044_v27 = vor.u32 %v14894_v56, %v13041_v17  ;;  %v13479_v37 = vld [vmem:[%s17982_s2 + $0x8c8] sm:$0xf]  ;;  %v12647_v56 = vld [vmem:[%s17982_s2 + $0x240] sm:$0xf]  ;;  %v12964_v17 = vor.u32 %v14874_v7, %v12961_v5  ;;  %v12808_v19 = vor.u32 %v14837_v6, %v12807_v15  ;;  %v14849_v15 = vld [vmem:[%s17982_s2 + $0x3f4] sm:$0xf] }
 0x612   :  { %v13480_v50 = vor.u32 %v15006_v63, %v13479_v37  ;;  %v12648_v16 = vor.u32 %v14797_v4, %v12647_v56  ;;  %v12468_v36 = vor.u32 %v14752_v25, %v12467_v20  ;;  %v12447_v37 = vld [vmem:[%s17982_s2 + $0xb0] sm:$0xf]  ;;  %v14747_v63 = vld [vmem:[%s17982_s2 + $0xc0] sm:$0xf0]  ;;  %v12727_v56 = vld [vmem:[%s17982_s2 + $0x2e0] sm:$0xf] }
 0x613   :  { %8431 = vmatpush.bf16.msrb.mxu1 %v13264_v42  ;;  %v13024_v42 = vor.u32 %v14889_v29, %v13021_v30  ;;  %v12787_v29 = vld [vmem:[%s17982_s2 + $0x358] sm:$0xf]  ;;  %v14832_v30 = vld [vmem:[%s17982_s2 + $0x368] sm:$0xf0]  ;;  %v12448_v32 = vor.u32 %v14747_v63, %v12447_v37  ;;  %v12861_v6 = vld [vmem:[%s17982_s2 + $0x404] sm:$0xf0] }
 0x614   :  { %8357 = vmatpush.bf16.msrb.mxu3 %v13500_v26  ;;  %v12921_v26 = vld [vmem:[%s17982_s2 + $0x47c] sm:$0xf0]  ;;  %v12788_v33 = vor.u32 %v14832_v30, %v12787_v29  ;;  %v14732_v20 = vld [vmem:[%s17982_s2 + $0x48] sm:$0xf0]  ;;  %v12547_v25 = vld [vmem:[%s17982_s2 + $0x178] sm:$0xf] }
 0x615   :  { %8444 = vmatpush.bf16.msrb.mxu2 %v13424_v18  ;;  %8419 = vmatpush.bf16.msrb.mxu0 %v13084_v55  ;;  %v14879_v18 = vld [vmem:[%s17982_s2 + $0x4e4] sm:$0xf]  ;;  %v14812_v29 = vld [vmem:[%s17982_s2 + $0x2c8] sm:$0xf0]  ;;  %v12367_v63 = vld [vmem:[%s17982_s2 + $0x10] sm:$0xf] }
 0x616   :  { %v12984_v55 = vor.u32 %v14879_v18, %v12981_v1  ;;  %v12924_v18 = vor.u32 %v14864_v22, %v12921_v26  ;;  %v14787_v1 = vld [vmem:[%s17982_s2 + $0x200] sm:$0xf0]  ;;  %v14844_v30 = vld [vmem:[%s17982_s2 + $0x3cc] sm:$0xf]  ;;  %v12841_v22 = vld [vmem:[%s17982_s2 + $0x3dc] sm:$0xf0] }
 0x617   :  { %8432 = vmatpush.bf16.msrb.mxu1 %v13244_v61  ;;  %v8193_v48 = vpop.f32.mrf.mxu2  ;;  %v14762_v61 = vld [vmem:[%s17982_s2 + $0x138] sm:$0xf0] }
 0x618   :  { %8358 = vmatpush.bf16.msrb.mxu3 %v13480_v50  ;;  %v12508_v47 = vor.u32 %v14762_v61, %v12507_v11  ;;  %v12427_v48 = vld [vmem:[%s17982_s2 + $0x88] sm:$0xf]  ;;  %v12904_v61 = vor.u32 %v14859_v21, %v12901_v31  ;;  %v12687_v21 = vld [vmem:[%s17982_s2 + $0x290] sm:$0xf]  ;;  %v14807_v31 = vld [vmem:[%s17982_s2 + $0x2a0] sm:$0xf0] }
 0x619   :  { %8445 = vmatpush.bf16.msrb.mxu2 %v13404_v57  ;;  %8420 = vmatpush.bf16.msrb.mxu0 %v13064_v2  ;;  %v12667_v57 = vld [vmem:[%s17982_s2 + $0x268] sm:$0xf]  ;;  %v12828_v2 = vor.u32 %v14842_v62, %v12827_v58  ;;  %v14854_v58 = vld [vmem:[%s17982_s2 + $0x41c] sm:$0xf]  ;;  %v12881_v62 = vld [vmem:[%s17982_s2 + $0x42c] sm:$0xf0] }
 0x61a   :  { %v12668_v45 = vor.u32 %v14802_v60, %v12667_v57  ;;  %v12587_v11 = vld [vmem:[%s17982_s2 + $0x1c8] sm:$0xf]  ;;  %v14782_v57 = vld [vmem:[%s17982_s2 + $0x1d8] sm:$0xf0] }
 0x61b   :  { %8433 = vmatpush.bf16.msrb.mxu1 %v13224_v34  ;;  %v12487_v34 = vld [vmem:[%s17982_s2 + $0x100] sm:$0xf]  ;;  %8359 = vmatmul.bf16.vlgmr.msrb.gmra.mxu3 %v16365_v59  ;;  %v14822_v60 = vld [vmem:[%s17982_s2 + $0x318] sm:$0xf0]  ;;  %v12588_v7 = vor.u32 %v14782_v57, %v12587_v11 }
 0x61c   :  { %8403 = vmatpush.bf16.msra.mxu3 %v12984_v55  ;;  %v14742_v55 = vld [vmem:[%s17982_s2 + $0x98] sm:$0xf0] }
 0x61d   :  { %8446 = vmatpush.bf16.msrb.mxu2 %v13384_v0  ;;  %8421 = vmatpush.bf16.msrb.mxu0 %v13044_v27  ;;  %v14757_v0 = vld [vmem:[%s17982_s2 + $0x110] sm:$0xf0]  ;;  %v12627_v27 = vld [vmem:[%s17982_s2 + $0x218] sm:$0xf]  ;;  %v14962_v11 = vld [vmem:[%s17982_s2 + $0x778] sm:$0xf0] }
 0x61e   :  { %v12488_v24 = vor.u32 %v14757_v0, %v12487_v34  ;;  %v12884_v34 = vor.u32 %v14854_v58, %v12881_v62  ;;  %v14777_v0 = vld [vmem:[%s17982_s2 + $0x1b0] sm:$0xf0]  ;;  %v15002_v57 = vld [vmem:[%s17982_s2 + $0x8b8] sm:$0xf0]  ;;  %v13601_v58 = vld [vmem:[%s17982_s2 + $0x9cc] sm:$0xf0]  ;;  %v12688_v62 = vor.u32 %v14807_v31, %v12687_v21 }
 0x61f   :  { %8434 = vmatpush.bf16.msrb.mxu1 %v13204_v28  ;;  %v12944_v28 = vor.u32 %v14869_v12, %v12941_v14  ;;  %v13541_v21 = vld [vmem:[%s17982_s2 + $0x954] sm:$0xf0] }
 0x620   :  { %8404 = vmatpush.bf16.msra.mxu3 %v12964_v17  ;;  %v14817_v17 = vld [vmem:[%s17982_s2 + $0x2f0] sm:$0xf0] }
 0x621   :  { %8447 = vmatpush.bf16.msrb.mxu2 %v13364_v35  ;;  %8422 = vmatpush.bf16.msrb.mxu0 %v13024_v42  ;;  %v14792_v35 = vld [vmem:[%s17982_s2 + $0x228] sm:$0xf0]  ;;  %v12607_v42 = vld [vmem:[%s17982_s2 + $0x1f0] sm:$0xf] }
 0x622   :  { %v12628_v52 = vor.u32 %v14792_v35, %v12627_v27  ;;  %v12608_v46 = vor.u32 %v14787_v1, %v12607_v42  ;;  %v12864_v27 = vor.u32 %v14849_v15, %v12861_v6  ;;  %v12707_v35 = vld [vmem:[%s17982_s2 + $0x2b8] sm:$0xf]  ;;  %v14727_v42 = vld [vmem:[%s17982_s2 + $0x20] sm:$0xf0]  ;;  %v13581_v15 = vld [vmem:[%s17982_s2 + $0x9a4] sm:$0xf0] }
 0x623   :  { %8435 = vmatpush.bf16.msrb.mxu1 %v13184_v40  ;;  %v12767_v40 = vld [vmem:[%s17982_s2 + $0x330] sm:$0xf]  ;;  %v12708_v37 = vor.u32 %v14812_v29, %v12707_v35  ;;  %v13427_v35 = vld [vmem:[%s17982_s2 + $0x858] sm:$0xf]  ;;  %v14992_v29 = vld [vmem:[%s17982_s2 + $0x868] sm:$0xf0] }
 0x624   :  { %8405 = vmatpush.bf16.msra.mxu3 %v12944_v28  ;;  %v14772_v28 = vld [vmem:[%s17982_s2 + $0x188] sm:$0xf0] }
 0x625   :  { %8448 = vmatpush.bf16.msrb.mxu2 %v13344_v44  ;;  %8423 = vmatpush.bf16.msrb.mxu0 %v13004_v3  ;;  %v14827_v44 = vld [vmem:[%s17982_s2 + $0x340] sm:$0xf0]  ;;  %v17064_v38 = vpop.f32.mrf.mxu0  ;;  %v12747_v3 = vld [vmem:[%s17982_s2 + $0x308] sm:$0xf] }
 0x626   :  { %v12768_v23 = vor.u32 %v14827_v44, %v12767_v40  ;;  %v12748_v5 = vor.u32 %v14822_v60, %v12747_v3  ;;  %v12844_v40 = vor.u32 %v14844_v30, %v12841_v22  ;;  %v14767_v44 = vld [vmem:[%s17982_s2 + $0x160] sm:$0xf0]  ;;  %v15034_v60 = vld [vmem:[%s17982_s2 + $0x9bc] sm:$0xf]  ;;  %v13561_v30 = vld [vmem:[%s17982_s2 + $0x97c] sm:$0xf0] }
 0x627   :  { %8436 = vmatpush.bf16.msrb.mxu1 %v13164_v41  ;;  %v17072_v50 = vpop.f32.mrf.mxu1  ;;  %v12428_v41 = vor.u32 %v14742_v55, %v12427_v48  ;;  %v13307_v48 = vld [vmem:[%s17982_s2 + $0x768] sm:$0xf]  ;;  %v12368_v55 = vor.u32 %v14727_v42, %v12367_v63  ;;  %v14947_v63 = vld [vmem:[%s17982_s2 + $0x700] sm:$0xf0]  ;;  %v13407_v42 = vld [vmem:[%s17982_s2 + $0x830] sm:$0xf] }
 0x628   :  { %8424 = vmatmul.bf16.vlgmr.msrb.gmra.mxu0 %v15839_v8  ;;  %8406 = vmatpush.bf16.msra.mxu3 %v12924_v18  ;;  %v12527_v18 = vld [vmem:[%s17982_s2 + $0x150] sm:$0xf] }
 0x629   :  { %8449 = vmatpush.bf16.msrb.mxu2 %v13324_v43  ;;  %8468 = vmatpush.bf16.msra.mxu0 %v12508_v47  ;;  %v12407_v43 = vld [vmem:[%s17982_s2 + $0x60] sm:$0xf]  ;;  %v14737_v47 = vld [vmem:[%s17982_s2 + $0x70] sm:$0xf0]  ;;  %v12528_v3 = vor.u32 %v14767_v44, %v12527_v18  ;;  %v14987_v18 = vld [vmem:[%s17982_s2 + $0x840] sm:$0xf0] }
 0x62a   :  { %8437 = vmatmul.bf16.vlgmr.msrb.gmra.mxu1 %v15841_v54  ;;  %v12408_v14 = vor.u32 %v14737_v47, %v12407_v43  ;;  %v13127_v43 = vld [vmem:[%s17982_s2 + $0x600] sm:$0xf]  ;;  %v14917_v47 = vld [vmem:[%s17982_s2 + $0x610] sm:$0xf0]  ;;  %v15019_v44 = vld [vmem:[%s17982_s2 + $0x944] sm:$0xf] }
 0x62b   :  { %8481 = vmatpush.bf16.msra.mxu1 %v12668_v45  ;;  %v12567_v45 = vld [vmem:[%s17982_s2 + $0x1a0] sm:$0xf]  ;;  %v13128_v6 = vor.u32 %v14917_v47, %v13127_v43 }
 0x62c   :  { %8450 = vmatmul.bf16.vlgmr.msrb.gmra.mxu2 %v15843_v53  ;;  %8407 = vmatpush.bf16.msra.mxu3 %v12904_v61  ;;  %v13467_v61 = vld [vmem:[%s17982_s2 + $0x8a8] sm:$0xf] }
 0x62d   :  { %8494 = vmatpush.bf16.msra.mxu2 %v12828_v2  ;;  %8469 = vmatpush.bf16.msra.mxu0 %v12488_v24  ;;  %v8219_v4 = vpop.f32.mrf.mxu0  ;;  %v12568_v24 = vor.u32 %v14777_v0, %v12567_v45  ;;  %v13287_v45 = vld [vmem:[%s17982_s2 + $0x740] sm:$0xf]  ;;  %v14957_v0 = vld [vmem:[%s17982_s2 + $0x750] sm:$0xf0] }
 0x62e   :  { %v15029_v4 = vld [vmem:[%s17982_s2 + $0x994] sm:$0xf] }
 0x62f   :  { %8482 = vmatpush.bf16.msra.mxu1 %v12648_v16  ;;  %v17107_v2 = vpop.f32.mrf.mxu2  ;;  %v8232_v12 = vpop.f32.mrf.mxu1  ;;  %v12728_v16 = vor.u32 %v14817_v17, %v12727_v56  ;;  %v13447_v56 = vld [vmem:[%s17982_s2 + $0x880] sm:$0xf]  ;;  %v14997_v17 = vld [vmem:[%s17982_s2 + $0x890] sm:$0xf0] }
 0x630   :  { %8408 = vmatpush.bf16.msra.mxu3 %v12884_v34  ;;  %v13604_v34 = vor.u32 %v15034_v60, %v13601_v58  ;;  %v17224_v12 = vld [vmem:[%s17985_s5 + $0x8] sm:$0xff]  ;;  %v14942_v60 = vld [vmem:[%s17982_s2 + $0x6d8] sm:$0xf0] }
 0x631   :  { %8495 = vmatpush.bf16.msra.mxu2 %v12808_v19  ;;  %8470 = vmatpush.bf16.msra.mxu0 %v12468_v36  ;;  %v12387_v19 = vld [vmem:[%s17982_s2 + $0x38] sm:$0xf]  ;;  %v15039_v36 = vld [vmem:[%s17982_s2 + $0x9e4] sm:$0xf]  ;;  %v13387_v58 = vld [vmem:[%s17982_s2 + $0x808] sm:$0xf] }
 0x632   :  { %v12388_v26 = vor.u32 %v14732_v20, %v12387_v19  ;;  %v13107_v19 = vld [vmem:[%s17982_s2 + $0x5d8] sm:$0xf]  ;;  %v14912_v20 = vld [vmem:[%s17982_s2 + $0x5e8] sm:$0xf0] }
 0x633   :  { %8483 = vmatpush.bf16.msra.mxu1 %v12628_v52  ;;  %v13621_v52 = vld [vmem:[%s17982_s2 + $0x9f4] sm:$0xf0]  ;;  %v13108_v22 = vor.u32 %v14912_v20, %v13107_v19  ;;  %v15009_v19 = vld [vmem:[%s17982_s2 + $0x8f4] sm:$0xf]  ;;  %v13501_v20 = vld [vmem:[%s17982_s2 + $0x904] sm:$0xf0] }
 0x634   :  { %8409 = vmatpush.bf16.msra.mxu3 %v12864_v27  ;;  %v13584_v27 = vor.u32 %v15029_v4, %v13581_v15  ;;  %v14937_v4 = vld [vmem:[%s17982_s2 + $0x6b0] sm:$0xf0]  ;;  %v13367_v15 = vld [vmem:[%s17982_s2 + $0x7e0] sm:$0xf] }
 0x635   :  { %8496 = vmatpush.bf16.msra.mxu2 %v12788_v33  ;;  %8471 = vmatpush.bf16.msra.mxu0 %v12448_v32  ;;  %v12548_v33 = vor.u32 %v14772_v28, %v12547_v25  ;;  %v13624_v32 = vor.u32 %v15039_v36, %v13621_v52  ;;  %v13267_v25 = vld [vmem:[%s17982_s2 + $0x718] sm:$0xf]  ;;  %v14952_v28 = vld [vmem:[%s17982_s2 + $0x728] sm:$0xf0]  ;;  %v13428_v52 = vor.u32 %v14992_v29, %v13427_v35 }
 0x636   :  { %v13268_v36 = vor.u32 %v14952_v28, %v13267_v25  ;;  %v13027_v29 = vld [vmem:[%s17982_s2 + $0x538] sm:$0xf] }
 0x637   :  { %8484 = vmatpush.bf16.msra.mxu1 %v12608_v46  ;;  %v8245_v1 = vpop.f32.mrf.mxu2  ;;  %v13147_v46 = vld [vmem:[%s17982_s2 + $0x628] sm:$0xf] }
 0x638   :  { %8410 = vmatpush.bf16.msra.mxu3 %v12844_v40 }
 0x639   :  { %8497 = vmatpush.bf16.msra.mxu2 %v12768_v23  ;;  %8472 = vmatpush.bf16.msra.mxu0 %v12428_v41  ;;  %v14922_v23 = vld [vmem:[%s17982_s2 + $0x638] sm:$0xf0] }
 0x63a   :  { %v13148_v41 = vor.u32 %v14922_v23, %v13147_v46 }
 0x63b   :  { %8485 = vmatpush.bf16.msra.mxu1 %v12588_v7  ;;  %v13308_v7 = vor.u32 %v14962_v11, %v13307_v48  ;;  %8411 = vmatmul.bf16.vlgmr.msra.gmra.mxu3 %v15672_v13  ;;  %v17272_v40 = vpop.f32.mrf.mxu3  ;;  %v13408_v48 = vor.u32 %v14987_v18, %v13407_v42  ;;  %v14902_v11 = vld [vmem:[%s17982_s2 + $0x598] sm:$0xf0] }
 0x63c   :  { %8455 = vmatpush.bf16.msrb.mxu3 %v13624_v32 }
 0x63d   :  { %8498 = vmatpush.bf16.msra.mxu2 %v12748_v5  ;;  %8473 = vmatpush.bf16.msra.mxu0 %v12408_v14  ;;  %v13468_v5 = vor.u32 %v15002_v57, %v13467_v61  ;;  %v6375_v14 = vperm.slane %v17224_v12, 1  ;;  %v13227_v61 = vld [vmem:[%s17982_s2 + $0x6c8] sm:$0xf] }
 0x63e   :  { %v13228_v43 = vor.u32 %v14942_v60, %v13227_v61  ;;  %v13691_v61 = vld [vmem:[%s17983_s3 + $0x70] sm:$0xf] }
 0x63f   :  { %8486 = vmatpush.bf16.msra.mxu1 %v12568_v24  ;;  %v13288_v24 = vor.u32 %v14957_v0, %v13287_v45  ;;  %v13047_v45 = vld [vmem:[%s17982_s2 + $0x560] sm:$0xf] }
 0x640   :  { %8456 = vmatpush.bf16.msrb.mxu3 %v13604_v34  ;;  %v14897_v34 = vld [vmem:[%s17982_s2 + $0x570] sm:$0xf0]  ;;  %v13207_v0 = vld [vmem:[%s17982_s2 + $0x6a0] sm:$0xf] }
 0x641   :  { %8499 = vmatpush.bf16.msra.mxu2 %v12728_v16  ;;  %8474 = vmatpush.bf16.msra.mxu0 %v12388_v26  ;;  %v13448_v16 = vor.u32 %v14997_v17, %v13447_v56  ;;  %v6385_v26 = vperm.slane %v6375_v14, 1  ;;  %v13208_v28 = vor.u32 %v14937_v4, %v13207_v0  ;;  %v15056_v0 = vld [vmem:[%s17983_s3 + $0x64] sm:$0xf0] }
 0x643   :  { %8487 = vmatpush.bf16.msra.mxu1 %v12548_v33  ;;  %v13247_v33 = vld [vmem:[%s17982_s2 + $0x6f0] sm:$0xf] }
 0x644   :  { %8457 = vmatpush.bf16.msrb.mxu3 %v13584_v27  ;;  %v13248_v23 = vor.u32 %v14947_v63, %v13247_v33  ;;  %v13048_v27 = vor.u32 %v14897_v34, %v13047_v45  ;;  %v14882_v63 = vld [vmem:[%s17982_s2 + $0x4f8] sm:$0xf0]  ;;  %v13683_v34 = vld [vmem:[%s17983_s3 + $0x60] sm:$0xf] }
 0x645   :  { %8500 = vmatpush.bf16.msra.mxu2 %v12708_v37  ;;  %8475 = vmatpush.bf16.msra.mxu0 %v12368_v55  ;;  %v8269_v1 = vpop.f32.mrf.mxu0  ;;  %v13067_v55 = vld [vmem:[%s17982_s2 + $0x588] sm:$0xf] }
 0x646   :  { %v8270_v31 = vadd.f32 %v8269_v1, %v6385_v26  ;;  %v14932_v26 = vld [vmem:[%s17982_s2 + $0x688] sm:$0xf0]  ;;  %v13007_v1 = vld [vmem:[%s17982_s2 + $0x510] sm:$0xf] }
 0x647   :  { %8488 = vmatpush.bf16.msra.mxu1 %v12528_v3  ;;  %v8282_v32 = vpop.f32.mrf.mxu1  ;;  %v13544_v3 = vor.u32 %v15019_v44, %v13541_v21  ;;  %v14887_v44 = vld [vmem:[%s17982_s2 + $0x520] sm:$0xf0]  ;;  %v13167_v21 = vld [vmem:[%s17982_s2 + $0x650] sm:$0xf] }
 0x648   :  { %8476 = vmatmul.bf16.vlgmr.msra.gmra.mxu0 %v15666_v9  ;;  %v15024_v9 = vld [vmem:[%s17982_s2 + $0x96c] sm:$0xf]  ;;  %v8283_v57 = vadd.f32 %v8282_v32, %v8270_v31  ;;  %v13008_v60 = vor.u32 %v14887_v44, %v13007_v1  ;;  %v13659_v1 = vld [vmem:[%s17983_s3 + $0x30] sm:$0xf]  ;;  %v15050_v44 = vld [vmem:[%s17983_s3 + $0x34] sm:$0xf0] }
 0x649   :  { %8501 = vmatpush.bf16.msra.mxu2 %v12688_v62  ;;  %8520 = vmatpush.bf16.msrb.mxu0 %v13148_v41  ;;  %v13564_v37 = vor.u32 %v15024_v9, %v13561_v30  ;;  %v14982_v62 = vld [vmem:[%s17982_s2 + $0x818] sm:$0xf0]  ;;  %v14892_v9 = vld [vmem:[%s17982_s2 + $0x548] sm:$0xf0]  ;;  %v13187_v30 = vld [vmem:[%s17982_s2 + $0x678] sm:$0xf] }
 0x64a   :  { %8489 = vmatmul.bf16.vlgmr.msra.gmra.mxu1 %v15668_v10  ;;  %v13087_v10 = vld [vmem:[%s17982_s2 + $0x5b0] sm:$0xf]  ;;  %v15014_v41 = vld [vmem:[%s17982_s2 + $0x91c] sm:$0xf]  ;;  %v13388_v47 = vor.u32 %v14982_v62, %v13387_v58  ;;  %v13028_v33 = vor.u32 %v14892_v9, %v13027_v29  ;;  %v13188_v42 = vor.u32 %v14932_v26, %v13187_v30  ;;  %v15074_v58 = vld [vmem:[%s17983_s3 + $0xf4] sm:$0xf0] }
 0x64b   :  { %8533 = vmatpush.bf16.msrb.mxu1 %v13308_v7  ;;  %8458 = vmatpush.bf16.msrb.mxu3 %v13564_v37  ;;  %v13521_v7 = vld [vmem:[%s17982_s2 + $0x92c] sm:$0xf0]  ;;  %v12987_v37 = vld [vmem:[%s17982_s2 + $0x4e8] sm:$0xf]  ;;  %v12967_v62 = vld [vmem:[%s17982_s2 + $0x4c0] sm:$0xf] }
 0x64c   :  { %8502 = vmatmul.bf16.vlgmr.msra.gmra.mxu2 %v15670_v39  ;;  %v14907_v39 = vld [vmem:[%s17982_s2 + $0x5c0] sm:$0xf0]  ;;  %v13524_v17 = vor.u32 %v15014_v41, %v13521_v7  ;;  %v14877_v41 = vld [vmem:[%s17982_s2 + $0x4d0] sm:$0xf0]  ;;  %v12927_v29 = vld [vmem:[%s17982_s2 + $0x470] sm:$0xf] }
 0x64d   :  { %8546 = vmatpush.bf16.msrb.mxu2 %v13468_v5  ;;  %8521 = vmatpush.bf16.msrb.mxu0 %v13128_v6  ;;  %v13088_v46 = vor.u32 %v14907_v39, %v13087_v10  ;;  %v13068_v5 = vor.u32 %v14902_v11, %v13067_v55  ;;  %v14977_v6 = vld [vmem:[%s17982_s2 + $0x7f0] sm:$0xf0]  ;;  %v15004_v10 = vld [vmem:[%s17982_s2 + $0x8cc] sm:$0xf]  ;;  %v13481_v39 = vld [vmem:[%s17982_s2 + $0x8dc] sm:$0xf0]  ;;  %v12988_v55 = vor.u32 %v14882_v63, %v12987_v37 }
 0x64e   :  { %v13368_v35 = vor.u32 %v14977_v6, %v13367_v15  ;;  %v13484_v32 = vor.u32 %v15004_v10, %v13481_v39  ;;  %v12968_v45 = vor.u32 %v14877_v41, %v12967_v62  ;;  %v15072_v15 = vld [vmem:[%s17983_s3 + $0xe4] sm:$0xf0]  ;;  %v12947_v6 = vld [vmem:[%s17982_s2 + $0x498] sm:$0xf]  ;;  %v14867_v9 = vld [vmem:[%s17982_s2 + $0x480] sm:$0xf0] }
 0x64f   :  { %8534 = vmatpush.bf16.msrb.mxu1 %v13288_v24  ;;  %8459 = vmatpush.bf16.msrb.mxu3 %v13544_v3  ;;  %v8295_v56 = vpop.f32.mrf.mxu2  ;;  %v8271_v24 = vpop.f32.mrf.mxu0  ;;  %v13755_v3 = vld [vmem:[%s17983_s3 + $0xf0] sm:$0xf]  ;;  %v13731_v26 = vld [vmem:[%s17983_s3 + $0xc0] sm:$0xf]  ;;  %v14862_v10 = vld [vmem:[%s17982_s2 + $0x458] sm:$0xf0] }
 0x650   :  { %v17322_v14 = vadd.f32 %v8295_v56, %v8283_v57  ;;  %v8284_v25 = vpop.f32.mrf.mxu1  ;;  %v15058_v57 = vld [vmem:[%s17983_s3 + $0x74] sm:$0xf0]  ;;  %v13747_v56 = vld [vmem:[%s17983_s3 + $0xe0] sm:$0xf]  ;;  %v14872_v24 = vld [vmem:[%s17982_s2 + $0x4a8] sm:$0xf0] }
 0x651   :  { %8547 = vmatpush.bf16.msrb.mxu2 %v13448_v16  ;;  %8522 = vmatpush.bf16.msrb.mxu0 %v13108_v22  ;;  %v8154_v16 = vpop.f32.mrf.mxu3  ;;  %v13504_v22 = vor.u32 %v15009_v19, %v13501_v20  ;;  %v15054_v20 = vld [vmem:[%s17983_s3 + $0x54] sm:$0xf0]  ;;  %v13739_v25 = vld [vmem:[%s17983_s3 + $0xd0] sm:$0xf] }
 0x652   :  { %v12948_v16 = vor.u32 %v14872_v24, %v12947_v6  ;;  %v15090_v62 = vld [vmem:[%s17983_s3 + $0x174] sm:$0xf0] }
 0x653   :  { %8535 = vmatpush.bf16.msrb.mxu1 %v13268_v36  ;;  %8460 = vmatpush.bf16.msrb.mxu3 %v13524_v17  ;;  %v13347_v36 = vld [vmem:[%s17982_s2 + $0x7b8] sm:$0xf]  ;;  %v17407_v17 = vadd.f32 %v17272_v40, %v16721_v51  ;;  %v13684_v51 = vor.u32 %v15056_v0, %v13683_v34  ;;  %v13748_v40 = vor.u32 %v15072_v15, %v13747_v56  ;;  %v13643_v15 = vld [vmem:[%s17983_s3 + $0x10] sm:$0xf] }
 0x654   :  { %v15046_v6 = vld [vmem:[%s17983_s3 + $0x14] sm:$0xf0] }
 0x655   :  { %8548 = vmatpush.bf16.msrb.mxu2 %v13428_v52  ;;  %8523 = vmatpush.bf16.msrb.mxu0 %v13088_v46  ;;  %v14972_v52 = vld [vmem:[%s17982_s2 + $0x7c8] sm:$0xf0]  ;;  %v14927_v46 = vld [vmem:[%s17982_s2 + $0x660] sm:$0xf0]  ;;  %vm8572_vm0 = vcmp.gt.f32.partialorder %v17407_v17, 0.0 }
 0x656   :  { %v13348_v18 = vor.u32 %v14972_v52, %v13347_v36  ;;  %v13168_v7 = vor.u32 %v14927_v46, %v13167_v21  ;;  %v12907_v52 = vld [vmem:[%s17982_s2 + $0x448] sm:$0xf]  ;;  %v14857_v46 = vld [vmem:[%s17982_s2 + $0x430] sm:$0xf0] }
 0x657   :  { %8536 = vmatpush.bf16.msrb.mxu1 %v13248_v23  ;;  %8461 = vmatpush.bf16.msrb.mxu3 %v13504_v22  ;;  %v8297_v31 = vpop.f32.mrf.mxu2  ;;  %v13327_v23 = vld [vmem:[%s17982_s2 + $0x790] sm:$0xf]  ;;  %v15052_v22 = vld [vmem:[%s17983_s3 + $0x44] sm:$0xf0] }
 0x658   :  { %v15066_v31 = vld [vmem:[%s17983_s3 + $0xb4] sm:$0xf0] }
 0x659   :  { %8549 = vmatpush.bf16.msrb.mxu2 %v13408_v48  ;;  %8524 = vmatpush.bf16.msrb.mxu0 %v13068_v5  ;;  %v14967_v48 = vld [vmem:[%s17982_s2 + $0x7a0] sm:$0xf0]  ;;  %v8204_v11 = vpop.f32.mrf.mxu3 }
 0x65a   :  { %v13328_v5 = vor.u32 %v14967_v48, %v13327_v23  ;;  %v8205_v4 = vadd.f32 %v8204_v11, %v16920_v49  ;;  %v13675_v49 = vld [vmem:[%s17983_s3 + $0x50] sm:$0xf]  ;;  %v15048_v11 = vld [vmem:[%s17983_s3 + $0x24] sm:$0xf0] }
 0x65b   :  { %8537 = vmatpush.bf16.msrb.mxu1 %v13228_v43  ;;  %8462 = vmatpush.bf16.msrb.mxu3 %v13484_v32  ;;  %v13692_v43 = vor.u32 %v15058_v57, %v13691_v61  ;;  %v13676_v30 = vor.u32 %v15054_v20, %v13675_v49  ;;  %v12887_v32 = vld [vmem:[%s17982_s2 + $0x420] sm:$0xf]  ;;  %v13707_v49 = vld [vmem:[%s17983_s3 + $0x90] sm:$0xf] }
 0x65c   :  { %v13715_v61 = vld [vmem:[%s17983_s3 + $0xa0] sm:$0xf]  ;;  %v12847_v20 = vld [vmem:[%s17982_s2 + $0x3d0] sm:$0xf] }
 0x65d   :  { %8550 = vmatpush.bf16.msrb.mxu2 %v13388_v47  ;;  %8525 = vmatpush.bf16.msrb.mxu0 %v13048_v27  ;;  %v13756_v47 = vor.u32 %v15074_v58, %v13755_v3  ;;  %v15070_v27 = vld [vmem:[%s17983_s3 + $0xd4] sm:$0xf0]  ;;  %v12888_v3 = vor.u32 %v14857_v46, %v12887_v32  ;;  %v13819_v58 = vld [vmem:[%s17983_s3 + $0x170] sm:$0xf]  ;;  %v15055_v46 = vld [vmem:[%s17983_s3 + $0x64] sm:$0xf] }
 0x65e   :  { %8463 = vmatmul.bf16.vlgmr.msrb.gmra.mxu3 %v16365_v59 }
 0x65f   :  { %8538 = vmatpush.bf16.msrb.mxu1 %v13208_v28  ;;  %8507 = vmatpush.bf16.msra.mxu3 %v12988_v55  ;;  %v8576_v28 = vmin.f32 %v17407_v17, 0.0  ;;  %v13660_v55 = vor.u32 %v15050_v44, %v13659_v1  ;;  %v13757_v44 = vld [vmem:[%s17983_s3 + $0xf8] sm:$0xf0] }
 0x661   :  { %8551 = vmatpush.bf16.msrb.mxu2 %v13368_v35  ;;  %8526 = vmatpush.bf16.msrb.mxu0 %v13028_v33  ;;  %v8206_v19 = vpop.f32.mrf.mxu3  ;;  %v8218_v35 = vadd.f32 %v17064_v38, %v8205_v4  ;;  %v13667_v38 = vld [vmem:[%s17983_s3 + $0x40] sm:$0xf]  ;;  %v8580_v36 = vmul.f32 1.442695, %v8576_v28 }
 0x662   :  { %v13668_v63 = vor.u32 %v15052_v22, %v13667_v38  ;;  %v15062_v19 = vld [vmem:[%s17983_s3 + $0x94] sm:$0xf0]  ;;  %v13635_v38 = vld [vmem:[%s17983_s3] sm:$0xf] }
 0x663   :  { %8539 = vmatpush.bf16.msrb.mxu1 %v13188_v42  ;;  %8508 = vmatpush.bf16.msra.mxu3 %v12968_v45  ;;  %v8231_v39 = vadd.f32 %v17072_v50, %v8218_v35  ;;  %v13723_v50 = vld [vmem:[%s17983_s3 + $0xb0] sm:$0xf]  ;;  %15127 = vpow2.f32 %v8580_v36  ;;  %v13708_v22 = vor.u32 %v15062_v19, %v13707_v49  ;;  %v13741_v49 = vld [vmem:[%s17983_s3 + $0xd8] sm:$0xf0] }
 0x664   :  { %v13724_v57 = vor.u32 %v15066_v31, %v13723_v50  ;;  %v13803_v36 = vld [vmem:[%s17983_s3 + $0x150] sm:$0xf]  ;;  %v13607_v50 = vld [vmem:[%s17982_s2 + $0x9c0] sm:$0xf] }
 0x665   :  { %8552 = vmatpush.bf16.msrb.mxu2 %v13348_v18  ;;  %8527 = vmatpush.bf16.msrb.mxu0 %v13008_v60  ;;  %v17462_v33 = vpop.f32.mrf.mxu0  ;;  %v12908_v18 = vor.u32 %v14862_v10, %v12907_v52  ;;  %v8244_v21 = vadd.f32 %v17107_v2, %v8231_v39  ;;  %v13651_v2 = vld [vmem:[%s17983_s3 + $0x20] sm:$0xf]  ;;  %v15064_v60 = vld [vmem:[%s17983_s3 + $0xa4] sm:$0xf0]  ;;  %v15086_v52 = vld [vmem:[%s17983_s3 + $0x154] sm:$0xf0] }
 0x666   :  { %v13652_v4 = vor.u32 %v15048_v11, %v13651_v2  ;;  %v13716_v24 = vor.u32 %v15064_v60, %v13715_v61  ;;  %v13804_v1 = vor.u32 %v15086_v52, %v13803_v36  ;;  %v13795_v11 = vld [vmem:[%s17983_s3 + $0x140] sm:$0xf]  ;;  %v15084_v61 = vld [vmem:[%s17983_s3 + $0x144] sm:$0xf0] }
 0x667   :  { %8540 = vmatpush.bf16.msrb.mxu1 %v13168_v7  ;;  %8509 = vmatpush.bf16.msra.mxu3 %v12948_v16  ;;  %v17464_v37 = vpop.f32.mrf.mxu1  ;;  %v15088_v16 = vld [vmem:[%s17983_s3 + $0x164] sm:$0xf0] }
 0x668   :  { %8528 = vmatmul.bf16.vlgmr.msrb.gmra.mxu0 %v15839_v8  ;;  %v13740_v8 = vor.u32 %v15070_v27, %v13739_v25  ;;  %v14847_v25 = vld [vmem:[%s17982_s2 + $0x3e0] sm:$0xf0] }
 0x669   :  { %8553 = vmatpush.bf16.msrb.mxu2 %v13328_v5  ;;  %8990 = vmatpush.bf16.msra.mxu0 %v13692_v43  ;;  %v8256_v23 = vpop.f32.mrf.mxu3  ;;  %v12867_v5 = vld [vmem:[%s17982_s2 + $0x3f8] sm:$0xf]  ;;  %v14852_v43 = vld [vmem:[%s17982_s2 + $0x408] sm:$0xf0]  ;;  %v15128_v34 = vpop.eup %15127 }
 0x66a   :  { %8541 = vmatmul.bf16.vlgmr.msrb.gmra.mxu1 %v15841_v54  ;;  %v12928_v54 = vor.u32 %v14867_v9, %v12927_v29  ;;  %v17485_v48 = vadd.f32 %v8256_v23, %v8244_v21  ;;  %v13629_v28 = vadd.f32 -1.0, %v15128_v34  ;;  %v13627_v29 = vld [vmem:[%s17982_s2 + $0x9e8] sm:$0xf]  ;;  %v15042_v9 = vld [vmem:[%s17982_s2 + $0x9f8] sm:$0xf0] }
 0x66b   :  { %9003 = vmatpush.bf16.msra.mxu1 %v13756_v47  ;;  %v13820_v47 = vor.u32 %v15090_v62, %v13819_v58  ;;  %v13628_v39 = vor.u32 %v15042_v9, %v13627_v29  ;;  %v15037_v21 = vld [vmem:[%s17982_s2 + $0x9d0] sm:$0xf0]  ;;  %v13685_v58 = vld [vmem:[%s17983_s3 + $0x68] sm:$0xf0]  ;;  %v15071_v62 = vld [vmem:[%s17983_s3 + $0xe4] sm:$0xf] }
 0x66c   :  { %8554 = vmatmul.bf16.vlgmr.msrb.gmra.mxu2 %v15843_v53  ;;  %v15068_v53 = vld [vmem:[%s17983_s3 + $0xc4] sm:$0xf0]  ;;  %8510 = vmatpush.bf16.msra.mxu3 %v12928_v54  ;;  %v8577_v41 = vmin.f32 %v17485_v48, 0.0  ;;  %v13699_v54 = vld [vmem:[%s17983_s3 + $0x80] sm:$0xf]  ;;  %vm8573_vm1 = vcmp.gt.f32.partialorder %v17485_v48, 0.0  ;;  %v13608_v60 = vor.u32 %v15037_v21, %v13607_v50 }
 0x66d   :  { %8991 = vmatpush.bf16.msra.mxu0 %v13684_v51  ;;  %v13732_v42 = vor.u32 %v15068_v53, %v13731_v26  ;;  %v8323_v45 = vpop.f32.mrf.mxu0  ;;  %9016 = vmatpush.bf16.msra.mxu2 %v13820_v47  ;;  %v12868_v51 = vor.u32 %v14852_v43, %v12867_v5  ;;  %v12848_v26 = vor.u32 %v14847_v25, %v12847_v20  ;;  %v15060_v53 = vld [vmem:[%s17983_s3 + $0x84] sm:$0xf0]  ;;  %v13749_v5 = vld [vmem:[%s17983_s3 + $0xe8] sm:$0xf0]  ;;  %v13725_v50 = vld [vmem:[%s17983_s3 + $0xb8] sm:$0xf0] }
 0x66e   :  { %v8582_v0 = vmul.f32 1.442695, %v8577_v41  ;;  %v15032_v43 = vld [vmem:[%s17982_s2 + $0x9a8] sm:$0xf0]  ;;  %v13796_v47 = vor.u32 %v15084_v61, %v13795_v11  ;;  %v15080_v20 = vld [vmem:[%s17983_s3 + $0x124] sm:$0xf0] }
 0x66f   :  { %9004 = vmatpush.bf16.msra.mxu1 %v13748_v40  ;;  %v17506_v7 = vpop.f32.mrf.mxu2  ;;  %v8336_v56 = vpop.f32.mrf.mxu1  ;;  %v13811_v40 = vld [vmem:[%s17983_s3 + $0x160] sm:$0xf]  ;;  %v13669_v9 = vld [vmem:[%s17983_s3 + $0x48] sm:$0xf0] }
 0x670   :  { %8511 = vmatpush.bf16.msra.mxu3 %v12908_v18  ;;  %15129 = vpow2.f32 %v8582_v0  ;;  %v13812_v27 = vor.u32 %v15088_v16, %v13811_v40  ;;  %v15073_v18 = vld [vmem:[%s17983_s3 + $0xf4] sm:$0xf]  ;;  %v13787_v56 = vld [vmem:[%s17983_s3 + $0x130] sm:$0xf]  ;;  %v15027_v16 = vld [vmem:[%s17982_s2 + $0x980] sm:$0xf0] }
 0x671   :  { %8992 = vmatpush.bf16.msra.mxu0 %v13676_v30  ;;  %v8258_v35 = vpop.f32.mrf.mxu3  ;;  %v13644_v30 = vor.u32 %v15046_v6, %v13643_v15  ;;  %v15053_v0 = vld [vmem:[%s17983_s3 + $0x54] sm:$0xf]  ;;  %v13677_v6 = vld [vmem:[%s17983_s3 + $0x58] sm:$0xf0]  ;;  %v13567_v40 = vld [vmem:[%s17982_s2 + $0x970] sm:$0xf] }
 0x672   :  { %9017 = vmatpush.bf16.msra.mxu2 %v13812_v27  ;;  %v13680_v25 = vor.u32 %v15053_v0, %v13677_v6  ;;  %v15051_v27 = vld [vmem:[%s17983_s3 + $0x44] sm:$0xf]  ;;  %v13568_v35 = vor.u32 %v15027_v16, %v13567_v40  ;;  %v13527_v21 = vld [vmem:[%s17982_s2 + $0x920] sm:$0xf]  ;;  %v13653_v11 = vld [vmem:[%s17983_s3 + $0x28] sm:$0xf0] }
 0x673   :  { %9005 = vmatpush.bf16.msra.mxu1 %v13740_v8  ;;  %v15044_v8 = vld [vmem:[%s17983_s3 + $0x4] sm:$0xf0]  ;;  %v13672_v52 = vor.u32 %v15051_v27, %v13669_v9  ;;  %v13763_v61 = vld [vmem:[%s17983_s3 + $0x100] sm:$0xf]  ;;  %v13645_v6 = vld [vmem:[%s17983_s3 + $0x18] sm:$0xf0] }
 0x674   :  { %8512 = vmatpush.bf16.msra.mxu3 %v12888_v3  ;;  %v13636_v32 = vor.u32 %v15044_v8, %v13635_v38  ;;  %v13760_v3 = vor.u32 %v15073_v18, %v13757_v44  ;;  %v13733_v38 = vld [vmem:[%s17983_s3 + $0xc8] sm:$0xf0]  ;;  %v13547_v8 = vld [vmem:[%s17982_s2 + $0x948] sm:$0xf]  ;;  %v15049_v18 = vld [vmem:[%s17983_s3 + $0x34] sm:$0xf] }
 0x675   :  { %8993 = vmatpush.bf16.msra.mxu0 %v13668_v63  ;;  %v15057_v63 = vld [vmem:[%s17983_s3 + $0x74] sm:$0xf]  ;;  %v15087_v16 = vld [vmem:[%s17983_s3 + $0x164] sm:$0xf] }
 0x676   :  { %v15130_v31 = vpop.eup %15129  ;;  %9018 = vmatpush.bf16.msra.mxu2 %v13804_v1  ;;  %v13661_v1 = vld [vmem:[%s17983_s3 + $0x38] sm:$0xf0]  ;;  %v15065_v44 = vld [vmem:[%s17983_s3 + $0xb4] sm:$0xf] }
 0x677   :  { %9006 = vmatpush.bf16.msra.mxu1 %v13732_v42  ;;  %v8349_v10 = vpop.f32.mrf.mxu2  ;;  %v13693_v42 = vld [vmem:[%s17983_s3 + $0x78] sm:$0xf0]  ;;  %v13630_v23 = vadd.f32 -1.0, %v15130_v31  ;;  %v15017_v31 = vld [vmem:[%s17982_s2 + $0x930] sm:$0xf0] }
 0x678   :  { %8513 = vmatpush.bf16.msra.mxu3 %v12868_v51  ;;  %v13696_v2 = vor.u32 %v15057_v63, %v13693_v42  ;;  %v6376_v51 = vperm.slane %v17224_v12, 5  ;;  %v13779_v12 = vld [vmem:[%s17983_s3 + $0x120] sm:$0xf]  ;;  %v15061_v40 = vld [vmem:[%s17983_s3 + $0x94] sm:$0xf] }
 0x679   :  { %8994 = vmatpush.bf16.msra.mxu0 %v13660_v55  ;;  %v13700_v55 = vor.u32 %v15060_v53, %v13699_v54  ;;  %v8593_v41 = vsel %vm8573_vm1, %v17485_v48, %v13630_v23  ;;  %v13688_v48 = vor.u32 %v15055_v46, %v13685_v58  ;;  %v15022_v54 = vld [vmem:[%s17982_s2 + $0x958] sm:$0xf0]  ;;  %v15078_v53 = vld [vmem:[%s17983_s3 + $0x114] sm:$0xf0]  ;;  %v15063_v58 = vld [vmem:[%s17983_s3 + $0xa4] sm:$0xf] }
 0x67a   :  { %v17608_v45 = vpack.c.bf16 %v8593_v41, %v8593_v41  ;;  %9019 = vmatpush.bf16.msra.mxu2 %v13796_v47  ;;  %v6386_v29 = vperm.slane %v6376_v51, 1  ;;  %v13548_v42 = vor.u32 %v15022_v54, %v13547_v8  ;;  %v13821_v41 = vld [vmem:[%s17983_s3 + $0x178] sm:$0xf0]  ;;  %v15085_v8 = vld [vmem:[%s17983_s3 + $0x154] sm:$0xf] }
 0x67b   :  { %9007 = vmatpush.bf16.msra.mxu1 %v13724_v57  ;;  %v8592_v57 = vsel %vm8572_vm0, %v17407_v17, %v13629_v28  ;;  %v13587_v17 = vld [vmem:[%s17982_s2 + $0x998] sm:$0xf]  ;;  %v13805_v54 = vld [vmem:[%s17983_s3 + $0x158] sm:$0xf0] }
 0x67c   :  { %8514 = vmatpush.bf16.msra.mxu3 %v12848_v26  ;;  %v17611_v34 = vpack.c.bf16 %v8592_v57, %v8592_v57  ;;  %v13588_v15 = vor.u32 %v15032_v43, %v13587_v17  ;;  %v13771_v26 = vld [vmem:[%s17983_s3 + $0x110] sm:$0xf]  ;;  %v15076_v57 = vld [vmem:[%s17983_s3 + $0x104] sm:$0xf0]  ;;  %v13507_v17 = vld [vmem:[%s17982_s2 + $0x8f8] sm:$0xf] }
 0x67d   :  { %8995 = vmatpush.bf16.msra.mxu0 %v13652_v4  ;;  %v15082_v4 = vld [vmem:[%s17983_s3 + $0x134] sm:$0xf0]  ;;  %v15012_v43 = vld [vmem:[%s17982_s2 + $0x908] sm:$0xf0]  ;;  %v13764_v47 = vor.u32 %v15076_v57, %v13763_v61  ;;  %v13883_v57 = vld [vmem:[%s17983_s3 + $0x1f0] sm:$0xf] }
 0x67e   :  { %v13788_v19 = vor.u32 %v15082_v4, %v13787_v56  ;;  %v17688_v23 = vpop.f32.mrf.mxu3 }
 0x67f   :  { %9008 = vmatpush.bf16.msra.mxu1 %v13716_v24  ;;  %8515 = vmatmul.bf16.vlgmr.msra.gmra.mxu3 %v15672_v13  ;;  %v13752_v13 = vor.u32 %v15071_v62, %v13749_v5  ;;  %v15069_v24 = vld [vmem:[%s17983_s3 + $0xd4] sm:$0xf]  ;;  %v13717_v5 = vld [vmem:[%s17983_s3 + $0xa8] sm:$0xf0] }
 0x680   :  { %8559 = vmatpush.bf16.msrb.mxu3 %v13628_v39  ;;  %v13744_v28 = vor.u32 %v15069_v24, %v13741_v49  ;;  %9020 = vmatpush.bf16.msra.mxu2 %v13788_v19  ;;  %v15089_v62 = vld [vmem:[%s17983_s3 + $0x174] sm:$0xf]  ;;  %v13720_v51 = vor.u32 %v15063_v58, %v13717_v5  ;;  %v13508_v49 = vor.u32 %v15012_v43, %v13507_v17  ;;  %v13813_v19 = vld [vmem:[%s17983_s3 + $0x168] sm:$0xf0]  ;;  %v13875_v17 = vld [vmem:[%s17983_s3 + $0x1e0] sm:$0xf] }
 0x681   :  { %8996 = vmatpush.bf16.msra.mxu0 %v13644_v30  ;;  %v15067_v30 = vld [vmem:[%s17983_s3 + $0xc4] sm:$0xf]  ;;  %v13824_v0 = vor.u32 %v15089_v62, %v13821_v41  ;;  %v15104_v43 = vld [vmem:[%s17983_s3 + $0x1e4] sm:$0xf0] }
 0x682   :  { %v13736_v63 = vor.u32 %v15067_v30, %v13733_v38  ;;  %v13637_v38 = vld [vmem:[%s17983_s3 + $0x8] sm:$0xf0] }
 0x683   :  { %9009 = vmatpush.bf16.msra.mxu1 %v13708_v22  ;;  %v13780_v22 = vor.u32 %v15080_v20, %v13779_v12  ;;  %v13709_v12 = vld [vmem:[%s17983_s3 + $0x98] sm:$0xf0]  ;;  %v13487_v20 = vld [vmem:[%s17982_s2 + $0x8d0] sm:$0xf] }
 0x684   :  { %8560 = vmatpush.bf16.msrb.mxu3 %v13608_v60  ;;  %v13528_v60 = vor.u32 %v15017_v31, %v13527_v21  ;;  %v13712_v9 = vor.u32 %v15061_v40, %v13709_v12 }
 0x685   :  { %8997 = vmatpush.bf16.msra.mxu0 %v13636_v32  ;;  %v8373_v36 = vpop.f32.mrf.mxu0  ;;  %9021 = vmatpush.bf16.msra.mxu2 %v13780_v22  ;;  %v13772_v32 = vor.u32 %v15078_v53, %v13771_v26  ;;  %v15059_v22 = vld [vmem:[%s17983_s3 + $0x84] sm:$0xf]  ;;  %v13701_v26 = vld [vmem:[%s17983_s3 + $0x88] sm:$0xf0] }
 0x686   :  { %v8374_v10 = vadd.f32 %v8373_v36, %v6386_v29  ;;  %v8310_v27 = vpop.f32.mrf.mxu3  ;;  %v15043_v29 = vld [vmem:[%s17983_s3 + $0x4] sm:$0xf]  ;;  %v13808_v36 = vor.u32 %v15085_v8, %v13805_v54  ;;  %v13835_v8 = vld [vmem:[%s17983_s3 + $0x190] sm:$0xf]  ;;  %v15094_v54 = vld [vmem:[%s17983_s3 + $0x194] sm:$0xf0] }
 0x687   :  { %9010 = vmatpush.bf16.msra.mxu1 %v13700_v55  ;;  %v8386_v39 = vpop.f32.mrf.mxu1  ;;  %v15047_v55 = vld [vmem:[%s17983_s3 + $0x24] sm:$0xf] }
 0x688   :  { %8998 = vmatmul.bf16.vlgmr.msra.gmra.mxu0 %v17611_v34  ;;  %8561 = vmatpush.bf16.msrb.mxu3 %v13588_v15  ;;  %v8387_v46 = vadd.f32 %v8386_v39, %v8374_v10  ;;  %v15045_v15 = vld [vmem:[%s17983_s3 + $0x14] sm:$0xf]  ;;  %v13704_v10 = vor.u32 %v15059_v22, %v13701_v26  ;;  %v15083_v39 = vld [vmem:[%s17983_s3 + $0x144] sm:$0xf]  ;;  %v13836_v22 = vor.u32 %v15094_v54, %v13835_v8 }
 0x689   :  { %9042 = vmatpush.bf16.msrb.mxu0 %v13696_v2  ;;  %v13664_v2 = vor.u32 %v15049_v18, %v13661_v1  ;;  %9022 = vmatpush.bf16.msra.mxu2 %v13772_v32  ;;  %v8309_v18 = vadd.f32 %v17688_v23, %v17322_v14  ;;  %v15081_v1 = vld [vmem:[%s17983_s3 + $0x134] sm:$0xf]  ;;  %v13781_v14 = vld [vmem:[%s17983_s3 + $0x128] sm:$0xf0] }
 0x68a   :  { %9011 = vmatmul.bf16.vlgmr.msra.gmra.mxu1 %v17608_v45 }
 0x68b   :  { %9055 = vmatpush.bf16.msrb.mxu1 %v13760_v3  ;;  %v13728_v3 = vor.u32 %v15065_v44, %v13725_v50  ;;  %v13789_v44 = vld [vmem:[%s17983_s3 + $0x138] sm:$0xf0]  ;;  %v8322_v21 = vadd.f32 %v17462_v33, %v8309_v18  ;;  %v15105_v18 = vld [vmem:[%s17983_s3 + $0x1f4] sm:$0xf] }
 0x68c   :  { %8562 = vmatpush.bf16.msrb.mxu3 %v13568_v35  ;;  %v13648_v35 = vor.u32 %v15045_v15, %v13645_v6  ;;  %v13792_v50 = vor.u32 %v15081_v1, %v13789_v44  ;;  %v13773_v33 = vld [vmem:[%s17983_s3 + $0x118] sm:$0xf0]  ;;  %v13859_v6 = vld [vmem:[%s17983_s3 + $0x1c0] sm:$0xf] }
 0x68d   :  { %9043 = vmatpush.bf16.msrb.mxu0 %v13688_v48  ;;  %v8375_v4 = vpop.f32.mrf.mxu0  ;;  %9023 = vmatpush.bf16.msra.mxu2 %v13764_v47  ;;  %v8335_v32 = vadd.f32 %v17464_v37, %v8322_v21  ;;  %v15075_v37 = vld [vmem:[%s17983_s3 + $0x104] sm:$0xf]  ;;  %v13885_v1 = vld [vmem:[%s17983_s3 + $0x1f8] sm:$0xf0] }
 0x68e   :  { %v13867_v4 = vld [vmem:[%s17983_s3 + $0x1d0] sm:$0xf]  ;;  %v13888_v44 = vor.u32 %v15105_v18, %v13885_v1  ;;  %v15103_v21 = vld [vmem:[%s17983_s3 + $0x1e4] sm:$0xf] }
 0x68f   :  { %9056 = vmatpush.bf16.msrb.mxu1 %v13752_v13  ;;  %v8399_v48 = vpop.f32.mrf.mxu2  ;;  %v13656_v13 = vor.u32 %v15047_v55, %v13653_v11  ;;  %v8388_v24 = vpop.f32.mrf.mxu1  ;;  %v8348_v55 = vadd.f32 %v17506_v7, %v8335_v32  ;;  %v13765_v11 = vld [vmem:[%s17983_s3 + $0x108] sm:$0xf0] }
 0x690   :  { %8563 = vmatpush.bf16.msrb.mxu3 %v13548_v42  ;;  %v17720_v56 = vadd.f32 %v8399_v48, %v8387_v46  ;;  %v13768_v7 = vor.u32 %v15075_v37, %v13765_v11  ;;  %v13876_v48 = vor.u32 %v15104_v43, %v13875_v17  ;;  %v15100_v24 = vld [vmem:[%s17983_s3 + $0x1c4] sm:$0xf0]  ;;  %v15099_v11 = vld [vmem:[%s17983_s3 + $0x1c4] sm:$0xf] }
 0x691   :  { %9044 = vmatpush.bf16.msrb.mxu0 %v13680_v25  ;;  %v15007_v25 = vld [vmem:[%s17982_s2 + $0x8e0] sm:$0xf0]  ;;  %9068 = vmatpush.bf16.msrb.mxu2 %v13824_v0 }
 0x692   :  { %v13488_v30 = vor.u32 %v15007_v25, %v13487_v20 }
 0x693   :  { %9057 = vmatpush.bf16.msrb.mxu1 %v13744_v28  ;;  %v13816_v28 = vor.u32 %v15087_v16, %v13813_v19  ;;  %v13851_v16 = vld [vmem:[%s17983_s3 + $0x1b0] sm:$0xf]  ;;  %v15098_v19 = vld [vmem:[%s17983_s3 + $0x1b4] sm:$0xf0] }
 0x694   :  { %8564 = vmatpush.bf16.msrb.mxu3 %v13528_v60  ;;  %v13852_v25 = vor.u32 %v15098_v19, %v13851_v16 }
 0x695   :  { %9045 = vmatpush.bf16.msrb.mxu0 %v13672_v52  ;;  %9069 = vmatpush.bf16.msrb.mxu2 %v13816_v28  ;;  %v13640_v52 = vor.u32 %v15043_v29, %v13637_v38  ;;  %v13843_v28 = vld [vmem:[%s17983_s3 + $0x1a0] sm:$0xf]  ;;  %v15141_v29 = vld [vmem:[%s17985_s5 + $0x10] sm:$0xff] }
 0x697   :  { %9058 = vmatpush.bf16.msrb.mxu1 %v13736_v63  ;;  %v8401_v53 = vpop.f32.mrf.mxu2  ;;  %v13797_v63 = vld [vmem:[%s17983_s3 + $0x148] sm:$0xf0] }
 0x698   :  { %8565 = vmatpush.bf16.msrb.mxu3 %v13508_v49  ;;  %v13800_v42 = vor.u32 %v15083_v39, %v13797_v63  ;;  %v13860_v49 = vor.u32 %v15100_v24, %v13859_v6 }
 0x699   :  { %9046 = vmatpush.bf16.msrb.mxu0 %v13664_v2  ;;  %9070 = vmatpush.bf16.msrb.mxu2 %v13808_v36 }
 0x69b   :  { %9059 = vmatpush.bf16.msrb.mxu1 %v13728_v3  ;;  %v15106_v3 = vld [vmem:[%s17983_s3 + $0x1f4] sm:$0xf0] }
 0x69c   :  { %8566 = vmatpush.bf16.msrb.mxu3 %v13488_v30  ;;  %v13884_v60 = vor.u32 %v15106_v3, %v13883_v57  ;;  %v15097_v3 = vld [vmem:[%s17983_s3 + $0x1b4] sm:$0xf] }
 0x69d   :  { %9047 = vmatpush.bf16.msrb.mxu0 %v13656_v13  ;;  %9071 = vmatpush.bf16.msrb.mxu2 %v13800_v42  ;;  %v15102_v13 = vld [vmem:[%s17983_s3 + $0x1d4] sm:$0xf0] }
 0x69e   :  { %v8360_v2 = vpop.f32.mrf.mxu3  ;;  %v13868_v15 = vor.u32 %v15102_v13, %v13867_v4 }
 0x69f   :  { %9060 = vmatpush.bf16.msrb.mxu1 %v13720_v51  ;;  %8567 = vmatmul.bf16.vlgmr.msrb.gmra.mxu3 %v16365_v59  ;;  %v15079_v59 = vld [vmem:[%s17983_s3 + $0x124] sm:$0xf]  ;;  %v8361_v61 = vadd.f32 %v8360_v2, %v8348_v55  ;;  %v13869_v55 = vld [vmem:[%s17983_s3 + $0x1d8] sm:$0xf0] }
 0x6a0   :  { %v13784_v31 = vor.u32 %v15079_v59, %v13781_v14  ;;  %9029 = vmatpush.bf16.msra.mxu3 %v13884_v60  ;;  %v13877_v59 = vld [vmem:[%s17983_s3 + $0x1e8] sm:$0xf0] }
 0x6a1   :  { %9048 = vmatpush.bf16.msrb.mxu0 %v13648_v35  ;;  %9072 = vmatpush.bf16.msrb.mxu2 %v13792_v50  ;;  %v8578_v58 = vmin.f32 %v8361_v61, 0.0  ;;  %vm8574_vm2 = vcmp.gt.f32.partialorder %v8361_v61, 0.0  ;;  %v15096_v35 = vld [vmem:[%s17983_s3 + $0x1a4] sm:$0xf0]  ;;  %v13880_v32 = vor.u32 %v15103_v21, %v13877_v59 }
 0x6a2   :  { %v13844_v30 = vor.u32 %v15096_v35, %v13843_v28 }
 0x6a3   :  { %9061 = vmatpush.bf16.msrb.mxu1 %v13712_v9  ;;  %v8584_v41 = vmul.f32 1.442695, %v8578_v58  ;;  %v6377_v9 = vperm.slane %v15141_v29, 1 }
 0x6a4   :  { %9030 = vmatpush.bf16.msra.mxu3 %v13876_v48 }
 0x6a5   :  { %9049 = vmatpush.bf16.msrb.mxu0 %v13640_v52  ;;  %9073 = vmatpush.bf16.msrb.mxu2 %v13784_v31  ;;  %15131 = vpow2.f32 %v8584_v41  ;;  %v6387_v38 = vperm.slane %v6377_v9, 1  ;;  %v13827_v52 = vld [vmem:[%s17983_s3 + $0x180] sm:$0xf]  ;;  %v15095_v41 = vld [vmem:[%s17983_s3 + $0x1a4] sm:$0xf] }
 0x6a6   :  { %v8362_v0 = vpop.f32.mrf.mxu3 }
 0x6a7   :  { %9062 = vmatpush.bf16.msrb.mxu1 %v13704_v10  ;;  %v17797_v46 = vpop.f32.mrf.mxu1  ;;  %v15092_v10 = vld [vmem:[%s17983_s3 + $0x184] sm:$0xf0] }
 0x6a8   :  { %9050 = vmatmul.bf16.vlgmr.msrb.gmra.mxu0 %v17611_v34  ;;  %v15077_v34 = vld [vmem:[%s17983_s3 + $0x114] sm:$0xf]  ;;  %9031 = vmatpush.bf16.msra.mxu3 %v13868_v15  ;;  %v13828_v42 = vor.u32 %v15092_v10, %v13827_v52  ;;  %v15091_v15 = vld [vmem:[%s17983_s3 + $0x184] sm:$0xf] }
 0x6a9   :  { %v13776_v23 = vor.u32 %v15077_v34, %v13773_v33 }
 0x6aa   :  { %9063 = vmatmul.bf16.vlgmr.msrb.gmra.mxu1 %v17608_v45  ;;  %v17795_v45 = vpop.f32.mrf.mxu0 }
 0x6ab   :  { %9074 = vmatpush.bf16.msrb.mxu2 %v13776_v23  ;;  %v15132_v40 = vpop.eup %15131  ;;  %v15101_v23 = vld [vmem:[%s17983_s3 + $0x1d4] sm:$0xf] }
 0x6ac   :  { %v13631_v12 = vadd.f32 -1.0, %v15132_v40  ;;  %9032 = vmatpush.bf16.msra.mxu3 %v13860_v49  ;;  %v13872_v2 = vor.u32 %v15101_v23, %v13869_v55  ;;  %v15113_v55 = vld [vmem:[%s17984_s4 + $0x30] sm:$0xff] }
 0x6ae   :  { %v8594_v20 = vsel %vm8574_vm2, %v8361_v61, %v13631_v12  ;;  %v13861_v61 = vld [vmem:[%s17983_s3 + $0x1c8] sm:$0xf0] }
 0x6af   :  { %v17812_v62 = vpop.f32.mrf.mxu2  ;;  %v8440_v47 = vpop.f32.mrf.mxu1  ;;  %9075 = vmatpush.bf16.msrb.mxu2 %v13768_v7  ;;  %v8598_v27 = vpack.c.bf16 %v8594_v20, %v8594_v20  ;;  %v13864_v57 = vor.u32 %v15099_v11, %v13861_v61  ;;  %v13853_v7 = vld [vmem:[%s17983_s3 + $0x1b8] sm:$0xf0] }
 0x6b0   :  { %9033 = vmatpush.bf16.msra.mxu3 %v13852_v25  ;;  %v13856_v58 = vor.u32 %v15097_v3, %v13853_v7  ;;  %v15093_v47 = vld [vmem:[%s17983_s3 + $0x194] sm:$0xf]  ;;  %v15111_v3 = vld [vmem:[%s17984_s4 + $0x20] sm:$0xff]  ;;  %v15110_v7 = vld [vmem:[%s17984_s4 + $0x18] sm:$0xff] }
 0x6b1   :  { %9024 = vmatmul.bf16.vlgmr.msra.gmra.mxu2 %v8598_v27 }
 0x6b2   :  { %v8427_v5 = vpop.f32.mrf.mxu0 }
 0x6b3   :  { %v13845_v5 = vld [vmem:[%s17983_s3 + $0x1a8] sm:$0xf0] }
 0x6b4   :  { %9034 = vmatpush.bf16.msra.mxu3 %v13844_v30  ;;  %v13848_v17 = vor.u32 %v15095_v41, %v13845_v5  ;;  %v15121_v41 = vld [vmem:[%s17984_s4 + $0x70] sm:$0xff]  ;;  %v15108_v5 = vld [vmem:[%s17984_s4 + $0x8] sm:$0xff] }
 0x6b7   :  { %v8453_v51 = vpop.f32.mrf.mxu2 }
 0x6b8   :  { %9035 = vmatpush.bf16.msra.mxu3 %v13836_v22 }
 0x6bc   :  { %9036 = vmatpush.bf16.msra.mxu3 %v13828_v42 }
 0x6be   :  { %v8412_v63 = vpop.f32.mrf.mxu3 }
 0x6bf   :  { %v8413_v60 = vadd.f32 %v8412_v63, %v17720_v56  ;;  %v13837_v56 = vld [vmem:[%s17983_s3 + $0x198] sm:$0xf0] }
 0x6c0   :  { %9081 = vmatpush.bf16.msrb.mxu3 %v13888_v44  ;;  %v13840_v0 = vor.u32 %v15093_v47, %v13837_v56  ;;  %v15119_v47 = vld [vmem:[%s17984_s4 + $0x60] sm:$0xff]  ;;  %v15118_v56 = vld [vmem:[%s17984_s4 + $0x58] sm:$0xff] }
 0x6c1   :  { %9076 = vmatmul.bf16.vlgmr.msrb.gmra.mxu2 %v8598_v27  ;;  %v8426_v43 = vadd.f32 %v17795_v45, %v8413_v60  ;;  %v13829_v45 = vld [vmem:[%s17983_s3 + $0x188] sm:$0xf0]  ;;  %v15122_v60 = vld [vmem:[%s17984_s4 + $0x78] sm:$0xff] }
 0x6c2   :  { %v13832_v24 = vor.u32 %v15091_v15, %v13829_v45  ;;  %9250 = vmatpush.bf16.msra.mxu1 %v15122_v60 }
 0x6c3   :  { %v8439_v48 = vadd.f32 %v17797_v46, %v8426_v43  ;;  %v15107_v43 = vld [vmem:[%s17984_s4] sm:$0xff] }
 0x6c4   :  { %9082 = vmatpush.bf16.msrb.mxu3 %v13880_v32 }
 0x6c5   :  { %v8477_v26 = vpop.f32.mrf.mxu0  ;;  %v8452_v6 = vadd.f32 %v17812_v62, %v8439_v48  ;;  %v17916_v62 = vld [vmem:[%s17985_s5] sm:$0xff]  ;;  %v15117_v48 = vld [vmem:[%s17984_s4 + $0x50] sm:$0xff] }
 0x6c6   :  { %v8478_v53 = vadd.f32 %v8477_v26, %v6387_v38  ;;  %v8414_v33 = vpop.f32.mrf.mxu3  ;;  %v8664_v9 = vperm.slane %v17916_v62, 2  ;;  %9251 = vmatpush.bf16.msra.mxu1 %v15121_v41 }
 0x6c7   :  { %v8490_v36 = vpop.f32.mrf.mxu1 }
 0x6c8   :  { %v8491_v39 = vadd.f32 %v8490_v36, %v8478_v53  ;;  %9083 = vmatpush.bf16.msrb.mxu3 %v13872_v2  ;;  %v8668_v30 = vperm.slane %v8664_v9, 2  ;;  %v15112_v2 = vld [vmem:[%s17984_s4 + $0x28] sm:$0xff] }
 0x6cc   :  { %9084 = vmatpush.bf16.msrb.mxu3 %v13864_v57 }
 0x6cd   :  { %v8479_v31 = vpop.f32.mrf.mxu0 }
 0x6cf   :  { %v8503_v50 = vpop.f32.mrf.mxu2  ;;  %v8492_v34 = vpop.f32.mrf.mxu1 }
 0x6d0   :  { %v17871_v14 = vadd.f32 %v8503_v50, %v8491_v39  ;;  %9085 = vmatpush.bf16.msrb.mxu3 %v13856_v58  ;;  %v8665_v39 = vperm.slane %v17916_v62, 6  ;;  %v15109_v58 = vld [vmem:[%s17984_s4 + $0x10] sm:$0xff] }
 0x6d2   :  { %v8669_v42 = vperm.slane %v8665_v39, 2 }
 0x6d4   :  { %9086 = vmatpush.bf16.msrb.mxu3 %v13848_v17  ;;  %v15120_v17 = vld [vmem:[%s17984_s4 + $0x68] sm:$0xff] }
 0x6d5   :  { %9252 = vmatpush.bf16.msra.mxu1 %v15120_v17 }
 0x6d7   :  { %v8505_v37 = vpop.f32.mrf.mxu2 }
 0x6d8   :  { %9087 = vmatpush.bf16.msrb.mxu3 %v13840_v0  ;;  %v15116_v0 = vld [vmem:[%s17984_s4 + $0x48] sm:$0xff] }
 0x6d9   :  { %9253 = vmatpush.bf16.msra.mxu1 %v15119_v47 }
 0x6dc   :  { %9088 = vmatpush.bf16.msrb.mxu3 %v13832_v24 }
 0x6dd   :  { %9254 = vmatpush.bf16.msra.mxu1 %v15118_v56 }
 0x6e1   :  { %v8464_v51 = vpop.f32.mrf.mxu3  ;;  %9255 = vmatpush.bf16.msra.mxu1 %v15117_v48 }
 0x6e2   :  { %v8465_v49 = vadd.f32 %v8464_v51, %v8452_v6 }
 0x6e4   :  { %v8579_v40 = vmin.f32 %v8465_v49, 0.0  ;;  %vm8575_vm3 = vcmp.gt.f32.partialorder %v8465_v49, 0.0 }
 0x6e5   :  { %v8529_v4 = vpop.f32.mrf.mxu0  ;;  %9256 = vmatpush.bf16.msra.mxu1 %v15116_v0 }
 0x6e6   :  { %v8586_v16 = vmul.f32 1.442695, %v8579_v40 }
 0x6e7   :  { %v8542_v13 = vpop.f32.mrf.mxu1 }
 0x6e8   :  { %15133 = vpow2.f32 %v8586_v16 }
 0x6e9   :  { %v8466_v20 = vpop.f32.mrf.mxu3 }
 0x6ed   :  { %v8531_v19 = vpop.f32.mrf.mxu0 }
 0x6ee   :  { %v15134_v27 = vpop.eup %15133 }
 0x6ef   :  { %v8555_v46 = vpop.f32.mrf.mxu2  ;;  %v8544_v12 = vpop.f32.mrf.mxu1  ;;  %v13632_v28 = vadd.f32 -1.0, %v15134_v27 }
 0x6f1   :  { %v8595_v35 = vsel %vm8575_vm3, %v8465_v49, %v13632_v28 }
 0x6f2   :  { %v8599_v29 = vpack.c.bf16 %v8595_v35, %v8595_v35 }
 0x6f4   :  { %9037 = vmatmul.bf16.vlgmr.msra.gmra.mxu3 %v8599_v29 }
 0x6f7   :  { %v8557_v25 = vpop.f32.mrf.mxu2 }
 0x702   :  { %v8516_v22 = vpop.f32.mrf.mxu3 }
 0x703   :  { %v8517_v10 = vadd.f32 %v8516_v22, %v17871_v14  ;;  %v15114_v14 = vld [vmem:[%s17984_s4 + $0x38] sm:$0xff]  ;;  %v9140_v22 = vperm.slane %v17916_v62, 3 }
 0x704   :  { %9089 = vmatmul.bf16.vlgmr.msrb.gmra.mxu3 %v8599_v29  ;;  %9237 = vmatpush.bf16.msra.mxu0 %v15114_v14 }
 0x705   :  { %v8999_v38 = vpop.f32.mrf.mxu0  ;;  %v8530_v63 = vadd.f32 %v8529_v4, %v8517_v10 }
 0x706   :  { %v9000_v8 = vadd.f32 %v8999_v38, %v8668_v30  ;;  %v15172_v38 = vmov 0.0  }
 0x707   :  { %v9012_v54 = vpop.f32.mrf.mxu1  ;;  %v8543_v18 = vadd.f32 %v8542_v13, %v8530_v63  ;;  %v15115_v13 = vld [vmem:[%s17984_s4 + $0x40] sm:$0xff]  ;;  %9263 = vst [vmem:[%s17986_s6] sm:$0x3] %v15172_v38 }
 0x708   :  { %v9013_v26 = vadd.f32 %v9012_v54, %v9000_v8  ;;  %9238 = vmatpush.bf16.msra.mxu0 %v15113_v55  ;;  %9257 = vmatpush.bf16.msra.mxu1 %v15115_v13 }
 0x709   :  { %v8556_v21 = vadd.f32 %v8555_v46, %v8543_v18 }
 0x70a   :  { %v8518_v52 = vpop.f32.mrf.mxu3 }
 0x70c   :  { %9239 = vmatpush.bf16.msra.mxu0 %v15112_v2 }
 0x70d   :  { %v9001_v53 = vpop.f32.mrf.mxu0 }
 0x70f   :  { %v9014_v36 = vpop.f32.mrf.mxu1 }
 0x710   :  { %9240 = vmatpush.bf16.msra.mxu0 %v15111_v3 }
 0x714   :  { %9241 = vmatpush.bf16.msra.mxu0 %v15110_v7 }
 0x718   :  { %9242 = vmatpush.bf16.msra.mxu0 %v15109_v58 }
 0x71c   :  { %9243 = vmatpush.bf16.msra.mxu0 %v15108_v5 }
 0x720   :  { %9244 = vmatpush.bf16.msra.mxu0 %v15107_v43 }
 0x722   :  { %v8568_v31 = vpop.f32.mrf.mxu3 }
 0x723   :  { %v8569_v32 = vadd.f32 %v8568_v31, %v8556_v21 }
 0x725   :  { %v9051_v1 = vpop.f32.mrf.mxu0  ;;  %9267 = vrot.lane.b32.xlu0 %v8569_v32, %s15171_s27 }
 0x726   :  { %v9052_v44 = vadd.f32 %v9051_v1, %v8669_v42 }
 0x727   :  { %v9064_v50 = vpop.f32.mrf.mxu1 }
 0x728   :  { %v9065_v59 = vadd.f32 %v9064_v50, %v9052_v44 }
 0x72a   :  { %v8570_v23 = vpop.f32.mrf.mxu3 }
 0x72d   :  { %v9053_v34 = vpop.f32.mrf.mxu0 }
 0x72f   :  { %v9066_v33 = vpop.f32.mrf.mxu1 }
 0x734   :  { %v9025_v37 = vpop.f32.mrf.mxu2 }
 0x735   :  { %v9026_v4 = vadd.f32 %v9025_v37, %v9013_v26 }
 0x73c   :  { %v9027_v11 = vpop.f32.mrf.mxu2 }
 0x744   :  { %v9077_v61 = vpop.f32.mrf.mxu2 }
 0x745   :  { %v9078_v46 = vadd.f32 %v9077_v61, %v9065_v59 }
 0x74c   :  { %v9079_v57 = vpop.f32.mrf.mxu2 }
 0x777   :  { %v9038_v15 = vpop.f32.mrf.mxu3 }
 0x778   :  { %v9039_v45 = vadd.f32 %v9038_v15, %v9026_v4 }
 0x77a   :  { %v9096_v6 = vmin.f32 %v9039_v45, 0.0  ;;  %vm9094_vm4 = vcmp.gt.f32.partialorder %v9039_v45, 0.0 }
 0x77c   :  { %v9098_v24 = vmul.f32 1.442695, %v9096_v6 }
 0x77e   :  { %15135 = vpow2.f32 %v9098_v24 }
 0x77f   :  { %v9040_v51 = vpop.f32.mrf.mxu3 }
 0x784   :  { %v15136_v49 = vpop.eup %15135 }
 0x785   :  { %v13889_v40 = vadd.f32 -1.0, %v15136_v49 }
 0x787   :  { %v9104_v16 = vsel %vm9094_vm4, %v9039_v45, %v13889_v40  ;;  %v9090_v19 = vpop.f32.mrf.mxu3 }
 0x788   :  { %v9106_v12 = vpack.c.bf16 %v9104_v16, %v9104_v16  ;;  %v9091_v20 = vadd.f32 %v9090_v19, %v9078_v46 }
 0x78a   :  { %v9097_v25 = vmin.f32 %v9091_v20, 0.0  ;;  %9245 = vmatmul.bf16.vlgmr.msra.gmra.mxu0 %v9106_v12  ;;  %vm9095_vm5 = vcmp.gt.f32.partialorder %v9091_v20, 0.0 }
 0x78c   :  { %v9100_v27 = vmul.f32 1.442695, %v9097_v25 }
 0x78e   :  { %15137 = vpow2.f32 %v9100_v27 }
 0x78f   :  { %v9092_v28 = vpop.f32.mrf.mxu3 }
 0x794   :  { %v15138_v35 = vpop.eup %15137 }
 0x795   :  { %v13890_v29 = vadd.f32 -1.0, %v15138_v35 }
 0x797   :  { %v9105_v9 = vsel %vm9095_vm5, %v9091_v20, %v13890_v29  ;;  %v9268_v52 = vpop.permute.xlu0 %9267 }
 0x798   :  { %v9107_v30 = vpack.c.bf16 %v9105_v9, %v9105_v9 }
 0x79a   :  { %9258 = vmatmul.bf16.vlgmr.msra.gmra.mxu1 %v9107_v30 }
 0x807   :  { %v9246_v8 = vpop.f32.mrf.mxu0 }
 0x808   :  { %v9247_v26 = vadd.f32 %v9246_v8, %v9140_v22 }
 0x80f   :  { %v9248_v54 = vpop.f32.mrf.mxu0 }
 0x817   :  { %v9259_v53 = vpop.f32.mrf.mxu1 }
 0x818   :  { %v9260_v36 = vadd.f32 %v9259_v53, %v9247_v26 }
 0x81a   :  { %9265 = vst.msk [vmem:[%s17986_s6] sm:$0x3] %vm9264_vm6, %v9260_v36 }
 0x81b   :  { %9271 = vst.msk [vmem:[%s17986_s6] sm:$0x3] %vm9270_vm7, %v9268_v52 }
 0x81f   :  { %v9261_v10 = vpop.f32.mrf.mxu1 }
 0x820   :  { %9276 = vsyncpa [#allocation3], 1 }

</bundles_post_ra>
